<compile_context>
chip_gen: v7x
topology: tpu7x:2x2x1
jax: 0.10.0
libtpu: 0.0.40
codegen_flags: <defaults>
</compile_context>

<pallas_src>
import math
from functools import partial

import jax
import jax.numpy as jnp
from jax.experimental import pallas as pl
from jax.experimental.pallas import tpu as pltpu

BN_EPS = 1e-5
LANE = 128


def _round_up(x, m):
    return (x + m - 1) // m * m


# ------------------------------ Pallas kernels ------------------------------

def _conv_stats_kernel(x_ref, w_ref, y_ref, s1_ref, s2_ref, acc_ref, *,
                       kh, kw, stride, dilation, ho, wo):
    """Direct (im2col-free) conv for one image + BN batch-stat partials.

    x_ref : (1, Hp, Wp, Cinp)    bf16  spatially padded input image
    w_ref : (kh*kw, Cinp, Coutp) bf16  per-tap weight matrices
    y_ref : (1, ho, wo, Coutp)   f32   raw conv output
    s1_ref: (1, 1, Coutp)        f32   sum over the ho*wo positions
    s2_ref: (1, 1, Coutp)        f32   sum of squares over the positions
    acc_ref: (ho*wo, Coutp)      f32   VMEM accumulator
    """
    cinp = x_ref.shape[-1]
    t = 0
    for i in range(kh):
        for j in range(kw):
            hi = i * dilation
            wj = j * dilation
            if stride == 1:
                xs = x_ref[:, hi:hi + ho, wj:wj + wo, :]
            else:
                # TODO(synk): strided tap slicing is untested (demo uses stride=1).
                xs = x_ref[:, pl.ds(hi, ho, stride), pl.ds(wj, wo, stride), :]
            xs2 = xs.reshape(ho * wo, cinp)
            part = jnp.dot(xs2, w_ref[t], preferred_element_type=jnp.float32)
            if t == 0:
                acc_ref[...] = part
            else:
                acc_ref[...] += part
            t += 1
    acc = acc_ref[...]
    y_ref[...] = acc.reshape(1, ho, wo, acc.shape[-1])
    s1_ref[...] = jnp.sum(acc, axis=0, keepdims=True).reshape(1, 1, -1)
    s2_ref[...] = jnp.sum(acc * acc, axis=0, keepdims=True).reshape(1, 1, -1)


def _bn_affine_kernel(y_ref, s_ref, b_ref, o_ref, *, relu):
    out = y_ref[...] * s_ref[...] + b_ref[...]
    if relu:
        out = jnp.maximum(out, 0.0)
    o_ref[...] = out.astype(o_ref.dtype)


def _bn_affine_res_kernel(y_ref, s_ref, b_ref, r_ref, o_ref, *, relu):
    out = y_ref[...] * s_ref[...] + b_ref[...] + r_ref[...].astype(jnp.float32)
    if relu:
        out = jnp.maximum(out, 0.0)
    o_ref[...] = out.astype(o_ref.dtype)


# ----------------------------- conv + BN wrapper -----------------------------

def conv_bn_act(x, w, gamma, beta, *, stride, dilation, padding, relu,
                residual=None, out_dtype=jnp.bfloat16):
    """x: (N, H, W, Cinp) bf16 activation (channels already padded to 128-mult).
    w: PyTorch-layout weight (Cout, Cin, kh, kw), bias=False.
    Returns (N, Ho, Wo, Coutp) in out_dtype with Coutp = round_up(Cout, 128)."""
    N, H, W, Cinp = x.shape
    Cout, Cin, kh, kw = w.shape
    assert Cin <= Cinp
    Coutp = _round_up(Cout, LANE)
    Ho = (H + 2 * padding - dilation * (kh - 1) - 1) // stride + 1
    Wo = (W + 2 * padding - dilation * (kw - 1) - 1) // stride + 1

    xp = x
    if padding:
        xp = jnp.pad(x, ((0, 0), (padding, padding), (padding, padding), (0, 0)))
    Hp, Wp = H + 2 * padding, W + 2 * padding

    # (Cout, Cin, kh, kw) -> (kh*kw, Cinp, Coutp), zero-padded, bf16 for the MXU.
    wt = jnp.transpose(w, (2, 3, 1, 0)).reshape(kh * kw, Cin, Cout)
    wt = jnp.pad(wt, ((0, 0), (0, Cinp - Cin), (0, Coutp - Cout))).astype(jnp.bfloat16)

    conv_kern = partial(_conv_stats_kernel, kh=kh, kw=kw, stride=stride,
                        dilation=dilation, ho=Ho, wo=Wo)
    y, s1, s2 = pl.pallas_call(
        conv_kern,
        grid=(N,),
        in_specs=[
            pl.BlockSpec((1, Hp, Wp, Cinp), lambda n: (n, 0, 0, 0)),
            pl.BlockSpec((kh * kw, Cinp, Coutp), lambda n: (0, 0, 0)),
        ],
        out_specs=(
            pl.BlockSpec((1, Ho, Wo, Coutp), lambda n: (n, 0, 0, 0)),
            pl.BlockSpec((1, 1, Coutp), lambda n: (n, 0, 0)),
            pl.BlockSpec((1, 1, Coutp), lambda n: (n, 0, 0)),
        ),
        out_shape=(
            jax.ShapeDtypeStruct((N, Ho, Wo, Coutp), jnp.float32),
            jax.ShapeDtypeStruct((N, 1, Coutp), jnp.float32),
            jax.ShapeDtypeStruct((N, 1, Coutp), jnp.float32),
        ),
        scratch_shapes=[pltpu.VMEM((Ho * Wo, Coutp), jnp.float32)],
        compiler_params=pltpu.CompilerParams(dimension_semantics=("parallel",)),
    )(xp.astype(jnp.bfloat16), wt)

    # Training-mode BN: batch mean / biased variance from the in-kernel partials.
    # Only tiny per-channel vectors are reduced here in XLA.
    cnt = float(N * Ho * Wo)
    ssum = jnp.sum(s1[:, 0, :], axis=0)
    ssq = jnp.sum(s2[:, 0, :], axis=0)
    mean = ssum / cnt
    var = jnp.maximum(ssq / cnt - mean * mean, 0.0)   # modest dynamic range: E[x^2]-E[x]^2 ok
    g = jnp.pad(gamma.astype(jnp.float32), (0, Coutp - Cout))
    b = jnp.pad(beta.astype(jnp.float32), (0, Coutp - Cout))
    scale = g * jax.lax.rsqrt(var + BN_EPS)
    bias = b - mean * scale
    scale4 = scale.reshape(1, 1, 1, Coutp)
    bias4 = bias.reshape(1, 1, 1, Coutp)

    y_spec = pl.BlockSpec((1, Ho, Wo, Coutp), lambda n: (n, 0, 0, 0))
    v_spec = pl.BlockSpec((1, 1, 1, Coutp), lambda n: (0, 0, 0, 0))
    if residual is None:
        aff_kern = partial(_bn_affine_kernel, relu=relu)
        in_specs = [y_spec, v_spec, v_spec]
        args = (y, scale4, bias4)
    else:
        aff_kern = partial(_bn_affine_res_kernel, relu=relu)
        in_specs = [y_spec, v_spec, v_spec, y_spec]
        args = (y, scale4, bias4, residual)

    return pl.pallas_call(
        aff_kern,
        grid=(N,),
        in_specs=in_specs,
        out_specs=pl.BlockSpec((1, Ho, Wo, Coutp), lambda n: (n, 0, 0, 0)),
        out_shape=jax.ShapeDtypeStruct((N, Ho, Wo, Coutp), out_dtype),
        compiler_params=pltpu.CompilerParams(dimension_semantics=("parallel",)),
    )(*args)


# ------------------------------ BasicBlock forward ---------------------------

def basic_block_forward(x_nchw, params, *, stride=1, dilation=1):
    """Forward pass of DBnet BasicBlock. x: (N, Cin, H, W) f32, returns NCHW."""
    x = jnp.transpose(x_nchw, (0, 2, 3, 1)).astype(jnp.float32)   # NHWC
    N, H, W, Cin = x.shape
    planes = params["conv1_w"].shape[0]
    Cinp = _round_up(Cin, LANE)
    Coutp = _round_up(planes, LANE)

    # lane-dense channel padding, done once; padded lanes stay exactly zero
    # through the whole block (zero weights / zero gamma for padded channels).
    x_b = jnp.pad(x, ((0, 0), (0, 0), (0, 0), (0, Cinp - Cin))).astype(jnp.bfloat16)

    out = conv_bn_act(x_b, params["conv1_w"], params["bn1_g"], params["bn1_b"],
                      stride=1, dilation=1, padding=1, relu=True)
    out = conv_bn_act(out, params["conv2_w"], params["bn2_g"], params["bn2_b"],
                      stride=stride, dilation=dilation, padding=dilation, relu=True)

    if "down_w" in params:
        # TODO(synk): `downsample` is an opaque module in the reference; assume
        # the conventional 1x1 conv(stride) + BN used by DBnet resnets.
        identity = conv_bn_act(x_b, params["down_w"], params["down_g"],
                               params["down_b"], stride=stride, dilation=1,
                               padding=0, relu=False, out_dtype=jnp.float32)
    else:
        identity = jnp.pad(x, ((0, 0), (0, 0), (0, 0), (0, Coutp - Cin)))

    out = conv_bn_act(out, params["conv3_w"], params["bn3_g"], params["bn3_b"],
                      stride=1, dilation=1, padding=1, relu=True,
                      residual=identity, out_dtype=jnp.float32)

    out = out[..., :planes]                          # drop padded channels
    return jnp.transpose(out, (0, 3, 1, 2))          # NHWC -> NCHW


# -------------------------- reference (plain JAX/XLA) ------------------------

def reference_forward(x, p, *, stride=1, dilation=1):
    def conv(x, w, s, d, pad):
        return jax.lax.conv_general_dilated(
            x, w, window_strides=(s, s), padding=((pad, pad), (pad, pad)),
            rhs_dilation=(d, d), dimension_numbers=("NCHW", "OIHW", "NCHW"))

    def bn(x, g, b):
        mean = jnp.mean(x, axis=(0, 2, 3), keepdims=True)
        var = jnp.var(x, axis=(0, 2, 3), keepdims=True)
        return ((x - mean) * jax.lax.rsqrt(var + BN_EPS)
                * g.reshape(1, -1, 1, 1) + b.reshape(1, -1, 1, 1))

    out = jax.nn.relu(bn(conv(x, p["conv1_w"], 1, 1, 1), p["bn1_g"], p["bn1_b"]))
    out = jax.nn.relu(bn(conv(out, p["conv2_w"], stride, dilation, dilation),
                         p["bn2_g"], p["bn2_b"]))
    out = bn(conv(out, p["conv3_w"], 1, 1, 1), p["bn3_g"], p["bn3_b"])
    identity = x
    if "down_w" in p:
        identity = bn(conv(x, p["down_w"], stride, 1, 0), p["down_g"], p["down_b"])
    return jax.nn.relu(out + identity)


# --------------------------------- parameters --------------------------------

def init_params(key, inplanes, planes):
    k1, k2, k3 = jax.random.split(key, 3)

    def conv_w(k, cout, cin, ksz):
        fan = ksz * ksz * cout
        return jax.random.normal(k, (cout, cin, ksz, ksz), jnp.float32) * math.sqrt(2.0 / fan)

    return {
        "conv1_w": conv_w(k1, planes, inplanes, 3),
        "bn1_g": jnp.ones((planes,), jnp.float32),
        "bn1_b": jnp.zeros((planes,), jnp.float32),
        "conv2_w": conv_w(k2, planes, planes, 3),
        "bn2_g": jnp.ones((planes,), jnp.float32),
        "bn2_b": jnp.zeros((planes,), jnp.float32),
        "conv3_w": conv_w(k3, planes, planes, 3),
        "bn3_g": jnp.ones((planes,), jnp.float32),
        "bn3_b": jnp.zeros((planes,), jnp.float32),
    }


# ------------------------------------ main ------------------------------------

if __name__ == "__main__":
    key = jax.random.PRNGKey(0)
    pkey, xkey = jax.random.split(key)

    N, C, H, W = 2, 64, 16, 16
    planes = 64
    stride, dilation = 1, 2          # DBnet-style atrous BasicBlock config

    params = init_params(pkey, C, planes)
    x = jax.random.normal(xkey, (N, C, H, W), dtype=jnp.float32)

    fwd = jax.jit(partial(basic_block_forward, stride=stride, dilation=dilation))
    out = jax.block_until_ready(fwd(x, params))

    assert out.shape == (N, planes, H, W), out.shape
    assert bool(jnp.all(jnp.isfinite(out)))

    ref = reference_forward(x, params, stride=stride, dilation=dilation)
    max_err = float(jnp.max(jnp.abs(out - ref)))
    assert max_err < 0.3, f"max abs err vs f32 reference too large: {max_err}"

    print("KERNEL_OK")
</pallas_src>

<mosaic_0001>
module attributes {stable_mosaic.version = 11 : i64} {
  func.func @_conv_stats_kernel(%arg0: i32, %arg1: memref<1x18x18x128xbf16, #tpu.memory_space<vmem>>, %arg2: memref<9x128x128xbf16, #tpu.memory_space<vmem>>, %arg3: memref<1x16x16x128xf32, #tpu.memory_space<vmem>>, %arg4: memref<1x1x128xf32, #tpu.memory_space<vmem>>, %arg5: memref<1x1x128xf32, #tpu.memory_space<vmem>>, %arg6: memref<256x128xf32, #tpu.memory_space<vmem>>) attributes {dimension_semantics = [#tpu.dimension_semantics<parallel>], iteration_bounds = array<i64: 2>, scalar_prefetch = 0 : i64, scratch_operands = 1 : i64, tpu.core_type = #tpu.core_type<tc>, window_params = [{transform_indices = @transform_0, window_bounds = array<i64: 1, 18, 18, 128>}, {pipeline_mode = #tpu.pipeline_mode<synchronous>, transform_indices = @transform_1, window_bounds = array<i64: 9, 128, 128>}, {transform_indices = @transform_2, window_bounds = array<i64: 1, 16, 16, 128>}, {transform_indices = @transform_3, window_bounds = array<i64: 1, 1, 128>}, {transform_indices = @transform_4, window_bounds = array<i64: 1, 1, 128>}]} {
    %c0 = arith.constant 0 : index
    %c0_0 = arith.constant 0 : index
    %c0_1 = arith.constant 0 : index
    %c0_2 = arith.constant 0 : index
    %0 = vector.load %arg1[%c0, %c0_0, %c0_1, %c0_2] : memref<1x18x18x128xbf16, #tpu.memory_space<vmem>>, vector<1x16x16x128xbf16>
    %1 = vector.shape_cast %0 : vector<1x16x16x128xbf16> to vector<256x128xbf16>
    %c0_3 = arith.constant 0 : index
    %c0_4 = arith.constant 0 : index
    %c0_5 = arith.constant 0 : index
    %2 = vector.load %arg2[%c0_3, %c0_4, %c0_5] : memref<9x128x128xbf16, #tpu.memory_space<vmem>>, vector<1x128x128xbf16>
    %3 = vector.shape_cast %2 : vector<1x128x128xbf16> to vector<128x128xbf16>
    %cst = arith.constant dense<0.000000e+00> : vector<256x128xf32>
    %4 = tpu.matmul %1, %3, %cst {dimension_numbers = #tpu.dot_dimension_numbers<[1], [0], [0], [1], [0, 0, 1, 1], [], []>} : vector<256x128xbf16>, vector<128x128xbf16>, vector<256x128xf32> -> vector<256x128xf32>
    %c0_6 = arith.constant 0 : index
    %c0_7 = arith.constant 0 : index
    %5 = vector.load %arg6[%c0_6, %c0_7] : memref<256x128xf32, #tpu.memory_space<vmem>>, vector<256x128xf32>
    tpu.vector_store %arg6[%c0_6, %c0_7], %4 {strides = array<i32>} : memref<256x128xf32, #tpu.memory_space<vmem>>, vector<256x128xf32>,
    %c0_8 = arith.constant 0 : index
    %c0_9 = arith.constant 0 : index
    %c1 = arith.constant 1 : index
    %c0_10 = arith.constant 0 : index
    %6 = vector.load %arg1[%c0_8, %c0_9, %c1, %c0_10] : memref<1x18x18x128xbf16, #tpu.memory_space<vmem>>, vector<1x16x16x128xbf16>
    %7 = vector.shape_cast %6 : vector<1x16x16x128xbf16> to vector<256x128xbf16>
    %c1_11 = arith.constant 1 : index
    %c0_12 = arith.constant 0 : index
    %c0_13 = arith.constant 0 : index
    %8 = vector.load %arg2[%c1_11, %c0_12, %c0_13] : memref<9x128x128xbf16, #tpu.memory_space<vmem>>, vector<1x128x128xbf16>
    %9 = vector.shape_cast %8 : vector<1x128x128xbf16> to vector<128x128xbf16>
    %cst_14 = arith.constant dense<0.000000e+00> : vector<256x128xf32>
    %10 = tpu.matmul %7, %9, %cst_14 {dimension_numbers = #tpu.dot_dimension_numbers<[1], [0], [0], [1], [0, 0, 1, 1], [], []>} : vector<256x128xbf16>, vector<128x128xbf16>, vector<256x128xf32> -> vector<256x128xf32>
    %c0_15 = arith.constant 0 : index
    %c0_16 = arith.constant 0 : index
    %11 = vector.load %arg6[%c0_15, %c0_16] : memref<256x128xf32, #tpu.memory_space<vmem>>, vector<256x128xf32>
    %12 = arith.addf %11, %10 : vector<256x128xf32>
    %c0_17 = arith.constant 0 : index
    %c0_18 = arith.constant 0 : index
    %13 = vector.load %arg6[%c0_17, %c0_18] : memref<256x128xf32, #tpu.memory_space<vmem>>, vector<256x128xf32>
    tpu.vector_store %arg6[%c0_17, %c0_18], %12 {strides = array<i32>} : memref<256x128xf32, #tpu.memory_space<vmem>>, vector<256x128xf32>,
    %c0_19 = arith.constant 0 : index
    %c0_20 = arith.constant 0 : index
    %c2 = arith.constant 2 : index
    %c0_21 = arith.constant 0 : index
    %14 = vector.load %arg1[%c0_19, %c0_20, %c2, %c0_21] : memref<1x18x18x128xbf16, #tpu.memory_space<vmem>>, vector<1x16x16x128xbf16>
    %15 = vector.shape_cast %14 : vector<1x16x16x128xbf16> to vector<256x128xbf16>
    %c2_22 = arith.constant 2 : index
    %c0_23 = arith.constant 0 : index
    %c0_24 = arith.constant 0 : index
    %16 = vector.load %arg2[%c2_22, %c0_23, %c0_24] : memref<9x128x128xbf16, #tpu.memory_space<vmem>>, vector<1x128x128xbf16>
    %17 = vector.shape_cast %16 : vector<1x128x128xbf16> to vector<128x128xbf16>
    %cst_25 = arith.constant dense<0.000000e+00> : vector<256x128xf32>
    %18 = tpu.matmul %15, %17, %cst_25 {dimension_numbers = #tpu.dot_dimension_numbers<[1], [0], [0], [1], [0, 0, 1, 1], [], []>} : vector<256x128xbf16>, vector<128x128xbf16>, vector<256x128xf32> -> vector<256x128xf32>
    %c0_26 = arith.constant 0 : index
    %c0_27 = arith.constant 0 : index
    %19 = vector.load %arg6[%c0_26, %c0_27] : memref<256x128xf32, #tpu.memory_space<vmem>>, vector<256x128xf32>
    %20 = arith.addf %19, %18 : vector<256x128xf32>
    %c0_28 = arith.constant 0 : index
    %c0_29 = arith.constant 0 : index
    %21 = vector.load %arg6[%c0_28, %c0_29] : memref<256x128xf32, #tpu.memory_space<vmem>>, vector<256x128xf32>
    tpu.vector_store %arg6[%c0_28, %c0_29], %20 {strides = array<i32>} : memref<256x128xf32, #tpu.memory_space<vmem>>, vector<256x128xf32>,
    %c0_30 = arith.constant 0 : index
    %c1_31 = arith.constant 1 : index
    %c0_32 = arith.constant 0 : index
    %c0_33 = arith.constant 0 : index
    %22 = vector.load %arg1[%c0_30, %c1_31, %c0_32, %c0_33] : memref<1x18x18x128xbf16, #tpu.memory_space<vmem>>, vector<1x16x16x128xbf16>
    %23 = vector.shape_cast %22 : vector<1x16x16x128xbf16> to vector<256x128xbf16>
    %c3 = arith.constant 3 : index
    %c0_34 = arith.constant 0 : index
    %c0_35 = arith.constant 0 : index
    %24 = vector.load %arg2[%c3, %c0_34, %c0_35] : memref<9x128x128xbf16, #tpu.memory_space<vmem>>, vector<1x128x128xbf16>
    %25 = vector.shape_cast %24 : vector<1x128x128xbf16> to vector<128x128xbf16>
    %cst_36 = arith.constant dense<0.000000e+00> : vector<256x128xf32>
    %26 = tpu.matmul %23, %25, %cst_36 {dimension_numbers = #tpu.dot_dimension_numbers<[1], [0], [0], [1], [0, 0, 1, 1], [], []>} : vector<256x128xbf16>, vector<128x128xbf16>, vector<256x128xf32> -> vector<256x128xf32>
    %c0_37 = arith.constant 0 : index
    %c0_38 = arith.constant 0 : index
    %27 = vector.load %arg6[%c0_37, %c0_38] : memref<256x128xf32, #tpu.memory_space<vmem>>, vector<256x128xf32>
    %28 = arith.addf %27, %26 : vector<256x128xf32>
    %c0_39 = arith.constant 0 : index
    %c0_40 = arith.constant 0 : index
    %29 = vector.load %arg6[%c0_39, %c0_40] : memref<256x128xf32, #tpu.memory_space<vmem>>, vector<256x128xf32>
    tpu.vector_store %arg6[%c0_39, %c0_40], %28 {strides = array<i32>} : memref<256x128xf32, #tpu.memory_space<vmem>>, vector<256x128xf32>,
    %c0_41 = arith.constant 0 : index
    %c1_42 = arith.constant 1 : index
    %c1_43 = arith.constant 1 : index
    %c0_44 = arith.constant 0 : index
    %30 = vector.load %arg1[%c0_41, %c1_42, %c1_43, %c0_44] : memref<1x18x18x128xbf16, #tpu.memory_space<vmem>>, vector<1x16x16x128xbf16>
    %31 = vector.shape_cast %30 : vector<1x16x16x128xbf16> to vector<256x128xbf16>
    %c4 = arith.constant 4 : index
    %c0_45 = arith.constant 0 : index
    %c0_46 = arith.constant 0 : index
    %32 = vector.load %arg2[%c4, %c0_45, %c0_46] : memref<9x128x128xbf16, #tpu.memory_space<vmem>>, vector<1x128x128xbf16>
    %33 = vector.shape_cast %32 : vector<1x128x128xbf16> to vector<128x128xbf16>
    %cst_47 = arith.constant dense<0.000000e+00> : vector<256x128xf32>
    %34 = tpu.matmul %31, %33, %cst_47 {dimension_numbers = #tpu.dot_dimension_numbers<[1], [0], [0], [1], [0, 0, 1, 1], [], []>} : vector<256x128xbf16>, vector<128x128xbf16>, vector<256x128xf32> -> vector<256x128xf32>
    %c0_48 = arith.constant 0 : index
    %c0_49 = arith.constant 0 : index
    %35 = vector.load %arg6[%c0_48, %c0_49] : memref<256x128xf32, #tpu.memory_space<vmem>>, vector<256x128xf32>
    %36 = arith.addf %35, %34 : vector<256x128xf32>
    %c0_50 = arith.constant 0 : index
    %c0_51 = arith.constant 0 : index
    %37 = vector.load %arg6[%c0_50, %c0_51] : memref<256x128xf32, #tpu.memory_space<vmem>>, vector<256x128xf32>
    tpu.vector_store %arg6[%c0_50, %c0_51], %36 {strides = array<i32>} : memref<256x128xf32, #tpu.memory_space<vmem>>, vector<256x128xf32>,
    %c0_52 = arith.constant 0 : index
    %c1_53 = arith.constant 1 : index
    %c2_54 = arith.constant 2 : index
    %c0_55 = arith.constant 0 : index
    %38 = vector.load %arg1[%c0_52, %c1_53, %c2_54, %c0_55] : memref<1x18x18x128xbf16, #tpu.memory_space<vmem>>, vector<1x16x16x128xbf16>
    %39 = vector.shape_cast %38 : vector<1x16x16x128xbf16> to vector<256x128xbf16>
    %c5 = arith.constant 5 : index
    %c0_56 = arith.constant 0 : index
    %c0_57 = arith.constant 0 : index
    %40 = vector.load %arg2[%c5, %c0_56, %c0_57] : memref<9x128x128xbf16, #tpu.memory_space<vmem>>, vector<1x128x128xbf16>
    %41 = vector.shape_cast %40 : vector<1x128x128xbf16> to vector<128x128xbf16>
    %cst_58 = arith.constant dense<0.000000e+00> : vector<256x128xf32>
    %42 = tpu.matmul %39, %41, %cst_58 {dimension_numbers = #tpu.dot_dimension_numbers<[1], [0], [0], [1], [0, 0, 1, 1], [], []>} : vector<256x128xbf16>, vector<128x128xbf16>, vector<256x128xf32> -> vector<256x128xf32>
    %c0_59 = arith.constant 0 : index
    %c0_60 = arith.constant 0 : index
    %43 = vector.load %arg6[%c0_59, %c0_60] : memref<256x128xf32, #tpu.memory_space<vmem>>, vector<256x128xf32>
    %44 = arith.addf %43, %42 : vector<256x128xf32>
    %c0_61 = arith.constant 0 : index
    %c0_62 = arith.constant 0 : index
    %45 = vector.load %arg6[%c0_61, %c0_62] : memref<256x128xf32, #tpu.memory_space<vmem>>, vector<256x128xf32>
    tpu.vector_store %arg6[%c0_61, %c0_62], %44 {strides = array<i32>} : memref<256x128xf32, #tpu.memory_space<vmem>>, vector<256x128xf32>,
    %c0_63 = arith.constant 0 : index
    %c2_64 = arith.constant 2 : index
    %c0_65 = arith.constant 0 : index
    %c0_66 = arith.constant 0 : index
    %46 = vector.load %arg1[%c0_63, %c2_64, %c0_65, %c0_66] : memref<1x18x18x128xbf16, #tpu.memory_space<vmem>>, vector<1x16x16x128xbf16>
    %47 = vector.shape_cast %46 : vector<1x16x16x128xbf16> to vector<256x128xbf16>
    %c6 = arith.constant 6 : index
    %c0_67 = arith.constant 0 : index
    %c0_68 = arith.constant 0 : index
    %48 = vector.load %arg2[%c6, %c0_67, %c0_68] : memref<9x128x128xbf16, #tpu.memory_space<vmem>>, vector<1x128x128xbf16>
    %49 = vector.shape_cast %48 : vector<1x128x128xbf16> to vector<128x128xbf16>
    %cst_69 = arith.constant dense<0.000000e+00> : vector<256x128xf32>
    %50 = tpu.matmul %47, %49, %cst_69 {dimension_numbers = #tpu.dot_dimension_numbers<[1], [0], [0], [1], [0, 0, 1, 1], [], []>} : vector<256x128xbf16>, vector<128x128xbf16>, vector<256x128xf32> -> vector<256x128xf32>
    %c0_70 = arith.constant 0 : index
    %c0_71 = arith.constant 0 : index
    %51 = vector.load %arg6[%c0_70, %c0_71] : memref<256x128xf32, #tpu.memory_space<vmem>>, vector<256x128xf32>
    %52 = arith.addf %51, %50 : vector<256x128xf32>
    %c0_72 = arith.constant 0 : index
    %c0_73 = arith.constant 0 : index
    %53 = vector.load %arg6[%c0_72, %c0_73] : memref<256x128xf32, #tpu.memory_space<vmem>>, vector<256x128xf32>
    tpu.vector_store %arg6[%c0_72, %c0_73], %52 {strides = array<i32>} : memref<256x128xf32, #tpu.memory_space<vmem>>, vector<256x128xf32>,
    %c0_74 = arith.constant 0 : index
    %c2_75 = arith.constant 2 : index
    %c1_76 = arith.constant 1 : index
    %c0_77 = arith.constant 0 : index
    %54 = vector.load %arg1[%c0_74, %c2_75, %c1_76, %c0_77] : memref<1x18x18x128xbf16, #tpu.memory_space<vmem>>, vector<1x16x16x128xbf16>
    %55 = vector.shape_cast %54 : vector<1x16x16x128xbf16> to vector<256x128xbf16>
    %c7 = arith.constant 7 : index
    %c0_78 = arith.constant 0 : index
    %c0_79 = arith.constant 0 : index
    %56 = vector.load %arg2[%c7, %c0_78, %c0_79] : memref<9x128x128xbf16, #tpu.memory_space<vmem>>, vector<1x128x128xbf16>
    %57 = vector.shape_cast %56 : vector<1x128x128xbf16> to vector<128x128xbf16>
    %cst_80 = arith.constant dense<0.000000e+00> : vector<256x128xf32>
    %58 = tpu.matmul %55, %57, %cst_80 {dimension_numbers = #tpu.dot_dimension_numbers<[1], [0], [0], [1], [0, 0, 1, 1], [], []>} : vector<256x128xbf16>, vector<128x128xbf16>, vector<256x128xf32> -> vector<256x128xf32>
    %c0_81 = arith.constant 0 : index
    %c0_82 = arith.constant 0 : index
    %59 = vector.load %arg6[%c0_81, %c0_82] : memref<256x128xf32, #tpu.memory_space<vmem>>, vector<256x128xf32>
    %60 = arith.addf %59, %58 : vector<256x128xf32>
    %c0_83 = arith.constant 0 : index
    %c0_84 = arith.constant 0 : index
    %61 = vector.load %arg6[%c0_83, %c0_84] : memref<256x128xf32, #tpu.memory_space<vmem>>, vector<256x128xf32>
    tpu.vector_store %arg6[%c0_83, %c0_84], %60 {strides = array<i32>} : memref<256x128xf32, #tpu.memory_space<vmem>>, vector<256x128xf32>,
    %c0_85 = arith.constant 0 : index
    %c2_86 = arith.constant 2 : index
    %c2_87 = arith.constant 2 : index
    %c0_88 = arith.constant 0 : index
    %62 = vector.load %arg1[%c0_85, %c2_86, %c2_87, %c0_88] : memref<1x18x18x128xbf16, #tpu.memory_space<vmem>>, vector<1x16x16x128xbf16>
    %63 = vector.shape_cast %62 : vector<1x16x16x128xbf16> to vector<256x128xbf16>
    %c8 = arith.constant 8 : index
    %c0_89 = arith.constant 0 : index
    %c0_90 = arith.constant 0 : index
    %64 = vector.load %arg2[%c8, %c0_89, %c0_90] : memref<9x128x128xbf16, #tpu.memory_space<vmem>>, vector<1x128x128xbf16>
    %65 = vector.shape_cast %64 : vector<1x128x128xbf16> to vector<128x128xbf16>
    %cst_91 = arith.constant dense<0.000000e+00> : vector<256x128xf32>
    %66 = tpu.matmul %63, %65, %cst_91 {dimension_numbers = #tpu.dot_dimension_numbers<[1], [0], [0], [1], [0, 0, 1, 1], [], []>} : vector<256x128xbf16>, vector<128x128xbf16>, vector<256x128xf32> -> vector<256x128xf32>
    %c0_92 = arith.constant 0 : index
    %c0_93 = arith.constant 0 : index
    %67 = vector.load %arg6[%c0_92, %c0_93] : memref<256x128xf32, #tpu.memory_space<vmem>>, vector<256x128xf32>
    %68 = arith.addf %67, %66 : vector<256x128xf32>
    %c0_94 = arith.constant 0 : index
    %c0_95 = arith.constant 0 : index
    %69 = vector.load %arg6[%c0_94, %c0_95] : memref<256x128xf32, #tpu.memory_space<vmem>>, vector<256x128xf32>
    tpu.vector_store %arg6[%c0_94, %c0_95], %68 {strides = array<i32>} : memref<256x128xf32, #tpu.memory_space<vmem>>, vector<256x128xf32>,
    %c0_96 = arith.constant 0 : index
    %c0_97 = arith.constant 0 : index
    %70 = vector.load %arg6[%c0_96, %c0_97] : memref<256x128xf32, #tpu.memory_space<vmem>>, vector<256x128xf32>
    %71 = vector.shape_cast %70 : vector<256x128xf32> to vector<1x16x16x128xf32>
    %c0_98 = arith.constant 0 : index
    %c0_99 = arith.constant 0 : index
    %c0_100 = arith.constant 0 : index
    %c0_101 = arith.constant 0 : index
    %72 = vector.load %arg3[%c0_98, %c0_99, %c0_100, %c0_101] : memref<1x16x16x128xf32, #tpu.memory_space<vmem>>, vector<1x16x16x128xf32>
    tpu.vector_store %arg3[%c0_98, %c0_99, %c0_100, %c0_101], %71 {strides = array<i32>} : memref<1x16x16x128xf32, #tpu.memory_space<vmem>>, vector<1x16x16x128xf32>,
    %cst_102 = arith.constant dense<0.000000e+00> : vector<128xf32>
    %73 = vector.multi_reduction <add>, %70, %cst_102 [0] : vector<256x128xf32> to vector<128xf32>
    %74 = vector.shape_cast %73 : vector<128xf32> to vector<1x128xf32>
    %75 = vector.shape_cast %74 : vector<1x128xf32> to vector<1x1x128xf32>
    %c0_103 = arith.constant 0 : index
    %c0_104 = arith.constant 0 : index
    %c0_105 = arith.constant 0 : index
    %76 = vector.load %arg4[%c0_103, %c0_104, %c0_105] : memref<1x1x128xf32, #tpu.memory_space<vmem>>, vector<1x1x128xf32>
    tpu.vector_store %arg4[%c0_103, %c0_104, %c0_105], %75 {strides = array<i32>} : memref<1x1x128xf32, #tpu.memory_space<vmem>>, vector<1x1x128xf32>,
    %77 = arith.mulf %70, %70 : vector<256x128xf32>
    %cst_106 = arith.constant dense<0.000000e+00> : vector<128xf32>
    %78 = vector.multi_reduction <add>, %77, %cst_106 [0] : vector<256x128xf32> to vector<128xf32>
    %79 = vector.shape_cast %78 : vector<128xf32> to vector<1x128xf32>
    %80 = vector.shape_cast %79 : vector<1x128xf32> to vector<1x1x128xf32>
    %c0_107 = arith.constant 0 : index
    %c0_108 = arith.constant 0 : index
    %c0_109 = arith.constant 0 : index
    %81 = vector.load %arg5[%c0_107, %c0_108, %c0_109] : memref<1x1x128xf32, #tpu.memory_space<vmem>>, vector<1x1x128xf32>
    tpu.vector_store %arg5[%c0_107, %c0_108, %c0_109], %80 {strides = array<i32>} : memref<1x1x128xf32, #tpu.memory_space<vmem>>, vector<1x1x128xf32>,
    return
  }
  func.func @transform_0(%arg0: i32) -> (i32, i32, i32, i32) {
    %c0_i32 = arith.constant 0 : i32
    %c0_i32_0 = arith.constant 0 : i32
    %c0_i32_1 = arith.constant 0 : i32
    %c0_i32_2 = arith.constant 0 : i32
    return %arg0, %c0_i32, %c0_i32_0, %c0_i32_1 : i32, i32, i32, i32
  }
  func.func @transform_1(%arg0: i32) -> (i32, i32, i32) {
    %c0_i32 = arith.constant 0 : i32
    %c0_i32_0 = arith.constant 0 : i32
    %c0_i32_1 = arith.constant 0 : i32
    %c0_i32_2 = arith.constant 0 : i32
    return %c0_i32, %c0_i32_0, %c0_i32_1 : i32, i32, i32
  }
  func.func @transform_2(%arg0: i32) -> (i32, i32, i32, i32) {
    %c0_i32 = arith.constant 0 : i32
    %c0_i32_0 = arith.constant 0 : i32
    %c0_i32_1 = arith.constant 0 : i32
    %c0_i32_2 = arith.constant 0 : i32
    return %arg0, %c0_i32, %c0_i32_0, %c0_i32_1 : i32, i32, i32, i32
  }
  func.func @transform_3(%arg0: i32) -> (i32, i32, i32) {
    %c0_i32 = arith.constant 0 : i32
    %c0_i32_0 = arith.constant 0 : i32
    %c0_i32_1 = arith.constant 0 : i32
    return %arg0, %c0_i32, %c0_i32_0 : i32, i32, i32
  }
  func.func @transform_4(%arg0: i32) -> (i32, i32, i32) {
    %c0_i32 = arith.constant 0 : i32
    %c0_i32_0 = arith.constant 0 : i32
    %c0_i32_1 = arith.constant 0 : i32
    return %arg0, %c0_i32, %c0_i32_0 : i32, i32, i32
  }
}

module attributes {stable_mosaic.version = 11 : i64} {
  func.func @_bn_affine_kernel(%arg0: i32, %arg1: memref<1x16x16x128xf32, #tpu.memory_space<vmem>>, %arg2: memref<1x1x1x128xf32, #tpu.memory_space<vmem>>, %arg3: memref<1x1x1x128xf32, #tpu.memory_space<vmem>>, %arg4: memref<1x16x16x128xbf16, #tpu.memory_space<vmem>>) attributes {dimension_semantics = [#tpu.dimension_semantics<parallel>], iteration_bounds = array<i64: 2>, scalar_prefetch = 0 : i64, scratch_operands = 0 : i64, tpu.core_type = #tpu.core_type<tc>, window_params = [{transform_indices = @transform_0, window_bounds = array<i64: 1, 16, 16, 128>}, {pipeline_mode = #tpu.pipeline_mode<synchronous>, transform_indices = @transform_1, window_bounds = array<i64: 1, 1, 1, 128>}, {pipeline_mode = #tpu.pipeline_mode<synchronous>, transform_indices = @transform_2, window_bounds = array<i64: 1, 1, 1, 128>}, {transform_indices = @transform_3, window_bounds = array<i64: 1, 16, 16, 128>}]} {
    %c0 = arith.constant 0 : index
    %c0_0 = arith.constant 0 : index
    %c0_1 = arith.constant 0 : index
    %c0_2 = arith.constant 0 : index
    %0 = vector.load %arg1[%c0, %c0_0, %c0_1, %c0_2] : memref<1x16x16x128xf32, #tpu.memory_space<vmem>>, vector<1x16x16x128xf32>
    %c0_3 = arith.constant 0 : index
    %c0_4 = arith.constant 0 : index
    %c0_5 = arith.constant 0 : index
    %c0_6 = arith.constant 0 : index
    %1 = vector.load %arg2[%c0_3, %c0_4, %c0_5, %c0_6] : memref<1x1x1x128xf32, #tpu.memory_space<vmem>>, vector<1x1x1x128xf32>
    %2 = vector.broadcast %1 : vector<1x1x1x128xf32> to vector<1x16x16x128xf32>
    %3 = arith.mulf %0, %2 : vector<1x16x16x128xf32>
    %c0_7 = arith.constant 0 : index
    %c0_8 = arith.constant 0 : index
    %c0_9 = arith.constant 0 : index
    %c0_10 = arith.constant 0 : index
    %4 = vector.load %arg3[%c0_7, %c0_8, %c0_9, %c0_10] : memref<1x1x1x128xf32, #tpu.memory_space<vmem>>, vector<1x1x1x128xf32>
    %5 = vector.broadcast %4 : vector<1x1x1x128xf32> to vector<1x16x16x128xf32>
    %6 = arith.addf %3, %5 : vector<1x16x16x128xf32>
    %cst = arith.constant 0.000000e+00 : f32
    %7 = vector.broadcast %cst : f32 to vector<1x16x16x128xf32>
    %8 = arith.maximumf %6, %7 : vector<1x16x16x128xf32>
    %9 = arith.truncf %8 : vector<1x16x16x128xf32> to vector<1x16x16x128xbf16>
    %c0_11 = arith.constant 0 : index
    %c0_12 = arith.constant 0 : index
    %c0_13 = arith.constant 0 : index
    %c0_14 = arith.constant 0 : index
    %10 = vector.load %arg4[%c0_11, %c0_12, %c0_13, %c0_14] : memref<1x16x16x128xbf16, #tpu.memory_space<vmem>>, vector<1x16x16x128xbf16>
    tpu.vector_store %arg4[%c0_11, %c0_12, %c0_13, %c0_14], %9 {strides = array<i32>} : memref<1x16x16x128xbf16, #tpu.memory_space<vmem>>, vector<1x16x16x128xbf16>,
    return
  }
  func.func @transform_0(%arg0: i32) -> (i32, i32, i32, i32) {
    %c0_i32 = arith.constant 0 : i32
    %c0_i32_0 = arith.constant 0 : i32
    %c0_i32_1 = arith.constant 0 : i32
    %c0_i32_2 = arith.constant 0 : i32
    return %arg0, %c0_i32, %c0_i32_0, %c0_i32_1 : i32, i32, i32, i32
  }
  func.func @transform_1(%arg0: i32) -> (i32, i32, i32, i32) {
    %c0_i32 = arith.constant 0 : i32
    %c0_i32_0 = arith.constant 0 : i32
    %c0_i32_1 = arith.constant 0 : i32
    %c0_i32_2 = arith.constant 0 : i32
    %c0_i32_3 = arith.constant 0 : i32
    return %c0_i32, %c0_i32_0, %c0_i32_1, %c0_i32_2 : i32, i32, i32, i32
  }
  func.func @transform_2(%arg0: i32) -> (i32, i32, i32, i32) {
    %c0_i32 = arith.constant 0 : i32
    %c0_i32_0 = arith.constant 0 : i32
    %c0_i32_1 = arith.constant 0 : i32
    %c0_i32_2 = arith.constant 0 : i32
    %c0_i32_3 = arith.constant 0 : i32
    return %c0_i32, %c0_i32_0, %c0_i32_1, %c0_i32_2 : i32, i32, i32, i32
  }
  func.func @transform_3(%arg0: i32) -> (i32, i32, i32, i32) {
    %c0_i32 = arith.constant 0 : i32
    %c0_i32_0 = arith.constant 0 : i32
    %c0_i32_1 = arith.constant 0 : i32
    %c0_i32_2 = arith.constant 0 : i32
    return %arg0, %c0_i32, %c0_i32_0, %c0_i32_1 : i32, i32, i32, i32
  }
}

module attributes {stable_mosaic.version = 11 : i64} {
  func.func @_conv_stats_kernel(%arg0: i32, %arg1: memref<1x20x20x128xbf16, #tpu.memory_space<vmem>>, %arg2: memref<9x128x128xbf16, #tpu.memory_space<vmem>>, %arg3: memref<1x16x16x128xf32, #tpu.memory_space<vmem>>, %arg4: memref<1x1x128xf32, #tpu.memory_space<vmem>>, %arg5: memref<1x1x128xf32, #tpu.memory_space<vmem>>, %arg6: memref<256x128xf32, #tpu.memory_space<vmem>>) attributes {dimension_semantics = [#tpu.dimension_semantics<parallel>], iteration_bounds = array<i64: 2>, scalar_prefetch = 0 : i64, scratch_operands = 1 : i64, tpu.core_type = #tpu.core_type<tc>, window_params = [{transform_indices = @transform_0, window_bounds = array<i64: 1, 20, 20, 128>}, {pipeline_mode = #tpu.pipeline_mode<synchronous>, transform_indices = @transform_1, window_bounds = array<i64: 9, 128, 128>}, {transform_indices = @transform_2, window_bounds = array<i64: 1, 16, 16, 128>}, {transform_indices = @transform_3, window_bounds = array<i64: 1, 1, 128>}, {transform_indices = @transform_4, window_bounds = array<i64: 1, 1, 128>}]} {
    %c0 = arith.constant 0 : index
    %c0_0 = arith.constant 0 : index
    %c0_1 = arith.constant 0 : index
    %c0_2 = arith.constant 0 : index
    %0 = vector.load %arg1[%c0, %c0_0, %c0_1, %c0_2] : memref<1x20x20x128xbf16, #tpu.memory_space<vmem>>, vector<1x16x16x128xbf16>
    %1 = vector.shape_cast %0 : vector<1x16x16x128xbf16> to vector<256x128xbf16>
    %c0_3 = arith.constant 0 : index
    %c0_4 = arith.constant 0 : index
    %c0_5 = arith.constant 0 : index
    %2 = vector.load %arg2[%c0_3, %c0_4, %c0_5] : memref<9x128x128xbf16, #tpu.memory_space<vmem>>, vector<1x128x128xbf16>
    %3 = vector.shape_cast %2 : vector<1x128x128xbf16> to vector<128x128xbf16>
    %cst = arith.constant dense<0.000000e+00> : vector<256x128xf32>
    %4 = tpu.matmul %1, %3, %cst {dimension_numbers = #tpu.dot_dimension_numbers<[1], [0], [0], [1], [0, 0, 1, 1], [], []>} : vector<256x128xbf16>, vector<128x128xbf16>, vector<256x128xf32> -> vector<256x128xf32>
    %c0_6 = arith.constant 0 : index
    %c0_7 = arith.constant 0 : index
    %5 = vector.load %arg6[%c0_6, %c0_7] : memref<256x128xf32, #tpu.memory_space<vmem>>, vector<256x128xf32>
    tpu.vector_store %arg6[%c0_6, %c0_7], %4 {strides = array<i32>} : memref<256x128xf32, #tpu.memory_space<vmem>>, vector<256x128xf32>,
    %c0_8 = arith.constant 0 : index
    %c0_9 = arith.constant 0 : index
    %c2 = arith.constant 2 : index
    %c0_10 = arith.constant 0 : index
    %6 = vector.load %arg1[%c0_8, %c0_9, %c2, %c0_10] : memref<1x20x20x128xbf16, #tpu.memory_space<vmem>>, vector<1x16x16x128xbf16>
    %7 = vector.shape_cast %6 : vector<1x16x16x128xbf16> to vector<256x128xbf16>
    %c1 = arith.constant 1 : index
    %c0_11 = arith.constant 0 : index
    %c0_12 = arith.constant 0 : index
    %8 = vector.load %arg2[%c1, %c0_11, %c0_12] : memref<9x128x128xbf16, #tpu.memory_space<vmem>>, vector<1x128x128xbf16>
    %9 = vector.shape_cast %8 : vector<1x128x128xbf16> to vector<128x128xbf16>
    %cst_13 = arith.constant dense<0.000000e+00> : vector<256x128xf32>
    %10 = tpu.matmul %7, %9, %cst_13 {dimension_numbers = #tpu.dot_dimension_numbers<[1], [0], [0], [1], [0, 0, 1, 1], [], []>} : vector<256x128xbf16>, vector<128x128xbf16>, vector<256x128xf32> -> vector<256x128xf32>
    %c0_14 = arith.constant 0 : index
    %c0_15 = arith.constant 0 : index
    %11 = vector.load %arg6[%c0_14, %c0_15] : memref<256x128xf32, #tpu.memory_space<vmem>>, vector<256x128xf32>
    %12 = arith.addf %11, %10 : vector<256x128xf32>
    %c0_16 = arith.constant 0 : index
    %c0_17 = arith.constant 0 : index
    %13 = vector.load %arg6[%c0_16, %c0_17] : memref<256x128xf32, #tpu.memory_space<vmem>>, vector<256x128xf32>
    tpu.vector_store %arg6[%c0_16, %c0_17], %12 {strides = array<i32>} : memref<256x128xf32, #tpu.memory_space<vmem>>, vector<256x128xf32>,
    %c0_18 = arith.constant 0 : index
    %c0_19 = arith.constant 0 : index
    %c4 = arith.constant 4 : index
    %c0_20 = arith.constant 0 : index
    %14 = vector.load %arg1[%c0_18, %c0_19, %c4, %c0_20] : memref<1x20x20x128xbf16, #tpu.memory_space<vmem>>, vector<1x16x16x128xbf16>
    %15 = vector.shape_cast %14 : vector<1x16x16x128xbf16> to vector<256x128xbf16>
    %c2_21 = arith.constant 2 : index
    %c0_22 = arith.constant 0 : index
    %c0_23 = arith.constant 0 : index
    %16 = vector.load %arg2[%c2_21, %c0_22, %c0_23] : memref<9x128x128xbf16, #tpu.memory_space<vmem>>, vector<1x128x128xbf16>
    %17 = vector.shape_cast %16 : vector<1x128x128xbf16> to vector<128x128xbf16>
    %cst_24 = arith.constant dense<0.000000e+00> : vector<256x128xf32>
    %18 = tpu.matmul %15, %17, %cst_24 {dimension_numbers = #tpu.dot_dimension_numbers<[1], [0], [0], [1], [0, 0, 1, 1], [], []>} : vector<256x128xbf16>, vector<128x128xbf16>, vector<256x128xf32> -> vector<256x128xf32>
    %c0_25 = arith.constant 0 : index
    %c0_26 = arith.constant 0 : index
    %19 = vector.load %arg6[%c0_25, %c0_26] : memref<256x128xf32, #tpu.memory_space<vmem>>, vector<256x128xf32>
    %20 = arith.addf %19, %18 : vector<256x128xf32>
    %c0_27 = arith.constant 0 : index
    %c0_28 = arith.constant 0 : index
    %21 = vector.load %arg6[%c0_27, %c0_28] : memref<256x128xf32, #tpu.memory_space<vmem>>, vector<256x128xf32>
    tpu.vector_store %arg6[%c0_27, %c0_28], %20 {strides = array<i32>} : memref<256x128xf32, #tpu.memory_space<vmem>>, vector<256x128xf32>,
    %c0_29 = arith.constant 0 : index
    %c2_30 = arith.constant 2 : index
    %c0_31 = arith.constant 0 : index
    %c0_32 = arith.constant 0 : index
    %22 = vector.load %arg1[%c0_29, %c2_30, %c0_31, %c0_32] : memref<1x20x20x128xbf16, #tpu.memory_space<vmem>>, vector<1x16x16x128xbf16>
    %23 = vector.shape_cast %22 : vector<1x16x16x128xbf16> to vector<256x128xbf16>
    %c3 = arith.constant 3 : index
    %c0_33 = arith.constant 0 : index
    %c0_34 = arith.constant 0 : index
    %24 = vector.load %arg2[%c3, %c0_33, %c0_34] : memref<9x128x128xbf16, #tpu.memory_space<vmem>>, vector<1x128x128xbf16>
    %25 = vector.shape_cast %24 : vector<1x128x128xbf16> to vector<128x128xbf16>
    %cst_35 = arith.constant dense<0.000000e+00> : vector<256x128xf32>
    %26 = tpu.matmul %23, %25, %cst_35 {dimension_numbers = #tpu.dot_dimension_numbers<[1], [0], [0], [1], [0, 0, 1, 1], [], []>} : vector<256x128xbf16>, vector<128x128xbf16>, vector<256x128xf32> -> vector<256x128xf32>
    %c0_36 = arith.constant 0 : index
    %c0_37 = arith.constant 0 : index
    %27 = vector.load %arg6[%c0_36, %c0_37] : memref<256x128xf32, #tpu.memory_space<vmem>>, vector<256x128xf32>
    %28 = arith.addf %27, %26 : vector<256x128xf32>
    %c0_38 = arith.constant 0 : index
    %c0_39 = arith.constant 0 : index
    %29 = vector.load %arg6[%c0_38, %c0_39] : memref<256x128xf32, #tpu.memory_space<vmem>>, vector<256x128xf32>
    tpu.vector_store %arg6[%c0_38, %c0_39], %28 {strides = array<i32>} : memref<256x128xf32, #tpu.memory_space<vmem>>, vector<256x128xf32>,
    %c0_40 = arith.constant 0 : index
    %c2_41 = arith.constant 2 : index
    %c2_42 = arith.constant 2 : index
    %c0_43 = arith.constant 0 : index
    %30 = vector.load %arg1[%c0_40, %c2_41, %c2_42, %c0_43] : memref<1x20x20x128xbf16, #tpu.memory_space<vmem>>, vector<1x16x16x128xbf16>
    %31 = vector.shape_cast %30 : vector<1x16x16x128xbf16> to vector<256x128xbf16>
    %c4_44 = arith.constant 4 : index
    %c0_45 = arith.constant 0 : index
    %c0_46 = arith.constant 0 : index
    %32 = vector.load %arg2[%c4_44, %c0_45, %c0_46] : memref<9x128x128xbf16, #tpu.memory_space<vmem>>, vector<1x128x128xbf16>
    %33 = vector.shape_cast %32 : vector<1x128x128xbf16> to vector<128x128xbf16>
    %cst_47 = arith.constant dense<0.000000e+00> : vector<256x128xf32>
    %34 = tpu.matmul %31, %33, %cst_47 {dimension_numbers = #tpu.dot_dimension_numbers<[1], [0], [0], [1], [0, 0, 1, 1], [], []>} : vector<256x128xbf16>, vector<128x128xbf16>, vector<256x128xf32> -> vector<256x128xf32>
    %c0_48 = arith.constant 0 : index
    %c0_49 = arith.constant 0 : index
    %35 = vector.load %arg6[%c0_48, %c0_49] : memref<256x128xf32, #tpu.memory_space<vmem>>, vector<256x128xf32>
    %36 = arith.addf %35, %34 : vector<256x128xf32>
    %c0_50 = arith.constant 0 : index
    %c0_51 = arith.constant 0 : index
    %37 = vector.load %arg6[%c0_50, %c0_51] : memref<256x128xf32, #tpu.memory_space<vmem>>, vector<256x128xf32>
    tpu.vector_store %arg6[%c0_50, %c0_51], %36 {strides = array<i32>} : memref<256x128xf32, #tpu.memory_space<vmem>>, vector<256x128xf32>,
    %c0_52 = arith.constant 0 : index
    %c2_53 = arith.constant 2 : index
    %c4_54 = arith.constant 4 : index
    %c0_55 = arith.constant 0 : index
    %38 = vector.load %arg1[%c0_52, %c2_53, %c4_54, %c0_55] : memref<1x20x20x128xbf16, #tpu.memory_space<vmem>>, vector<1x16x16x128xbf16>
    %39 = vector.shape_cast %38 : vector<1x16x16x128xbf16> to vector<256x128xbf16>
    %c5 = arith.constant 5 : index
    %c0_56 = arith.constant 0 : index
    %c0_57 = arith.constant 0 : index
    %40 = vector.load %arg2[%c5, %c0_56, %c0_57] : memref<9x128x128xbf16, #tpu.memory_space<vmem>>, vector<1x128x128xbf16>
    %41 = vector.shape_cast %40 : vector<1x128x128xbf16> to vector<128x128xbf16>
    %cst_58 = arith.constant dense<0.000000e+00> : vector<256x128xf32>
    %42 = tpu.matmul %39, %41, %cst_58 {dimension_numbers = #tpu.dot_dimension_numbers<[1], [0], [0], [1], [0, 0, 1, 1], [], []>} : vector<256x128xbf16>, vector<128x128xbf16>, vector<256x128xf32> -> vector<256x128xf32>
    %c0_59 = arith.constant 0 : index
    %c0_60 = arith.constant 0 : index
    %43 = vector.load %arg6[%c0_59, %c0_60] : memref<256x128xf32, #tpu.memory_space<vmem>>, vector<256x128xf32>
    %44 = arith.addf %43, %42 : vector<256x128xf32>
    %c0_61 = arith.constant 0 : index
    %c0_62 = arith.constant 0 : index
    %45 = vector.load %arg6[%c0_61, %c0_62] : memref<256x128xf32, #tpu.memory_space<vmem>>, vector<256x128xf32>
    tpu.vector_store %arg6[%c0_61, %c0_62], %44 {strides = array<i32>} : memref<256x128xf32, #tpu.memory_space<vmem>>, vector<256x128xf32>,
    %c0_63 = arith.constant 0 : index
    %c4_64 = arith.constant 4 : index
    %c0_65 = arith.constant 0 : index
    %c0_66 = arith.constant 0 : index
    %46 = vector.load %arg1[%c0_63, %c4_64, %c0_65, %c0_66] : memref<1x20x20x128xbf16, #tpu.memory_space<vmem>>, vector<1x16x16x128xbf16>
    %47 = vector.shape_cast %46 : vector<1x16x16x128xbf16> to vector<256x128xbf16>
    %c6 = arith.constant 6 : index
    %c0_67 = arith.constant 0 : index
    %c0_68 = arith.constant 0 : index
    %48 = vector.load %arg2[%c6, %c0_67, %c0_68] : memref<9x128x128xbf16, #tpu.memory_space<vmem>>, vector<1x128x128xbf16>
    %49 = vector.shape_cast %48 : vector<1x128x128xbf16> to vector<128x128xbf16>
    %cst_69 = arith.constant dense<0.000000e+00> : vector<256x128xf32>
    %50 = tpu.matmul %47, %49, %cst_69 {dimension_numbers = #tpu.dot_dimension_numbers<[1], [0], [0], [1], [0, 0, 1, 1], [], []>} : vector<256x128xbf16>, vector<128x128xbf16>, vector<256x128xf32> -> vector<256x128xf32>
    %c0_70 = arith.constant 0 : index
    %c0_71 = arith.constant 0 : index
    %51 = vector.load %arg6[%c0_70, %c0_71] : memref<256x128xf32, #tpu.memory_space<vmem>>, vector<256x128xf32>
    %52 = arith.addf %51, %50 : vector<256x128xf32>
    %c0_72 = arith.constant 0 : index
    %c0_73 = arith.constant 0 : index
    %53 = vector.load %arg6[%c0_72, %c0_73] : memref<256x128xf32, #tpu.memory_space<vmem>>, vector<256x128xf32>
    tpu.vector_store %arg6[%c0_72, %c0_73], %52 {strides = array<i32>} : memref<256x128xf32, #tpu.memory_space<vmem>>, vector<256x128xf32>,
    %c0_74 = arith.constant 0 : index
    %c4_75 = arith.constant 4 : index
    %c2_76 = arith.constant 2 : index
    %c0_77 = arith.constant 0 : index
    %54 = vector.load %arg1[%c0_74, %c4_75, %c2_76, %c0_77] : memref<1x20x20x128xbf16, #tpu.memory_space<vmem>>, vector<1x16x16x128xbf16>
    %55 = vector.shape_cast %54 : vector<1x16x16x128xbf16> to vector<256x128xbf16>
    %c7 = arith.constant 7 : index
    %c0_78 = arith.constant 0 : index
    %c0_79 = arith.constant 0 : index
    %56 = vector.load %arg2[%c7, %c0_78, %c0_79] : memref<9x128x128xbf16, #tpu.memory_space<vmem>>, vector<1x128x128xbf16>
    %57 = vector.shape_cast %56 : vector<1x128x128xbf16> to vector<128x128xbf16>
    %cst_80 = arith.constant dense<0.000000e+00> : vector<256x128xf32>
    %58 = tpu.matmul %55, %57, %cst_80 {dimension_numbers = #tpu.dot_dimension_numbers<[1], [0], [0], [1], [0, 0, 1, 1], [], []>} : vector<256x128xbf16>, vector<128x128xbf16>, vector<256x128xf32> -> vector<256x128xf32>
    %c0_81 = arith.constant 0 : index
    %c0_82 = arith.constant 0 : index
    %59 = vector.load %arg6[%c0_81, %c0_82] : memref<256x128xf32, #tpu.memory_space<vmem>>, vector<256x128xf32>
    %60 = arith.addf %59, %58 : vector<256x128xf32>
    %c0_83 = arith.constant 0 : index
    %c0_84 = arith.constant 0 : index
    %61 = vector.load %arg6[%c0_83, %c0_84] : memref<256x128xf32, #tpu.memory_space<vmem>>, vector<256x128xf32>
    tpu.vector_store %arg6[%c0_83, %c0_84], %60 {strides = array<i32>} : memref<256x128xf32, #tpu.memory_space<vmem>>, vector<256x128xf32>,
    %c0_85 = arith.constant 0 : index
    %c4_86 = arith.constant 4 : index
    %c4_87 = arith.constant 4 : index
    %c0_88 = arith.constant 0 : index
    %62 = vector.load %arg1[%c0_85, %c4_86, %c4_87, %c0_88] : memref<1x20x20x128xbf16, #tpu.memory_space<vmem>>, vector<1x16x16x128xbf16>
    %63 = vector.shape_cast %62 : vector<1x16x16x128xbf16> to vector<256x128xbf16>
    %c8 = arith.constant 8 : index
    %c0_89 = arith.constant 0 : index
    %c0_90 = arith.constant 0 : index
    %64 = vector.load %arg2[%c8, %c0_89, %c0_90] : memref<9x128x128xbf16, #tpu.memory_space<vmem>>, vector<1x128x128xbf16>
    %65 = vector.shape_cast %64 : vector<1x128x128xbf16> to vector<128x128xbf16>
    %cst_91 = arith.constant dense<0.000000e+00> : vector<256x128xf32>
    %66 = tpu.matmul %63, %65, %cst_91 {dimension_numbers = #tpu.dot_dimension_numbers<[1], [0], [0], [1], [0, 0, 1, 1], [], []>} : vector<256x128xbf16>, vector<128x128xbf16>, vector<256x128xf32> -> vector<256x128xf32>
    %c0_92 = arith.constant 0 : index
    %c0_93 = arith.constant 0 : index
    %67 = vector.load %arg6[%c0_92, %c0_93] : memref<256x128xf32, #tpu.memory_space<vmem>>, vector<256x128xf32>
    %68 = arith.addf %67, %66 : vector<256x128xf32>
    %c0_94 = arith.constant 0 : index
    %c0_95 = arith.constant 0 : index
    %69 = vector.load %arg6[%c0_94, %c0_95] : memref<256x128xf32, #tpu.memory_space<vmem>>, vector<256x128xf32>
    tpu.vector_store %arg6[%c0_94, %c0_95], %68 {strides = array<i32>} : memref<256x128xf32, #tpu.memory_space<vmem>>, vector<256x128xf32>,
    %c0_96 = arith.constant 0 : index
    %c0_97 = arith.constant 0 : index
    %70 = vector.load %arg6[%c0_96, %c0_97] : memref<256x128xf32, #tpu.memory_space<vmem>>, vector<256x128xf32>
    %71 = vector.shape_cast %70 : vector<256x128xf32> to vector<1x16x16x128xf32>
    %c0_98 = arith.constant 0 : index
    %c0_99 = arith.constant 0 : index
    %c0_100 = arith.constant 0 : index
    %c0_101 = arith.constant 0 : index
    %72 = vector.load %arg3[%c0_98, %c0_99, %c0_100, %c0_101] : memref<1x16x16x128xf32, #tpu.memory_space<vmem>>, vector<1x16x16x128xf32>
    tpu.vector_store %arg3[%c0_98, %c0_99, %c0_100, %c0_101], %71 {strides = array<i32>} : memref<1x16x16x128xf32, #tpu.memory_space<vmem>>, vector<1x16x16x128xf32>,
    %cst_102 = arith.constant dense<0.000000e+00> : vector<128xf32>
    %73 = vector.multi_reduction <add>, %70, %cst_102 [0] : vector<256x128xf32> to vector<128xf32>
    %74 = vector.shape_cast %73 : vector<128xf32> to vector<1x128xf32>
    %75 = vector.shape_cast %74 : vector<1x128xf32> to vector<1x1x128xf32>
    %c0_103 = arith.constant 0 : index
    %c0_104 = arith.constant 0 : index
    %c0_105 = arith.constant 0 : index
    %76 = vector.load %arg4[%c0_103, %c0_104, %c0_105] : memref<1x1x128xf32, #tpu.memory_space<vmem>>, vector<1x1x128xf32>
    tpu.vector_store %arg4[%c0_103, %c0_104, %c0_105], %75 {strides = array<i32>} : memref<1x1x128xf32, #tpu.memory_space<vmem>>, vector<1x1x128xf32>,
    %77 = arith.mulf %70, %70 : vector<256x128xf32>
    %cst_106 = arith.constant dense<0.000000e+00> : vector<128xf32>
    %78 = vector.multi_reduction <add>, %77, %cst_106 [0] : vector<256x128xf32> to vector<128xf32>
    %79 = vector.shape_cast %78 : vector<128xf32> to vector<1x128xf32>
    %80 = vector.shape_cast %79 : vector<1x128xf32> to vector<1x1x128xf32>
    %c0_107 = arith.constant 0 : index
    %c0_108 = arith.constant 0 : index
    %c0_109 = arith.constant 0 : index
    %81 = vector.load %arg5[%c0_107, %c0_108, %c0_109] : memref<1x1x128xf32, #tpu.memory_space<vmem>>, vector<1x1x128xf32>
    tpu.vector_store %arg5[%c0_107, %c0_108, %c0_109], %80 {strides = array<i32>} : memref<1x1x128xf32, #tpu.memory_space<vmem>>, vector<1x1x128xf32>,
    return
  }
  func.func @transform_0(%arg0: i32) -> (i32, i32, i32, i32) {
    %c0_i32 = arith.constant 0 : i32
    %c0_i32_0 = arith.constant 0 : i32
    %c0_i32_1 = arith.constant 0 : i32
    %c0_i32_2 = arith.constant 0 : i32
    return %arg0, %c0_i32, %c0_i32_0, %c0_i32_1 : i32, i32, i32, i32
  }
  func.func @transform_1(%arg0: i32) -> (i32, i32, i32) {
    %c0_i32 = arith.constant 0 : i32
    %c0_i32_0 = arith.constant 0 : i32
    %c0_i32_1 = arith.constant 0 : i32
    %c0_i32_2 = arith.constant 0 : i32
    return %c0_i32, %c0_i32_0, %c0_i32_1 : i32, i32, i32
  }
  func.func @transform_2(%arg0: i32) -> (i32, i32, i32, i32) {
    %c0_i32 = arith.constant 0 : i32
    %c0_i32_0 = arith.constant 0 : i32
    %c0_i32_1 = arith.constant 0 : i32
    %c0_i32_2 = arith.constant 0 : i32
    return %arg0, %c0_i32, %c0_i32_0, %c0_i32_1 : i32, i32, i32, i32
  }
  func.func @transform_3(%arg0: i32) -> (i32, i32, i32) {
    %c0_i32 = arith.constant 0 : i32
    %c0_i32_0 = arith.constant 0 : i32
    %c0_i32_1 = arith.constant 0 : i32
    return %arg0, %c0_i32, %c0_i32_0 : i32, i32, i32
  }
  func.func @transform_4(%arg0: i32) -> (i32, i32, i32) {
    %c0_i32 = arith.constant 0 : i32
    %c0_i32_0 = arith.constant 0 : i32
    %c0_i32_1 = arith.constant 0 : i32
    return %arg0, %c0_i32, %c0_i32_0 : i32, i32, i32
  }
}

module attributes {stable_mosaic.version = 11 : i64} {
  func.func @_bn_affine_res_kernel(%arg0: i32, %arg1: memref<1x16x16x128xf32, #tpu.memory_space<vmem>>, %arg2: memref<1x1x1x128xf32, #tpu.memory_space<vmem>>, %arg3: memref<1x1x1x128xf32, #tpu.memory_space<vmem>>, %arg4: memref<1x16x16x128xf32, #tpu.memory_space<vmem>>, %arg5: memref<1x16x16x128xf32, #tpu.memory_space<vmem>>) attributes {dimension_semantics = [#tpu.dimension_semantics<parallel>], iteration_bounds = array<i64: 2>, scalar_prefetch = 0 : i64, scratch_operands = 0 : i64, tpu.core_type = #tpu.core_type<tc>, window_params = [{transform_indices = @transform_0, window_bounds = array<i64: 1, 16, 16, 128>}, {pipeline_mode = #tpu.pipeline_mode<synchronous>, transform_indices = @transform_1, window_bounds = array<i64: 1, 1, 1, 128>}, {pipeline_mode = #tpu.pipeline_mode<synchronous>, transform_indices = @transform_2, window_bounds = array<i64: 1, 1, 1, 128>}, {transform_indices = @transform_3, window_bounds = array<i64: 1, 16, 16, 128>}, {transform_indices = @transform_4, window_bounds = array<i64: 1, 16, 16, 128>}]} {
    %c0 = arith.constant 0 : index
    %c0_0 = arith.constant 0 : index
    %c0_1 = arith.constant 0 : index
    %c0_2 = arith.constant 0 : index
    %0 = vector.load %arg1[%c0, %c0_0, %c0_1, %c0_2] : memref<1x16x16x128xf32, #tpu.memory_space<vmem>>, vector<1x16x16x128xf32>
    %c0_3 = arith.constant 0 : index
    %c0_4 = arith.constant 0 : index
    %c0_5 = arith.constant 0 : index
    %c0_6 = arith.constant 0 : index
    %1 = vector.load %arg2[%c0_3, %c0_4, %c0_5, %c0_6] : memref<1x1x1x128xf32, #tpu.memory_space<vmem>>, vector<1x1x1x128xf32>
    %2 = vector.broadcast %1 : vector<1x1x1x128xf32> to vector<1x16x16x128xf32>
    %3 = arith.mulf %0, %2 : vector<1x16x16x128xf32>
    %c0_7 = arith.constant 0 : index
    %c0_8 = arith.constant 0 : index
    %c0_9 = arith.constant 0 : index
    %c0_10 = arith.constant 0 : index
    %4 = vector.load %arg3[%c0_7, %c0_8, %c0_9, %c0_10] : memref<1x1x1x128xf32, #tpu.memory_space<vmem>>, vector<1x1x1x128xf32>
    %5 = vector.broadcast %4 : vector<1x1x1x128xf32> to vector<1x16x16x128xf32>
    %6 = arith.addf %3, %5 : vector<1x16x16x128xf32>
    %c0_11 = arith.constant 0 : index
    %c0_12 = arith.constant 0 : index
    %c0_13 = arith.constant 0 : index
    %c0_14 = arith.constant 0 : index
    %7 = vector.load %arg4[%c0_11, %c0_12, %c0_13, %c0_14] : memref<1x16x16x128xf32, #tpu.memory_space<vmem>>, vector<1x16x16x128xf32>
    %8 = arith.addf %6, %7 : vector<1x16x16x128xf32>
    %cst = arith.constant 0.000000e+00 : f32
    %9 = vector.broadcast %cst : f32 to vector<1x16x16x128xf32>
    %10 = arith.maximumf %8, %9 : vector<1x16x16x128xf32>
    %c0_15 = arith.constant 0 : index
    %c0_16 = arith.constant 0 : index
    %c0_17 = arith.constant 0 : index
    %c0_18 = arith.constant 0 : index
    %11 = vector.load %arg5[%c0_15, %c0_16, %c0_17, %c0_18] : memref<1x16x16x128xf32, #tpu.memory_space<vmem>>, vector<1x16x16x128xf32>
    tpu.vector_store %arg5[%c0_15, %c0_16, %c0_17, %c0_18], %10 {strides = array<i32>} : memref<1x16x16x128xf32, #tpu.memory_space<vmem>>, vector<1x16x16x128xf32>,
    return
  }
  func.func @transform_0(%arg0: i32) -> (i32, i32, i32, i32) {
    %c0_i32 = arith.constant 0 : i32
    %c0_i32_0 = arith.constant 0 : i32
    %c0_i32_1 = arith.constant 0 : i32
    %c0_i32_2 = arith.constant 0 : i32
    return %arg0, %c0_i32, %c0_i32_0, %c0_i32_1 : i32, i32, i32, i32
  }
  func.func @transform_1(%arg0: i32) -> (i32, i32, i32, i32) {
    %c0_i32 = arith.constant 0 : i32
    %c0_i32_0 = arith.constant 0 : i32
    %c0_i32_1 = arith.constant 0 : i32
    %c0_i32_2 = arith.constant 0 : i32
    %c0_i32_3 = arith.constant 0 : i32
    return %c0_i32, %c0_i32_0, %c0_i32_1, %c0_i32_2 : i32, i32, i32, i32
  }
  func.func @transform_2(%arg0: i32) -> (i32, i32, i32, i32) {
    %c0_i32 = arith.constant 0 : i32
    %c0_i32_0 = arith.constant 0 : i32
    %c0_i32_1 = arith.constant 0 : i32
    %c0_i32_2 = arith.constant 0 : i32
    %c0_i32_3 = arith.constant 0 : i32
    return %c0_i32, %c0_i32_0, %c0_i32_1, %c0_i32_2 : i32, i32, i32, i32
  }
  func.func @transform_3(%arg0: i32) -> (i32, i32, i32, i32) {
    %c0_i32 = arith.constant 0 : i32
    %c0_i32_0 = arith.constant 0 : i32
    %c0_i32_1 = arith.constant 0 : i32
    %c0_i32_2 = arith.constant 0 : i32
    return %arg0, %c0_i32, %c0_i32_0, %c0_i32_1 : i32, i32, i32, i32
  }
  func.func @transform_4(%arg0: i32) -> (i32, i32, i32, i32) {
    %c0_i32 = arith.constant 0 : i32
    %c0_i32_0 = arith.constant 0 : i32
    %c0_i32_1 = arith.constant 0 : i32
    %c0_i32_2 = arith.constant 0 : i32
    return %arg0, %c0_i32, %c0_i32_0, %c0_i32_1 : i32, i32, i32, i32
  }
}

</mosaic_0001>

<bundles_post_ra>
// kernel: basic_block_forward.7
= control target key start
LH: loop header
LB: loop body
LE: loop exit
PB: predicated region body
PF: predicated region fallthrough
CT: control target
= control target key end

     0   :  { %s738_s12 = smov 0   ;;  %s885_s0 = inlined_call_operand.vmem [shape: f32[2,16,16,128], index: 0, kind: input, shape index: {}]   ;;  %s886_s1 = inlined_call_operand.vmem [shape: f32[1,1,1,128], index: 1, kind: input, shape index: {}]   ;;  %s887_s2 = inlined_call_operand.vmem [shape: f32[1,1,1,128], index: 2, kind: input, shape index: {}]   ;;  %s888_s3 = inlined_call_operand.vmem [shape: bf16[2,16,16,128], index: 3, kind: output, shape index: {}]  }
   0x1 LB: > { %s528_s13 = sadd.s32 4294967295, %s716_s12   ;;  %p532_p0 = scmp.ge.s32.totalorder %s716_s12, 1  ;;  %s716_s12 = sphi %s738_s12, %s13_s12  }
   0x2   : > { %p137_p1 = scmp.lt.s32.totalorder %s716_s12, 3 }
   0x4   : > { %p138_p2 = pnand %p532_p0, %p137_p1 }
   0x5   : > { %p161_p3 = scmp.lt.s32.totalorder (!%p138_p2), %s528_s13, 1  ;;  %v752_v0 = vld [vmem:[%s886_s1] ss:$0 sm:$0xff] (!%p138_p2) }
   0x6   : > { %141 = sbr.rel (%p138_p2) target bundleno = 51 (0x33), region = 32  ;;  %v762_v1 = vld [vmem:[%s887_s2] ss:$0 sm:$0xff] (!%p138_p2) }
   0xd   : > { %s890_s13 = smov (!%p161_p3, %s528_s13), 1 }
   0xe   : > { %s573_s14 = sshll.u32 %s890_s13, 8  ;;  %s574_s22 = sshll.u32 %s890_s13, 7 }
   0xf   : > { %s757_s19 = scalar_lea.vmem %s885_s0, %s573_s14  ;;  %s794_s25 = scalar_lea.vmem %s888_s3, %s574_s22 }
  0x10   : > { %v171_v2 = vld [vmem:[%s757_s19] sm:$0xff]  ;;  %v172_v3 = vld [vmem:[%s757_s19 + $0x8] sm:$0xff]  ;;  %v173_v4 = vld [vmem:[%s757_s19 + $0x10] sm:$0xff] }
  0x11   : > { %v210_v5 = vmul.f32 %v752_v0, %v171_v2  ;;  %v211_v6 = vmul.f32 %v752_v0, %v172_v3  ;;  %v174_v7 = vld [vmem:[%s757_s19 + $0x18] sm:$0xff]  ;;  %v212_v8 = vmul.f32 %v752_v0, %v173_v4  ;;  %v175_v9 = vld [vmem:[%s757_s19 + $0x20] sm:$0xff]  ;;  %v176_v10 = vld [vmem:[%s757_s19 + $0x28] sm:$0xff] }
  0x12   : > { %v213_v11 = vmul.f32 %v752_v0, %v174_v7  ;;  %v214_v12 = vmul.f32 %v752_v0, %v175_v9  ;;  %v215_v13 = vmul.f32 %v752_v0, %v176_v10  ;;  %v177_v14 = vld [vmem:[%s757_s19 + $0x30] sm:$0xff]  ;;  %v178_v15 = vld [vmem:[%s757_s19 + $0x38] sm:$0xff]  ;;  %v179_v24 = vld [vmem:[%s757_s19 + $0x40] sm:$0xff] }
  0x13   : > { %v249_v16 = vadd.f32 %v762_v1, %v210_v5  ;;  %v250_v17 = vadd.f32 %v762_v1, %v211_v6  ;;  %v251_v18 = vadd.f32 %v762_v1, %v212_v8  ;;  %v216_v19 = vmul.f32 %v752_v0, %v177_v14  ;;  %v180_v25 = vld [vmem:[%s757_s19 + $0x48] sm:$0xff]  ;;  %v181_v30 = vld [vmem:[%s757_s19 + $0x50] sm:$0xff]  ;;  %v182_v35 = vld [vmem:[%s757_s19 + $0x58] sm:$0xff] }
  0x14   : > { %v252_v20 = vadd.f32 %v762_v1, %v213_v11  ;;  %v253_v21 = vadd.f32 %v762_v1, %v214_v12  ;;  %v254_v22 = vadd.f32 %v762_v1, %v215_v13  ;;  %v217_v23 = vmul.f32 %v752_v0, %v178_v15  ;;  %v183_v36 = vld [vmem:[%s757_s19 + $0x60] sm:$0xff]  ;;  %v184_v41 = vld [vmem:[%s757_s19 + $0x68] sm:$0xff]  ;;  %v185_v42 = vld [vmem:[%s757_s19 + $0x70] sm:$0xff] }
  0x15   : > { %v281_v26 = vmax.f32 %v249_v16, 0.0  ;;  %v282_v27 = vmax.f32 %v250_v17, 0.0  ;;  %v283_v28 = vmax.f32 %v251_v18, 0.0  ;;  %v255_v29 = vadd.f32 %v762_v1, %v216_v19  ;;  %v186_v51 = vld [vmem:[%s757_s19 + $0x78] sm:$0xff]  ;;  %v187_v56 = vld [vmem:[%s757_s19 + $0x80] sm:$0xff]  ;;  %v188_v61 = vld [vmem:[%s757_s19 + $0x88] sm:$0xff] }
  0x16   : > { %v284_v31 = vmax.f32 %v252_v20, 0.0  ;;  %v285_v32 = vmax.f32 %v253_v21, 0.0  ;;  %v286_v33 = vmax.f32 %v254_v22, 0.0  ;;  %v256_v34 = vadd.f32 %v762_v1, %v217_v23  ;;  %v189_v4 = vld [vmem:[%s757_s19 + $0x90] sm:$0xff]  ;;  %v190_v5 = vld [vmem:[%s757_s19 + $0x98] sm:$0xff]  ;;  %v191_v10 = vld [vmem:[%s757_s19 + $0xa0] sm:$0xff] }
  0x17   : > { %v610_v37 = vpack.c.bf16 %v282_v27, %v281_v26  ;;  %v287_v38 = vmax.f32 %v255_v29, 0.0  ;;  %v218_v39 = vmul.f32 %v752_v0, %v179_v24  ;;  %v219_v40 = vmul.f32 %v752_v0, %v180_v25  ;;  %v192_v15 = vld [vmem:[%s757_s19 + $0xa8] sm:$0xff]  ;;  %v193_v20 = vld [vmem:[%s757_s19 + $0xb0] sm:$0xff]  ;;  %v194_v25 = vld [vmem:[%s757_s19 + $0xb8] sm:$0xff] }
  0x18   : > { %v615_v43 = vpack.c.bf16 %v284_v31, %v283_v28  ;;  %v620_v44 = vpack.c.bf16 %v286_v33, %v285_v32  ;;  %v288_v45 = vmax.f32 %v256_v34, 0.0  ;;  %v220_v46 = vmul.f32 %v752_v0, %v181_v30  ;;  %v195_v30 = vld [vmem:[%s757_s19 + $0xc0] sm:$0xff] }
  0x19   : > { %611 = vst [vmem:[%s794_s25] sm:$0xff] %v610_v37   ;;  %v257_v47 = vadd.f32 %v762_v1, %v218_v39  ;;  %v258_v48 = vadd.f32 %v762_v1, %v219_v40  ;;  %v221_v49 = vmul.f32 %v752_v0, %v182_v35  ;;  %v222_v50 = vmul.f32 %v752_v0, %v183_v36  ;;  %v196_v35 = vld [vmem:[%s757_s19 + $0xc8] sm:$0xff]  ;;  %v197_v40 = vld [vmem:[%s757_s19 + $0xd0] sm:$0xff] }
  0x1a   : > { %687 = vst [vmem:[%s794_s25 + $0x8] sm:$0xff] %v615_v43   ;;  %688 = vst [vmem:[%s794_s25 + $0x10] sm:$0xff] %v620_v44   ;;  %v625_v52 = vpack.c.bf16 %v288_v45, %v287_v38  ;;  %v259_v53 = vadd.f32 %v762_v1, %v220_v46  ;;  %v223_v54 = vmul.f32 %v752_v0, %v184_v41  ;;  %v198_v41 = vld [vmem:[%s757_s19 + $0xd8] sm:$0xff]  ;;  %v199_v46 = vld [vmem:[%s757_s19 + $0xe0] sm:$0xff] }
  0x1b   : > { %v224_v55 = vmul.f32 %v752_v0, %v185_v42  ;;  %v289_v57 = vmax.f32 %v257_v47, 0.0  ;;  %v290_v58 = vmax.f32 %v258_v48, 0.0  ;;  %v260_v59 = vadd.f32 %v762_v1, %v221_v49 }
  0x1c   : > { %v261_v60 = vadd.f32 %v762_v1, %v222_v50  ;;  %689 = vst [vmem:[%s794_s25 + $0x18] sm:$0xff] %v625_v52   ;;  %v291_v62 = vmax.f32 %v259_v53, 0.0  ;;  %v262_v63 = vadd.f32 %v762_v1, %v223_v54  ;;  %v225_v2 = vmul.f32 %v752_v0, %v186_v51  ;;  %v200_v51 = vld [vmem:[%s757_s19 + $0xe8] sm:$0xff] }
  0x1d   : > { %v263_v3 = vadd.f32 %v762_v1, %v224_v55  ;;  %v630_v6 = vpack.c.bf16 %v290_v58, %v289_v57  ;;  %v292_v7 = vmax.f32 %v260_v59, 0.0  ;;  %v226_v9 = vmul.f32 %v752_v0, %v187_v56  ;;  %v201_v56 = vld [vmem:[%s757_s19 + $0xf0] sm:$0xff] }
  0x1e   : > { %v293_v8 = vmax.f32 %v261_v60, 0.0  ;;  %v294_v11 = vmax.f32 %v262_v63, 0.0  ;;  %v264_v12 = vadd.f32 %v762_v1, %v225_v2  ;;  %v227_v14 = vmul.f32 %v752_v0, %v188_v61  ;;  %v202_v61 = vld [vmem:[%s757_s19 + $0xf8] sm:$0xff] }
  0x1f   : > { %v295_v13 = vmax.f32 %v263_v3, 0.0  ;;  %690 = vst [vmem:[%s794_s25 + $0x20] sm:$0xff] %v630_v6   ;;  %v635_v16 = vpack.c.bf16 %v292_v7, %v291_v62  ;;  %v265_v17 = vadd.f32 %v762_v1, %v226_v9  ;;  %v228_v18 = vmul.f32 %v752_v0, %v189_v4 }
  0x20   : > { %v229_v19 = vmul.f32 %v752_v0, %v190_v5  ;;  %v640_v21 = vpack.c.bf16 %v294_v11, %v293_v8  ;;  %v296_v22 = vmax.f32 %v264_v12, 0.0  ;;  %v266_v23 = vadd.f32 %v762_v1, %v227_v14 }
  0x21   : > { %v230_v24 = vmul.f32 %v752_v0, %v191_v10  ;;  %691 = vst [vmem:[%s794_s25 + $0x28] sm:$0xff] %v635_v16   ;;  %v297_v26 = vmax.f32 %v265_v17, 0.0  ;;  %v267_v27 = vadd.f32 %v762_v1, %v228_v18  ;;  %v231_v29 = vmul.f32 %v752_v0, %v192_v15 }
  0x22   : > { %v268_v28 = vadd.f32 %v762_v1, %v229_v19  ;;  %692 = vst [vmem:[%s794_s25 + $0x30] sm:$0xff] %v640_v21   ;;  %v645_v31 = vpack.c.bf16 %v296_v22, %v295_v13  ;;  %v298_v32 = vmax.f32 %v266_v23, 0.0  ;;  %v232_v34 = vmul.f32 %v752_v0, %v193_v20 }
  0x23   : > { %v269_v33 = vadd.f32 %v762_v1, %v230_v24  ;;  %v299_v36 = vmax.f32 %v267_v27, 0.0  ;;  %v270_v38 = vadd.f32 %v762_v1, %v231_v29  ;;  %v233_v39 = vmul.f32 %v752_v0, %v194_v25 }
  0x24   : > { %v300_v37 = vmax.f32 %v268_v28, 0.0  ;;  %693 = vst [vmem:[%s794_s25 + $0x38] sm:$0xff] %v645_v31   ;;  %v650_v42 = vpack.c.bf16 %v298_v32, %v297_v26  ;;  %v271_v44 = vadd.f32 %v762_v1, %v232_v34  ;;  %v234_v45 = vmul.f32 %v752_v0, %v195_v30 }
  0x25   : > { %v301_v43 = vmax.f32 %v269_v33, 0.0  ;;  %v302_v48 = vmax.f32 %v270_v38, 0.0  ;;  %v272_v49 = vadd.f32 %v762_v1, %v233_v39  ;;  %v235_v50 = vmul.f32 %v752_v0, %v196_v35 }
  0x26   : > { %v655_v47 = vpack.c.bf16 %v300_v37, %v299_v36  ;;  %694 = vst [vmem:[%s794_s25 + $0x40] sm:$0xff] %v650_v42   ;;  %v303_v52 = vmax.f32 %v271_v44, 0.0  ;;  %v273_v53 = vadd.f32 %v762_v1, %v234_v45  ;;  %v236_v54 = vmul.f32 %v752_v0, %v197_v40 }
  0x27   : > { %v237_v55 = vmul.f32 %v752_v0, %v198_v41  ;;  %v660_v57 = vpack.c.bf16 %v302_v48, %v301_v43  ;;  %v304_v58 = vmax.f32 %v272_v49, 0.0  ;;  %v274_v59 = vadd.f32 %v762_v1, %v235_v50 }
  0x28   : > { %695 = vst [vmem:[%s794_s25 + $0x48] sm:$0xff] %v655_v47   ;;  %v238_v60 = vmul.f32 %v752_v0, %v199_v46  ;;  %v305_v62 = vmax.f32 %v273_v53, 0.0  ;;  %v275_v63 = vadd.f32 %v762_v1, %v236_v54  ;;  %v239_v3 = vmul.f32 %v752_v0, %v200_v51 }
  0x29   : > { %v276_v2 = vadd.f32 %v762_v1, %v237_v55  ;;  %696 = vst [vmem:[%s794_s25 + $0x50] sm:$0xff] %v660_v57   ;;  %v665_v4 = vpack.c.bf16 %v304_v58, %v303_v52  ;;  %v306_v5 = vmax.f32 %v274_v59, 0.0  ;;  %v240_v7 = vmul.f32 %v752_v0, %v201_v56 }
  0x2a   : > { %v277_v6 = vadd.f32 %v762_v1, %v238_v60  ;;  %v307_v8 = vmax.f32 %v275_v63, 0.0  ;;  %v278_v10 = vadd.f32 %v762_v1, %v239_v3  ;;  %v241_v11 = vmul.f32 %v752_v0, %v202_v61 }
  0x2b   : > { %v308_v9 = vmax.f32 %v276_v2, 0.0  ;;  %697 = vst [vmem:[%s794_s25 + $0x58] sm:$0xff] %v665_v4   ;;  %v670_v12 = vpack.c.bf16 %v306_v5, %v305_v62  ;;  %v279_v14 = vadd.f32 %v762_v1, %v240_v7 }
  0x2c   : > { %v309_v13 = vmax.f32 %v277_v6, 0.0  ;;  %v310_v16 = vmax.f32 %v278_v10, 0.0  ;;  %v280_v17 = vadd.f32 %v762_v1, %v241_v11 }
  0x2d   : > { %v675_v15 = vpack.c.bf16 %v308_v9, %v307_v8  ;;  %698 = vst [vmem:[%s794_s25 + $0x60] sm:$0xff] %v670_v12   ;;  %v311_v18 = vmax.f32 %v279_v14, 0.0 }
  0x2e   : > { %v680_v19 = vpack.c.bf16 %v310_v16, %v309_v13  ;;  %v312_v20 = vmax.f32 %v280_v17, 0.0 }
  0x2f   : > { %699 = vst [vmem:[%s794_s25 + $0x68] sm:$0xff] %v675_v15  }
  0x30   : > { %700 = vst [vmem:[%s794_s25 + $0x70] sm:$0xff] %v680_v19   ;;  %v685_v21 = vpack.c.bf16 %v312_v20, %v311_v18 }
  0x32   : > { %701 = vst [vmem:[%s794_s25 + $0x78] sm:$0xff] %v685_v21  }
  0x33 PF: > { %s13_s12 = sadd.s32 1, %s716_s12  }
  0x34   : > { %p10_p4 = scmp.ge.s32.totalorder %s13_s12, 4  }
  0x36   :  { %12 = sbr.rel (!%p10_p4) target bundleno = 1 (0x1), region = 62 }

// kernel: basic_block_forward.11
= control target key start
LH: loop header
LB: loop body
LE: loop exit
PB: predicated region body
PF: predicated region fallthrough
CT: control target
= control target key end

     0   :  { %s582_s15 = smov 0   ;;  %s783_s0 = inlined_call_operand.vmem [shape: f32[2,16,16,128], index: 0, kind: input, shape index: {}]   ;;  %s784_s1 = inlined_call_operand.vmem [shape: f32[1,1,1,128], index: 1, kind: input, shape index: {}]   ;;  %s785_s2 = inlined_call_operand.vmem [shape: f32[1,1,1,128], index: 2, kind: input, shape index: {}]   ;;  %s786_s3 = inlined_call_operand.vmem [shape: f32[2,16,16,128], index: 3, kind: input, shape index: {}]   ;;  %s787_s4 = inlined_call_operand.vmem [shape: f32[2,16,16,128], index: 4, kind: output, shape index: {}]  }
   0x1 LB: > { %s523_s16 = sadd.s32 4294967295, %s555_s15   ;;  %p527_p0 = scmp.ge.s32.totalorder %s555_s15, 1  ;;  %s555_s15 = sphi %s582_s15, %s14_s15  }
   0x2   : > { %p172_p1 = scmp.lt.s32.totalorder %s555_s15, 3 }
   0x4   : > { %p173_p2 = pnand %p527_p0, %p172_p1 }
   0x5   : > { %p203_p3 = scmp.lt.s32.totalorder (!%p173_p2), %s523_s16, 1  ;;  %v595_v0 = vld [vmem:[%s784_s1] ss:$0 sm:$0xff] (!%p173_p2) }
   0x6   : > { %176 = sbr.rel (%p173_p2) target bundleno = 55 (0x37), region = 36  ;;  %v613_v2 = vld [vmem:[%s785_s2] ss:$0 sm:$0xff] (!%p173_p2) }
   0xd   : > { %s789_s16 = smov (!%p203_p3, %s523_s16), 1 }
   0xe   : > { %s590_s17 = sshll.u32 %s789_s16, 8 }
   0xf   : > { %s601_s22 = scalar_lea.vmem %s783_s0, %s590_s17  ;;  %s607_s25 = scalar_lea.vmem %s786_s3, %s590_s17 }
  0x10   : > { %v218_v1 = vld [vmem:[%s601_s22] sm:$0xff]  ;;  %v219_v3 = vld [vmem:[%s601_s22 + $0x8] sm:$0xff]  ;;  %v220_v7 = vld [vmem:[%s601_s22 + $0x10] sm:$0xff]  ;;  %s643_s30 = scalar_lea.vmem %s787_s4, %s590_s17 }
  0x11   : > { %v257_v4 = vmul.f32 %v595_v0, %v218_v1  ;;  %v328_v5 = vld [vmem:[%s607_s25] sm:$0xff]  ;;  %v258_v6 = vmul.f32 %v595_v0, %v219_v3  ;;  %v329_v8 = vld [vmem:[%s607_s25 + $0x8] sm:$0xff]  ;;  %v259_v9 = vmul.f32 %v595_v0, %v220_v7  ;;  %v221_v10 = vld [vmem:[%s601_s22 + $0x18] sm:$0xff] }
  0x12   : > { %v222_v11 = vld [vmem:[%s601_s22 + $0x20] sm:$0xff]  ;;  %v330_v14 = vld [vmem:[%s607_s25 + $0x10] sm:$0xff]  ;;  %v260_v15 = vmul.f32 %v595_v0, %v221_v10  ;;  %v331_v16 = vld [vmem:[%s607_s25 + $0x18] sm:$0xff] }
  0x13   : > { %v296_v12 = vadd.f32 %v613_v2, %v257_v4  ;;  %v297_v13 = vadd.f32 %v613_v2, %v258_v6  ;;  %v261_v17 = vmul.f32 %v595_v0, %v222_v11  ;;  %v223_v18 = vld [vmem:[%s601_s22 + $0x28] sm:$0xff]  ;;  %v298_v19 = vadd.f32 %v613_v2, %v259_v9  ;;  %v332_v20 = vld [vmem:[%s607_s25 + $0x20] sm:$0xff]  ;;  %v224_v22 = vld [vmem:[%s601_s22 + $0x30] sm:$0xff] }
  0x14   : > { %v262_v21 = vmul.f32 %v595_v0, %v223_v18  ;;  %v225_v23 = vld [vmem:[%s601_s22 + $0x38] sm:$0xff]  ;;  %v299_v26 = vadd.f32 %v613_v2, %v260_v15  ;;  %v333_v28 = vld [vmem:[%s607_s25 + $0x28] sm:$0xff]  ;;  %v263_v31 = vmul.f32 %v595_v0, %v224_v22  ;;  %v226_v33 = vld [vmem:[%s601_s22 + $0x40] sm:$0xff] }
  0x15   : > { %v360_v24 = vadd.f32 %v328_v5, %v296_v12  ;;  %v361_v25 = vadd.f32 %v329_v8, %v297_v13  ;;  %v300_v27 = vadd.f32 %v613_v2, %v261_v17  ;;  %v362_v29 = vadd.f32 %v330_v14, %v298_v19  ;;  %v227_v34 = vld [vmem:[%s601_s22 + $0x48] sm:$0xff]  ;;  %v334_v39 = vld [vmem:[%s607_s25 + $0x30] sm:$0xff]  ;;  %v335_v40 = vld [vmem:[%s607_s25 + $0x38] sm:$0xff] }
  0x16   : > { %v301_v30 = vadd.f32 %v613_v2, %v262_v21  ;;  %v264_v32 = vmul.f32 %v595_v0, %v225_v23  ;;  %v363_v37 = vadd.f32 %v331_v16, %v299_v26  ;;  %v228_v41 = vld [vmem:[%s601_s22 + $0x50] sm:$0xff]  ;;  %v302_v44 = vadd.f32 %v613_v2, %v263_v31  ;;  %v229_v46 = vld [vmem:[%s601_s22 + $0x58] sm:$0xff]  ;;  %v230_v47 = vld [vmem:[%s601_s22 + $0x60] sm:$0xff] }
  0x17   : > { %v392_v35 = vmax.f32 %v360_v24, 0.0  ;;  %v393_v36 = vmax.f32 %v361_v25, 0.0  ;;  %v364_v38 = vadd.f32 %v332_v20, %v300_v27  ;;  %v394_v42 = vmax.f32 %v362_v29, 0.0  ;;  %v231_v52 = vld [vmem:[%s601_s22 + $0x68] sm:$0xff]  ;;  %v336_v56 = vld [vmem:[%s607_s25 + $0x40] sm:$0xff]  ;;  %v338_v61 = vld [vmem:[%s607_s25 + $0x50] sm:$0xff] }
  0x18   : > { %v365_v43 = vadd.f32 %v333_v28, %v301_v30  ;;  %v303_v45 = vadd.f32 %v613_v2, %v264_v32  ;;  %v395_v48 = vmax.f32 %v363_v37, 0.0  ;;  %v265_v50 = vmul.f32 %v595_v0, %v226_v33  ;;  %v337_v57 = vld [vmem:[%s607_s25 + $0x48] sm:$0xff]  ;;  %v232_v1 = vld [vmem:[%s601_s22 + $0x70] sm:$0xff]  ;;  %v233_v3 = vld [vmem:[%s601_s22 + $0x78] sm:$0xff] }
  0x19   : > { %424 = vst [vmem:[%s643_s30] sm:$0xff] %v392_v35  ;;  %425 = vst [vmem:[%s643_s30 + $0x8] sm:$0xff] %v393_v36  ;;  %v396_v49 = vmax.f32 %v364_v38, 0.0  ;;  %v266_v51 = vmul.f32 %v595_v0, %v227_v34  ;;  %v366_v54 = vadd.f32 %v334_v39, %v302_v44  ;;  %v267_v58 = vmul.f32 %v595_v0, %v228_v41  ;;  %v339_v7 = vld [vmem:[%s607_s25 + $0x58] sm:$0xff]  ;;  %v340_v8 = vld [vmem:[%s607_s25 + $0x60] sm:$0xff] }
  0x1a   : > { %426 = vst [vmem:[%s643_s30 + $0x10] sm:$0xff] %v394_v42  ;;  %v397_v53 = vmax.f32 %v365_v43, 0.0  ;;  %v367_v55 = vadd.f32 %v335_v40, %v303_v45  ;;  %427 = vst [vmem:[%s643_s30 + $0x18] sm:$0xff] %v395_v48  ;;  %v304_v59 = vadd.f32 %v613_v2, %v265_v50  ;;  %v268_v62 = vmul.f32 %v595_v0, %v229_v46  ;;  %v341_v14 = vld [vmem:[%s607_s25 + $0x68] sm:$0xff]  ;;  %v234_v19 = vld [vmem:[%s601_s22 + $0x80] sm:$0xff] }
  0x1b   : > { %428 = vst [vmem:[%s643_s30 + $0x20] sm:$0xff] %v396_v49  ;;  %v305_v60 = vadd.f32 %v613_v2, %v266_v51  ;;  %v269_v63 = vmul.f32 %v595_v0, %v230_v47  ;;  %v398_v4 = vmax.f32 %v366_v54, 0.0  ;;  %v306_v6 = vadd.f32 %v613_v2, %v267_v58  ;;  %v235_v20 = vld [vmem:[%s601_s22 + $0x88] sm:$0xff]  ;;  %v342_v25 = vld [vmem:[%s607_s25 + $0x70] sm:$0xff]  ;;  %v343_v26 = vld [vmem:[%s607_s25 + $0x78] sm:$0xff] }
  0x1c   : > { %429 = vst [vmem:[%s643_s30 + $0x28] sm:$0xff] %v397_v53  ;;  %v399_v5 = vmax.f32 %v367_v55, 0.0  ;;  %v270_v9 = vmul.f32 %v595_v0, %v231_v52  ;;  %v368_v10 = vadd.f32 %v336_v56, %v304_v59  ;;  %v307_v12 = vadd.f32 %v613_v2, %v268_v62  ;;  %v236_v27 = vld [vmem:[%s601_s22 + $0x90] sm:$0xff]  ;;  %v237_v32 = vld [vmem:[%s601_s22 + $0x98] sm:$0xff]  ;;  %v238_v33 = vld [vmem:[%s601_s22 + $0xa0] sm:$0xff] }
  0x1d   : > { %v369_v11 = vadd.f32 %v337_v57, %v305_v60  ;;  %v308_v13 = vadd.f32 %v613_v2, %v269_v63  ;;  %430 = vst [vmem:[%s643_s30 + $0x30] sm:$0xff] %v398_v4  ;;  %v370_v15 = vadd.f32 %v338_v61, %v306_v6  ;;  %v271_v17 = vmul.f32 %v595_v0, %v232_v1  ;;  %v239_v38 = vld [vmem:[%s601_s22 + $0xa8] sm:$0xff]  ;;  %v344_v42 = vld [vmem:[%s607_s25 + $0x80] sm:$0xff]  ;;  %v346_v47 = vld [vmem:[%s607_s25 + $0x90] sm:$0xff] }
  0x1e   : > { %431 = vst [vmem:[%s643_s30 + $0x38] sm:$0xff] %v399_v5  ;;  %v309_v16 = vadd.f32 %v613_v2, %v270_v9  ;;  %v272_v18 = vmul.f32 %v595_v0, %v233_v3  ;;  %v400_v21 = vmax.f32 %v368_v10, 0.0  ;;  %v371_v23 = vadd.f32 %v339_v7, %v307_v12  ;;  %v345_v43 = vld [vmem:[%s607_s25 + $0x88] sm:$0xff]  ;;  %v240_v50 = vld [vmem:[%s601_s22 + $0xb0] sm:$0xff]  ;;  %v241_v51 = vld [vmem:[%s601_s22 + $0xb8] sm:$0xff] }
  0x1f   : > { %v401_v22 = vmax.f32 %v369_v11, 0.0  ;;  %v372_v24 = vadd.f32 %v340_v8, %v308_v13  ;;  %v402_v28 = vmax.f32 %v370_v15, 0.0  ;;  %v310_v30 = vadd.f32 %v613_v2, %v271_v17  ;;  %v347_v55 = vld [vmem:[%s607_s25 + $0x98] sm:$0xff]  ;;  %v348_v56 = vld [vmem:[%s607_s25 + $0xa0] sm:$0xff]  ;;  %v349_v62 = vld [vmem:[%s607_s25 + $0xa8] sm:$0xff] }
  0x20   : > { %v373_v29 = vadd.f32 %v341_v14, %v309_v16  ;;  %v311_v31 = vadd.f32 %v613_v2, %v272_v18  ;;  %432 = vst [vmem:[%s643_s30 + $0x40] sm:$0xff] %v400_v21  ;;  %v403_v34 = vmax.f32 %v371_v23, 0.0  ;;  %v273_v36 = vmul.f32 %v595_v0, %v234_v19  ;;  %v242_v5 = vld [vmem:[%s601_s22 + $0xc0] sm:$0xff]  ;;  %v243_v6 = vld [vmem:[%s601_s22 + $0xc8] sm:$0xff]  ;;  %v350_v11 = vld [vmem:[%s607_s25 + $0xb0] sm:$0xff] }
  0x21   : > { %433 = vst [vmem:[%s643_s30 + $0x48] sm:$0xff] %v401_v22  ;;  %v404_v35 = vmax.f32 %v372_v24, 0.0  ;;  %v274_v37 = vmul.f32 %v595_v0, %v235_v20  ;;  %434 = vst [vmem:[%s643_s30 + $0x50] sm:$0xff] %v402_v28  ;;  %v374_v40 = vadd.f32 %v342_v25, %v310_v30  ;;  %v275_v44 = vmul.f32 %v595_v0, %v236_v27  ;;  %v351_v12 = vld [vmem:[%s607_s25 + $0xb8] sm:$0xff]  ;;  %v244_v13 = vld [vmem:[%s601_s22 + $0xd0] sm:$0xff] }
  0x22   : > { %v405_v39 = vmax.f32 %v373_v29, 0.0  ;;  %v375_v41 = vadd.f32 %v343_v26, %v311_v31  ;;  %435 = vst [vmem:[%s643_s30 + $0x58] sm:$0xff] %v403_v34  ;;  %v312_v45 = vadd.f32 %v613_v2, %v273_v36  ;;  %v276_v48 = vmul.f32 %v595_v0, %v237_v32  ;;  %v245_v18 = vld [vmem:[%s601_s22 + $0xd8] sm:$0xff]  ;;  %v246_v19 = vld [vmem:[%s601_s22 + $0xe0] sm:$0xff]  ;;  %v247_v24 = vld [vmem:[%s601_s22 + $0xe8] sm:$0xff] }
  0x23   : > { %436 = vst [vmem:[%s643_s30 + $0x60] sm:$0xff] %v404_v35  ;;  %v313_v46 = vadd.f32 %v613_v2, %v274_v37  ;;  %v277_v49 = vmul.f32 %v595_v0, %v238_v33  ;;  %v406_v52 = vmax.f32 %v374_v40, 0.0  ;;  %v314_v54 = vadd.f32 %v613_v2, %v275_v44  ;;  %v352_v28 = vld [vmem:[%s607_s25 + $0xc0] sm:$0xff]  ;;  %v353_v29 = vld [vmem:[%s607_s25 + $0xc8] sm:$0xff]  ;;  %v354_v33 = vld [vmem:[%s607_s25 + $0xd0] sm:$0xff] }
  0x24   : > { %437 = vst [vmem:[%s643_s30 + $0x68] sm:$0xff] %v405_v39  ;;  %v407_v53 = vmax.f32 %v375_v41, 0.0  ;;  %v278_v57 = vmul.f32 %v595_v0, %v239_v38  ;;  %v376_v58 = vadd.f32 %v344_v42, %v312_v45  ;;  %v315_v60 = vadd.f32 %v613_v2, %v276_v48  ;;  %v248_v36 = vld [vmem:[%s601_s22 + $0xf0] sm:$0xff]  ;;  %v249_v37 = vld [vmem:[%s601_s22 + $0xf8] sm:$0xff]  ;;  %v356_v42 = vld [vmem:[%s607_s25 + $0xe0] sm:$0xff] }
  0x25   : > { %v377_v59 = vadd.f32 %v345_v43, %v313_v46  ;;  %v316_v61 = vadd.f32 %v613_v2, %v277_v49  ;;  %438 = vst [vmem:[%s643_s30 + $0x70] sm:$0xff] %v406_v52  ;;  %v378_v63 = vadd.f32 %v346_v47, %v314_v54  ;;  %v279_v3 = vmul.f32 %v595_v0, %v240_v50  ;;  %v355_v41 = vld [vmem:[%s607_s25 + $0xd8] sm:$0xff]  ;;  %v357_v48 = vld [vmem:[%s607_s25 + $0xe8] sm:$0xff] }
  0x26   : > { %439 = vst [vmem:[%s643_s30 + $0x78] sm:$0xff] %v407_v53  ;;  %v317_v1 = vadd.f32 %v613_v2, %v278_v57  ;;  %v280_v4 = vmul.f32 %v595_v0, %v241_v51  ;;  %v408_v7 = vmax.f32 %v376_v58, 0.0  ;;  %v379_v9 = vadd.f32 %v347_v55, %v315_v60  ;;  %v358_v57 = vld [vmem:[%s607_s25 + $0xf0] sm:$0xff]  ;;  %v359_v58 = vld [vmem:[%s607_s25 + $0xf8] sm:$0xff] }
  0x27   : > { %v409_v8 = vmax.f32 %v377_v59, 0.0  ;;  %v380_v10 = vadd.f32 %v348_v56, %v316_v61  ;;  %v410_v14 = vmax.f32 %v378_v63, 0.0  ;;  %v318_v16 = vadd.f32 %v613_v2, %v279_v3 }
  0x28   : > { %v381_v15 = vadd.f32 %v349_v62, %v317_v1  ;;  %v319_v17 = vadd.f32 %v613_v2, %v280_v4  ;;  %440 = vst [vmem:[%s643_s30 + $0x80] sm:$0xff] %v408_v7  ;;  %v411_v20 = vmax.f32 %v379_v9, 0.0  ;;  %v281_v22 = vmul.f32 %v595_v0, %v242_v5 }
  0x29   : > { %441 = vst [vmem:[%s643_s30 + $0x88] sm:$0xff] %v409_v8  ;;  %v412_v21 = vmax.f32 %v380_v10, 0.0  ;;  %v282_v23 = vmul.f32 %v595_v0, %v243_v6  ;;  %442 = vst [vmem:[%s643_s30 + $0x90] sm:$0xff] %v410_v14  ;;  %v382_v26 = vadd.f32 %v350_v11, %v318_v16  ;;  %v283_v30 = vmul.f32 %v595_v0, %v244_v13 }
  0x2a   : > { %v413_v25 = vmax.f32 %v381_v15, 0.0  ;;  %v383_v27 = vadd.f32 %v351_v12, %v319_v17  ;;  %443 = vst [vmem:[%s643_s30 + $0x98] sm:$0xff] %v411_v20  ;;  %v320_v31 = vadd.f32 %v613_v2, %v281_v22  ;;  %v284_v34 = vmul.f32 %v595_v0, %v245_v18 }
  0x2b   : > { %444 = vst [vmem:[%s643_s30 + $0xa0] sm:$0xff] %v412_v21  ;;  %v321_v32 = vadd.f32 %v613_v2, %v282_v23  ;;  %v285_v35 = vmul.f32 %v595_v0, %v246_v19  ;;  %v414_v38 = vmax.f32 %v382_v26, 0.0  ;;  %v322_v40 = vadd.f32 %v613_v2, %v283_v30 }
  0x2c   : > { %445 = vst [vmem:[%s643_s30 + $0xa8] sm:$0xff] %v413_v25  ;;  %v415_v39 = vmax.f32 %v383_v27, 0.0  ;;  %v286_v43 = vmul.f32 %v595_v0, %v247_v24  ;;  %v384_v44 = vadd.f32 %v352_v28, %v320_v31  ;;  %v323_v46 = vadd.f32 %v613_v2, %v284_v34 }
  0x2d   : > { %v385_v45 = vadd.f32 %v353_v29, %v321_v32  ;;  %v324_v47 = vadd.f32 %v613_v2, %v285_v35  ;;  %446 = vst [vmem:[%s643_s30 + $0xb0] sm:$0xff] %v414_v38  ;;  %v386_v49 = vadd.f32 %v354_v33, %v322_v40  ;;  %v287_v51 = vmul.f32 %v595_v0, %v248_v36 }
  0x2e   : > { %447 = vst [vmem:[%s643_s30 + $0xb8] sm:$0xff] %v415_v39  ;;  %v325_v50 = vadd.f32 %v613_v2, %v286_v43  ;;  %v288_v52 = vmul.f32 %v595_v0, %v249_v37  ;;  %v416_v53 = vmax.f32 %v384_v44, 0.0  ;;  %v387_v55 = vadd.f32 %v355_v41, %v323_v46 }
  0x2f   : > { %v417_v54 = vmax.f32 %v385_v45, 0.0  ;;  %v388_v56 = vadd.f32 %v356_v42, %v324_v47  ;;  %v418_v59 = vmax.f32 %v386_v49, 0.0  ;;  %v326_v61 = vadd.f32 %v613_v2, %v287_v51 }
  0x30   : > { %v389_v60 = vadd.f32 %v357_v48, %v325_v50  ;;  %v327_v62 = vadd.f32 %v613_v2, %v288_v52  ;;  %448 = vst [vmem:[%s643_s30 + $0xc0] sm:$0xff] %v416_v53  ;;  %v419_v0 = vmax.f32 %v387_v55, 0.0 }
  0x31   : > { %449 = vst [vmem:[%s643_s30 + $0xc8] sm:$0xff] %v417_v54  ;;  %v420_v63 = vmax.f32 %v388_v56, 0.0  ;;  %450 = vst [vmem:[%s643_s30 + $0xd0] sm:$0xff] %v418_v59  ;;  %v390_v3 = vadd.f32 %v358_v57, %v326_v61 }
  0x32   : > { %v421_v1 = vmax.f32 %v389_v60, 0.0  ;;  %v391_v4 = vadd.f32 %v359_v58, %v327_v62  ;;  %451 = vst [vmem:[%s643_s30 + $0xd8] sm:$0xff] %v419_v0 }
  0x33   : > { %452 = vst [vmem:[%s643_s30 + $0xe0] sm:$0xff] %v420_v63  ;;  %v422_v5 = vmax.f32 %v390_v3, 0.0 }
  0x34   : > { %453 = vst [vmem:[%s643_s30 + $0xe8] sm:$0xff] %v421_v1  ;;  %v423_v6 = vmax.f32 %v391_v4, 0.0 }
  0x35   : > { %454 = vst [vmem:[%s643_s30 + $0xf0] sm:$0xff] %v422_v5 }
  0x36   : > { %455 = vst [vmem:[%s643_s30 + $0xf8] sm:$0xff] %v423_v6 }
  0x37 PF: > { %s14_s15 = sadd.s32 1, %s555_s15  }
  0x38   : > { %p11_p4 = scmp.ge.s32.totalorder %s14_s15, 4  }
  0x3a   :  { %13 = sbr.rel (!%p11_p4) target bundleno = 1 (0x1), region = 69 }

// kernel: basic_block_forward.6
= control target key start
LH: loop header
LB: loop body
LE: loop exit
PB: predicated region body
PF: predicated region fallthrough
CT: control target
= control target key end

     0   :  { %s7771_s15 = smov 0   ;;  %s8924_s0 = inlined_call_operand.vmem [shape: bf16[2,18,18,128], index: 0, kind: input, shape index: {}]   ;;  %s8925_s1 = inlined_call_operand.vmem [shape: bf16[9,128,128], index: 1, kind: input, shape index: {}]   ;;  %s8926_s2 = inlined_call_operand.vmem [shape: f32[2,16,16,128], index: 2, kind: output, shape index: {0}]   ;;  %s8927_s3 = inlined_call_operand.vmem [shape: f32[2,1,128], index: 3, kind: output, shape index: {1}]   ;;  %s8928_s4 = inlined_call_operand.vmem [shape: f32[2,1,128], index: 4, kind: output, shape index: {2}]  }
   0x1 LB: > { %s6022_s16 = sadd.s32 4294967295, %s7744_s15   ;;  %p6026_p0 = scmp.ge.s32.totalorder %s7744_s15, 1  ;;  %s7744_s15 = sphi %s7771_s15, %s15_s15  }
   0x2   : > { %p167_p1 = scmp.lt.s32.totalorder %s7744_s15, 3 }
   0x4   : > { %p168_p2 = pnand %p6026_p0, %p167_p1 }
   0x5   : > { %v7610_v0 = vld [vmem:[%s8925_s1] sm:$0xff] (!%p168_p2)   ;;  %v7612_v2 = vld [vmem:[%s8925_s1 + $0x8] sm:$0xff] (!%p168_p2)   ;;  %p199_p3 = scmp.lt.s32.totalorder (!%p168_p2), %s6022_s16, 1  ;;  %v7614_v4 = vld [vmem:[%s8925_s1 + $0x10] sm:$0xff] (!%p168_p2)   ;;  %vm649_vm0 = vsmask.f32 (!%p168_p2), 3328 }
   0x6   : > { %171 = sbr.rel (%p168_p2) target bundleno = 571 (0x23b), region = 28  ;;  %v7611_v1 = vld [vmem:[%s8925_s1 + $0x100] sm:$0xff] (!%p168_p2)   ;;  %6897 = vmatprep.subr.bf16.mxu1 (!%p168_p2), %v7610_v0  ;;  %v7613_v3 = vld [vmem:[%s8925_s1 + $0x108] sm:$0xff] (!%p168_p2)   ;;  %v7615_v5 = vld [vmem:[%s8925_s1 + $0x110] sm:$0xff] (!%p168_p2)   ;;  %vm650_vm1 = vsmask.f32 (!%p168_p2), 7440 }
   0x7   : > { %7089 = vmatprep.subr.bf16.mxu0 (!%p168_p2), %v7611_v1  ;;  %6898 = vmatpush3.bf16.msra.mxu1 (!%p168_p2), %v7610_v0  ;;  %v7616_v6 = vld [vmem:[%s8925_s1 + $0x18] sm:$0xff] (!%p168_p2)   ;;  %v7618_v8 = vld [vmem:[%s8925_s1 + $0x20] sm:$0xff] (!%p168_p2)   ;;  %v7620_v10 = vld [vmem:[%s8925_s1 + $0x28] sm:$0xff] (!%p168_p2)   ;;  %vm1518_vm3 = vcmask (!%p168_p2), 1042432   ;;  %vm1519_vm4 = vcmask (!%p168_p2), 1046532  }
   0x8   : > { %7090 = vmatpush3.bf16.msra.mxu0 (!%p168_p2), %v7611_v1  ;;  %6899 = vmatprep.subr.bf16.mxu1 (!%p168_p2), %v7612_v2  ;;  %v7617_v7 = vld [vmem:[%s8925_s1 + $0x118] sm:$0xff] (!%p168_p2)   ;;  %v7619_v9 = vld [vmem:[%s8925_s1 + $0x120] sm:$0xff] (!%p168_p2)   ;;  %v7621_v11 = vld [vmem:[%s8925_s1 + $0x128] sm:$0xff] (!%p168_p2)  }
   0x9   : > { %7091 = vmatprep.subr.bf16.mxu0 (!%p168_p2), %v7613_v3  ;;  %v7622_v18 = vld [vmem:[%s8925_s1 + $0x30] sm:$0xff] (!%p168_p2)   ;;  %v7624_v32 = vld [vmem:[%s8925_s1 + $0x38] sm:$0xff] (!%p168_p2)   ;;  %vm7841_vm2 = vmor (!%p168_p2), %vm649_vm0, %vm650_vm1 }
   0xa   : > { %v7623_v24 = vld [vmem:[%s8925_s1 + $0x130] sm:$0xff] (!%p168_p2)   ;;  %v7625_v38 = vld [vmem:[%s8925_s1 + $0x138] sm:$0xff] (!%p168_p2)   ;;  %v7628_v47 = vld [vmem:[%s8925_s1 + $0x40] sm:$0xff] (!%p168_p2)  }
   0xb   : > { %6900 = vmatpush3.bf16.msra.mxu1 (!%p168_p2), %v7612_v2  ;;  %v7629_v52 = vld [vmem:[%s8925_s1 + $0x140] sm:$0xff] (!%p168_p2)   ;;  %vm7941_vm5 = vmor (!%p168_p2), %vm1518_vm3, %vm1519_vm4 }
   0xc   : > { %7092 = vmatpush3.bf16.msra.mxu0 (!%p168_p2), %v7613_v3  ;;  %6901 = vmatprep.subr.bf16.mxu1 (!%p168_p2), %v7614_v4 }
   0xd   : > { %s8934_s16 = smov (!%p199_p3, %s6022_s16), 1  ;;  %7093 = vmatprep.subr.bf16.mxu0 %v7615_v5 }
   0xe   : > { %s7601_s7 = smul.u32 216, %s8934_s16  ;;  %s211_s24 = scalar_lea.vmem %s8927_s3, %s8934_s16 }
   0xf   : > { %6902 = vmatpush3.bf16.msra.mxu1 %v7614_v4  ;;  %s214_s27 = scalar_lea.vmem %s8928_s4, %s8934_s16 }
  0x10   : > { %7094 = vmatpush3.bf16.msra.mxu0 %v7615_v5  ;;  %6903 = vmatprep.subr.bf16.mxu1 %v7616_v6  ;;  %s7818_s18 = scalar_lea.vmem %s8924_s0, %s7601_s7 }
  0x11   : > { %7095 = vmatprep.subr.bf16.mxu0 %v7617_v7  ;;  %v7626_v12 = vld [vmem:[%s7818_s18] sm:$0xff]   ;;  %v6222_v13 = vld [vmem:[%s7818_s18 + $0xc] sm:$0xf]  ;;  %v6223_v14 = vld [vmem:[%s7818_s18 + $0x10] sm:$0xf] }
  0x12   : > { %6913 = vmatprep.mubr.bf16.mxu1 %v7626_v12  ;;  %v6224_v15 = vld [vmem:[%s7818_s18 + $0x14] sm:$0x1]  ;;  %v2519_v16 = vshrl.u32 %v6222_v13, 16  ;;  %v2522_v17 = vshll.u32 %v6222_v13, 16  ;;  %v2528_v19 = vshll.u32 %v6223_v14, 16  ;;  %v2532_v20 = vshrl.u32 %v6223_v14, 16 }
  0x13   : > { %6904 = vmatpush3.bf16.msra.mxu1 %v7616_v6  ;;  %v2538_v21 = vshll.u32 %v6224_v15, 16  ;;  %v6225_v29 = vld [vmem:[%s7818_s18 + $0x18] sm:$0xf]  ;;  %v6226_v30 = vld [vmem:[%s7818_s18 + $0x1c] sm:$0xf]  ;;  %v7627_v55 = vld [vmem:[%s7818_s18 + $0xc] sm:$0xff]  }
  0x14   : > { %7096 = vmatpush3.bf16.msra.mxu0 %v7617_v7  ;;  %6905 = vmatprep.subr.bf16.mxu1 %v7618_v8  ;;  %v2521_v22 = vrot.slane %v2519_v16, 4  ;;  %v2524_v23 = vrot.slane %v2522_v17, 5  ;;  %v2530_v25 = vrot.slane %v2528_v19, 5  ;;  %v2534_v26 = vrot.slane %v2532_v20, 4  ;;  %v6227_v31 = vld [vmem:[%s7818_s18 + $0x20] sm:$0x1] }
  0x15   : > { %7097 = vmatprep.subr.bf16.mxu0 %v7619_v9  ;;  %v2540_v27 = vrot.slane %v2538_v21, 5  ;;  %v2543_v35 = vshrl.u32 %v6225_v29, 16  ;;  %v2546_v36 = vshll.u32 %v6225_v29, 16  ;;  %v2552_v37 = vshll.u32 %v6226_v30, 16  ;;  %v6228_v53 = vld [vmem:[%s7818_s18 + $0x24] sm:$0xf] }
  0x16   : > { %v2525_v28 = vor.u32 %v2524_v23, %v2521_v22  ;;  %v2535_v34 = vor.u32 %v2534_v26, %v2530_v25  ;;  %v2556_v40 = vshrl.u32 %v6226_v30, 16  ;;  %v2562_v41 = vshll.u32 %v6227_v31, 16  ;;  %v6229_v57 = vld [vmem:[%s7818_s18 + $0x28] sm:$0xf]  ;;  %v6230_v58 = vld [vmem:[%s7818_s18 + $0x2c] sm:$0x1] }
  0x17   : > { %6906 = vmatpush3.bf16.msra.mxu1 %v7618_v8  ;;  %v2545_v43 = vrot.slane %v2543_v35, 4  ;;  %v2548_v44 = vrot.slane %v2546_v36, 5  ;;  %v2554_v45 = vrot.slane %v2552_v37, 5  ;;  %v2567_v59 = vshrl.u32 %v6228_v53, 16  ;;  %v7631_v2 = vld [vmem:[%s7818_s18 + $0x18] sm:$0xff]   ;;  %v7630_v6 = vld [vmem:[%s8925_s1 + $0x148] sm:$0xff]  }
  0x18   : > { %7098 = vmatpush3.bf16.msra.mxu0 %v7619_v9  ;;  %6907 = vmatprep.subr.bf16.mxu1 %v7620_v10  ;;  %v2526_v39 = vrot.slane %v2525_v28, 4  ;;  %v2536_v42 = vrot.slane %v2535_v34, 4  ;;  %v2558_v48 = vrot.slane %v2556_v40, 4  ;;  %v2564_v51 = vrot.slane %v2562_v41, 5  ;;  %v6231_v13 = vld [vmem:[%s7818_s18 + $0x30] sm:$0xf] }
  0x19   : > { %7099 = vmatprep.subr.bf16.mxu0 %v7621_v11  ;;  %v2549_v50 = vor.u32 %v2548_v44, %v2545_v43  ;;  %v2570_v60 = vshll.u32 %v6228_v53, 16  ;;  %v2576_v62 = vshll.u32 %v6229_v57, 16  ;;  %v2580_v63 = vshrl.u32 %v6229_v57, 16  ;;  %v6232_v14 = vld [vmem:[%s7818_s18 + $0x34] sm:$0xf]  ;;  %v7632_v28 = vld [vmem:[%s7818_s18 + $0x24] sm:$0xff]  }
  0x1a   : > { %v2531_v46 = vsel %vm7841_vm2, %v2526_v39, %v2530_v25  ;;  %v2541_v49 = vsel %vm7841_vm2, %v2536_v42, %v2540_v27  ;;  %v2559_v56 = vor.u32 %v2558_v48, %v2554_v45  ;;  %v2586_v0 = vshll.u32 %v6230_v58, 16  ;;  %v6233_v17 = vld [vmem:[%s7818_s18 + $0x38] sm:$0x1]  ;;  %v7634_v31 = vld [vmem:[%s8925_s1 + $0x150] sm:$0xff]   ;;  %v6234_v39 = vld [vmem:[%s7818_s18 + $0x3c] sm:$0xf] }
  0x1b   : > { %6908 = vmatpush3.bf16.msra.mxu1 %v7620_v10  ;;  %v6286_v54 = vcombine.low %v2531_v46, %v2541_v49  ;;  %v2550_v61 = vrot.slane %v2549_v50, 4  ;;  %v2569_v3 = vrot.slane %v2567_v59, 4  ;;  %v2572_v4 = vrot.slane %v2570_v60, 5  ;;  %v7633_v10 = vld [vmem:[%s8925_s1 + $0x48] sm:$0xff]   ;;  %v7636_v36 = vld [vmem:[%s7818_s18 + $0x30] sm:$0xff]  }
  0x1c   : > { %7100 = vmatpush3.bf16.msra.mxu0 %v7621_v11  ;;  %6909 = vmatprep.subr.bf16.mxu1 %v7622_v18  ;;  %v2560_v1 = vrot.slane %v2559_v56, 4  ;;  %v2578_v7 = vrot.slane %v2576_v62, 5  ;;  %v2582_v8 = vrot.slane %v2580_v63, 4  ;;  %v2588_v9 = vrot.slane %v2586_v0, 5  ;;  %v6235_v40 = vld [vmem:[%s7818_s18 + $0x40] sm:$0xf] }
  0x1d   : > { %7101 = vmatprep.subr.bf16.mxu0 %v7623_v24  ;;  %7105 = vmatprep.mubr.bf16.mxu0 %v6286_v54  ;;  %v2555_v5 = vsel %vm7841_vm2, %v2550_v61, %v2554_v45  ;;  %v2573_v12 = vor.u32 %v2572_v4, %v2569_v3  ;;  %v2594_v19 = vshll.u32 %v6231_v13, 16  ;;  %v2600_v21 = vshll.u32 %v6232_v14, 16  ;;  %v6236_v41 = vld [vmem:[%s7818_s18 + $0x44] sm:$0x1]  ;;  %v7638_v54 = vld [vmem:[%s8925_s1 + $0x50] sm:$0xff]  }
  0x1e   : > { %v2565_v11 = vsel %vm7841_vm2, %v2560_v1, %v2564_v51  ;;  %v2583_v16 = vor.u32 %v2582_v8, %v2578_v7  ;;  %v2604_v22 = vshrl.u32 %v6232_v14, 16  ;;  %v2610_v23 = vshll.u32 %v6233_v17, 16  ;;  %v6237_v58 = vld [vmem:[%s7818_s18 + $0x48] sm:$0xf]  ;;  %v6238_v61 = vld [vmem:[%s7818_s18 + $0x4c] sm:$0xf] }
  0x1f   : > { %6910 = vmatpush3.bf16.msra.mxu1 %v7622_v18  ;;  %v6287_v15 = vcombine.low %v2555_v5, %v2565_v11  ;;  %v2591_v18 = vshrl.u32 %v6231_v13, 16  ;;  %v2574_v20 = vrot.slane %v2573_v12, 4  ;;  %v2596_v26 = vrot.slane %v2594_v19, 5  ;;  %v6239_v62 = vld [vmem:[%s7818_s18 + $0x50] sm:$0x1]  ;;  %v7639_v8 = vld [vmem:[%s8925_s1 + $0x160] sm:$0xff]  }
  0x20   : > { %7102 = vmatpush3.bf16.msra.mxu0 %v7623_v24  ;;  %6911 = vmatprep.subr.bf16.mxu1 %v7624_v32  ;;  %v2584_v24 = vrot.slane %v2583_v16, 4  ;;  %v2602_v29 = vrot.slane %v2600_v21, 5  ;;  %v2606_v30 = vrot.slane %v2604_v22, 4  ;;  %v2612_v35 = vrot.slane %v2610_v23, 5  ;;  %v6240_v19 = vld [vmem:[%s7818_s18 + $0x54] sm:$0xf] }
  0x21   : > { %7103 = vmatprep.subr.bf16.mxu0 %v7625_v38  ;;  %v2593_v25 = vrot.slane %v2591_v18, 4  ;;  %v2579_v27 = vsel %vm7841_vm2, %v2574_v20, %v2578_v7  ;;  %v2615_v43 = vshrl.u32 %v6234_v39, 16  ;;  %v2618_v44 = vshll.u32 %v6234_v39, 16  ;;  %v7641_v18 = vld [vmem:[%s7818_s18 + $0x48] sm:$0xff]   ;;  %v6241_v20 = vld [vmem:[%s7818_s18 + $0x58] sm:$0xf] }
  0x22   : > { %v2624_v45 = vshll.u32 %v6235_v40, 16  ;;  %v2628_v48 = vshrl.u32 %v6235_v40, 16  ;;  %v2634_v49 = vshll.u32 %v6236_v41, 16  ;;  %v2639_v63 = vshrl.u32 %v6237_v58, 16  ;;  %v7640_v23 = vld [vmem:[%s8925_s1 + $0x168] sm:$0xff]   ;;  %v7642_v39 = vld [vmem:[%s7818_s18 + $0x54] sm:$0xff]  }
  0x23   : > { %6912 = vmatpush3.bf16.msra.mxu1 %v7624_v32  ;;  %v2589_v32 = vsel %vm7841_vm2, %v2584_v24, %v2588_v9  ;;  %v2597_v34 = vor.u32 %v2596_v26, %v2593_v25  ;;  %v2617_v51 = vrot.slane %v2615_v43, 4  ;;  %v2642_v0 = vshll.u32 %v6237_v58, 16  ;;  %v6242_v24 = vld [vmem:[%s7818_s18 + $0x5c] sm:$0x1]  ;;  %v6243_v43 = vld [vmem:[%s7818_s18 + $0x60] sm:$0xf] }
  0x24   : > { %7104 = vmatpush3.bf16.msra.mxu0 %v7625_v38  ;;  %6945 = vmatprep.subr.bf16.mxu1 %v7628_v47  ;;  %v6288_v37 = vcombine.low %v2579_v27, %v2589_v32  ;;  %v2607_v38 = vor.u32 %v2606_v30, %v2602_v29  ;;  %v2626_v53 = vrot.slane %v2624_v45, 5  ;;  %v2630_v56 = vrot.slane %v2628_v48, 4  ;;  %v7643_v40 = vld [vmem:[%s8925_s1 + $0x58] sm:$0xff]   ;;  %v6245_v45 = vld [vmem:[%s7818_s18 + $0x68] sm:$0x1] }
  0x25   : > { %7137 = vmatprep.subr.bf16.mxu0 %v7629_v52  ;;  %v2598_v42 = vrot.slane %v2597_v34, 4  ;;  %v2636_v57 = vrot.slane %v2634_v49, 5  ;;  %v2652_v3 = vshrl.u32 %v6238_v61, 16  ;;  %v2658_v4 = vshll.u32 %v6239_v62, 16 }
  0x26   : > { %6914 = vmatmul.mubr.bf16.vlgmr.msra.gmra.mrb[0].mxu1 %v7627_v55  ;;  %v2608_v46 = vrot.slane %v2607_v38, 4  ;;  %v2631_v1 = vor.u32 %v2630_v56, %v2626_v53  ;;  %v2644_v7 = vrot.slane %v2642_v0, 5  ;;  %v2663_v25 = vshrl.u32 %v6240_v19, 16  ;;  %v6310_v0 = vld [vmem:[%s7818_s18 + $0xc] sm:$0xe] }
  0x27   : > { %7106 = vmatmul.mubr.bf16.vlgmr.msra.gmra.mrb[0].mxu0 %v6287_v15  ;;  %6946 = vmatpush3.bf16.msra.mxu1 %v7628_v47  ;;  %v7635_v47 = vld [vmem:[%s8925_s1 + $0x158] sm:$0xff]   ;;  %v2603_v50 = vsel %vm7841_vm2, %v2598_v42, %v2602_v29  ;;  %v2654_v12 = vrot.slane %v2652_v3, 4  ;;  %v2660_v17 = vrot.slane %v2658_v4, 5  ;;  %v2666_v26 = vshll.u32 %v6240_v19, 16 }
  0x28   : > { %7138 = vmatpush3.bf16.msra.mxu0 %v7629_v52  ;;  %6917 = vmatprep.mubr.bf16.mxu1 %v7631_v2  ;;  %v2620_v52 = vrot.slane %v2618_v44, 5  ;;  %v2613_v55 = vsel %vm7841_vm2, %v2608_v46, %v2612_v35  ;;  %v2648_v2 = vshll.u32 %v6238_v61, 16  ;;  %v2632_v9 = vrot.slane %v2631_v1, 4  ;;  %v6244_v44 = vld [vmem:[%s7818_s18 + $0x64] sm:$0xf] }
  0x29   : > { %7139 = vmatprep.subr.bf16.mxu0 %v7630_v6  ;;  %6947 = vmatprep.subr.bf16.mxu1 %v7633_v10  ;;  %v6289_v59 = vcombine.low %v2603_v50, %v2613_v55  ;;  %v2676_v29 = vshrl.u32 %v6241_v20, 16  ;;  %v2682_v30 = vshll.u32 %v6242_v24, 16  ;;  %v2665_v32 = vrot.slane %v2663_v25, 4  ;;  %v7644_v50 = vld [vmem:[%s8925_s1 + $0x170] sm:$0xff]  }
  0x2a   : > { %7109 = vmatprep.mubr.bf16.mxu0 %v6288_v37  ;;  %v2621_v60 = vor.u32 %v2620_v52, %v2617_v51  ;;  %v2650_v11 = vrot.slane %v2648_v2, 5  ;;  %v2637_v15 = vsel %vm7841_vm2, %v2632_v9, %v2636_v57  ;;  %v2668_v34 = vrot.slane %v2666_v26, 5 }
  0x2b   : > { %6948 = vmatpush3.bf16.msra.mxu1 %v7633_v10  ;;  %v7637_v10 = vld [vmem:[%s7818_s18 + $0x3c] sm:$0xff]   ;;  %v2678_v37 = vrot.slane %v2676_v29, 4  ;;  %v2684_v38 = vrot.slane %v2682_v30, 5  ;;  %v2690_v48 = vshll.u32 %v6243_v43, 16  ;;  %v2696_v49 = vshll.u32 %v6244_v44, 16 }
  0x2c   : > { %7140 = vmatpush3.bf16.msra.mxu0 %v7630_v6  ;;  %6949 = vmatprep.subr.bf16.mxu1 %v7638_v54  ;;  %v2622_v5 = vrot.slane %v2621_v60, 4  ;;  %v2641_v6 = vrot.slane %v2639_v63, 4  ;;  %v2655_v16 = vor.u32 %v2654_v12, %v2650_v11  ;;  %v2669_v42 = vor.u32 %v2668_v34, %v2665_v32  ;;  %v7645_v60 = vld [vmem:[%s8925_s1 + $0x178] sm:$0xff]   ;;  %v7646_v63 = vld [vmem:[%s7818_s18 + $0x60] sm:$0xff]   ;;  %v6318_v32 = vld [vmem:[%s7818_s18 + $0x2c] sm:$0x1] }
  0x2d   : > { %7141 = vmatprep.subr.bf16.mxu0 %v7634_v31  ;;  %v2700_v52 = vshrl.u32 %v6244_v44, 16  ;;  %v2692_v56 = vrot.slane %v2690_v48, 5  ;;  %v2698_v57 = vrot.slane %v2696_v49, 5  ;;  %v6316_v29 = vld [vmem:[%s7818_s18 + $0x24] sm:$0xe]  ;;  %v7653_v48 = vld [vmem:[%s8925_s1 + $0x188] sm:$0xff]  }
  0x2e   : > { %6918 = vmatmul.mubr.bf16.gmra.mrb[4].mxu1 %v7632_v28  ;;  %v2627_v13 = vsel %vm7841_vm2, %v2622_v5, %v2626_v53  ;;  %v2645_v14 = vor.u32 %v2644_v7, %v2641_v6  ;;  %v2656_v27 = vrot.slane %v2655_v16, 4  ;;  %v2672_v28 = vshll.u32 %v6241_v20, 16  ;;  %v6311_v5 = vld [vmem:[%s7818_s18 + $0x10] sm:$0xf]  ;;  %v6312_v6 = vld [vmem:[%s7818_s18 + $0x14] sm:$0x1] }
  0x2f   : > { %6921 = vmatprep.mubr.bf16.mxu1 %v7636_v36  ;;  %6950 = vmatpush3.bf16.msra.mxu1 %v7638_v54  ;;  %v6290_v21 = vcombine.low %v2627_v13, %v2637_v15  ;;  %v2670_v51 = vrot.slane %v2669_v42, 4  ;;  %v2706_v53 = vshll.u32 %v6245_v45, 16  ;;  %v6358_v7 = vrot.slane %v6310_v0, 9  ;;  %v7649_v13 = vld [vmem:[%s8925_s1 + $0x180] sm:$0xff]   ;;  %v6314_v20 = vld [vmem:[%s7818_s18 + $0x1c] sm:$0xf] }
  0x30   : > { %7142 = vmatpush3.bf16.msra.mxu0 %v7634_v31  ;;  %v2646_v22 = vrot.slane %v2645_v14, 4  ;;  %v2661_v35 = vsel %vm7841_vm2, %v2656_v27, %v2660_v17  ;;  %v2674_v36 = vrot.slane %v2672_v28, 5  ;;  %6951 = vmatprep.subr.bf16.mxu1 %v7643_v40  ;;  %v3386_v9 = vrot.slane %v6311_v5, 5  ;;  %v7647_v17 = vld [vmem:[%s7818_s18 + $0x6c] sm:$0xff]   ;;  %v7651_v42 = vld [vmem:[%s7818_s18 + $0x84] sm:$0xff]  }
  0x31   : > { %7110 = vmatmul.mubr.bf16.gmra.mrb[4].mxu0 %v6289_v59  ;;  %7143 = vmatprep.subr.bf16.mxu0 %v7635_v47  ;;  %v2702_v59 = vrot.slane %v2700_v52, 4  ;;  %v2708_v3 = vrot.slane %v2706_v53, 5  ;;  %v3393_v26 = vrot.slane %v6314_v20, 5  ;;  %v6360_v34 = vrot.slane %v6316_v29, 9  ;;  %v6320_v44 = vld [vmem:[%s7818_s18 + $0x34] sm:$0xf] }
  0x32   : > { %7113 = vmatprep.mubr.bf16.mxu0 %v6290_v21  ;;  %v2651_v31 = vsel %vm7841_vm2, %v2646_v22, %v2650_v11  ;;  %v2679_v46 = vor.u32 %v2678_v37, %v2674_v36  ;;  %v2675_v58 = vsel %vm7841_vm2, %v2670_v51, %v2674_v36  ;;  %v7648_v11 = vld [vmem:[%s8925_s1 + $0x60] sm:$0xff]   ;;  %v3387_v15 = vsel %vm7941_vm5, %v6358_v7, %v3386_v9  ;;  %v6325_v0 = vld [vmem:[%s7818_s18 + $0x48] sm:$0xe]  ;;  %v6326_v5 = vld [vmem:[%s7818_s18 + $0x4c] sm:$0xf] }
  0x33   : > { %v6291_v41 = vcombine.low %v2651_v31, %v2661_v35  ;;  %6952 = vmatpush3.bf16.msra.mxu1 %v7643_v40  ;;  %v2703_v2 = vor.u32 %v2702_v59, %v2698_v57  ;;  %v3388_v16 = vrot.slane %v3386_v9, 4  ;;  %v6315_v21 = vld [vmem:[%s7818_s18 + $0x20] sm:$0x1]  ;;  %v3395_v30 = vrot.slane %v3393_v26, 4  ;;  %v6317_v31 = vld [vmem:[%s7818_s18 + $0x28] sm:$0xf] }
  0x34   : > { %7144 = vmatpush3.bf16.msra.mxu0 %v7635_v47  ;;  %v2687_v47 = vshrl.u32 %v6243_v43, 16  ;;  %v2680_v54 = vrot.slane %v2679_v46, 4  ;;  %6953 = vmatprep.subr.bf16.mxu1 %v7648_v11  ;;  %v3396_v27 = vrot.slane %v6315_v21, 5  ;;  %v3400_v36 = vrot.slane %v6317_v31, 5  ;;  %v6319_v43 = vld [vmem:[%s7818_s18 + $0x30] sm:$0xe] }
  0x35   : > { %7145 = vmatprep.subr.bf16.mxu0 %v7639_v8  ;;  %v2704_v12 = vrot.slane %v2703_v2, 4  ;;  %v3403_v37 = vrot.slane %v6318_v32, 5  ;;  %v6321_v46 = vld [vmem:[%s7818_s18 + $0x38] sm:$0x1]  ;;  %v7656_v59 = vld [vmem:[%s8925_s1 + $0x70] sm:$0xff]   ;;  %v6363_v7 = vrot.slane %v6325_v0, 9 }
  0x36   : > { %6922 = vmatmul.mubr.bf16.gmra.mrb[8].mxu1 %v7637_v10  ;;  %v2689_v55 = vrot.slane %v2687_v47, 4  ;;  %v2685_v61 = vsel %vm7841_vm2, %v2680_v54, %v2684_v38  ;;  %v3389_v10 = vrot.slane %v6312_v6, 5  ;;  %v3397_v38 = vsel %vm7941_vm5, %v3395_v30, %v3396_v27  ;;  %v7654_v54 = vld [vmem:[%s7818_s18 + $0x90] sm:$0xff]   ;;  %v6331_v27 = vld [vmem:[%s7818_s18 + $0x60] sm:$0xe]  ;;  %v7661_v31 = vld [vmem:[%s8925_s1 + $0x198] sm:$0xff]  }
  0x37   : > { %6925 = vmatprep.mubr.bf16.mxu1 %v7641_v18  ;;  %v6292_v1 = vcombine.low %v2675_v58, %v2685_v61  ;;  %v6313_v18 = vld [vmem:[%s7818_s18 + $0x18] sm:$0xe]  ;;  %v2709_v19 = vsel %vm7841_vm2, %v2704_v12, %v2708_v3  ;;  %6954 = vmatpush3.bf16.msra.mxu1 %v7648_v11  ;;  %v3401_v40 = vsel %vm7941_vm5, %v6360_v34, %v3400_v36  ;;  %v3407_v47 = vrot.slane %v6320_v44, 5  ;;  %v7655_v3 = vld [vmem:[%s7818_s18 + $0x9c] sm:$0xff]   ;;  %v6327_v6 = vld [vmem:[%s7818_s18 + $0x50] sm:$0x1] }
  0x38   : > { %7146 = vmatpush3.bf16.msra.mxu0 %v7639_v8  ;;  %v2693_v62 = vor.u32 %v2692_v56, %v2689_v55  ;;  %v6359_v22 = vrot.slane %v6313_v18, 9  ;;  %v3390_v25 = vsel %vm7941_vm5, %v3388_v16, %v3389_v10  ;;  %v3410_v51 = vrot.slane %v6321_v46, 5  ;;  %v6322_v55 = vld [vmem:[%s7818_s18 + $0x3c] sm:$0xe]  ;;  %v6323_v56 = vld [vmem:[%s7818_s18 + $0x40] sm:$0xf] }
  0x39   : > { %7147 = vmatprep.subr.bf16.mxu0 %v7640_v23  ;;  %7114 = vmatmul.mubr.bf16.gmra.mrb[8].mxu0 %v6291_v41  ;;  %v6390_v28 = vcombine.low %v3387_v15, %v3390_v25  ;;  %v3402_v41 = vrot.slane %v3400_v36, 4  ;;  %v3409_v53 = vrot.slane %v3407_v47, 4  ;;  %v6362_v58 = vrot.slane %v6322_v55, 9  ;;  %v7657_v12 = vld [vmem:[%s8925_s1 + $0x190] sm:$0xff]   ;;  %v7658_v15 = vld [vmem:[%s7818_s18 + $0xa8] sm:$0xff]  }
  0x3a   : > { %v2694_v8 = vrot.slane %v2693_v62, 4  ;;  %7117 = vmatprep.mubr.bf16.mxu0 %v6292_v1  ;;  %v3394_v35 = vsel %vm7941_vm5, %v6359_v22, %v3393_v26  ;;  %v3424_v11 = vrot.slane %v6327_v6, 5  ;;  %v6328_v16 = vld [vmem:[%s7818_s18 + $0x54] sm:$0xe]  ;;  %v6330_v18 = vld [vmem:[%s7818_s18 + $0x5c] sm:$0x1] }
  0x3b   : > { %v6391_v45 = vcombine.low %v3394_v35, %v3397_v38  ;;  %v3404_v49 = vsel %vm7941_vm5, %v3402_v41, %v3403_v37  ;;  %v3431_v21 = vrot.slane %v6330_v18, 5  ;;  %v7660_v26 = vld [vmem:[%s8925_s1 + $0x78] sm:$0xff]   ;;  %v6333_v29 = vld [vmem:[%s7818_s18 + $0x68] sm:$0x1]  ;;  %v6365_v30 = vrot.slane %v6331_v27, 9 }
  0x3c   : > { %7148 = vmatpush3.bf16.msra.mxu0 %v7640_v23  ;;  %v2699_v14 = vsel %vm7841_vm2, %v2694_v8, %v2698_v57  ;;  %v7650_v23 = vld [vmem:[%s7818_s18 + $0x78] sm:$0xff]   ;;  %v6392_v52 = vcombine.low %v3401_v40, %v3404_v49  ;;  %v6324_v57 = vld [vmem:[%s7818_s18 + $0x44] sm:$0x1]  ;;  %v3421_v8 = vrot.slane %v6326_v5, 5  ;;  %v3438_v36 = vrot.slane %v6333_v29, 5 }
  0x3d   : > { %7149 = vmatprep.subr.bf16.mxu0 %v7644_v50  ;;  %v6293_v24 = vcombine.low %v2699_v14, %v2709_v19  ;;  %v3417_v61 = vrot.slane %v6324_v57, 5  ;;  %v6364_v19 = vrot.slane %v6328_v16, 9  ;;  %v7659_v34 = vld [vmem:[%s7818_s18 + $0xb4] sm:$0xff]   ;;  %v602_v40 = vld [vmem:[%s7818_s18 + $0x4] sm:$0xf] }
  0x3e   : > { %6926 = vmatmul.mubr.bf16.gmra.mrb[12].mxu1 %v7642_v39  ;;  %v7652_v39 = vld [vmem:[%s8925_s1 + $0x68] sm:$0xff]   ;;  %v3423_v14 = vrot.slane %v3421_v8, 4  ;;  %v3422_v22 = vsel %vm7941_vm5, %v6363_v7, %v3421_v8  ;;  %v666_v49 = vshrl.u32 %v602_v40, 16  ;;  %v605_v5 = vld [vmem:[%s7818_s18 + $0x10] sm:$0xf] }
  0x3f   : > { %6929 = vmatprep.mubr.bf16.mxu1 %v7646_v63  ;;  %6955 = vmatprep.subr.bf16.mxu1 %v7652_v39  ;;  %v3411_v63 = vsel %vm7941_vm5, %v3409_v53, %v3410_v51  ;;  %v603_v41 = vld [vmem:[%s7818_s18 + $0x8] sm:$0x1]  ;;  %v6334_v46 = vld [vmem:[%s7818_s18 + $0x6c] sm:$0xe]  ;;  %v6335_v51 = vld [vmem:[%s7818_s18 + $0x70] sm:$0xf] }
  0x40   : > { %7150 = vmatpush3.bf16.msra.mxu0 %v7644_v50  ;;  %v6361_v50 = vrot.slane %v6319_v43, 9  ;;  %6956 = vmatpush3.bf16.msra.mxu1 %v7652_v39  ;;  %v601_v39 = vld [vmem:[%s7818_s18] sm:$0xf]  ;;  %v3442_v57 = vrot.slane %v6335_v51, 5  ;;  %v606_v6 = vld [vmem:[%s7818_s18 + $0x14] sm:$0x1] }
  0x41   : > { %7151 = vmatprep.subr.bf16.mxu0 %v7645_v60  ;;  %7118 = vmatmul.mubr.bf16.gmra.mrb[12].mxu0 %v6293_v24  ;;  %v653_v44 = vshrl.u32 %v601_v39, 16  ;;  %v6339_v29 = vld [vmem:[%s7818_s18 + $0x80] sm:$0x1] }
  0x42   : > { %7153 = vmatprep.mubr.bf16.mxu0 %v6390_v28  ;;  %v3408_v62 = vsel %vm7941_vm5, %v6361_v50, %v3407_v47  ;;  %6957 = vmatprep.subr.bf16.mxu1 %v7656_v59  ;;  %v6332_v28 = vld [vmem:[%s7818_s18 + $0x64] sm:$0xf]  ;;  %v672_v50 = vshll.u32 %v603_v41, 16  ;;  %v608_v41 = vld [vmem:[%s7818_s18 + $0x1c] sm:$0xf] }
  0x43   : > { %v6393_v9 = vcombine.low %v3408_v62, %v3411_v63  ;;  %v3435_v35 = vrot.slane %v6332_v28, 5  ;;  %v8042_v47 = vld [vmem:[%s8925_s1 + $0x80] sm:$0xff]   ;;  %v604_v63 = vld [vmem:[%s7818_s18 + $0xc] sm:$0xf]  ;;  %v714_v51 = vshrl.u32 %v608_v41, 16 }
  0x44   : > { %7152 = vmatpush3.bf16.msra.mxu0 %v7645_v60  ;;  %v3414_v60 = vrot.slane %v6323_v56, 5  ;;  %6958 = vmatpush3.bf16.msra.mxu1 %v7656_v59  ;;  %v6336_v56 = vld [vmem:[%s7818_s18 + $0x74] sm:$0x1]  ;;  %v674_v62 = vrot.slane %v672_v50, 5  ;;  %v677_v8 = vshrl.u32 %v604_v63, 16 }
  0x45   : > { %7185 = vmatprep.subr.bf16.mxu0 %v7649_v13  ;;  %6959 = vmatprep.subr.bf16.mxu1 %v7660_v26  ;;  %v3437_v43 = vrot.slane %v3435_v35, 4 }
  0x46   : > { %6930 = vmatmul.mubr.bf16.gmra.mrb[16].mxu1 %v7647_v17  ;;  %v3415_v1 = vsel %vm7941_vm5, %v6362_v58, %v3414_v60  ;;  %v3416_v2 = vrot.slane %v3414_v60, 4  ;;  %v6329_v17 = vld [vmem:[%s7818_s18 + $0x58] sm:$0xf]  ;;  %v7663_v58 = vld [vmem:[%s8925_s1 + $0x1a0] sm:$0xff]   ;;  %v679_v18 = vrot.slane %v677_v8, 4 }
  0x47   : > { %6933 = vmatprep.mubr.bf16.mxu1 %v7650_v23  ;;  %v3428_v20 = vrot.slane %v6329_v17, 5  ;;  %v3425_v23 = vsel %vm7941_vm5, %v3423_v14, %v3424_v11  ;;  %v3439_v53 = vsel %vm7941_vm5, %v3437_v43, %v3438_v36  ;;  %v7665_v11 = vld [vmem:[%s8925_s1 + $0x1a8] sm:$0xff]   ;;  %v690_v14 = vshrl.u32 %v605_v5, 16  ;;  %v607_v36 = vld [vmem:[%s7818_s18 + $0x18] sm:$0xf] }
  0x48   : > { %v3418_v10 = vsel %vm7941_vm5, %v3416_v2, %v3417_v61  ;;  %v6395_v37 = vcombine.low %v3422_v22, %v3425_v23  ;;  %6960 = vmatpush3.bf16.msra.mxu1 %v7660_v26  ;;  %v668_v61 = vrot.slane %v666_v49, 4  ;;  %v3444_v2 = vrot.slane %v3442_v57, 4  ;;  %v6338_v26 = vld [vmem:[%s7818_s18 + $0x7c] sm:$0xf] }
  0x49   : > { %7154 = vmatmul.mubr.bf16.vlgmr.msra.gmra.mrb[0].mxu0 %v6391_v45  ;;  %v3429_v24 = vsel %vm7941_vm5, %v6364_v19, %v3428_v20  ;;  %v3430_v25 = vrot.slane %v3428_v20, 4  ;;  %v656_v45 = vshll.u32 %v601_v39, 16  ;;  %6993 = vmatprep.subr.bf16.mxu1 %v8042_v47  ;;  %v6337_v20 = vld [vmem:[%s7818_s18 + $0x78] sm:$0xe] }
  0x4a   : > { %7186 = vmatpush3.bf16.msra.mxu0 %v7649_v13  ;;  %7157 = vmatprep.mubr.bf16.mxu0 %v6392_v52  ;;  %v6394_v13 = vcombine.low %v3415_v1, %v3418_v10  ;;  %v6366_v52 = vrot.slane %v6334_v46, 9  ;;  %v686_v10 = vshll.u32 %v605_v5, 16  ;;  %v710_v46 = vshll.u32 %v608_v41, 16 }
  0x4b   : > { %7187 = vmatprep.subr.bf16.mxu0 %v7653_v48  ;;  %v3432_v32 = vsel %vm7941_vm5, %v3430_v25, %v3431_v21  ;;  %v658_v55 = vrot.slane %v656_v45, 5  ;;  %v7667_v21 = vld [vmem:[%s8925_s1 + $0x1b0] sm:$0xff]   ;;  %v704_v45 = vshll.u32 %v607_v36, 16 }
  0x4c   : > { %v6396_v38 = vcombine.low %v3429_v24, %v3432_v32  ;;  %v3443_v1 = vsel %vm7941_vm5, %v6366_v52, %v3442_v57  ;;  %v688_v23 = vrot.slane %v686_v10, 5  ;;  %v692_v24 = vrot.slane %v690_v14, 4 }
  0x4e   : > { %6934 = vmatmul.mubr.bf16.gmra.mrb[20].mxu1 %v7651_v42  ;;  %7188 = vmatpush3.bf16.msra.mxu0 %v7653_v48  ;;  %v8036_v42 = vsel %vm7941_vm5, %v6365_v30, %v3435_v35  ;;  %v662_v48 = vshll.u32 %v602_v40, 16  ;;  %v6367_v30 = vrot.slane %v6337_v20, 9  ;;  %v3452_v35 = vrot.slane %v6339_v29, 5 }
  0x4f   : > { %6937 = vmatprep.mubr.bf16.mxu1 %v7654_v54  ;;  %7189 = vmatprep.subr.bf16.mxu0 %v7657_v12  ;;  %v655_v54 = vrot.slane %v653_v44, 4  ;;  %v6397_v59 = vcombine.low %v8036_v42, %v3439_v53  ;;  %v609_v42 = vld [vmem:[%s7818_s18 + $0x20] sm:$0x1]  ;;  %v701_v44 = vshrl.u32 %v607_v36, 16  ;;  %v6341_v53 = vld [vmem:[%s7818_s18 + $0x88] sm:$0xf] }
  0x50   : > { %v664_v60 = vrot.slane %v662_v48, 5  ;;  %v6340_v48 = vld [vmem:[%s7818_s18 + $0x84] sm:$0xe]  ;;  %v720_v52 = vshll.u32 %v609_v42, 16 }
  0x51   : > { %7158 = vmatmul.mubr.bf16.gmra.mrb[4].mxu0 %v6393_v9  ;;  %v659_v0 = vor.u32 %v658_v55, %v655_v54  ;;  %v680_v9 = vshll.u32 %v604_v63, 16  ;;  %v6342_v54 = vld [vmem:[%s7818_s18 + $0x8c] sm:$0x1]  ;;  %v703_v57 = vrot.slane %v701_v44, 4  ;;  %v716_v63 = vrot.slane %v714_v51, 4 }
  0x52   : > { %7161 = vmatprep.mubr.bf16.mxu0 %v6394_v13  ;;  %7190 = vmatpush3.bf16.msra.mxu0 %v7657_v12  ;;  %v669_v7 = vor.u32 %v668_v61, %v664_v60  ;;  %v6368_v5 = vrot.slane %v6340_v48, 9  ;;  %v6347_v51 = vld [vmem:[%s7818_s18 + $0xa0] sm:$0xf] }
  0x53   : > { %7191 = vmatprep.subr.bf16.mxu0 %v7661_v31  ;;  %v660_v12 = vrot.slane %v659_v0, 4  ;;  %v682_v19 = vrot.slane %v680_v9, 5  ;;  %v722_v0 = vrot.slane %v720_v52, 5 }
  0x54   : > { %v670_v16 = vrot.slane %v669_v7, 4  ;;  %v3459_v7 = vrot.slane %v6342_v54, 5 }
  0x55   : > { %v665_v22 = vsel %vm7841_vm2, %v660_v12, %v664_v60  ;;  %v683_v28 = vor.u32 %v682_v19, %v679_v18  ;;  %v611_v60 = vld [vmem:[%s7818_s18 + $0x28] sm:$0xf]  ;;  %v7666_v12 = vld [vmem:[%s8925_s1 + $0x90] sm:$0xff]   ;;  %v8106_v18 = vld [vmem:[%s8925_s1 + $0x1c0] sm:$0xff]  }
  0x56   : > { %6938 = vmatmul.mubr.bf16.gmra.mrb[24].mxu1 %v7655_v3  ;;  %7192 = vmatpush3.bf16.msra.mxu0 %v7661_v31  ;;  %v3445_v3 = vrot.slane %v6336_v56, 5  ;;  %v675_v27 = vsel %vm7841_vm2, %v670_v16, %v674_v62  ;;  %v3449_v31 = vrot.slane %v6338_v26, 5  ;;  %v712_v62 = vrot.slane %v710_v46, 5 }
  0x57   : > { %6941 = vmatprep.mubr.bf16.mxu1 %v7658_v15  ;;  %7193 = vmatprep.subr.bf16.mxu0 %v7663_v58  ;;  %v696_v15 = vshll.u32 %v606_v6, 16  ;;  %v6070_v32 = vcombine.low %v665_v22, %v675_v27  ;;  %v3456_v6 = vrot.slane %v6341_v53, 5  ;;  %v738_v16 = vshrl.u32 %v611_v60, 16  ;;  %v6345_v27 = vld [vmem:[%s7818_s18 + $0x98] sm:$0x1] }
  0x58   : > { %v3446_v13 = vsel %vm7941_vm5, %v3444_v2, %v3445_v3  ;;  %v3450_v39 = vsel %vm7941_vm5, %v6367_v30, %v3449_v31  ;;  %v3451_v40 = vrot.slane %v3449_v31, 4  ;;  %v7664_v2 = vld [vmem:[%s8925_s1 + $0x88] sm:$0xff]   ;;  %v717_v8 = vor.u32 %v716_v63, %v712_v62 }
  0x59   : > { %7162 = vmatmul.mubr.bf16.gmra.mrb[8].mxu0 %v6395_v37  ;;  %v6398_v17 = vcombine.low %v3443_v1, %v3446_v13  ;;  %v698_v25 = vrot.slane %v696_v15, 5  ;;  %v7669_v37 = vld [vmem:[%s8925_s1 + $0x1b8] sm:$0xff]   ;;  %v612_v1 = vld [vmem:[%s7818_s18 + $0x2c] sm:$0x1]  ;;  %v3457_v14 = vsel %vm7941_vm5, %v6368_v5, %v3456_v6  ;;  %v3458_v15 = vrot.slane %v3456_v6, 4  ;;  %v7671_v5 = vld [vmem:[%s8925_s1 + $0xa0] sm:$0xff]  }
  0x5a   : > { %7165 = vmatprep.mubr.bf16.mxu0 %v6396_v38  ;;  %7194 = vmatpush3.bf16.msra.mxu0 %v7663_v58  ;;  %v684_v38 = vrot.slane %v683_v28, 4  ;;  %v3453_v50 = vsel %vm7941_vm5, %v3451_v40, %v3452_v35  ;;  %v706_v58 = vrot.slane %v704_v45, 5  ;;  %v718_v19 = vrot.slane %v717_v8, 4  ;;  %v615_v40 = vld [vmem:[%s7818_s18 + $0x38] sm:$0x1] }
  0x5b   : > { %7195 = vmatprep.subr.bf16.mxu0 %v7665_v11  ;;  %v6399_v56 = vcombine.low %v3450_v39, %v3453_v50  ;;  %v744_v26 = vshll.u32 %v612_v1, 16  ;;  %v614_v39 = vld [vmem:[%s7818_s18 + $0x34] sm:$0xf]  ;;  %v3466_v42 = vrot.slane %v6345_v27, 5  ;;  %v6346_v45 = vld [vmem:[%s7818_s18 + $0x9c] sm:$0xe] }
  0x5c   : > { %v689_v49 = vsel %vm7841_vm2, %v684_v38, %v688_v23  ;;  %v707_v3 = vor.u32 %v706_v58, %v703_v57  ;;  %v723_v28 = vsel %vm7841_vm2, %v718_v19, %v722_v0  ;;  %v758_v50 = vshll.u32 %v614_v39, 16 }
  0x5d   : > { %v3470_v8 = vrot.slane %v6347_v51, 5 }
  0x5e   : > { %6942 = vmatmul.mubr.bf16.gmra.mrb[28].mxu1 %v7659_v34  ;;  %v693_v34 = vor.u32 %v692_v24, %v688_v23  ;;  %7196 = vmatpush3.bf16.msra.mxu0 %v7665_v11  ;;  %v734_v11 = vshll.u32 %v611_v60, 16  ;;  %v708_v13 = vrot.slane %v707_v3, 4  ;;  %v3460_v24 = vsel %vm7941_vm5, %v3458_v15, %v3459_v7  ;;  %v618_v3 = vld [vmem:[%s7818_s18 + $0x44] sm:$0x1] }
  0x5f   : > { %7197 = vmatprep.subr.bf16.mxu0 %v7667_v21  ;;  %6961 = vmatprep.mubr.bf16.mxu1 %v6070_v32  ;;  %v6400_v29 = vcombine.low %v3457_v14, %v3460_v24  ;;  %v613_v32 = vld [vmem:[%s7818_s18 + $0x30] sm:$0xf]  ;;  %v768_v60 = vshll.u32 %v615_v40, 16  ;;  %v6370_v7 = vrot.slane %v6346_v45, 9  ;;  %v6349_v14 = vld [vmem:[%s7818_s18 + $0xa8] sm:$0xe] }
  0x60   : > { %v694_v43 = vrot.slane %v693_v34, 4  ;;  %v736_v22 = vrot.slane %v734_v11, 5  ;;  %v713_v23 = vsel %vm7841_vm2, %v708_v13, %v712_v62  ;;  %v7668_v34 = vld [vmem:[%s8925_s1 + $0x98] sm:$0xff]   ;;  %v752_v44 = vshll.u32 %v613_v32, 16  ;;  %v617_v62 = vld [vmem:[%s7818_s18 + $0x40] sm:$0xf] }
  0x61   : > { %7166 = vmatmul.mubr.bf16.gmra.mrb[12].mxu0 %v6397_v59  ;;  %v610_v59 = vld [vmem:[%s7818_s18 + $0x24] sm:$0xf]  ;;  %v6072_v35 = vcombine.low %v713_v23, %v723_v28  ;;  %v770_v6 = vrot.slane %v768_v60, 5  ;;  %v3471_v15 = vsel %vm7941_vm5, %v6370_v7, %v3470_v8  ;;  %v786_v19 = vshrl.u32 %v617_v62, 16  ;;  %v6351_v24 = vld [vmem:[%s7818_s18 + $0xb0] sm:$0x1] }
  0x62   : > { %7169 = vmatprep.mubr.bf16.mxu0 %v6398_v17  ;;  %v699_v55 = vsel %vm7841_vm2, %v694_v43, %v698_v25  ;;  %7198 = vmatpush3.bf16.msra.mxu0 %v7667_v21  ;;  %v725_v9 = vshrl.u32 %v610_v59, 16  ;;  %v728_v10 = vshll.u32 %v610_v59, 16  ;;  %v6343_v17 = vld [vmem:[%s7818_s18 + $0x90] sm:$0xe]  ;;  %v740_v25 = vrot.slane %v738_v16, 4  ;;  %v7683_v7 = vld [vmem:[%s8925_s1 + $0xb8] sm:$0xff]  }
  0x63   : > { %v6071_v61 = vcombine.low %v689_v49, %v699_v55  ;;  %7199 = vmatprep.subr.bf16.mxu0 %v7669_v37  ;;  %v6369_v31 = vrot.slane %v6343_v17, 9  ;;  %v749_v43 = vshrl.u32 %v613_v32, 16  ;;  %v754_v54 = vrot.slane %v752_v44, 5 }
  0x64   : > { %v727_v20 = vrot.slane %v725_v9, 4  ;;  %v730_v21 = vrot.slane %v728_v10, 5  ;;  %v741_v36 = vor.u32 %v740_v25, %v736_v22  ;;  %v762_v55 = vshrl.u32 %v614_v39, 16  ;;  %v7675_v25 = vld [vmem:[%s8925_s1 + $0xa8] sm:$0xff]  }
  0x65   : > { %v751_v53 = vrot.slane %v749_v43, 4  ;;  %v760_v59 = vrot.slane %v758_v50, 5  ;;  %v3472_v16 = vrot.slane %v3470_v8, 4  ;;  %v782_v17 = vshll.u32 %v617_v62, 16 }
  0x66   : > { %6962 = vmatmul.mubr.bf16.vlgmr.msra.gmra.mrb[0].mxu1 %v6071_v61  ;;  %7200 = vmatpush3.bf16.msra.mxu0 %v7669_v37  ;;  %v731_v30 = vor.u32 %v730_v21, %v727_v20  ;;  %v746_v37 = vrot.slane %v744_v26, 5  ;;  %v742_v46 = vrot.slane %v741_v36, 4  ;;  %v616_v61 = vld [vmem:[%s7818_s18 + $0x3c] sm:$0xf]  ;;  %v6350_v20 = vld [vmem:[%s7818_s18 + $0xac] sm:$0xf] }
  0x67   : > { %6994 = vmatpush3.bf16.msra.mxu1 %v8042_v47  ;;  %v6344_v47 = vld [vmem:[%s7818_s18 + $0x94] sm:$0xf]  ;;  %7233 = vmatprep.subr.bf16.mxu0 %v8106_v18  ;;  %v755_v1 = vor.u32 %v754_v54, %v751_v53  ;;  %v776_v13 = vshll.u32 %v616_v61, 16  ;;  %v784_v27 = vrot.slane %v782_v17, 5  ;;  %v788_v28 = vrot.slane %v786_v19, 4 }
  0x68   : > { %6995 = vmatprep.subr.bf16.mxu1 %v7664_v2  ;;  %v3463_v38 = vrot.slane %v6344_v47, 5  ;;  %v732_v41 = vrot.slane %v731_v30, 4  ;;  %6965 = vmatprep.mubr.bf16.mxu1 %v6072_v35  ;;  %v747_v57 = vsel %vm7841_vm2, %v742_v46, %v746_v37  ;;  %v619_v35 = vld [vmem:[%s7818_s18 + $0x48] sm:$0xf]  ;;  %v7679_v36 = vld [vmem:[%s8925_s1 + $0xb0] sm:$0xff]   ;;  %v3477_v40 = vrot.slane %v6350_v20, 5 }
  0x69   : > { %7170 = vmatmul.mubr.bf16.gmra.mrb[16].mxu0 %v6399_v56  ;;  %v6348_v56 = vld [vmem:[%s7818_s18 + $0xa4] sm:$0x1]  ;;  %v756_v10 = vrot.slane %v755_v1, 4  ;;  %v778_v23 = vrot.slane %v776_v13, 5  ;;  %v3480_v44 = vrot.slane %v6351_v24, 5  ;;  %v797_v45 = vshrl.u32 %v619_v35, 16 }
  0x6a   : > { %7173 = vmatprep.mubr.bf16.mxu0 %v6400_v29  ;;  %v3464_v48 = vsel %vm7941_vm5, %v6369_v31, %v3463_v38  ;;  %v3465_v49 = vrot.slane %v3463_v38, 4  ;;  %v737_v52 = vsel %vm7841_vm2, %v732_v41, %v736_v22  ;;  %v3473_v9 = vrot.slane %v6348_v56, 5  ;;  %v620_v41 = vld [vmem:[%s7818_s18 + $0x4c] sm:$0xf]  ;;  %v6353_v53 = vld [vmem:[%s7818_s18 + $0xb8] sm:$0xf] }
  0x6b   : > { %6996 = vmatpush3.bf16.msra.mxu1 %v7664_v2  ;;  %v6073_v63 = vcombine.low %v737_v52, %v747_v57  ;;  %v764_v2 = vrot.slane %v762_v55, 4  ;;  %v761_v21 = vsel %vm7841_vm2, %v756_v10, %v760_v59  ;;  %v792_v29 = vshll.u32 %v618_v3, 16 }
  0x6c   : > { %6997 = vmatprep.subr.bf16.mxu1 %v7666_v12  ;;  %v3467_v58 = vsel %vm7941_vm5, %v3465_v49, %v3466_v42  ;;  %v3474_v26 = vsel %vm7941_vm5, %v3472_v16, %v3473_v9  ;;  %v789_v38 = vor.u32 %v788_v28, %v784_v27  ;;  %v621_v42 = vld [vmem:[%s7818_s18 + $0x50] sm:$0x1]  ;;  %v800_v46 = vshll.u32 %v619_v35, 16  ;;  %v6355_v16 = vld [vmem:[%s7818_s18 + $0xc0] sm:$0xe] }
  0x6d   : > { %v6401_v0 = vcombine.low %v3464_v48, %v3467_v58  ;;  %v765_v11 = vor.u32 %v764_v2, %v760_v59  ;;  %v6402_v31 = vcombine.low %v3471_v15, %v3474_v26  ;;  %v794_v39 = vrot.slane %v792_v29, 5  ;;  %v6352_v48 = vld [vmem:[%s7818_s18 + $0xb4] sm:$0xe]  ;;  %v6354_v58 = vld [vmem:[%s7818_s18 + $0xbc] sm:$0x1] }
  0x6e   : > { %6966 = vmatmul.mubr.bf16.gmra.mrb[4].mxu1 %v6073_v63  ;;  %v790_v49 = vrot.slane %v789_v38, 4  ;;  %v3479_v51 = vrot.slane %v3477_v40, 4  ;;  %v806_v52 = vshll.u32 %v620_v41, 16  ;;  %v799_v55 = vrot.slane %v797_v45, 4  ;;  %v622_v63 = vld [vmem:[%s7818_s18 + $0x54] sm:$0xf] }
  0x6f   : > { %6998 = vmatpush3.bf16.msra.mxu1 %v7666_v12  ;;  %v773_v12 = vshrl.u32 %v616_v61, 16  ;;  %v766_v22 = vrot.slane %v765_v11, 4  ;;  %v802_v56 = vrot.slane %v800_v46, 5  ;;  %v810_v57 = vshrl.u32 %v620_v41, 16  ;;  %v6357_v26 = vld [vmem:[%s7818_s18 + $0xc8] sm:$0x1] }
  0x70   : > { %6999 = vmatprep.subr.bf16.mxu1 %v7668_v34  ;;  %v795_v59 = vsel %vm7841_vm2, %v790_v49, %v794_v39  ;;  %v3481_v60 = vsel %vm7941_vm5, %v3479_v51, %v3480_v44  ;;  %v808_v61 = vrot.slane %v806_v52, 5  ;;  %v816_v62 = vshll.u32 %v621_v42, 16  ;;  %v626_v42 = vld [vmem:[%s7818_s18 + $0x64] sm:$0xf] }
  0x71   : > { %7174 = vmatmul.mubr.bf16.gmra.mrb[20].mxu0 %v6401_v0  ;;  %v775_v47 = vrot.slane %v773_v12, 4  ;;  %v771_v30 = vsel %vm7841_vm2, %v766_v22, %v770_v6  ;;  %v623_v0 = vld [vmem:[%s7818_s18 + $0x58] sm:$0xf]  ;;  %v803_v3 = vor.u32 %v802_v56, %v799_v55  ;;  %v624_v6 = vld [vmem:[%s7818_s18 + $0x5c] sm:$0x1]  ;;  %v6372_v9 = vrot.slane %v6352_v48, 9 }
  0x72   : > { %v6074_v37 = vcombine.low %v761_v21, %v771_v30  ;;  %7177 = vmatprep.mubr.bf16.mxu0 %v6402_v31  ;;  %v818_v8 = vrot.slane %v816_v62, 5  ;;  %v3484_v10 = vrot.slane %v6353_v53, 5  ;;  %v3487_v11 = vrot.slane %v6354_v58, 5  ;;  %v6356_v22 = vld [vmem:[%s7818_s18 + $0xc4] sm:$0xf] }
  0x73   : > { %7000 = vmatpush3.bf16.msra.mxu1 %v7668_v34  ;;  %v779_v32 = vor.u32 %v778_v23, %v775_v47  ;;  %v6371_v34 = vrot.slane %v6349_v14, 9  ;;  %v804_v12 = vrot.slane %v803_v3, 4  ;;  %v821_v14 = vshrl.u32 %v622_v63, 16  ;;  %v628_v58 = vld [vmem:[%s7818_s18 + $0x6c] sm:$0xf] }
  0x74   : > { %7001 = vmatprep.subr.bf16.mxu1 %v7671_v5  ;;  %6969 = vmatprep.mubr.bf16.mxu1 %v6074_v37  ;;  %v824_v15 = vshll.u32 %v622_v63, 16  ;;  %v3485_v17 = vsel %vm7941_vm5, %v6372_v9, %v3484_v10  ;;  %v3486_v19 = vrot.slane %v3484_v10, 4  ;;  %v830_v20 = vshll.u32 %v623_v0, 16  ;;  %v625_v37 = vld [vmem:[%s7818_s18 + $0x60] sm:$0xf] }
  0x75   : > { %v780_v43 = vrot.slane %v779_v32, 4  ;;  %v3478_v50 = vsel %vm7941_vm5, %v6371_v34, %v3477_v40  ;;  %v834_v21 = vshrl.u32 %v623_v0, 16  ;;  %v809_v47 = vsel %vm7841_vm2, %v804_v12, %v808_v61  ;;  %v629_v63 = vld [vmem:[%s7818_s18 + $0x70] sm:$0xf]  ;;  %v630_v0 = vld [vmem:[%s7818_s18 + $0x74] sm:$0x1] }
  0x76   : > { %v6403_v2 = vcombine.low %v3478_v50, %v3481_v60  ;;  %v823_v24 = vrot.slane %v821_v14, 4  ;;  %v3488_v28 = vsel %vm7941_vm5, %v3486_v19, %v3487_v11  ;;  %v832_v29 = vrot.slane %v830_v20, 5 }
  0x77   : > { %7002 = vmatpush3.bf16.msra.mxu1 %v7671_v5  ;;  %v785_v54 = vsel %vm7841_vm2, %v780_v43, %v784_v27  ;;  %v812_v5 = vrot.slane %v810_v57, 4  ;;  %v8187_v27 = vld [vmem:[%s8925_s1 + $0xc0] sm:$0xff]   ;;  %v836_v30 = vrot.slane %v834_v21, 4  ;;  %v840_v31 = vshll.u32 %v624_v6, 16  ;;  %v627_v43 = vld [vmem:[%s7818_s18 + $0x68] sm:$0x1] }
  0x78   : > { %7003 = vmatprep.subr.bf16.mxu1 %v7675_v25  ;;  %v6075_v1 = vcombine.low %v785_v54, %v795_v59  ;;  %v6404_v34 = vcombine.low %v3485_v17, %v3488_v28  ;;  %v3491_v41 = vrot.slane %v6356_v22, 5  ;;  %v3494_v45 = vrot.slane %v6357_v26, 5  ;;  %v7670_v57 = vld [vmem:[%s7818_s18 + $0x18] sm:$0xff]   ;;  %v7672_v22 = vld [vmem:[%s7818_s18 + $0x24] sm:$0xff]   ;;  %v7674_v26 = vld [vmem:[%s7818_s18 + $0x30] sm:$0xff]  }
  0x79   : > { %7178 = vmatmul.mubr.bf16.gmra.mrb[24].mxu0 %v6403_v2  ;;  %v813_v13 = vor.u32 %v812_v5, %v808_v61  ;;  %v837_v39 = vor.u32 %v836_v30, %v832_v29  ;;  %v842_v40 = vrot.slane %v840_v31, 5  ;;  %v845_v46 = vshrl.u32 %v625_v37, 16 }
  0x7a   : > { %6970 = vmatmul.mubr.bf16.gmra.mrb[8].mxu1 %v6075_v1  ;;  %7181 = vmatprep.mubr.bf16.mxu0 %v6404_v34  ;;  %v848_v48 = vshll.u32 %v625_v37, 16  ;;  %v3493_v51 = vrot.slane %v3491_v41, 4  ;;  %v854_v52 = vshll.u32 %v626_v42, 16  ;;  %v858_v56 = vshrl.u32 %v626_v42, 16  ;;  %v634_v37 = vld [vmem:[%s7818_s18 + $0x84] sm:$0xf] }
  0x7b   : > { %7004 = vmatpush3.bf16.msra.mxu1 %v7675_v25  ;;  %v814_v23 = vrot.slane %v813_v13, 4  ;;  %v826_v25 = vrot.slane %v824_v15, 5  ;;  %v838_v49 = vrot.slane %v837_v39, 4  ;;  %v847_v54 = vrot.slane %v845_v46, 4 }
  0x7c   : > { %7005 = vmatprep.subr.bf16.mxu1 %v7679_v36  ;;  %v850_v55 = vrot.slane %v848_v48, 5  ;;  %v3495_v60 = vsel %vm7941_vm5, %v3493_v51, %v3494_v45  ;;  %v856_v61 = vrot.slane %v854_v52, 5  ;;  %v864_v62 = vshll.u32 %v627_v43, 16  ;;  %v635_v43 = vld [vmem:[%s7818_s18 + $0x88] sm:$0xf] }
  0x7d   : > { %v819_v32 = vsel %vm7841_vm2, %v814_v23, %v818_v8  ;;  %v827_v35 = vor.u32 %v826_v25, %v823_v24  ;;  %v843_v59 = vsel %vm7841_vm2, %v838_v49, %v842_v40  ;;  %v860_v5 = vrot.slane %v858_v56, 4  ;;  %v631_v23 = vld [vmem:[%s7818_s18 + $0x78] sm:$0xf]  ;;  %v632_v24 = vld [vmem:[%s7818_s18 + $0x7c] sm:$0xf] }
  0x7e   : > { %v6076_v38 = vcombine.low %v809_v47, %v819_v32  ;;  %v851_v3 = vor.u32 %v850_v55, %v847_v54  ;;  %v866_v6 = vrot.slane %v864_v62, 5  ;;  %v872_v8 = vshll.u32 %v628_v58, 16  ;;  %v633_v25 = vld [vmem:[%s7818_s18 + $0x80] sm:$0x1]  ;;  %v636_v48 = vld [vmem:[%s7818_s18 + $0x8c] sm:$0x1] }
  0x7f   : > { %7006 = vmatpush3.bf16.msra.mxu1 %v7679_v36  ;;  %v6373_v36 = vrot.slane %v6355_v16, 9  ;;  %v828_v44 = vrot.slane %v827_v35, 4  ;;  %v878_v9 = vshll.u32 %v629_v63, 16  ;;  %v861_v11 = vor.u32 %v860_v5, %v856_v61  ;;  %v7681_v54 = vld [vmem:[%s8925_s1 + $0x1d0] sm:$0xff]  }
  0x80   : > { %7007 = vmatprep.subr.bf16.mxu1 %v7683_v7  ;;  %6973 = vmatprep.mubr.bf16.mxu1 %v6076_v38  ;;  %v852_v10 = vrot.slane %v851_v3, 4  ;;  %v882_v12 = vshrl.u32 %v629_v63, 16  ;;  %v888_v13 = vshll.u32 %v630_v0, 16  ;;  %v874_v15 = vrot.slane %v872_v8, 5  ;;  %v7677_v38 = vld [vmem:[%s8925_s1 + $0x1c8] sm:$0xff]   ;;  %v7676_v63 = vld [vmem:[%s7818_s18 + $0x3c] sm:$0xff]  }
  0x81   : > { %v3492_v50 = vsel %vm7941_vm5, %v6373_v36, %v3491_v41  ;;  %v833_v53 = vsel %vm7841_vm2, %v828_v44, %v832_v29  ;;  %v880_v16 = vrot.slane %v878_v9, 5  ;;  %v862_v19 = vrot.slane %v861_v11, 4  ;;  %v7678_v3 = vld [vmem:[%s7818_s18 + $0x48] sm:$0xff]   ;;  %v638_v8 = vld [vmem:[%s7818_s18 + $0x94] sm:$0xf] }
  0x82   : > { %v6077_v1 = vcombine.low %v833_v53, %v843_v59  ;;  %v6405_v2 = vcombine.low %v3492_v50, %v3495_v60  ;;  %v857_v17 = vsel %vm7841_vm2, %v852_v10, %v856_v61  ;;  %v884_v20 = vrot.slane %v882_v12, 4  ;;  %v639_v9 = vld [vmem:[%s7818_s18 + $0x98] sm:$0x1] }
  0x83   : > { %7008 = vmatpush3.bf16.msra.mxu1 %v7683_v7  ;;  %v869_v7 = vshrl.u32 %v628_v58, 16  ;;  %v890_v21 = vrot.slane %v888_v13, 5  ;;  %v867_v28 = vsel %vm7841_vm2, %v862_v19, %v866_v6  ;;  %v893_v30 = vshrl.u32 %v631_v23, 16 }
  0x84   : > { %7041 = vmatprep.subr.bf16.mxu1 %v8187_v27  ;;  %6974 = vmatmul.mubr.bf16.gmra.mrb[12].mxu1 %v6077_v1  ;;  %v885_v29 = vor.u32 %v884_v20, %v880_v16  ;;  %v896_v31 = vshll.u32 %v631_v23, 16  ;;  %v6078_v32 = vcombine.low %v857_v17, %v867_v28  ;;  %v902_v35 = vshll.u32 %v632_v24, 16  ;;  %v640_v20 = vld [vmem:[%s7818_s18 + $0x9c] sm:$0xf] }
  0x85   : > { %7182 = vmatmul.mubr.bf16.gmra.mrb[28].mxu0 %v6405_v2  ;;  %v871_v14 = vrot.slane %v869_v7, 4  ;;  %v906_v36 = vshrl.u32 %v632_v24, 16  ;;  %v895_v40 = vrot.slane %v893_v30, 4  ;;  %v912_v42 = vshll.u32 %v633_v25, 16  ;;  %v637_v2 = vld [vmem:[%s7818_s18 + $0x90] sm:$0xf] }
  0x86   : > { %7201 = vmatprep.mubr.bf16.mxu0 %v7670_v57  ;;  %v886_v39 = vrot.slane %v885_v29, 4  ;;  %v898_v41 = vrot.slane %v896_v31, 5  ;;  %6977 = vmatprep.mubr.bf16.mxu1 %v6078_v32  ;;  %v904_v45 = vrot.slane %v902_v35, 5  ;;  %v917_v49 = vshrl.u32 %v634_v37, 16  ;;  %v641_v24 = vld [vmem:[%s7818_s18 + $0xa0] sm:$0xf] }
  0x87   : > { %v875_v47 = vor.u32 %v874_v15, %v871_v14  ;;  %v908_v46 = vrot.slane %v906_v36, 4  ;;  %v914_v52 = vrot.slane %v912_v42, 5  ;;  %v920_v53 = vshll.u32 %v634_v37, 16  ;;  %v7685_v14 = vld [vmem:[%s8925_s1 + $0x1d8] sm:$0xff]   ;;  %v642_v29 = vld [vmem:[%s7818_s18 + $0xa4] sm:$0x1] }
  0x88   : > { %v891_v50 = vsel %vm7841_vm2, %v886_v39, %v890_v21  ;;  %v899_v51 = vor.u32 %v898_v41, %v895_v40  ;;  %v919_v57 = vrot.slane %v917_v49, 4  ;;  %v926_v58 = vshll.u32 %v635_v43, 16  ;;  %v7689_v36 = vld [vmem:[%s8925_s1 + $0x1e0] sm:$0xff]  }
  0x89   : > { %v876_v34 = vrot.slane %v875_v47, 4  ;;  %v909_v56 = vor.u32 %v908_v46, %v904_v45  ;;  %v922_v60 = vrot.slane %v920_v53, 5  ;;  %v930_v61 = vshrl.u32 %v635_v43, 16  ;;  %v643_v53 = vld [vmem:[%s7818_s18 + $0xa8] sm:$0xf] }
  0x8a   : > { %v900_v59 = vrot.slane %v899_v51, 4  ;;  %v936_v62 = vshll.u32 %v636_v48, 16  ;;  %v928_v1 = vrot.slane %v926_v58, 5  ;;  %v941_v11 = vshrl.u32 %v637_v2, 16  ;;  %v645_v58 = vld [vmem:[%s7818_s18 + $0xb0] sm:$0x1] }
  0x8b   : > { %v881_v44 = vsel %vm7841_vm2, %v876_v34, %v880_v16  ;;  %v910_v0 = vrot.slane %v909_v56, 4  ;;  %v923_v5 = vor.u32 %v922_v60, %v919_v57  ;;  %v932_v6 = vrot.slane %v930_v61, 4 }
  0x8c   : > { %v6079_v55 = vcombine.low %v881_v44, %v891_v50  ;;  %v938_v7 = vrot.slane %v936_v62, 5  ;;  %v944_v12 = vshll.u32 %v637_v2, 16  ;;  %v950_v13 = vshll.u32 %v638_v8, 16  ;;  %v7682_v50 = vld [vmem:[%s7818_s18 + $0x60] sm:$0xff]  }
  0x8d   : > { %7202 = vmatmul.mubr.bf16.vlgmr.msra.gmra.mrb[0].mxu0 %v7672_v22  ;;  %v915_v10 = vsel %vm7841_vm2, %v910_v0, %v914_v52  ;;  %v924_v16 = vrot.slane %v923_v5, 4  ;;  %v933_v17 = vor.u32 %v932_v6, %v928_v1  ;;  %v954_v19 = vshrl.u32 %v638_v8, 16  ;;  %v7693_v0 = vld [vmem:[%s8925_s1 + $0x1e8] sm:$0xff]   ;;  %v646_v5 = vld [vmem:[%s7818_s18 + $0xb4] sm:$0xf] }
  0x8e   : > { %7234 = vmatpush3.bf16.msra.mxu0 %v8106_v18  ;;  %7205 = vmatprep.mubr.bf16.mxu0 %v7674_v26  ;;  %v905_v18 = vsel %vm7841_vm2, %v900_v59, %v904_v45  ;;  %v943_v21 = vrot.slane %v941_v11, 4  ;;  %v946_v22 = vrot.slane %v944_v12, 5  ;;  %v952_v47 = vrot.slane %v950_v13, 5  ;;  %v7680_v45 = vld [vmem:[%s7818_s18 + $0x54] sm:$0xff]  }
  0x8f   : > { %7235 = vmatprep.subr.bf16.mxu0 %v7677_v38  ;;  %6978 = vmatmul.mubr.bf16.gmra.mrb[16].mxu1 %v6079_v55  ;;  %v6080_v15 = vcombine.low %v905_v18, %v915_v10  ;;  %v960_v23 = vshll.u32 %v639_v9, 16  ;;  %v929_v25 = vsel %vm7841_vm2, %v924_v16, %v928_v1  ;;  %v934_v26 = vrot.slane %v933_v17, 4  ;;  %v647_v9 = vld [vmem:[%s7818_s18 + $0xb8] sm:$0xf]  ;;  %v648_v10 = vld [vmem:[%s7818_s18 + $0xbc] sm:$0x1] }
  0x90   : > { %v956_v28 = vrot.slane %v954_v19, 4  ;;  %v965_v30 = vshrl.u32 %v640_v20, 16  ;;  %v947_v31 = vor.u32 %v946_v22, %v943_v21  ;;  %v968_v34 = vshll.u32 %v640_v20, 16 }
  0x91   : > { %6981 = vmatprep.mubr.bf16.mxu1 %v6080_v15  ;;  %v962_v32 = vrot.slane %v960_v23, 5  ;;  %v974_v35 = vshll.u32 %v641_v24, 16  ;;  %v939_v37 = vsel %vm7841_vm2, %v934_v26, %v938_v7  ;;  %v978_v40 = vshrl.u32 %v641_v24, 16  ;;  %v7697_v15 = vld [vmem:[%s8925_s1 + $0x1f0] sm:$0xff]  }
  0x92   : > { %7236 = vmatpush3.bf16.msra.mxu0 %v7677_v38  ;;  %v957_v38 = vor.u32 %v956_v28, %v952_v47  ;;  %v967_v39 = vrot.slane %v965_v30, 4  ;;  %v6081_v41 = vcombine.low %v929_v25, %v939_v37  ;;  %v948_v42 = vrot.slane %v947_v31, 4  ;;  %v7684_v24 = vld [vmem:[%s7818_s18 + $0x6c] sm:$0xff]   ;;  %v1422_v37 = vld [vmem:[%s7818_s18] sm:$0xe] }
  0x93   : > { %7237 = vmatprep.subr.bf16.mxu0 %v7681_v54  ;;  %v970_v43 = vrot.slane %v968_v34, 5  ;;  %v976_v44 = vrot.slane %v974_v35, 5  ;;  %v980_v48 = vrot.slane %v978_v40, 4  ;;  %v984_v49 = vshll.u32 %v642_v29, 16  ;;  %v7686_v29 = vld [vmem:[%s7818_s18 + $0x78] sm:$0xff]  }
  0x94   : > { %v958_v46 = vrot.slane %v957_v38, 4  ;;  %v953_v51 = vsel %vm7841_vm2, %v948_v42, %v952_v47  ;;  %v989_v59 = vshrl.u32 %v643_v53, 16  ;;  %v992_v62 = vshll.u32 %v643_v53, 16  ;;  %v7701_v34 = vld [vmem:[%s8925_s1 + $0x1f8] sm:$0xff]   ;;  %v1423_v38 = vld [vmem:[%s7818_s18 + $0x4] sm:$0xf] }
  0x95   : > { %7206 = vmatmul.mubr.bf16.gmra.mrb[4].mxu0 %v7676_v63  ;;  %v971_v52 = vor.u32 %v970_v43, %v967_v39  ;;  %v981_v56 = vor.u32 %v980_v48, %v976_v44  ;;  %v986_v57 = vrot.slane %v984_v49, 5  ;;  %v1008_v18 = vshll.u32 %v645_v58, 16  ;;  %v1424_v39 = vld [vmem:[%s7818_s18 + $0x8] sm:$0x1]  ;;  %v1425_v48 = vld [vmem:[%s7818_s18 + $0xc] sm:$0xe] }
  0x96   : > { %7209 = vmatprep.mubr.bf16.mxu0 %v7678_v3  ;;  %7238 = vmatpush3.bf16.msra.mxu0 %v7681_v54  ;;  %v644_v54 = vld [vmem:[%s7818_s18 + $0xac] sm:$0xf]  ;;  %v963_v55 = vsel %vm7841_vm2, %v958_v46, %v962_v32  ;;  %v991_v2 = vrot.slane %v989_v59, 4  ;;  %v994_v7 = vrot.slane %v992_v62, 5  ;;  %v1016_v19 = vshll.u32 %v646_v5, 16 }
  0x97   : > { %7239 = vmatprep.subr.bf16.mxu0 %v7685_v14  ;;  %6982 = vmatmul.mubr.bf16.gmra.mrb[20].mxu1 %v6081_v41  ;;  %v6082_v60 = vcombine.low %v953_v51, %v963_v55  ;;  %v972_v61 = vrot.slane %v971_v52, 4  ;;  %v998_v63 = vshll.u32 %v644_v54, 16  ;;  %v982_v1 = vrot.slane %v981_v56, 4  ;;  %v1426_v49 = vld [vmem:[%s7818_s18 + $0x10] sm:$0xf]  ;;  %v7688_v55 = vld [vmem:[%s7818_s18 + $0x84] sm:$0xff]  }
  0x98   : > { %v1002_v3 = vshrl.u32 %v644_v54, 16  ;;  %v1010_v13 = vrot.slane %v1008_v18, 5  ;;  %v995_v17 = vor.u32 %v994_v7, %v991_v2  ;;  %v1022_v20 = vshll.u32 %v647_v9, 16  ;;  %v1427_v53 = vld [vmem:[%s7818_s18 + $0x14] sm:$0x1]  ;;  %v8297_v56 = vld [vmem:[%s8925_s1 + $0x200] sm:$0xff]  }
  0x99   : > { %6985 = vmatprep.mubr.bf16.mxu1 %v6082_v60  ;;  %v977_v6 = vsel %vm7841_vm2, %v972_v61, %v976_v44  ;;  %v1000_v8 = vrot.slane %v998_v63, 5  ;;  %v987_v11 = vsel %vm7841_vm2, %v982_v1, %v986_v57  ;;  %v1026_v47 = vshrl.u32 %v647_v9, 16  ;;  %v1428_v1 = vld [vmem:[%s7818_s18 + $0x18] sm:$0xe]  ;;  %v7690_v2 = vld [vmem:[%s7818_s18 + $0x90] sm:$0xff]  }
  0x9a   : > { %7240 = vmatpush3.bf16.msra.mxu0 %v7685_v14  ;;  %v1004_v12 = vrot.slane %v1002_v3, 4  ;;  %v1013_v14 = vshrl.u32 %v646_v5, 16  ;;  %v6083_v16 = vcombine.low %v977_v6, %v987_v11  ;;  %v1032_v23 = vshll.u32 %v648_v10, 16  ;;  %v1429_v3 = vld [vmem:[%s7818_s18 + $0x1c] sm:$0xf] }
  0x9b   : > { %7241 = vmatprep.subr.bf16.mxu0 %v7689_v36  ;;  %v996_v25 = vrot.slane %v995_v17, 4  ;;  %v1018_v26 = vrot.slane %v1016_v19, 5  ;;  %v1024_v28 = vrot.slane %v1022_v20, 5  ;;  %v1028_v31 = vrot.slane %v1026_v47, 4  ;;  %v1430_v18 = vld [vmem:[%s7818_s18 + $0x20] sm:$0x1] }
  0x9c   : > { %v1005_v21 = vor.u32 %v1004_v12, %v1000_v8  ;;  %v1015_v22 = vrot.slane %v1013_v14, 4  ;;  %v1034_v32 = vrot.slane %v1032_v23, 5  ;;  %v6094_v42 = vrot.slane %v1422_v37, 9  ;;  %v1431_v10 = vld [vmem:[%s7818_s18 + $0x24] sm:$0xe]  ;;  %v7692_v47 = vld [vmem:[%s7818_s18 + $0x9c] sm:$0xff]  }
  0x9d   : > { %7210 = vmatmul.mubr.bf16.gmra.mrb[8].mxu0 %v7680_v45  ;;  %v1001_v35 = vsel %vm7841_vm2, %v996_v25, %v1000_v8  ;;  %v1029_v41 = vor.u32 %v1028_v31, %v1024_v28  ;;  %v1523_v43 = vrot.slane %v1423_v38, 5  ;;  %v1526_v46 = vrot.slane %v1424_v39, 5  ;;  %v1432_v11 = vld [vmem:[%s7818_s18 + $0x28] sm:$0xf]  ;;  %v1433_v12 = vld [vmem:[%s7818_s18 + $0x2c] sm:$0x1] }
  0x9e   : > { %7213 = vmatprep.mubr.bf16.mxu0 %v7682_v50  ;;  %7242 = vmatpush3.bf16.msra.mxu0 %v7689_v36  ;;  %v1006_v30 = vrot.slane %v1005_v21, 4  ;;  %v1019_v36 = vor.u32 %v1018_v26, %v1015_v22  ;;  %v6095_v54 = vrot.slane %v1425_v48, 9  ;;  %v1530_v58 = vrot.slane %v1426_v49, 5  ;;  %v7691_v22 = vld [vmem:[%s8925_s1 + $0xc8] sm:$0xff]   ;;  %v1435_v25 = vld [vmem:[%s7818_s18 + $0x34] sm:$0xf] }
  0x9f   : > { %7243 = vmatprep.subr.bf16.mxu0 %v7693_v0  ;;  %6986 = vmatmul.mubr.bf16.gmra.mrb[24].mxu1 %v6083_v16  ;;  %v1030_v50 = vrot.slane %v1029_v41, 4  ;;  %v1524_v51 = vsel %vm7941_vm5, %v6094_v42, %v1523_v43  ;;  %v1525_v52 = vrot.slane %v1523_v43, 4  ;;  %v1533_v59 = vrot.slane %v1427_v53, 5  ;;  %v1436_v26 = vld [vmem:[%s7818_s18 + $0x38] sm:$0x1]  ;;  %v7694_v31 = vld [vmem:[%s7818_s18 + $0xa8] sm:$0xff]  }
  0xa0   : > { %v1011_v40 = vsel %vm7841_vm2, %v1006_v30, %v1010_v13  ;;  %v1020_v45 = vrot.slane %v1019_v36, 4  ;;  %v6096_v5 = vrot.slane %v1428_v1, 9  ;;  %v1537_v6 = vrot.slane %v1429_v3, 5  ;;  %v1439_v36 = vld [vmem:[%s7818_s18 + $0x44] sm:$0x1]  ;;  %v7696_v48 = vld [vmem:[%s7818_s18 + $0xb4] sm:$0xff]  }
  0xa1   : > { %v6084_v44 = vcombine.low %v1001_v35, %v1011_v40  ;;  %v1035_v60 = vsel %vm7841_vm2, %v1030_v50, %v1034_v32  ;;  %v1527_v61 = vsel %vm7941_vm5, %v1525_v52, %v1526_v46  ;;  %v1540_v7 = vrot.slane %v1430_v18, 5  ;;  %v1437_v32 = vld [vmem:[%s7818_s18 + $0x3c] sm:$0xe]  ;;  %v1438_v35 = vld [vmem:[%s7818_s18 + $0x40] sm:$0xf]  ;;  %v7695_v40 = vld [vmem:[%s8925_s1 + $0xd0] sm:$0xff]  }
  0xa2   : > { %7244 = vmatpush3.bf16.msra.mxu0 %v7693_v0  ;;  %v1025_v57 = vsel %vm7841_vm2, %v1020_v45, %v1024_v28  ;;  %v6126_v63 = vcombine.low %v1524_v51, %v1527_v61  ;;  %v1532_v0 = vrot.slane %v1530_v58, 4  ;;  %v1531_v8 = vsel %vm7941_vm5, %v6095_v54, %v1530_v58  ;;  %v1441_v49 = vld [vmem:[%s7818_s18 + $0x4c] sm:$0xf]  ;;  %v1442_v50 = vld [vmem:[%s7818_s18 + $0x50] sm:$0x1]  ;;  %v7699_v52 = vld [vmem:[%s8925_s1 + $0xd8] sm:$0xff]  }
  0xa3   : > { %7245 = vmatprep.subr.bf16.mxu0 %v7697_v15  ;;  %6989 = vmatprep.mubr.bf16.mxu1 %v6084_v44  ;;  %v6085_v62 = vcombine.low %v1025_v57, %v1035_v60  ;;  %v1538_v13 = vsel %vm7941_vm5, %v6096_v5, %v1537_v6  ;;  %v1539_v14 = vrot.slane %v1537_v6, 4  ;;  %v6097_v16 = vrot.slane %v1431_v10, 9  ;;  %v1440_v44 = vld [vmem:[%s7818_s18 + $0x48] sm:$0xe]  ;;  %v1443_v57 = vld [vmem:[%s7818_s18 + $0x54] sm:$0xe] }
  0xa4   : > { %v1534_v9 = vsel %vm7941_vm5, %v1532_v0, %v1533_v59  ;;  %v1547_v21 = vrot.slane %v1433_v12, 5  ;;  %v1554_v30 = vrot.slane %v1436_v26, 5  ;;  %v1558_v39 = vrot.slane %v1438_v35, 5  ;;  %v1444_v58 = vld [vmem:[%s7818_s18 + $0x58] sm:$0xf]  ;;  %v7698_v61 = vld [vmem:[%s7818_s18 + $0xc0] sm:$0xff]  }
  0xa5   : > { %7214 = vmatmul.mubr.bf16.gmra.mrb[12].mxu0 %v7684_v24  ;;  %v6127_v17 = vcombine.low %v1531_v8, %v1534_v9  ;;  %v1541_v19 = vsel %vm7941_vm5, %v1539_v14, %v1540_v7  ;;  %v1434_v24 = vld [vmem:[%s7818_s18 + $0x30] sm:$0xe]  ;;  %v6099_v42 = vrot.slane %v1437_v32, 9  ;;  %v1561_v43 = vrot.slane %v1439_v36, 5  ;;  %v1445_v59 = vld [vmem:[%s7818_s18 + $0x5c] sm:$0x1] }
  0xa6   : > { %7217 = vmatprep.mubr.bf16.mxu0 %v7686_v29  ;;  %7246 = vmatpush3.bf16.msra.mxu0 %v7697_v15  ;;  %v1544_v15 = vrot.slane %v1432_v11, 5  ;;  %v6128_v23 = vcombine.low %v1538_v13, %v1541_v19  ;;  %v6098_v28 = vrot.slane %v1434_v24, 9  ;;  %v1551_v29 = vrot.slane %v1435_v25, 5  ;;  %v7702_v6 = vld [vmem:[%s8925_s1 + $0xe0] sm:$0xff]   ;;  %v1448_v11 = vld [vmem:[%s7818_s18 + $0x68] sm:$0x1] }
  0xa7   : > { %7247 = vmatprep.subr.bf16.mxu0 %v7701_v34  ;;  %6990 = vmatmul.mubr.bf16.gmra.mrb[28].mxu1 %v6085_v62  ;;  %v1560_v46 = vrot.slane %v1558_v39, 4  ;;  %v6100_v51 = vrot.slane %v1440_v44, 9  ;;  %v1565_v54 = vrot.slane %v1441_v49, 5  ;;  %v6101_v62 = vrot.slane %v1443_v57, 9  ;;  %v1446_v7 = vld [vmem:[%s7818_s18 + $0x60] sm:$0xe] }
  0xa8   : > { %7009 = vmatprep.mubr.bf16.mxu1 %v6126_v63  ;;  %v1546_v20 = vrot.slane %v1544_v15, 4  ;;  %v1545_v37 = vsel %vm7941_vm5, %v6097_v16, %v1544_v15  ;;  %v1572_v63 = vrot.slane %v1444_v58, 5  ;;  %v1559_v0 = vsel %vm7941_vm5, %v6099_v42, %v1558_v39  ;;  %v1447_v8 = vld [vmem:[%s7818_s18 + $0x64] sm:$0xf]  ;;  %v6486_v13 = vld [vmem:[%s7818_s18 + $0x18] sm:$0xf] }
  0xa9   : > { %v1567_v60 = vrot.slane %v1565_v54, 4  ;;  %v1562_v1 = vsel %vm7941_vm5, %v1560_v46, %v1561_v43  ;;  %v1566_v3 = vsel %vm7941_vm5, %v6100_v51, %v1565_v54  ;;  %v1579_v12 = vrot.slane %v1447_v8, 5  ;;  %v7700_v16 = vld [vmem:[%s7818_s18 + $0xcc] sm:$0xff]   ;;  %v6487_v19 = vld [vmem:[%s7818_s18 + $0x1c] sm:$0xf] }
  0xaa   : > { %7248 = vmatpush3.bf16.msra.mxu0 %v7701_v34  ;;  %v1553_v34 = vrot.slane %v1551_v29, 4  ;;  %v1548_v38 = vsel %vm7941_vm5, %v1546_v20, %v1547_v21  ;;  %v1574_v5 = vrot.slane %v1572_v63, 4  ;;  %v6131_v9 = vcombine.low %v1559_v0, %v1562_v1  ;;  %v6488_v20 = vld [vmem:[%s7818_s18 + $0x20] sm:$0x1]  ;;  %v1449_v26 = vld [vmem:[%s7818_s18 + $0x6c] sm:$0xe] }
  0xab   : > { %7281 = vmatprep.subr.bf16.mxu0 %v8297_v56  ;;  %v6129_v45 = vcombine.low %v1545_v37, %v1548_v38  ;;  %v8370_v10 = vsel %vm7941_vm5, %v6101_v62, %v1572_v63  ;;  %v4382_v21 = vshrl.u32 %v6486_v13, 16  ;;  %v4385_v24 = vshll.u32 %v6486_v13, 16  ;;  %v1451_v36 = vld [vmem:[%s7818_s18 + $0x74] sm:$0x1]  ;;  %v6489_v46 = vld [vmem:[%s7818_s18 + $0x24] sm:$0xf] }
  0xac   : > { %v1555_v41 = vsel %vm7941_vm5, %v1553_v34, %v1554_v30  ;;  %v4391_v25 = vshll.u32 %v6487_v19, 16  ;;  %v4401_v30 = vshll.u32 %v6488_v20, 16  ;;  %v6103_v32 = vrot.slane %v1449_v26, 9  ;;  %v6491_v51 = vld [vmem:[%s7818_s18 + $0x2c] sm:$0x1] }
  0xad   : > { %7218 = vmatmul.mubr.bf16.gmra.mrb[16].mxu0 %v7688_v55  ;;  %v1568_v55 = vrot.slane %v1442_v50, 5  ;;  %v4387_v34 = vrot.slane %v4385_v24, 5  ;;  %v6490_v50 = vld [vmem:[%s7818_s18 + $0x28] sm:$0xf]  ;;  %v1454_v8 = vld [vmem:[%s7818_s18 + $0x80] sm:$0x1] }
  0xae   : > { %7221 = vmatprep.mubr.bf16.mxu0 %v7690_v2  ;;  %v1575_v2 = vrot.slane %v1445_v59, 5  ;;  %v4393_v35 = vrot.slane %v4391_v25, 5  ;;  %v4403_v44 = vrot.slane %v4401_v30, 5  ;;  %v4415_v57 = vshll.u32 %v6490_v50, 16  ;;  %v6494_v20 = vld [vmem:[%s7818_s18 + $0x38] sm:$0x1] }
  0xaf   : > { %7010 = vmatmul.mubr.bf16.vlgmr.msra.gmra.mrb[0].mxu1 %v6127_v17  ;;  %v1569_v18 = vsel %vm7941_vm5, %v1567_v60, %v1568_v55  ;;  %v6102_v17 = vrot.slane %v1446_v7, 9  ;;  %v4419_v58 = vshrl.u32 %v6490_v50, 16  ;;  %v1453_v7 = vld [vmem:[%s7818_s18 + $0x7c] sm:$0xf]  ;;  %v1455_v26 = vld [vmem:[%s7818_s18 + $0x84] sm:$0xe] }
  0xb0   : > { %7042 = vmatpush3.bf16.msra.mxu1 %v8187_v27  ;;  %7013 = vmatprep.mubr.bf16.mxu1 %v6128_v23  ;;  %v1552_v27 = vsel %vm7941_vm5, %v6098_v28, %v1551_v29  ;;  %v6132_v14 = vcombine.low %v1566_v3, %v1569_v18  ;;  %v8376_v15 = vsel %vm7941_vm5, %v1574_v5, %v1575_v2  ;;  %v1582_v23 = vrot.slane %v1448_v11, 5  ;;  %v1452_v3 = vld [vmem:[%s7818_s18 + $0x78] sm:$0xe] }
  0xb1   : > { %7043 = vmatprep.subr.bf16.mxu1 %v7691_v22  ;;  %v6130_v53 = vcombine.low %v1552_v27, %v1555_v41  ;;  %v4384_v28 = vrot.slane %v4382_v21, 4  ;;  %v4395_v29 = vshrl.u32 %v6487_v19, 16  ;;  %v6133_v38 = vcombine.low %v8370_v10, %v8376_v15  ;;  %v7706_v41 = vld [vmem:[%s8925_s1 + $0xf0] sm:$0xff]   ;;  %v7708_v10 = vld [vmem:[%s8925_s1 + $0xf8] sm:$0xff]  }
  0xb2   : > { %v1580_v39 = vsel %vm7941_vm5, %v6102_v17, %v1579_v12  ;;  %v1589_v27 = vrot.slane %v1451_v36, 5  ;;  %v4417_v0 = vrot.slane %v4415_v57, 5  ;;  %v4421_v1 = vrot.slane %v4419_v58, 4  ;;  %v6492_v15 = vld [vmem:[%s7818_s18 + $0x30] sm:$0xf] }
  0xb3   : > { %v4388_v43 = vor.u32 %v4387_v34, %v4384_v28  ;;  %v4425_v2 = vshll.u32 %v6491_v51, 16  ;;  %v1596_v19 = vrot.slane %v1454_v8, 5  ;;  %v4430_v21 = vshrl.u32 %v6492_v15, 16 }
  0xb4   : > { %7044 = vmatpush3.bf16.msra.mxu1 %v7691_v22  ;;  %v7704_v22 = vld [vmem:[%s8925_s1 + $0xe8] sm:$0xff]  }
  0xb5   : > { %7222 = vmatmul.mubr.bf16.gmra.mrb[20].mxu0 %v7692_v47  ;;  %7045 = vmatprep.subr.bf16.mxu1 %v7695_v40  ;;  %v1581_v47 = vrot.slane %v1579_v12, 4  ;;  %v4389_v54 = vrot.slane %v4388_v43, 4  ;;  %v4422_v12 = vor.u32 %v4421_v1, %v4417_v0  ;;  %v4427_v13 = vrot.slane %v4425_v2, 5  ;;  %v6495_v43 = vld [vmem:[%s7818_s18 + $0x3c] sm:$0xf] }
  0xb6   : > { %7225 = vmatprep.mubr.bf16.mxu0 %v7694_v31  ;;  %v1450_v31 = vld [vmem:[%s7818_s18 + $0x70] sm:$0xf] }
  0xb7   : > { %7014 = vmatmul.mubr.bf16.gmra.mrb[4].mxu1 %v6129_v45  ;;  %v1586_v37 = vrot.slane %v1450_v31, 5  ;;  %v1583_v42 = vsel %vm7941_vm5, %v1581_v47, %v1582_v23  ;;  %v4394_v63 = vsel %vm7841_vm2, %v4389_v54, %v4393_v35  ;;  %v4423_v47 = vrot.slane %v4422_v12, 4  ;;  %v7709_v12 = vld [vmem:[%s8925_s1 + $0x218] sm:$0xff]  }
  0xb8   : > { %7017 = vmatprep.mubr.bf16.mxu1 %v6130_v53  ;;  %7046 = vmatpush3.bf16.msra.mxu1 %v7695_v40  ;;  %v4397_v40 = vrot.slane %v4395_v29, 4  ;;  %v4409_v53 = vshll.u32 %v6489_v46, 16  ;;  %v6134_v59 = vcombine.low %v1580_v39, %v1583_v42  ;;  %v4432_v29 = vrot.slane %v4430_v21, 4 }
  0xb9   : > { %7047 = vmatprep.subr.bf16.mxu1 %v7699_v52  ;;  %v1588_v45 = vrot.slane %v1586_v37, 4  ;;  %v8399_v49 = vsel %vm7941_vm5, %v6103_v32, %v1586_v37  ;;  %v1456_v32 = vld [vmem:[%s7818_s18 + $0x88] sm:$0xf]  ;;  %v4428_v34 = vsel %vm7841_vm2, %v4423_v47, %v4427_v13  ;;  %v4449_v37 = vshll.u32 %v6494_v20, 16 }
  0xba   : > { %v4411_v62 = vrot.slane %v4409_v53, 5  ;;  %v4454_v53 = vshrl.u32 %v6495_v43, 16  ;;  %v4457_v54 = vshll.u32 %v6495_v43, 16 }
  0xbb   : > { %v8405_v55 = vsel %vm7941_vm5, %v1588_v45, %v1589_v27  ;;  %v6105_v45 = vrot.slane %v1455_v26, 9 }
  0xbc   : > { %7048 = vmatpush3.bf16.msra.mxu1 %v7699_v52  ;;  %v4406_v52 = vshrl.u32 %v6489_v46, 16  ;;  %v6135_v5 = vcombine.low %v8399_v49, %v8405_v55  ;;  %v1600_v46 = vrot.slane %v1456_v32, 5  ;;  %v6496_v49 = vld [vmem:[%s7818_s18 + $0x40] sm:$0xf] }
  0xbd   : > { %7226 = vmatmul.mubr.bf16.gmra.mrb[24].mxu0 %v7696_v48  ;;  %7049 = vmatprep.subr.bf16.mxu1 %v7702_v6  ;;  %v4398_v48 = vor.u32 %v4397_v40, %v4393_v35  ;;  %v4463_v58 = vshll.u32 %v6496_v49, 16 }
  0xbe   : > { %7229 = vmatprep.mubr.bf16.mxu0 %v7698_v61  ;;  %v4408_v61 = vrot.slane %v4406_v52, 4  ;;  %v6497_v52 = vld [vmem:[%s7818_s18 + $0x44] sm:$0x1]  ;;  %v1601_v55 = vsel %vm7941_vm5, %v6105_v45, %v1600_v46  ;;  %v1602_v57 = vrot.slane %v1600_v46, 4 }
  0xbf   : > { %7018 = vmatmul.mubr.bf16.gmra.mrb[8].mxu1 %v6131_v9  ;;  %v4399_v60 = vrot.slane %v4398_v48, 4  ;;  %v6104_v9 = vrot.slane %v1452_v3, 9  ;;  %v4465_v2 = vrot.slane %v4463_v58, 5  ;;  %v7712_v45 = vld [vmem:[%s8925_s1 + $0x220] sm:$0xff]  }
  0xc0   : > { %7021 = vmatprep.mubr.bf16.mxu1 %v6132_v14  ;;  %7050 = vmatpush3.bf16.msra.mxu1 %v7702_v6  ;;  %v4412_v6 = vor.u32 %v4411_v62, %v4408_v61  ;;  %v1593_v14 = vrot.slane %v1453_v7, 5  ;;  %v4456_v62 = vrot.slane %v4454_v53, 4 }
  0xc1   : > { %7051 = vmatprep.subr.bf16.mxu1 %v7704_v22  ;;  %v4404_v18 = vsel %vm7841_vm2, %v4399_v60, %v4403_v44  ;;  %v4451_v44 = vrot.slane %v4449_v37, 5  ;;  %v8445_v60 = vld [vmem:[%s8925_s1 + $0x100] sm:$0xff]  }
  0xc2   : > { %v6550_v11 = vcombine.low %v4394_v63, %v4404_v18  ;;  %v4413_v17 = vrot.slane %v4412_v6, 4  ;;  %v1594_v23 = vsel %vm7941_vm5, %v6104_v9, %v1593_v14  ;;  %v1595_v24 = vrot.slane %v1593_v14, 4  ;;  %v1459_v9 = vld [vmem:[%s7818_s18 + $0x94] sm:$0xf] }
  0xc3   : > { %v4459_v63 = vrot.slane %v4457_v54, 5  ;;  %v4473_v18 = vshll.u32 %v6497_v52, 16  ;;  %v6503_v54 = vld [vmem:[%s7818_s18 + $0x5c] sm:$0x1] }
  0xc4   : > { %7052 = vmatpush3.bf16.msra.mxu1 %v7704_v22  ;;  %v4433_v22 = vshll.u32 %v6492_v15, 16  ;;  %v4418_v28 = vsel %vm7841_vm2, %v4413_v17, %v4417_v0  ;;  %v1597_v35 = vsel %vm7941_vm5, %v1595_v24, %v1596_v19  ;;  %v7707_v0 = vld [vmem:[%s8925_s1 + $0x210] sm:$0xff]   ;;  %v6498_v17 = vld [vmem:[%s7818_s18 + $0x48] sm:$0xf]  ;;  %v6499_v19 = vld [vmem:[%s7818_s18 + $0x4c] sm:$0xf] }
  0xc5   : > { %7230 = vmatmul.mubr.bf16.gmra.mrb[28].mxu0 %v7700_v16  ;;  %7053 = vmatprep.subr.bf16.mxu1 %v7706_v41  ;;  %v6493_v16 = vld [vmem:[%s7818_s18 + $0x34] sm:$0xf]  ;;  %v6551_v39 = vcombine.low %v4418_v28, %v4428_v34  ;;  %v6136_v40 = vcombine.low %v1594_v23, %v1597_v35  ;;  %v4460_v8 = vor.u32 %v4459_v63, %v4456_v62  ;;  %v4475_v15 = vrot.slane %v4473_v18, 5  ;;  %v1462_v35 = vld [vmem:[%s7818_s18 + $0xa0] sm:$0xf] }
  0xc6   : > { %7249 = vmatprep.mubr.bf16.mxu0 %v6550_v11  ;;  %v4439_v25 = vshll.u32 %v6493_v16, 16  ;;  %v4435_v30 = vrot.slane %v4433_v22, 5  ;;  %v4443_v31 = vshrl.u32 %v6493_v16, 16  ;;  %v1607_v16 = vrot.slane %v1459_v9, 5  ;;  %v6500_v22 = vld [vmem:[%s7818_s18 + $0x50] sm:$0x1] }
  0xc7   : > { %7022 = vmatmul.mubr.bf16.gmra.mrb[12].mxu1 %v6133_v38  ;;  %v1457_v38 = vld [vmem:[%s7818_s18 + $0x8c] sm:$0x1]  ;;  %v4461_v20 = vrot.slane %v4460_v8, 4  ;;  %v4478_v47 = vshrl.u32 %v6498_v17, 16  ;;  %v4481_v23 = vshll.u32 %v6498_v17, 16  ;;  %v4487_v28 = vshll.u32 %v6499_v19, 16 }
  0xc8   : > { %7025 = vmatprep.mubr.bf16.mxu1 %v6134_v59  ;;  %7054 = vmatpush3.bf16.msra.mxu1 %v7706_v41  ;;  %v4441_v36 = vrot.slane %v4439_v25, 5  ;;  %v4436_v27 = vor.u32 %v4435_v30, %v4432_v29  ;;  %v4445_v42 = vrot.slane %v4443_v31, 4  ;;  %v7705_v41 = vld [vmem:[%s8925_s1 + $0x208] sm:$0xff]   ;;  %v1603_v48 = vrot.slane %v1457_v38, 5  ;;  %v1461_v29 = vld [vmem:[%s7818_s18 + $0x9c] sm:$0xe] }
  0xc9   : > { %7055 = vmatprep.subr.bf16.mxu1 %v7708_v10  ;;  %v4467_v59 = vshrl.u32 %v6496_v49, 16  ;;  %v1609_v26 = vrot.slane %v1607_v16, 4  ;;  %v4466_v30 = vsel %vm7841_vm2, %v4461_v20, %v4465_v2  ;;  %v4480_v31 = vrot.slane %v4478_v47, 4  ;;  %v6504_v20 = vld [vmem:[%s7818_s18 + $0x60] sm:$0xf] }
  0xca   : > { %v4437_v50 = vrot.slane %v4436_v27, 4  ;;  %v4446_v51 = vor.u32 %v4445_v42, %v4441_v36  ;;  %v1604_v1 = vsel %vm7941_vm5, %v1602_v57, %v1603_v48  ;;  %v4483_v32 = vrot.slane %v4481_v23, 5  ;;  %v6506_v23 = vld [vmem:[%s7818_s18 + $0x68] sm:$0x1] }
  0xcb   : > { %v4469_v3 = vrot.slane %v4467_v59, 4  ;;  %v6137_v7 = vcombine.low %v1601_v55, %v1604_v1  ;;  %v4491_v34 = vshrl.u32 %v6499_v19, 16  ;;  %v4489_v38 = vrot.slane %v4487_v28, 5 }
  0xcc   : > { %7056 = vmatpush3.bf16.msra.mxu1 %v7708_v10  ;;  %v4442_v61 = vsel %vm7841_vm2, %v4437_v50, %v4441_v36  ;;  %v1460_v10 = vld [vmem:[%s7818_s18 + $0x98] sm:$0x1]  ;;  %v4484_v43 = vor.u32 %v4483_v32, %v4480_v31  ;;  %v6107_v48 = vrot.slane %v1461_v29, 9  ;;  %v1614_v49 = vrot.slane %v1462_v35, 5  ;;  %v1467_v31 = vld [vmem:[%s7818_s18 + $0xb4] sm:$0xe] }
  0xcd   : > { %7250 = vmatmul.mubr.bf16.vlgmr.msra.gmra.mrb[0].mxu0 %v6551_v39  ;;  %7329 = vmatprep.subr.bf16.mxu1 %v8445_v60  ;;  %v4470_v14 = vor.u32 %v4469_v3, %v4465_v2  ;;  %v1610_v21 = vrot.slane %v1460_v10, 5  ;;  %v4497_v39 = vshll.u32 %v6500_v22, 16  ;;  %v7715_v2 = vld [vmem:[%s8925_s1 + $0x228] sm:$0xff]  }
  0xce   : > { %7282 = vmatpush3.bf16.msra.mxu0 %v8297_v56  ;;  %v4447_v56 = vrot.slane %v4446_v51, 4  ;;  %v6502_v51 = vld [vmem:[%s7818_s18 + $0x58] sm:$0xf]  ;;  %v4485_v52 = vrot.slane %v4484_v43, 4  ;;  %v1615_v58 = vsel %vm7941_vm5, %v6107_v48, %v1614_v49  ;;  %v1616_v59 = vrot.slane %v1614_v49, 4 }
  0xcf   : > { %7026 = vmatmul.mubr.bf16.gmra.mrb[16].mxu1 %v6135_v5  ;;  %7283 = vmatprep.subr.bf16.mxu0 %v7705_v41  ;;  %v1458_v5 = vld [vmem:[%s7818_s18 + $0x90] sm:$0xe]  ;;  %v4471_v24 = vrot.slane %v4470_v14, 4  ;;  %v1611_v37 = vsel %vm7941_vm5, %v1609_v26, %v1610_v21  ;;  %v4499_v46 = vrot.slane %v4497_v39, 5  ;;  %v6505_v21 = vld [vmem:[%s7818_s18 + $0x64] sm:$0xf] }
  0xd0   : > { %7029 = vmatprep.mubr.bf16.mxu1 %v6136_v40  ;;  %v4452_v6 = vsel %vm7841_vm2, %v4447_v56, %v4451_v44  ;;  %v6106_v11 = vrot.slane %v1458_v5, 9  ;;  %v1463_v40 = vld [vmem:[%s7818_s18 + $0xa4] sm:$0x1]  ;;  %v6501_v44 = vld [vmem:[%s7818_s18 + $0x54] sm:$0xf]  ;;  %v4515_v56 = vshrl.u32 %v6502_v51, 16  ;;  %v4490_v62 = vsel %vm7841_vm2, %v4485_v52, %v4489_v38 }
  0xd1   : > { %v6552_v13 = vcombine.low %v4442_v61, %v4452_v6  ;;  %v4476_v36 = vsel %vm7841_vm2, %v4471_v24, %v4475_v15  ;;  %v1617_v50 = vrot.slane %v1463_v40, 5  ;;  %v4502_v55 = vshrl.u32 %v6501_v44, 16  ;;  %v7718_v14 = vld [vmem:[%s8925_s1 + $0x230] sm:$0xff]   ;;  %v7721_v48 = vld [vmem:[%s8925_s1 + $0x238] sm:$0xff]  }
  0xd2   : > { %7284 = vmatpush3.bf16.msra.mxu0 %v7705_v41  ;;  %v1608_v25 = vsel %vm7941_vm5, %v6106_v11, %v1607_v16  ;;  %v6553_v27 = vcombine.low %v4466_v30, %v4476_v36  ;;  %v4493_v41 = vrot.slane %v4491_v34, 4  ;;  %v4505_v57 = vshll.u32 %v6501_v44, 16  ;;  %v1465_v11 = vld [vmem:[%s7818_s18 + $0xac] sm:$0xf] }
  0xd3   : > { %7285 = vmatprep.subr.bf16.mxu0 %v7707_v0  ;;  %7253 = vmatprep.mubr.bf16.mxu0 %v6552_v13  ;;  %v6138_v42 = vcombine.low %v1608_v25, %v1611_v37  ;;  %v4511_v61 = vshll.u32 %v6502_v51, 16  ;;  %v1618_v3 = vsel %vm7941_vm5, %v1616_v59, %v1617_v50  ;;  %v4517_v5 = vrot.slane %v4515_v56, 4  ;;  %v1468_v37 = vld [vmem:[%s7818_s18 + $0xb8] sm:$0xf] }
  0xd4   : > { %v4494_v53 = vor.u32 %v4493_v41, %v4489_v38  ;;  %v4507_v1 = vrot.slane %v4505_v57, 5  ;;  %v4521_v6 = vshll.u32 %v6503_v54, 16  ;;  %v6139_v9 = vcombine.low %v1615_v58, %v1618_v3  ;;  %v6509_v57 = vld [vmem:[%s7818_s18 + $0x74] sm:$0x1] }
  0xd5   : > { %7254 = vmatmul.mubr.bf16.gmra.mrb[4].mxu0 %v6553_v27  ;;  %v4513_v18 = vrot.slane %v4511_v61, 5  ;;  %v1621_v19 = vrot.slane %v1465_v11, 5  ;;  %v4526_v24 = vshrl.u32 %v6504_v20, 16  ;;  %v4529_v25 = vshll.u32 %v6504_v20, 16 }
  0xd6   : > { %7286 = vmatpush3.bf16.msra.mxu0 %v7707_v0  ;;  %v4495_v63 = vrot.slane %v4494_v53, 4  ;;  %v4504_v0 = vrot.slane %v4502_v55, 4  ;;  %v4523_v17 = vrot.slane %v4521_v6, 5  ;;  %v4535_v30 = vshll.u32 %v6505_v21, 16  ;;  %v6508_v53 = vld [vmem:[%s7818_s18 + $0x70] sm:$0xf] }
  0xd7   : > { %7030 = vmatmul.mubr.bf16.gmra.mrb[20].mxu1 %v6137_v7  ;;  %7287 = vmatprep.subr.bf16.mxu0 %v7709_v12  ;;  %v1464_v7 = vld [vmem:[%s7818_s18 + $0xa8] sm:$0xe]  ;;  %v4518_v16 = vor.u32 %v4517_v5, %v4513_v18  ;;  %v1623_v29 = vrot.slane %v1621_v19, 4  ;;  %v4528_v34 = vrot.slane %v4526_v24, 4  ;;  %v4531_v35 = vrot.slane %v4529_v25, 5 }
  0xd8   : > { %7033 = vmatprep.mubr.bf16.mxu1 %v6138_v42  ;;  %v4500_v8 = vsel %vm7841_vm2, %v4495_v63, %v4499_v46  ;;  %v4508_v10 = vor.u32 %v4507_v1, %v4504_v0  ;;  %v6108_v13 = vrot.slane %v1464_v7, 9  ;;  %v4539_v36 = vshrl.u32 %v6505_v21, 16  ;;  %v1469_v42 = vld [vmem:[%s7818_s18 + $0xbc] sm:$0x1]  ;;  %v6507_v46 = vld [vmem:[%s7818_s18 + $0x6c] sm:$0xf] }
  0xd9   : > { %v6554_v15 = vcombine.low %v4490_v62, %v4500_v8  ;;  %v4519_v26 = vrot.slane %v4518_v16, 4  ;;  %v4537_v40 = vrot.slane %v4535_v30, 5  ;;  %v4545_v27 = vshll.u32 %v6506_v23, 16  ;;  %v7710_v8 = vld [vmem:[%s7818_s18 + $0xc] sm:$0xff]  }
  0xda   : > { %7288 = vmatpush3.bf16.msra.mxu0 %v7709_v12  ;;  %v1466_v12 = vld [vmem:[%s7818_s18 + $0xb0] sm:$0x1]  ;;  %v4509_v22 = vrot.slane %v4508_v10, 4  ;;  %v1622_v28 = vsel %vm7941_vm5, %v6108_v13, %v1621_v19  ;;  %v4532_v44 = vor.u32 %v4531_v35, %v4528_v34  ;;  %v6109_v50 = vrot.slane %v1467_v31, 9  ;;  %v6511_v13 = vld [vmem:[%s7818_s18 + $0x7c] sm:$0xf] }
  0xdb   : > { %7289 = vmatprep.subr.bf16.mxu0 %v7712_v45  ;;  %v1624_v47 = vrot.slane %v1466_v12, 5  ;;  %7257 = vmatprep.mubr.bf16.mxu0 %v6554_v15  ;;  %v4524_v38 = vsel %vm7841_vm2, %v4519_v26, %v4523_v17  ;;  %v4547_v49 = vrot.slane %v4545_v27, 5  ;;  %v1628_v51 = vrot.slane %v1468_v37, 5  ;;  %v6510_v12 = vld [vmem:[%s7818_s18 + $0x78] sm:$0xf] }
  0xdc   : > { %v4514_v32 = vsel %vm7841_vm2, %v4509_v22, %v4513_v18  ;;  %v1631_v52 = vrot.slane %v1469_v42, 5  ;;  %v4533_v54 = vrot.slane %v4532_v44, 4  ;;  %v4550_v58 = vshrl.u32 %v6507_v46, 16  ;;  %v6512_v17 = vld [vmem:[%s7818_s18 + $0x80] sm:$0x1] }
  0xdd   : > { %v1625_v39 = vsel %vm7941_vm5, %v1623_v29, %v1624_v47  ;;  %v6555_v43 = vcombine.low %v4514_v32, %v4524_v38  ;;  %v4553_v59 = vshll.u32 %v6507_v46, 16  ;;  %v1629_v61 = vsel %vm7941_vm5, %v6109_v50, %v1628_v51  ;;  %v6513_v26 = vld [vmem:[%s7818_s18 + $0x84] sm:$0xf]  ;;  %v6514_v32 = vld [vmem:[%s7818_s18 + $0x88] sm:$0xf] }
  0xde   : > { %7290 = vmatpush3.bf16.msra.mxu0 %v7712_v45  ;;  %v6140_v41 = vcombine.low %v1622_v28, %v1625_v39  ;;  %v4541_v45 = vrot.slane %v4539_v36, 4  ;;  %v1630_v56 = vrot.slane %v1628_v51, 4  ;;  %v4559_v62 = vshll.u32 %v6508_v53, 16  ;;  %v7711_v36 = vld [vmem:[%s7818_s18 + $0x18] sm:$0xff]   ;;  %v6515_v37 = vld [vmem:[%s7818_s18 + $0x8c] sm:$0x1] }
  0xdf   : > { %7034 = vmatmul.mubr.bf16.gmra.mrb[24].mxu1 %v6139_v9  ;;  %7291 = vmatprep.subr.bf16.mxu0 %v7715_v2  ;;  %v4563_v63 = vshrl.u32 %v6508_v53, 16  ;;  %v4538_v0 = vsel %vm7841_vm2, %v4533_v54, %v4537_v40  ;;  %v4555_v3 = vrot.slane %v4553_v59, 5  ;;  %v4569_v7 = vshll.u32 %v6509_v57, 16  ;;  %v6517_v57 = vld [vmem:[%s7818_s18 + $0x94] sm:$0xf] }
  0xe0   : > { %7258 = vmatmul.mubr.bf16.gmra.mrb[8].mxu0 %v6555_v43  ;;  %7037 = vmatprep.mubr.bf16.mxu1 %v6140_v41  ;;  %v4542_v55 = vor.u32 %v4541_v45, %v4537_v40  ;;  %v1632_v18 = vsel %vm7941_vm5, %v1630_v56, %v1631_v52  ;;  %v4561_v5 = vrot.slane %v4559_v62, 5  ;;  %v4574_v19 = vshrl.u32 %v6510_v12, 16  ;;  %v7713_v41 = vld [vmem:[%s7818_s18 + $0x24] sm:$0xff]  }
  0xe1   : > { %v4565_v6 = vrot.slane %v4563_v63, 4  ;;  %v6141_v10 = vcombine.low %v1629_v61, %v1632_v18  ;;  %v4571_v16 = vrot.slane %v4569_v7, 5  ;;  %v4577_v21 = vshll.u32 %v6510_v12, 16  ;;  %v6518_v61 = vld [vmem:[%s7818_s18 + $0x98] sm:$0x1] }
  0xe2   : > { %7292 = vmatpush3.bf16.msra.mxu0 %v7715_v2  ;;  %v4543_v1 = vrot.slane %v4542_v55, 4  ;;  %v4552_v2 = vrot.slane %v4550_v58, 4  ;;  %v4583_v22 = vshll.u32 %v6511_v13, 16  ;;  %v4587_v47 = vshrl.u32 %v6511_v13, 16  ;;  %v6516_v55 = vld [vmem:[%s7818_s18 + $0x90] sm:$0xf] }
  0xe3   : > { %7293 = vmatprep.subr.bf16.mxu0 %v7718_v14  ;;  %v4566_v15 = vor.u32 %v4565_v6, %v4561_v5  ;;  %v4576_v24 = vrot.slane %v4574_v19, 4  ;;  %v4593_v25 = vshll.u32 %v6512_v17, 16  ;;  %v4579_v29 = vrot.slane %v4577_v21, 5  ;;  %v6521_v12 = vld [vmem:[%s7818_s18 + $0xa4] sm:$0x1]  ;;  %v7714_v17 = vld [vmem:[%s7818_s18 + $0x30] sm:$0xff]  }
  0xe4   : > { %v4548_v9 = vsel %vm7841_vm2, %v4543_v1, %v4547_v49  ;;  %v4556_v11 = vor.u32 %v4555_v3, %v4552_v2  ;;  %v4585_v30 = vrot.slane %v4583_v22, 5  ;;  %v4589_v31 = vrot.slane %v4587_v47, 4  ;;  %v6519_v3 = vld [vmem:[%s7818_s18 + $0x9c] sm:$0xf] }
  0xe5   : > { %v4567_v23 = vrot.slane %v4566_v15, 4  ;;  %v4595_v35 = vrot.slane %v4593_v25, 5  ;;  %v4598_v38 = vshrl.u32 %v6513_v26, 16  ;;  %v4601_v39 = vshll.u32 %v6513_v26, 16 }
  0xe6   : > { %7294 = vmatpush3.bf16.msra.mxu0 %v7718_v14  ;;  %v6556_v14 = vcombine.low %v4538_v0, %v4548_v9  ;;  %v4557_v20 = vrot.slane %v4556_v11, 4  ;;  %v4580_v27 = vor.u32 %v4579_v29, %v4576_v24  ;;  %v4590_v42 = vor.u32 %v4589_v31, %v4585_v30  ;;  %v6520_v9 = vld [vmem:[%s7818_s18 + $0xa0] sm:$0xf]  ;;  %v7732_v29 = vld [vmem:[%s8925_s1 + $0x110] sm:$0xff]  }
  0xe7   : > { %7295 = vmatprep.subr.bf16.mxu0 %v7721_v48  ;;  %7038 = vmatmul.mubr.bf16.gmra.mrb[28].mxu1 %v6141_v10  ;;  %v4572_v34 = vsel %vm7841_vm2, %v4567_v23, %v4571_v16  ;;  %v4607_v43 = vshll.u32 %v6514_v32, 16  ;;  %v4600_v44 = vrot.slane %v4598_v38, 4  ;;  %v4603_v45 = vrot.slane %v4601_v39, 5  ;;  %v7716_v23 = vld [vmem:[%s7818_s18 + $0x3c] sm:$0xff]   ;;  %v6523_v38 = vld [vmem:[%s7818_s18 + $0xac] sm:$0xf] }
  0xe8   : > { %7261 = vmatprep.mubr.bf16.mxu0 %v6556_v14  ;;  %7057 = vmatprep.mubr.bf16.mxu1 %v7710_v8  ;;  %v4562_v28 = vsel %vm7841_vm2, %v4557_v20, %v4561_v5  ;;  %v4611_v46 = vshrl.u32 %v6514_v32, 16  ;;  %v4581_v49 = vrot.slane %v4580_v27, 4  ;;  %v4591_v50 = vrot.slane %v4590_v42, 4  ;;  %v7731_v8 = vld [vmem:[%s8925_s1 + $0x108] sm:$0xff]   ;;  %v6524_v39 = vld [vmem:[%s7818_s18 + $0xb0] sm:$0x1] }
  0xe9   : > { %v6557_v40 = vcombine.low %v4562_v28, %v4572_v34  ;;  %v4609_v51 = vrot.slane %v4607_v43, 5  ;;  %v4604_v52 = vor.u32 %v4603_v45, %v4600_v44  ;;  %v4622_v56 = vshrl.u32 %v6516_v55, 16  ;;  %v6522_v34 = vld [vmem:[%s7818_s18 + $0xa8] sm:$0xf] }
  0xea   : > { %7296 = vmatpush3.bf16.msra.mxu0 %v7721_v48  ;;  %v4617_v48 = vshll.u32 %v6515_v37, 16  ;;  %v4613_v53 = vrot.slane %v4611_v46, 4  ;;  %v4586_v58 = vsel %vm7841_vm2, %v4581_v49, %v4585_v30  ;;  %v4596_v59 = vsel %vm7841_vm2, %v4591_v50, %v4595_v35  ;;  %v7717_v49 = vld [vmem:[%s7818_s18 + $0x48] sm:$0xff]   ;;  %v7733_v50 = vld [vmem:[%s8925_s1 + $0x118] sm:$0xff]  }
  0xeb   : > { %7262 = vmatmul.mubr.bf16.gmra.mrb[12].mxu0 %v6557_v40  ;;  %v4625_v62 = vshll.u32 %v6516_v55, 16  ;;  %v6558_v63 = vcombine.low %v4586_v58, %v4596_v59  ;;  %v4605_v0 = vrot.slane %v4604_v52, 4  ;;  %v4631_v2 = vshll.u32 %v6517_v57, 16  ;;  %v6525_v55 = vld [vmem:[%s7818_s18 + $0xb4] sm:$0xf] }
  0xec   : > { %v4619_v54 = vrot.slane %v4617_v48, 5  ;;  %v4614_v1 = vor.u32 %v4613_v53, %v4609_v51  ;;  %v4624_v18 = vrot.slane %v4622_v56, 4  ;;  %v4635_v6 = vshrl.u32 %v6517_v57, 16  ;;  %v7719_v57 = vld [vmem:[%s7818_s18 + $0x54] sm:$0xff]  }
  0xed   : > { %v4627_v5 = vrot.slane %v4625_v62, 5  ;;  %v4641_v7 = vshll.u32 %v6518_v61, 16  ;;  %7265 = vmatprep.mubr.bf16.mxu0 %v6558_v63  ;;  %v4610_v10 = vsel %vm7841_vm2, %v4605_v0, %v4609_v51  ;;  %v4633_v11 = vrot.slane %v4631_v2, 5  ;;  %v6526_v56 = vld [vmem:[%s7818_s18 + $0xb8] sm:$0xf] }
  0xee   : > { %v4646_v13 = vshrl.u32 %v6519_v3, 16  ;;  %v4637_v15 = vrot.slane %v4635_v6, 4  ;;  %v4649_v19 = vshll.u32 %v6519_v3, 16  ;;  %v4655_v22 = vshll.u32 %v6520_v9, 16  ;;  %v6527_v62 = vld [vmem:[%s7818_s18 + $0xbc] sm:$0x1] }
  0xef   : > { %7058 = vmatmul.mubr.bf16.vlgmr.msra.gmra.mrb[0].mxu1 %v7711_v36  ;;  %v4628_v14 = vor.u32 %v4627_v5, %v4624_v18  ;;  %v4643_v16 = vrot.slane %v4641_v7, 5  ;;  %v4659_v47 = vshrl.u32 %v6520_v9, 16  ;;  %v4665_v32 = vshll.u32 %v6521_v12, 16  ;;  %v7734_v7 = vld [vmem:[%s8925_s1 + $0x120] sm:$0xff]  }
  0xf0   : > { %7337 = vmatpush3.bf16.msra.mxu1 %v8445_v60  ;;  %7061 = vmatprep.mubr.bf16.mxu1 %v7713_v41  ;;  %v4615_v60 = vrot.slane %v4614_v1, 4  ;;  %v4648_v21 = vrot.slane %v4646_v13, 4  ;;  %v4638_v26 = vor.u32 %v4637_v15, %v4633_v11  ;;  %v4651_v28 = vrot.slane %v4649_v19, 5  ;;  %v6529_v15 = vld [vmem:[%s7818_s18 + $0xc4] sm:$0xf] }
  0xf1   : > { %7330 = vmatprep.subr.bf16.mxu1 %v7731_v8  ;;  %v4629_v25 = vrot.slane %v4628_v14, 4  ;;  %v4657_v30 = vrot.slane %v4655_v22, 5  ;;  %v4661_v31 = vrot.slane %v4659_v47, 4  ;;  %v4670_v40 = vshrl.u32 %v6522_v34, 16 }
  0xf2   : > { %v4620_v20 = vsel %vm7841_vm2, %v4615_v60, %v4619_v54  ;;  %v4639_v36 = vrot.slane %v4638_v26, 4  ;;  %v4652_v37 = vor.u32 %v4651_v28, %v4648_v21  ;;  %v4667_v42 = vrot.slane %v4665_v32, 5  ;;  %v6530_v21 = vld [vmem:[%s7818_s18 + $0xc8] sm:$0x1]  ;;  %v7720_v26 = vld [vmem:[%s7818_s18 + $0x60] sm:$0xff]  }
  0xf3   : > { %v6559_v24 = vcombine.low %v4610_v10, %v4620_v20  ;;  %v4634_v35 = vsel %vm7841_vm2, %v4629_v25, %v4633_v11  ;;  %v4662_v27 = vor.u32 %v4661_v31, %v4657_v30  ;;  %v4673_v43 = vshll.u32 %v6522_v34, 16  ;;  %v6528_v11 = vld [vmem:[%s7818_s18 + $0xc0] sm:$0xf]  ;;  %v7735_v28 = vld [vmem:[%s8925_s1 + $0x128] sm:$0xff]  }
  0xf4   : > { %7338 = vmatpush3.bf16.msra.mxu1 %v7731_v8  ;;  %v4679_v41 = vshll.u32 %v6523_v38, 16  ;;  %v4644_v44 = vsel %vm7841_vm2, %v4639_v36, %v4643_v16  ;;  %v4653_v45 = vrot.slane %v4652_v37, 4  ;;  %v4672_v46 = vrot.slane %v4670_v40, 4  ;;  %v6531_v34 = vld [vmem:[%s7818_s18 + $0xcc] sm:$0xf] }
  0xf5   : > { %7331 = vmatprep.subr.bf16.mxu1 %v7732_v29  ;;  %7266 = vmatmul.mubr.bf16.gmra.mrb[16].mxu0 %v6559_v24  ;;  %v4683_v48 = vshrl.u32 %v6523_v38, 16  ;;  %v6560_v51 = vcombine.low %v4634_v35, %v4644_v44  ;;  %v4663_v52 = vrot.slane %v4662_v27, 4  ;;  %v4675_v53 = vrot.slane %v4673_v43, 5  ;;  %v6532_v35 = vld [vmem:[%s7818_s18 + $0xd0] sm:$0xf] }
  0xf6   : > { %v4681_v54 = vrot.slane %v4679_v41, 5  ;;  %v4658_v58 = vsel %vm7841_vm2, %v4653_v45, %v4657_v30  ;;  %v4689_v61 = vshll.u32 %v6524_v39, 16  ;;  %v4694_v1 = vshrl.u32 %v6525_v55, 16  ;;  %v7722_v36 = vld [vmem:[%s7818_s18 + $0x6c] sm:$0xff]   ;;  %v6533_v40 = vld [vmem:[%s7818_s18 + $0xd4] sm:$0x1] }
  0xf7   : > { %7062 = vmatmul.mubr.bf16.gmra.mrb[4].mxu1 %v7714_v17  ;;  %v4685_v59 = vrot.slane %v4683_v48, 4  ;;  %7269 = vmatprep.mubr.bf16.mxu0 %v6560_v51  ;;  %v4668_v63 = vsel %vm7841_vm2, %v4663_v52, %v4667_v42  ;;  %v4676_v0 = vor.u32 %v4675_v53, %v4672_v46  ;;  %v4697_v2 = vshll.u32 %v6525_v55, 16 }
  0xf8   : > { %7065 = vmatprep.mubr.bf16.mxu1 %v7716_v23  ;;  %7339 = vmatpush3.bf16.msra.mxu1 %v7732_v29  ;;  %v6561_v3 = vcombine.low %v4658_v58, %v4668_v63  ;;  %v4691_v5 = vrot.slane %v4689_v61, 5  ;;  %v4703_v6 = vshll.u32 %v6526_v56, 16  ;;  %v4696_v9 = vrot.slane %v4694_v1, 4  ;;  %v6574_v61 = vld [vmem:[%s7818_s18 + $0x18] sm:$0xe] }
  0xf9   : > { %7332 = vmatprep.subr.bf16.mxu1 %v7733_v50  ;;  %v4686_v18 = vor.u32 %v4685_v59, %v4681_v54  ;;  %v4677_v8 = vrot.slane %v4676_v0, 4  ;;  %v4699_v10 = vrot.slane %v4697_v2, 5  ;;  %v4707_v60 = vshrl.u32 %v6526_v56, 16  ;;  %v6575_v56 = vld [vmem:[%s7818_s18 + $0x1c] sm:$0xf] }
  0xfa   : > { %v4705_v13 = vrot.slane %v4703_v6, 5  ;;  %v4713_v14 = vshll.u32 %v6527_v62, 16  ;;  %v4718_v16 = vshrl.u32 %v6528_v11, 16  ;;  %v4721_v22 = vshll.u32 %v6528_v11, 16  ;;  %v6576_v0 = vld [vmem:[%s7818_s18 + $0x20] sm:$0x1] }
  0xfb   : > { %v4687_v12 = vrot.slane %v4686_v18, 4  ;;  %v4682_v17 = vsel %vm7841_vm2, %v4677_v8, %v4681_v54  ;;  %v4700_v19 = vor.u32 %v4699_v10, %v4696_v9  ;;  %v4709_v20 = vrot.slane %v4707_v60, 4  ;;  %v7723_v6 = vld [vmem:[%s7818_s18 + $0x78] sm:$0xff]   ;;  %v6577_v60 = vld [vmem:[%s7818_s18 + $0x24] sm:$0xe] }
  0xfc   : > { %7340 = vmatpush3.bf16.msra.mxu1 %v7733_v50  ;;  %v4715_v23 = vrot.slane %v4713_v14, 5  ;;  %v4720_v24 = vrot.slane %v4718_v16, 4  ;;  %v4727_v25 = vshll.u32 %v6529_v15, 16  ;;  %v4723_v32 = vrot.slane %v4721_v22, 5  ;;  %v7736_v50 = vld [vmem:[%s8925_s1 + $0x130] sm:$0xff]   ;;  %v7724_v16 = vld [vmem:[%s7818_s18 + $0x84] sm:$0xff]  }
  0xfd   : > { %7333 = vmatprep.subr.bf16.mxu1 %v7734_v7  ;;  %7270 = vmatmul.mubr.bf16.gmra.mrb[20].mxu0 %v6561_v3  ;;  %v4692_v47 = vsel %vm7841_vm2, %v4687_v12, %v4691_v5  ;;  %v4701_v30 = vrot.slane %v4700_v19, 4  ;;  %v4710_v31 = vor.u32 %v4709_v20, %v4705_v13  ;;  %v4731_v38 = vshrl.u32 %v6529_v15, 16  ;;  %v6578_v11 = vld [vmem:[%s7818_s18 + $0x28] sm:$0xf]  ;;  %v6579_v15 = vld [vmem:[%s7818_s18 + $0x2c] sm:$0x1] }
  0xfe   : > { %v6562_v29 = vcombine.low %v4682_v17, %v4692_v47  ;;  %v4729_v37 = vrot.slane %v4727_v25, 5  ;;  %v4737_v39 = vshll.u32 %v6530_v21, 16  ;;  %v4742_v27 = vshrl.u32 %v6531_v34, 16  ;;  %v6580_v22 = vld [vmem:[%s7818_s18 + $0x30] sm:$0xe] }
  0xff   : > { %7066 = vmatmul.mubr.bf16.gmra.mrb[8].mxu1 %v7717_v49  ;;  %v4706_v42 = vsel %vm7841_vm2, %v4701_v30, %v4705_v13  ;;  %v4711_v43 = vrot.slane %v4710_v31, 4  ;;  %v4724_v41 = vor.u32 %v4723_v32, %v4720_v24  ;;  %v4745_v44 = vshll.u32 %v6531_v34, 16  ;;  %v6581_v25 = vld [vmem:[%s7818_s18 + $0x34] sm:$0xf] }
 0x100   : > { %7069 = vmatprep.mubr.bf16.mxu1 %v7719_v57  ;;  %7341 = vmatpush3.bf16.msra.mxu1 %v7734_v7  ;;  %v4733_v45 = vrot.slane %v4731_v38, 4  ;;  %v4739_v46 = vrot.slane %v4737_v39, 5  ;;  %v4744_v48 = vrot.slane %v4742_v27, 4  ;;  %v4751_v49 = vshll.u32 %v6532_v35, 16  ;;  %v7737_v7 = vld [vmem:[%s8925_s1 + $0x138] sm:$0xff]  }
 0x101   : > { %7334 = vmatprep.subr.bf16.mxu1 %v7735_v28  ;;  %7273 = vmatprep.mubr.bf16.mxu0 %v6562_v29  ;;  %v4716_v51 = vsel %vm7841_vm2, %v4711_v43, %v4715_v23  ;;  %v4725_v52 = vrot.slane %v4724_v41, 4  ;;  %v4747_v53 = vrot.slane %v4745_v44, 5  ;;  %v4755_v54 = vshrl.u32 %v6532_v35, 16  ;;  %v6585_v38 = vld [vmem:[%s7818_s18 + $0x44] sm:$0x1] }
 0x102   : > { %v6563_v55 = vcombine.low %v4706_v42, %v4716_v51  ;;  %v4734_v57 = vor.u32 %v4733_v45, %v4729_v37  ;;  %v4753_v58 = vrot.slane %v4751_v49, 5  ;;  %v4761_v59 = vshll.u32 %v6533_v40, 16  ;;  %v7725_v42 = vld [vmem:[%s7818_s18 + $0x90] sm:$0xff]   ;;  %v6586_v41 = vld [vmem:[%s7818_s18 + $0x48] sm:$0xe] }
 0x103   : > { %v4748_v62 = vor.u32 %v4747_v53, %v4744_v48  ;;  %v4757_v63 = vrot.slane %v4755_v54, 4  ;;  %v6622_v1 = vrot.slane %v6574_v61, 9  ;;  %v4730_v2 = vsel %vm7841_vm2, %v4725_v52, %v4729_v37  ;;  %v6584_v37 = vld [vmem:[%s7818_s18 + $0x40] sm:$0xf]  ;;  %v6587_v49 = vld [vmem:[%s7818_s18 + $0x4c] sm:$0xf] }
 0x104   : > { %7342 = vmatpush3.bf16.msra.mxu1 %v7735_v28  ;;  %v4735_v3 = vrot.slane %v4734_v57, 4  ;;  %v5249_v18 = vrot.slane %v6575_v56, 5  ;;  %v5252_v5 = vrot.slane %v6576_v0, 5  ;;  %v4763_v10 = vrot.slane %v4761_v59, 5  ;;  %v7726_v48 = vld [vmem:[%s7818_s18 + $0x9c] sm:$0xff]  }
 0x105   : > { %7335 = vmatprep.subr.bf16.mxu1 %v7736_v50  ;;  %7274 = vmatmul.mubr.bf16.gmra.mrb[24].mxu0 %v6563_v55  ;;  %v4749_v8 = vrot.slane %v4748_v62, 4  ;;  %v4758_v9 = vor.u32 %v4757_v63, %v4753_v58  ;;  %v5256_v21 = vrot.slane %v6578_v11, 5  ;;  %v6623_v23 = vrot.slane %v6577_v60, 9  ;;  %v6589_v57 = vld [vmem:[%s7818_s18 + $0x54] sm:$0xe] }
 0x106   : > { %v4740_v12 = vsel %vm7841_vm2, %v4735_v3, %v4739_v46  ;;  %v5250_v13 = vsel %vm7941_vm5, %v6622_v1, %v5249_v18  ;;  %v5251_v14 = vrot.slane %v5249_v18, 4  ;;  %v5259_v24 = vrot.slane %v6579_v15, 5  ;;  %v6591_v59 = vld [vmem:[%s7818_s18 + $0x5c] sm:$0x1]  ;;  %v6592_v18 = vld [vmem:[%s7818_s18 + $0x60] sm:$0xe] }
 0x107   : > { %7070 = vmatmul.mubr.bf16.gmra.mrb[12].mxu1 %v7720_v26  ;;  %v6564_v17 = vcombine.low %v4730_v2, %v4740_v12  ;;  %v4754_v19 = vsel %vm7841_vm2, %v4749_v8, %v4753_v58  ;;  %v4759_v20 = vrot.slane %v4758_v9, 4  ;;  %v6582_v26 = vld [vmem:[%s7818_s18 + $0x38] sm:$0x1]  ;;  %v5258_v30 = vrot.slane %v5256_v21, 4  ;;  %v6594_v8 = vld [vmem:[%s7818_s18 + $0x68] sm:$0x1] }
 0x108   : > { %7073 = vmatprep.mubr.bf16.mxu1 %v7722_v36  ;;  %7343 = vmatpush3.bf16.msra.mxu1 %v7736_v50  ;;  %v5253_v47 = vsel %vm7941_vm5, %v5251_v14, %v5252_v5  ;;  %v6624_v31 = vrot.slane %v6580_v22, 9  ;;  %v5263_v34 = vrot.slane %v6581_v25, 5  ;;  %v5266_v35 = vrot.slane %v6582_v26, 5  ;;  %v6583_v36 = vld [vmem:[%s7818_s18 + $0x3c] sm:$0xe]  ;;  %v7727_v15 = vld [vmem:[%s7818_s18 + $0xa8] sm:$0xff]  }
 0x109   : > { %7336 = vmatprep.subr.bf16.mxu1 %v7737_v7  ;;  %7277 = vmatprep.mubr.bf16.mxu0 %v6564_v17  ;;  %v4764_v28 = vsel %vm7841_vm2, %v4759_v20, %v4763_v10  ;;  %v6654_v29 = vcombine.low %v5250_v13, %v5253_v47  ;;  %v6625_v39 = vrot.slane %v6583_v36, 9  ;;  %v5270_v40 = vrot.slane %v6584_v37, 5  ;;  %v6588_v50 = vld [vmem:[%s7818_s18 + $0x50] sm:$0x1]  ;;  %v6590_v58 = vld [vmem:[%s7818_s18 + $0x58] sm:$0xf] }
 0x10a   : > { %v6565_v32 = vcombine.low %v4754_v19, %v4764_v28  ;;  %v5265_v27 = vrot.slane %v5263_v34, 4  ;;  %v5273_v43 = vrot.slane %v6585_v38, 5  ;;  %v5257_v44 = vsel %vm7941_vm5, %v6623_v23, %v5256_v21  ;;  %v6593_v5 = vld [vmem:[%s7818_s18 + $0x64] sm:$0xf]  ;;  %v6595_v13 = vld [vmem:[%s7818_s18 + $0x6c] sm:$0xe] }
 0x10b   : > { %v5260_v45 = vsel %vm7941_vm5, %v5258_v30, %v5259_v24  ;;  %v5272_v46 = vrot.slane %v5270_v40, 4  ;;  %v6626_v51 = vrot.slane %v6586_v41, 9  ;;  %v5264_v52 = vsel %vm7941_vm5, %v6624_v31, %v5263_v34  ;;  %v6596_v19 = vld [vmem:[%s7818_s18 + $0x70] sm:$0xf]  ;;  %v6597_v20 = vld [vmem:[%s7818_s18 + $0x74] sm:$0x1] }
 0x10c   : > { %7344 = vmatpush3.bf16.msra.mxu1 %v7737_v7  ;;  %v5267_v53 = vsel %vm7941_vm5, %v5265_v27, %v5266_v35  ;;  %v5277_v54 = vrot.slane %v6587_v49, 5  ;;  %v5280_v55 = vrot.slane %v6588_v50, 5  ;;  %v6655_v61 = vcombine.low %v5257_v44, %v5260_v45  ;;  %v7728_v23 = vld [vmem:[%s7818_s18 + $0xb4] sm:$0xff]   ;;  %v6246_v26 = vld [vmem:[%s7818_s18 + $0x6c] sm:$0xf] }
 0x10d   : > { %7278 = vmatmul.mubr.bf16.gmra.mrb[28].mxu0 %v6565_v32  ;;  %v8655_v56 = vsel %vm7941_vm5, %v6625_v39, %v5270_v40  ;;  %v6627_v63 = vrot.slane %v6589_v57, 9  ;;  %v6656_v0 = vcombine.low %v5264_v52, %v5267_v53  ;;  %v8659_v1 = vsel %vm7941_vm5, %v5272_v46, %v5273_v43  ;;  %v6247_v28 = vld [vmem:[%s7818_s18 + $0x70] sm:$0xf]  ;;  %v6248_v31 = vld [vmem:[%s7818_s18 + $0x74] sm:$0x1] }
 0x10e   : > { %7297 = vmatprep.mubr.bf16.mxu0 %v6654_v29  ;;  %v5279_v62 = vrot.slane %v5277_v54, 4  ;;  %v5284_v2 = vrot.slane %v6590_v58, 5  ;;  %v5287_v3 = vrot.slane %v6591_v59, 5  ;;  %v6628_v9 = vrot.slane %v6592_v18, 9  ;;  %v6598_v35 = vld [vmem:[%s7818_s18 + $0x78] sm:$0xe] }
 0x10f   : > { %7074 = vmatmul.mubr.bf16.gmra.mrb[16].mxu1 %v7723_v6  ;;  %v8665_v6 = vsel %vm7941_vm5, %v6626_v51, %v5277_v54  ;;  %v5291_v10 = vrot.slane %v6593_v5, 5  ;;  %v5294_v12 = vrot.slane %v6594_v8, 5  ;;  %v6657_v14 = vcombine.low %v8655_v56, %v8659_v1  ;;  %v6599_v40 = vld [vmem:[%s7818_s18 + $0x7c] sm:$0xf]  ;;  %v6600_v27 = vld [vmem:[%s7818_s18 + $0x80] sm:$0x1] }
 0x110   : > { %7077 = vmatprep.mubr.bf16.mxu1 %v7724_v16  ;;  %v8669_v7 = vsel %vm7941_vm5, %v5279_v62, %v5280_v55  ;;  %v8674_v60 = vsel %vm7941_vm5, %v6627_v63, %v5284_v2  ;;  %v5286_v11 = vrot.slane %v5284_v2, 4  ;;  %v6629_v21 = vrot.slane %v6595_v13, 9  ;;  %v6249_v45 = vld [vmem:[%s7818_s18 + $0x78] sm:$0xf]  ;;  %v6250_v51 = vld [vmem:[%s7818_s18 + $0x7c] sm:$0xf] }
 0x111   : > { %v8682_v16 = vsel %vm7941_vm5, %v6628_v9, %v5291_v10  ;;  %v5293_v17 = vrot.slane %v5291_v10, 4  ;;  %v6658_v22 = vcombine.low %v8665_v6, %v8669_v7  ;;  %v5298_v24 = vrot.slane %v6596_v19, 5  ;;  %v6251_v57 = vld [vmem:[%s7818_s18 + $0x80] sm:$0x1]  ;;  %v6601_v62 = vld [vmem:[%s7818_s18 + $0x84] sm:$0xe] }
 0x112   : > { %v8690_v47 = vsel %vm7941_vm5, %v5286_v11, %v5287_v3  ;;  %v5301_v25 = vrot.slane %v6597_v20, 5  ;;  %v2711_v32 = vshrl.u32 %v6246_v26, 16  ;;  %v2714_v34 = vshll.u32 %v6246_v26, 16  ;;  %v6602_v3 = vld [vmem:[%s7818_s18 + $0x88] sm:$0xf]  ;;  %v7729_v9 = vld [vmem:[%s7818_s18 + $0xc0] sm:$0xff]  }
 0x113   : > { %v6659_v29 = vcombine.low %v8674_v60, %v8690_v47  ;;  %v8699_v30 = vsel %vm7941_vm5, %v5293_v17, %v5294_v12  ;;  %v8707_v37 = vsel %vm7941_vm5, %v6629_v21, %v5298_v24  ;;  %v5300_v38 = vrot.slane %v5298_v24, 4  ;;  %v6603_v8 = vld [vmem:[%s7818_s18 + $0x8c] sm:$0x1]  ;;  %v6253_v21 = vld [vmem:[%s7818_s18 + $0x88] sm:$0xf] }
 0x114   : > { %v6660_v36 = vcombine.low %v8682_v16, %v8699_v30  ;;  %v2720_v39 = vshll.u32 %v6247_v28, 16  ;;  %v2716_v43 = vrot.slane %v2714_v34, 5  ;;  %v2724_v41 = vshrl.u32 %v6247_v28, 16 }
 0x115   : > { %7298 = vmatmul.mubr.bf16.vlgmr.msra.gmra.mrb[0].mxu0 %v6655_v61  ;;  %v2730_v44 = vshll.u32 %v6248_v31, 16  ;;  %v8714_v46 = vsel %vm7941_vm5, %v5300_v38, %v5301_v25  ;;  %v6630_v49 = vrot.slane %v6598_v35, 9  ;;  %v5305_v50 = vrot.slane %v6599_v40, 5  ;;  %v6254_v31 = vld [vmem:[%s7818_s18 + $0x8c] sm:$0x1] }
 0x116   : > { %7301 = vmatprep.mubr.bf16.mxu0 %v6656_v0  ;;  %v6661_v52 = vcombine.low %v8707_v37, %v8714_v46  ;;  %v2726_v54 = vrot.slane %v2724_v41, 4  ;;  %v5308_v61 = vrot.slane %v6600_v27, 5  ;;  %v2735_v56 = vshrl.u32 %v6249_v45, 16  ;;  %v6604_v27 = vld [vmem:[%s7818_s18 + $0x90] sm:$0xe] }
 0x117   : > { %7078 = vmatmul.mubr.bf16.gmra.mrb[20].mxu1 %v7725_v42  ;;  %v2713_v42 = vrot.slane %v2711_v32, 4  ;;  %v2732_v55 = vrot.slane %v2730_v44, 5  ;;  %v8722_v58 = vsel %vm7941_vm5, %v6630_v49, %v5305_v50  ;;  %v5307_v59 = vrot.slane %v5305_v50, 4 }
 0x118   : > { %7081 = vmatprep.mubr.bf16.mxu1 %v7726_v48  ;;  %v2722_v48 = vrot.slane %v2720_v39, 5  ;;  %v2738_v1 = vshll.u32 %v6249_v45, 16  ;;  %v2744_v2 = vshll.u32 %v6250_v51, 16  ;;  %v2737_v5 = vrot.slane %v2735_v56, 4  ;;  %v6605_v45 = vld [vmem:[%s7818_s18 + $0x94] sm:$0xf] }
 0x119   : > { %v2717_v53 = vor.u32 %v2716_v43, %v2713_v42  ;;  %v8728_v18 = vsel %vm7941_vm5, %v5307_v59, %v5308_v61  ;;  %v2748_v6 = vshrl.u32 %v6250_v51, 16  ;;  %v2754_v7 = vshll.u32 %v6251_v57, 16  ;;  %v6256_v57 = vld [vmem:[%s7818_s18 + $0x94] sm:$0xf] }
 0x11a   : > { %v2727_v0 = vor.u32 %v2726_v54, %v2722_v48  ;;  %v6662_v12 = vcombine.low %v8722_v58, %v8728_v18  ;;  %v2740_v13 = vrot.slane %v2738_v1, 5  ;;  %v6631_v20 = vrot.slane %v6601_v62, 9  ;;  %v6255_v54 = vld [vmem:[%s7818_s18 + $0x90] sm:$0xf]  ;;  %v6607_v1 = vld [vmem:[%s7818_s18 + $0x9c] sm:$0xe] }
 0x11b   : > { %v2718_v63 = vrot.slane %v2717_v53, 4  ;;  %v2750_v17 = vrot.slane %v2748_v6, 4  ;;  %v2756_v19 = vrot.slane %v2754_v7, 5  ;;  %v5312_v24 = vrot.slane %v6602_v3, 5  ;;  %v6606_v53 = vld [vmem:[%s7818_s18 + $0x98] sm:$0x1] }
 0x11c   : > { %v2728_v11 = vrot.slane %v2727_v0, 4  ;;  %v5315_v25 = vrot.slane %v6603_v8, 5  ;;  %v2768_v40 = vshll.u32 %v6253_v21, 16  ;;  %v2772_v44 = vshrl.u32 %v6253_v21, 16  ;;  %v6608_v7 = vld [vmem:[%s7818_s18 + $0xa0] sm:$0xf] }
 0x11d   : > { %7302 = vmatmul.mubr.bf16.gmra.mrb[4].mxu0 %v6657_v14  ;;  %v2723_v10 = vsel %vm7841_vm2, %v2718_v63, %v2722_v48  ;;  %v6252_v14 = vld [vmem:[%s7818_s18 + $0x84] sm:$0xf]  ;;  %v8743_v38 = vsel %vm7941_vm5, %v6631_v20, %v5312_v24  ;;  %v5314_v39 = vrot.slane %v5312_v24, 4  ;;  %v2778_v51 = vshll.u32 %v6254_v31, 16  ;;  %v6257_v63 = vld [vmem:[%s7818_s18 + $0x98] sm:$0x1] }
 0x11e   : > { %7305 = vmatprep.mubr.bf16.mxu0 %v6658_v22  ;;  %v2733_v22 = vsel %vm7841_vm2, %v2728_v11, %v2732_v55  ;;  %v2759_v32 = vshrl.u32 %v6252_v14, 16  ;;  %v2762_v34 = vshll.u32 %v6252_v14, 16  ;;  %v2770_v50 = vrot.slane %v2768_v40, 5  ;;  %v6258_v20 = vld [vmem:[%s7818_s18 + $0x9c] sm:$0xf] }
 0x11f   : > { %7082 = vmatmul.mubr.bf16.gmra.mrb[24].mxu1 %v7727_v15  ;;  %v2746_v15 = vrot.slane %v2744_v2, 5  ;;  %v6294_v26 = vcombine.low %v2723_v10, %v2733_v22  ;;  %v8754_v49 = vsel %vm7941_vm5, %v5314_v39, %v5315_v25  ;;  %v2774_v55 = vrot.slane %v2772_v44, 4  ;;  %v6259_v25 = vld [vmem:[%s7818_s18 + $0xa0] sm:$0xf]  ;;  %v6260_v39 = vld [vmem:[%s7818_s18 + $0xa4] sm:$0x1] }
 0x120   : > { %7085 = vmatprep.mubr.bf16.mxu1 %v7728_v23  ;;  %v2741_v23 = vor.u32 %v2740_v13, %v2737_v5  ;;  %v2761_v43 = vrot.slane %v2759_v32, 4  ;;  %v2764_v41 = vrot.slane %v2762_v34, 5  ;;  %v6663_v47 = vcombine.low %v8743_v38, %v8754_v49  ;;  %v6609_v13 = vld [vmem:[%s7818_s18 + $0xa4] sm:$0x1]  ;;  %v6611_v44 = vld [vmem:[%s7818_s18 + $0xac] sm:$0xf] }
 0x121   : > { %v2751_v28 = vor.u32 %v2750_v17, %v2746_v15  ;;  %v2780_v61 = vrot.slane %v2778_v51, 5  ;;  %v6632_v56 = vrot.slane %v6604_v27, 9  ;;  %v5319_v62 = vrot.slane %v6605_v45, 5 }
 0x122   : > { %v2742_v35 = vrot.slane %v2741_v23, 4  ;;  %v2775_v16 = vor.u32 %v2774_v55, %v2770_v50  ;;  %v5322_v30 = vrot.slane %v6606_v53, 5  ;;  %v2786_v5 = vshll.u32 %v6255_v54, 16  ;;  %v6612_v53 = vld [vmem:[%s7818_s18 + $0xb0] sm:$0x1] }
 0x123   : > { %v2752_v42 = vrot.slane %v2751_v28, 4  ;;  %v8770_v2 = vsel %vm7941_vm5, %v6632_v56, %v5319_v62  ;;  %v5321_v3 = vrot.slane %v5319_v62, 4  ;;  %v2792_v6 = vshll.u32 %v6256_v57, 16 }
 0x124   : > { %v2747_v48 = vsel %vm7841_vm2, %v2742_v35, %v2746_v15  ;;  %v2796_v11 = vshrl.u32 %v6256_v57, 16  ;;  %v2788_v15 = vrot.slane %v2786_v5, 5  ;;  %v6633_v24 = vrot.slane %v6607_v1, 9 }
 0x125   : > { %7306 = vmatmul.mubr.bf16.gmra.mrb[8].mxu0 %v6659_v29  ;;  %v2757_v60 = vsel %vm7841_vm2, %v2752_v42, %v2756_v19  ;;  %v2765_v29 = vor.u32 %v2764_v41, %v2761_v43  ;;  %v5323_v14 = vsel %vm7941_vm5, %v5321_v3, %v5322_v30  ;;  %v2794_v17 = vrot.slane %v2792_v6, 5  ;;  %v6610_v43 = vld [vmem:[%s7818_s18 + $0xa8] sm:$0xe] }
 0x126   : > { %7309 = vmatprep.mubr.bf16.mxu0 %v6660_v36  ;;  %v6295_v59 = vcombine.low %v2747_v48, %v2757_v60  ;;  %v2783_v36 = vshrl.u32 %v6255_v54, 16  ;;  %v2802_v19 = vshll.u32 %v6257_v63, 16  ;;  %v6664_v22 = vcombine.low %v8770_v2, %v5323_v14  ;;  %v6261_v54 = vld [vmem:[%s7818_s18 + $0xa8] sm:$0xf]  ;;  %v6613_v2 = vld [vmem:[%s7818_s18 + $0xb4] sm:$0xe] }
 0x127   : > { %7086 = vmatmul.mubr.bf16.gmra.mrb[28].mxu1 %v7729_v9  ;;  %v2766_v0 = vrot.slane %v2765_v29, 4  ;;  %v2776_v9 = vrot.slane %v2775_v16, 4  ;;  %v2798_v23 = vrot.slane %v2796_v11, 4  ;;  %v5326_v32 = vrot.slane %v6608_v7, 5  ;;  %v6615_v14 = vld [vmem:[%s7818_s18 + $0xbc] sm:$0x1] }
 0x128   : > { %7121 = vmatprep.mubr.bf16.mxu1 %v6294_v26  ;;  %v2785_v10 = vrot.slane %v2783_v36, 4  ;;  %v2804_v31 = vrot.slane %v2802_v19, 5  ;;  %v5329_v35 = vrot.slane %v6609_v13, 5  ;;  %v2807_v40 = vshrl.u32 %v6258_v20, 16 }
 0x129   : > { %v2771_v8 = vsel %vm7841_vm2, %v2766_v0, %v2770_v50  ;;  %v2781_v21 = vsel %vm7841_vm2, %v2776_v9, %v2780_v61  ;;  %v2799_v34 = vor.u32 %v2798_v23, %v2794_v17  ;;  %v2810_v27 = vshll.u32 %v6258_v20, 16  ;;  %v6263_v0 = vld [vmem:[%s7818_s18 + $0xb0] sm:$0x1]  ;;  %v6265_v23 = vld [vmem:[%s7818_s18 + $0xb8] sm:$0xf] }
 0x12a   : > { %v6296_v26 = vcombine.low %v2771_v8, %v2781_v21  ;;  %v2789_v28 = vor.u32 %v2788_v15, %v2785_v10  ;;  %v8792_v46 = vsel %vm7941_vm5, %v6633_v24, %v5326_v32  ;;  %v2816_v42 = vshll.u32 %v6259_v25, 16  ;;  %v6614_v8 = vld [vmem:[%s7818_s18 + $0xb8] sm:$0xf] }
 0x12b   : > { %v2800_v58 = vrot.slane %v2799_v34, 4  ;;  %v2809_v18 = vrot.slane %v2807_v40, 4  ;;  %v2820_v41 = vshrl.u32 %v6259_v25, 16  ;;  %v2826_v51 = vshll.u32 %v6260_v39, 16  ;;  %v6266_v34 = vld [vmem:[%s7818_s18 + $0xbc] sm:$0x1] }
 0x12c   : > { %v2790_v37 = vrot.slane %v2789_v28, 4  ;;  %v2818_v50 = vrot.slane %v2816_v42, 5  ;;  %v6634_v62 = vrot.slane %v6610_v43, 9  ;;  %v5333_v63 = vrot.slane %v6611_v44, 5 }
 0x12d   : > { %7310 = vmatmul.mubr.bf16.gmra.mrb[12].mxu0 %v6661_v52  ;;  %v5328_v52 = vrot.slane %v5326_v32, 4  ;;  %v2805_v60 = vsel %vm7841_vm2, %v2800_v58, %v2804_v31  ;;  %v2822_v57 = vrot.slane %v2820_v41, 4  ;;  %v2828_v56 = vrot.slane %v2826_v51, 5  ;;  %v6267_v51 = vld [vmem:[%s7818_s18 + $0xc0] sm:$0xf] }
 0x12e   : > { %7313 = vmatprep.mubr.bf16.mxu0 %v6662_v12  ;;  %v2812_v12 = vrot.slane %v2810_v27, 5  ;;  %v2795_v45 = vsel %vm7841_vm2, %v2790_v37, %v2794_v17  ;;  %v5336_v36 = vrot.slane %v6612_v53, 5  ;;  %v2831_v1 = vshrl.u32 %v6261_v54, 16  ;;  %v6264_v17 = vld [vmem:[%s7818_s18 + $0xb4] sm:$0xf] }
 0x12f   : > { %7122 = vmatmul.mubr.bf16.vlgmr.msra.gmra.mrb[16].mxu1 %v6295_v59  ;;  %v8800_v48 = vsel %vm7941_vm5, %v5328_v52, %v5329_v35  ;;  %v6262_v59 = vld [vmem:[%s7818_s18 + $0xac] sm:$0xf]  ;;  %v6297_v61 = vcombine.low %v2795_v45, %v2805_v60  ;;  %v2823_v30 = vor.u32 %v2822_v57, %v2818_v50  ;;  %v5334_v3 = vsel %vm7941_vm5, %v6634_v62, %v5333_v63  ;;  %v6616_v52 = vld [vmem:[%s7818_s18 + $0xc0] sm:$0xe] }
 0x130   : > { %7125 = vmatprep.mubr.bf16.mxu1 %v6296_v26  ;;  %v6665_v29 = vcombine.low %v8792_v46, %v8800_v48  ;;  %v2813_v55 = vor.u32 %v2812_v12, %v2809_v18  ;;  %v5335_v5 = vrot.slane %v5333_v63, 4  ;;  %v2834_v6 = vshll.u32 %v6261_v54, 16  ;;  %v6617_v12 = vld [vmem:[%s7818_s18 + $0xc4] sm:$0xf] }
 0x131   : > { %v2840_v7 = vshll.u32 %v6262_v59, 16  ;;  %v2824_v10 = vrot.slane %v2823_v30, 4  ;;  %v2833_v11 = vrot.slane %v2831_v1, 4  ;;  %v2844_v13 = vshrl.u32 %v6262_v59, 16 }
 0x132   : > { %v2814_v16 = vrot.slane %v2813_v55, 4  ;;  %v5337_v38 = vsel %vm7941_vm5, %v5335_v5, %v5336_v36  ;;  %v2836_v49 = vrot.slane %v2834_v6, 5  ;;  %v2850_v15 = vshll.u32 %v6263_v0, 16  ;;  %v6619_v5 = vld [vmem:[%s7818_s18 + $0xcc] sm:$0xe] }
 0x133   : > { %v2829_v19 = vsel %vm7841_vm2, %v2824_v10, %v2828_v56  ;;  %v6666_v20 = vcombine.low %v5334_v3, %v5337_v38  ;;  %v2846_v21 = vrot.slane %v2844_v13, 4  ;;  %v5340_v28 = vrot.slane %v6614_v8, 5  ;;  %v6620_v10 = vld [vmem:[%s7818_s18 + $0xd0] sm:$0xf] }
 0x134   : > { %v2819_v9 = vsel %vm7841_vm2, %v2814_v16, %v2818_v50  ;;  %v2837_v25 = vor.u32 %v2836_v49, %v2833_v11  ;;  %v2852_v26 = vrot.slane %v2850_v15, 5  ;;  %v5343_v32 = vrot.slane %v6615_v14, 5  ;;  %v6618_v50 = vld [vmem:[%s7818_s18 + $0xc8] sm:$0x1]  ;;  %v6621_v49 = vld [vmem:[%s7818_s18 + $0xd4] sm:$0x1] }
 0x135   : > { %7314 = vmatmul.mubr.bf16.gmra.mrb[16].mxu0 %v6663_v47  ;;  %v2842_v47 = vrot.slane %v2840_v7, 5  ;;  %v6298_v24 = vcombine.low %v2819_v9, %v2829_v19  ;;  %v2855_v35 = vshrl.u32 %v6264_v17, 16  ;;  %v2858_v39 = vshll.u32 %v6264_v17, 16  ;;  %v6269_v16 = vld [vmem:[%s7818_s18 + $0xc8] sm:$0x1] }
 0x136   : > { %7317 = vmatprep.mubr.bf16.mxu0 %v6664_v22  ;;  %v6635_v22 = vrot.slane %v6613_v2, 9  ;;  %v2838_v40 = vrot.slane %v2837_v25, 4  ;;  %v5342_v37 = vrot.slane %v5340_v28, 4  ;;  %v2864_v46 = vshll.u32 %v6265_v23, 16 }
 0x137   : > { %7126 = vmatmul.mubr.bf16.gmra.mrb[20].mxu1 %v6297_v61  ;;  %v2847_v31 = vor.u32 %v2846_v21, %v2842_v47  ;;  %v2857_v43 = vrot.slane %v2855_v35, 4  ;;  %v2860_v58 = vrot.slane %v2858_v39, 5  ;;  %v2868_v18 = vshrl.u32 %v6265_v23, 16 }
 0x138   : > { %7129 = vmatprep.mubr.bf16.mxu1 %v6298_v24  ;;  %v5341_v27 = vsel %vm7941_vm5, %v6635_v22, %v5340_v28  ;;  %v2843_v41 = vsel %vm7841_vm2, %v2838_v40, %v2842_v47  ;;  %v5344_v44 = vsel %vm7941_vm5, %v5342_v37, %v5343_v32  ;;  %v2866_v45 = vrot.slane %v2864_v46, 5 }
 0x139   : > { %v2848_v42 = vrot.slane %v2847_v31, 4  ;;  %v2874_v48 = vshll.u32 %v6266_v34, 16  ;;  %v6667_v54 = vcombine.low %v5341_v27, %v5344_v44  ;;  %v2861_v60 = vor.u32 %v2860_v58, %v2857_v43 }
 0x13a   : > { %v2870_v55 = vrot.slane %v2868_v18, 4  ;;  %v6636_v61 = vrot.slane %v6616_v52, 9  ;;  %v5347_v56 = vrot.slane %v6617_v12, 5  ;;  %v5350_v0 = vrot.slane %v6618_v50, 5 }
 0x13b   : > { %v2853_v53 = vsel %vm7841_vm2, %v2848_v42, %v2852_v26  ;;  %v2876_v59 = vrot.slane %v2874_v48, 5  ;;  %v2862_v62 = vrot.slane %v2861_v60, 4  ;;  %v2879_v30 = vshrl.u32 %v6267_v51, 16 }
 0x13c   : > { %v6299_v57 = vcombine.low %v2843_v41, %v2853_v53  ;;  %v2871_v63 = vor.u32 %v2870_v55, %v2866_v45  ;;  %v5348_v36 = vsel %vm7941_vm5, %v6636_v61, %v5347_v56  ;;  %v5349_v1 = vrot.slane %v5347_v56, 4 }
 0x13d   : > { %7318 = vmatmul.mubr.bf16.gmra.mrb[20].mxu0 %v6665_v29  ;;  %v6268_v29 = vld [vmem:[%s7818_s18 + $0xc4] sm:$0xf]  ;;  %v2882_v2 = vshll.u32 %v6267_v51, 16  ;;  %v2867_v6 = vsel %vm7841_vm2, %v2862_v62, %v2866_v45  ;;  %v2881_v8 = vrot.slane %v2879_v30, 4  ;;  %v2898_v38 = vshll.u32 %v6269_v16, 16  ;;  %s6680_s18 = sshll.u32 %s8934_s16, 8 }
 0x13e   : > { %7321 = vmatprep.mubr.bf16.mxu0 %v6666_v20  ;;  %v2888_v3 = vshll.u32 %v6268_v29, 16  ;;  %v2872_v7 = vrot.slane %v2871_v63, 4  ;;  %v2892_v9 = vshrl.u32 %v6268_v29, 16  ;;  %v5351_v11 = vsel %vm7941_vm5, %v5349_v1, %v5350_v0  ;;  %s8874_s21 = scalar_lea.vmem %s8926_s2, %s6680_s18 }
 0x13f   : > { %7130 = vmatmul.mubr.bf16.gmra.mrb[24].mxu1 %v6299_v57  ;;  %v2884_v13 = vrot.slane %v2882_v2, 5  ;;  %v6668_v15 = vcombine.low %v5348_v36, %v5351_v11  ;;  %v6637_v19 = vrot.slane %v6619_v5, 9  ;;  %v5354_v22 = vrot.slane %v6620_v10, 5 }
 0x140   : > { %v2890_v14 = vrot.slane %v2888_v3, 5  ;;  %v2877_v47 = vsel %vm7841_vm2, %v2872_v7, %v2876_v59  ;;  %v2894_v17 = vrot.slane %v2892_v9, 4  ;;  %v2900_v24 = vrot.slane %v2898_v38, 5 }
 0x141   : > { %v6300_v20 = vcombine.low %v2867_v6, %v2877_v47  ;;  %v2885_v21 = vor.u32 %v2884_v13, %v2881_v8  ;;  %v5357_v25 = vrot.slane %v6621_v49, 5  ;;  %v5355_v28 = vsel %vm7941_vm5, %v6637_v19, %v5354_v22 }
 0x142   : > { %v2895_v23 = vor.u32 %v2894_v17, %v2890_v14  ;;  %v5356_v31 = vrot.slane %v5354_v22, 4 }
 0x143   : > { %7133 = vmatprep.mubr.bf16.mxu1 %v6300_v20  ;;  %v2886_v26 = vrot.slane %v2885_v21, 4 }
 0x144   : > { %v2896_v32 = vrot.slane %v2895_v23, 4  ;;  %v5358_v35 = vsel %vm7941_vm5, %v5356_v31, %v5357_v25 }
 0x145   : > { %7322 = vmatmul.mubr.bf16.gmra.mrb[24].mxu0 %v6667_v54  ;;  %v2891_v34 = vsel %vm7841_vm2, %v2886_v26, %v2890_v14  ;;  %v6669_v40 = vcombine.low %v5355_v28, %v5358_v35 }
 0x146   : > { %7325 = vmatprep.mubr.bf16.mxu0 %v6668_v15  ;;  %v2901_v39 = vsel %vm7841_vm2, %v2896_v32, %v2900_v24 }
 0x147   : > { %v6301_v27 = vcombine.low %v2891_v34, %v2901_v39 }
 0x149   : > { %7134 = vmatmul.mubr.bf16.gmra.mrb[28].mxu1 %v6301_v27 }
 0x14d   : > { %7326 = vmatmul.mubr.bf16.gmra.mrb[28].mxu0 %v6669_v40 }
 0x1c2   : > { %v7059_v37 = vpop.f32.mrb[0].mxu1 }
 0x1c3   : > { %v2247_v46 = vpop.f32.mrb[1].mxu1 }
 0x1c4   : > { %v7060_v52 = vpop.f32.mrb[2].mxu1 }
 0x1c5   : > { %v2250_v42 = vpop.f32.mrb[3].mxu1 }
 0x1ca   : > { %v7063_v43 = vpop.f32.mrb[4].mxu1 }
 0x1cb   : > { %v2263_v58 = vpop.f32.mrb[5].mxu1 }
 0x1cc   : > { %v7064_v18 = vpop.f32.mrb[6].mxu1 }
 0x1cd   : > { %v2266_v12 = vpop.f32.mrb[7].mxu1 }
 0x1d2   : > { %v7067_v41 = vpop.f32.mrb[8].mxu1 }
 0x1d3   : > { %v2279_v44 = vpop.f32.mrb[9].mxu1 }
 0x1d4   : > { %v7068_v4 = vpop.f32.mrb[10].mxu1 }
 0x1d5   : > { %v8860_v45 = vpop.f32.mrb[11].mxu1 }
 0x1da   : > { %v8862_v33 = vpop.f32.mrb[12].mxu1 }
 0x1db   : > { %v8864_v48 = vpop.f32.mrb[13].mxu1 }
 0x1dc   : > { %v8866_v50 = vpop.f32.mrb[14].mxu1 }
 0x1dd   : > { %v8868_v51 = vpop.f32.mrb[15].mxu1 }
 0x1e8   : > { %v7299_v53 = vpop.f32.mrb[0].mxu0 }
 0x1e9   : > { %v7345_v54 = vadd.f32 %v7299_v53, %v7059_v37  ;;  %v5522_v60 = vpop.f32.mrb[1].mxu0 }
 0x1ea   : > { %v7346_v55 = vadd.f32 %v5522_v60, %v2247_v46  ;;  %v7300_v29 = vpop.f32.mrb[2].mxu0 }
 0x1eb   : > { %5779 = vst [vmem:[%s8874_s21 + $0x10] sm:$0xff] %v7345_v54  ;;  %v7347_v57 = vadd.f32 %v7300_v29, %v7060_v52  ;;  %v5525_v59 = vpop.f32.mrb[3].mxu0  ;;  %v5849_v0 = vmul.f32 %v7345_v54, %v7345_v54 }
 0x1ec   : > { %5777 = vst [vmem:[%s8874_s21] sm:$0xff] %v7346_v55  ;;  %v7348_v61 = vadd.f32 %v5525_v59, %v2250_v42  ;;  %v5847_v56 = vmul.f32 %v7346_v55, %v7346_v55 }
 0x1ed   : > { %5780 = vst [vmem:[%s8874_s21 + $0x18] sm:$0xff] %v7347_v57  ;;  %v5850_v3 = vmul.f32 %v7347_v57, %v7347_v57 }
 0x1ee   : > { %5778 = vst [vmem:[%s8874_s21 + $0x8] sm:$0xff] %v7348_v61  ;;  %v5809_v62 = vadd.f32 %v7348_v61, %v7346_v55  ;;  %v5848_v63 = vmul.f32 %v7348_v61, %v7348_v61 }
 0x1f0   : > { %v5810_v16 = vadd.f32 %v7345_v54, %v5809_v62  ;;  %v5879_v30 = vadd.f32 %v5848_v63, %v5847_v56  ;;  %v7303_v36 = vpop.f32.mrb[4].mxu0 }
 0x1f1   : > { %v7349_v1 = vadd.f32 %v7303_v36, %v7063_v43  ;;  %v5538_v2 = vpop.f32.mrb[5].mxu0 }
 0x1f2   : > { %v5880_v5 = vadd.f32 %v5879_v30, %v5849_v0  ;;  %v7350_v6 = vadd.f32 %v5538_v2, %v2263_v58  ;;  %v5811_v7 = vadd.f32 %v7347_v57, %v5810_v16  ;;  %v7304_v8 = vpop.f32.mrb[6].mxu0 }
 0x1f3   : > { %5783 = vst [vmem:[%s8874_s21 + $0x30] sm:$0xff] %v7349_v1  ;;  %v7351_v9 = vadd.f32 %v7304_v8, %v7064_v18  ;;  %v5541_v10 = vpop.f32.mrb[7].mxu0  ;;  %v5853_v17 = vmul.f32 %v7349_v1, %v7349_v1 }
 0x1f4   : > { %5781 = vst [vmem:[%s8874_s21 + $0x20] sm:$0xff] %v7350_v6  ;;  %v5812_v11 = vadd.f32 %v7350_v6, %v5811_v7  ;;  %v5851_v13 = vmul.f32 %v7350_v6, %v7350_v6  ;;  %v5881_v14 = vadd.f32 %v5880_v5, %v5850_v3  ;;  %v7352_v38 = vadd.f32 %v5541_v10, %v2266_v12 }
 0x1f5   : > { %5784 = vst [vmem:[%s8874_s21 + $0x38] sm:$0xff] %v7351_v9  ;;  %v5854_v24 = vmul.f32 %v7351_v9, %v7351_v9 }
 0x1f6   : > { %v5882_v49 = vadd.f32 %v5881_v14, %v5851_v13  ;;  %5782 = vst [vmem:[%s8874_s21 + $0x28] sm:$0xff] %v7352_v38  ;;  %v5813_v47 = vadd.f32 %v7352_v38, %v5812_v11  ;;  %v5852_v15 = vmul.f32 %v7352_v38, %v7352_v38 }
 0x1f8   : > { %v5814_v19 = vadd.f32 %v7349_v1, %v5813_v47  ;;  %v5883_v20 = vadd.f32 %v5882_v49, %v5852_v15  ;;  %v7307_v21 = vpop.f32.mrb[8].mxu0 }
 0x1f9   : > { %v7353_v22 = vadd.f32 %v7307_v21, %v7067_v41  ;;  %v5554_v23 = vpop.f32.mrb[9].mxu0 }
 0x1fa   : > { %v5884_v25 = vadd.f32 %v5883_v20, %v5853_v17  ;;  %v7354_v26 = vadd.f32 %v5554_v23, %v2279_v44  ;;  %v5815_v28 = vadd.f32 %v7351_v9, %v5814_v19  ;;  %v7308_v31 = vpop.f32.mrb[10].mxu0 }
 0x1fb   : > { %5787 = vst [vmem:[%s8874_s21 + $0x50] sm:$0xff] %v7353_v22  ;;  %v7355_v32 = vadd.f32 %v7308_v31, %v7068_v4  ;;  %v5557_v34 = vpop.f32.mrb[11].mxu0  ;;  %v5857_v58 = vmul.f32 %v7353_v22, %v7353_v22 }
 0x1fc   : > { %5785 = vst [vmem:[%s8874_s21 + $0x40] sm:$0xff] %v7354_v26  ;;  %v5816_v35 = vadd.f32 %v7354_v26, %v5815_v28  ;;  %v5855_v39 = vmul.f32 %v7354_v26, %v7354_v26  ;;  %v5885_v40 = vadd.f32 %v5884_v25, %v5854_v24  ;;  %v7356_v27 = vadd.f32 %v5557_v34, %v8860_v45 }
 0x1fd   : > { %5788 = vst [vmem:[%s8874_s21 + $0x58] sm:$0xff] %v7355_v32  ;;  %v5858_v45 = vmul.f32 %v7355_v32, %v7355_v32 }
 0x1fe   : > { %v5886_v37 = vadd.f32 %v5885_v40, %v5855_v39  ;;  %5786 = vst [vmem:[%s8874_s21 + $0x48] sm:$0xff] %v7356_v27  ;;  %v5817_v46 = vadd.f32 %v7356_v27, %v5816_v35  ;;  %v5856_v52 = vmul.f32 %v7356_v27, %v7356_v27 }
 0x200   : > { %v5818_v18 = vadd.f32 %v7353_v22, %v5817_v46  ;;  %v5887_v12 = vadd.f32 %v5886_v37, %v5856_v52  ;;  %v7311_v41 = vpop.f32.mrb[12].mxu0 }
 0x201   : > { %v7357_v4 = vadd.f32 %v7311_v41, %v8862_v33  ;;  %v5570_v53 = vpop.f32.mrb[13].mxu0 }
 0x202   : > { %v7123_v42 = vpop.f32.mrb[16].mxu1  ;;  %v5888_v60 = vadd.f32 %v5887_v12, %v5857_v58  ;;  %v7358_v55 = vadd.f32 %v5570_v53, %v8864_v48  ;;  %v5819_v29 = vadd.f32 %v7355_v32, %v5818_v18  ;;  %v7312_v57 = vpop.f32.mrb[14].mxu0 }
 0x203   : > { %v3129_v43 = vpop.f32.mrb[17].mxu1  ;;  %5791 = vst [vmem:[%s8874_s21 + $0x70] sm:$0xff] %v7357_v4  ;;  %v7359_v59 = vadd.f32 %v7312_v57, %v8866_v50  ;;  %v5573_v61 = vpop.f32.mrb[15].mxu0  ;;  %v5861_v36 = vmul.f32 %v7357_v4, %v7357_v4 }
 0x204   : > { %v7124_v44 = vpop.f32.mrb[18].mxu1  ;;  %5789 = vst [vmem:[%s8874_s21 + $0x60] sm:$0xff] %v7358_v55  ;;  %v5820_v56 = vadd.f32 %v7358_v55, %v5819_v29  ;;  %v5859_v62 = vmul.f32 %v7358_v55, %v7358_v55  ;;  %v5889_v63 = vadd.f32 %v5888_v60, %v5858_v45  ;;  %v7360_v33 = vadd.f32 %v5573_v61, %v8868_v51 }
 0x205   : > { %v3132_v54 = vpop.f32.mrb[19].mxu1  ;;  %5792 = vst [vmem:[%s8874_s21 + $0x78] sm:$0xff] %v7359_v59  ;;  %v5862_v7 = vmul.f32 %v7359_v59, %v7359_v59 }
 0x206   : > { %v5890_v0 = vadd.f32 %v5889_v63, %v5859_v62  ;;  %5790 = vst [vmem:[%s8874_s21 + $0x68] sm:$0xff] %v7360_v33  ;;  %v5821_v16 = vadd.f32 %v7360_v33, %v5820_v56  ;;  %v5860_v30 = vmul.f32 %v7360_v33, %v7360_v33 }
 0x208   : > { %v5822_v48 = vadd.f32 %v7357_v4, %v5821_v16  ;;  %v5891_v1 = vadd.f32 %v5890_v0, %v5860_v30  ;;  %v7315_v2 = vpop.f32.mrb[16].mxu0 }
 0x209   : > { %v7361_v50 = vadd.f32 %v7315_v2, %v7123_v42  ;;  %v5586_v5 = vpop.f32.mrb[17].mxu0 }
 0x20a   : > { %v7127_v3 = vpop.f32.mrb[20].mxu1  ;;  %v5892_v8 = vadd.f32 %v5891_v1, %v5861_v36  ;;  %v7362_v51 = vadd.f32 %v5586_v5, %v3129_v43  ;;  %v5823_v9 = vadd.f32 %v7359_v59, %v5822_v48  ;;  %v7316_v10 = vpop.f32.mrb[18].mxu0 }
 0x20b   : > { %v3145_v6 = vpop.f32.mrb[21].mxu1  ;;  %5795 = vst [vmem:[%s8874_s21 + $0x90] sm:$0xff] %v7361_v50  ;;  %v7363_v13 = vadd.f32 %v7316_v10, %v7124_v44  ;;  %v5589_v14 = vpop.f32.mrb[19].mxu0  ;;  %v5865_v22 = vmul.f32 %v7361_v50, %v7361_v50 }
 0x20c   : > { %v7128_v11 = vpop.f32.mrb[22].mxu1  ;;  %5793 = vst [vmem:[%s8874_s21 + $0x80] sm:$0xff] %v7362_v51  ;;  %v5824_v49 = vadd.f32 %v7362_v51, %v5823_v9  ;;  %v5863_v47 = vmul.f32 %v7362_v51, %v7362_v51  ;;  %v5893_v15 = vadd.f32 %v5892_v8, %v5862_v7  ;;  %v7364_v17 = vadd.f32 %v5589_v14, %v3132_v54 }
 0x20d   : > { %v3148_v38 = vpop.f32.mrb[23].mxu1  ;;  %5796 = vst [vmem:[%s8874_s21 + $0x98] sm:$0xff] %v7363_v13  ;;  %v5866_v31 = vmul.f32 %v7363_v13, %v7363_v13 }
 0x20e   : > { %v5894_v19 = vadd.f32 %v5893_v15, %v5863_v47  ;;  %5794 = vst [vmem:[%s8874_s21 + $0x88] sm:$0xff] %v7364_v17  ;;  %v5825_v20 = vadd.f32 %v7364_v17, %v5824_v49  ;;  %v5864_v21 = vmul.f32 %v7364_v17, %v7364_v17 }
 0x210   : > { %v5826_v23 = vadd.f32 %v7361_v50, %v5825_v20  ;;  %v5895_v24 = vadd.f32 %v5894_v19, %v5864_v21  ;;  %v7319_v25 = vpop.f32.mrb[20].mxu0 }
 0x211   : > { %v7365_v26 = vadd.f32 %v7319_v25, %v7127_v3  ;;  %v5602_v28 = vpop.f32.mrb[21].mxu0 }
 0x212   : > { %v5896_v32 = vadd.f32 %v5895_v24, %v5865_v22  ;;  %v7366_v34 = vadd.f32 %v5602_v28, %v3145_v6  ;;  %v5827_v35 = vadd.f32 %v7363_v13, %v5826_v23  ;;  %v7320_v39 = vpop.f32.mrb[22].mxu0  ;;  %v7131_v43 = vpop.f32.mrb[24].mxu1 }
 0x213   : > { %5799 = vst [vmem:[%s8874_s21 + $0xb0] sm:$0xff] %v7365_v26  ;;  %v7367_v40 = vadd.f32 %v7320_v39, %v7128_v11  ;;  %v5605_v27 = vpop.f32.mrb[23].mxu0  ;;  %v3161_v58 = vpop.f32.mrb[25].mxu1  ;;  %v5869_v53 = vmul.f32 %v7365_v26, %v7365_v26 }
 0x214   : > { %5797 = vst [vmem:[%s8874_s21 + $0xa0] sm:$0xff] %v7366_v34  ;;  %v5828_v37 = vadd.f32 %v7366_v34, %v5827_v35  ;;  %v5867_v46 = vmul.f32 %v7366_v34, %v7366_v34  ;;  %v5897_v52 = vadd.f32 %v5896_v32, %v5866_v31  ;;  %v7368_v42 = vadd.f32 %v5605_v27, %v3148_v38  ;;  %v7132_v44 = vpop.f32.mrb[26].mxu1 }
 0x215   : > { %5800 = vst [vmem:[%s8874_s21 + $0xb8] sm:$0xff] %v7367_v40  ;;  %v3164_v4 = vpop.f32.mrb[27].mxu1  ;;  %v5870_v57 = vmul.f32 %v7367_v40, %v7367_v40 }
 0x216   : > { %v5898_v18 = vadd.f32 %v5897_v52, %v5867_v46  ;;  %5798 = vst [vmem:[%s8874_s21 + $0xa8] sm:$0xff] %v7368_v42  ;;  %v5829_v12 = vadd.f32 %v7368_v42, %v5828_v37  ;;  %v5868_v41 = vmul.f32 %v7368_v42, %v7368_v42 }
 0x218   : > { %v5830_v54 = vadd.f32 %v7365_v26, %v5829_v12  ;;  %v5899_v45 = vadd.f32 %v5898_v18, %v5868_v41  ;;  %v7323_v60 = vpop.f32.mrb[24].mxu0 }
 0x219   : > { %v7369_v55 = vadd.f32 %v7323_v60, %v7131_v43  ;;  %v5618_v29 = vpop.f32.mrb[25].mxu0 }
 0x21a   : > { %v5900_v59 = vadd.f32 %v5899_v45, %v5869_v53  ;;  %v7370_v61 = vadd.f32 %v5618_v29, %v3161_v58  ;;  %v5831_v56 = vadd.f32 %v7367_v40, %v5830_v54  ;;  %v7324_v62 = vpop.f32.mrb[26].mxu0 }
 0x21b   : > { %5803 = vst [vmem:[%s8874_s21 + $0xd0] sm:$0xff] %v7369_v55  ;;  %v7371_v63 = vadd.f32 %v7324_v62, %v7132_v44  ;;  %v5621_v33 = vpop.f32.mrb[27].mxu0  ;;  %v5873_v3 = vmul.f32 %v7369_v55, %v7369_v55 }
 0x21c   : > { %5801 = vst [vmem:[%s8874_s21 + $0xc0] sm:$0xff] %v7370_v61  ;;  %v5832_v0 = vadd.f32 %v7370_v61, %v5831_v56  ;;  %v5871_v16 = vmul.f32 %v7370_v61, %v7370_v61  ;;  %v5901_v30 = vadd.f32 %v5900_v59, %v5870_v57  ;;  %v7372_v36 = vadd.f32 %v5621_v33, %v3164_v4  ;;  %v7135_v6 = vpop.f32.mrb[28].mxu1 }
 0x21d   : > { %5804 = vst [vmem:[%s8874_s21 + $0xd8] sm:$0xff] %v7371_v63  ;;  %v3177_v51 = vpop.f32.mrb[29].mxu1  ;;  %v5874_v10 = vmul.f32 %v7371_v63, %v7371_v63 }
 0x21e   : > { %v5902_v48 = vadd.f32 %v5901_v30, %v5871_v16  ;;  %5802 = vst [vmem:[%s8874_s21 + $0xc8] sm:$0xff] %v7372_v36  ;;  %v5833_v1 = vadd.f32 %v7372_v36, %v5832_v0  ;;  %v5872_v2 = vmul.f32 %v7372_v36, %v7372_v36  ;;  %v7136_v38 = vpop.f32.mrb[30].mxu1 }
 0x21f   : > { %v3180_v15 = vpop.f32.mrb[31].mxu1 }
 0x220   : > { %v5834_v50 = vadd.f32 %v7369_v55, %v5833_v1  ;;  %v5903_v5 = vadd.f32 %v5902_v48, %v5872_v2  ;;  %v7327_v7 = vpop.f32.mrb[28].mxu0 }
 0x221   : > { %v7373_v8 = vadd.f32 %v7327_v7, %v7135_v6  ;;  %v5634_v9 = vpop.f32.mrb[29].mxu0 }
 0x222   : > { %v5904_v11 = vadd.f32 %v5903_v5, %v5873_v3  ;;  %v7374_v13 = vadd.f32 %v5634_v9, %v3177_v51  ;;  %v5835_v14 = vadd.f32 %v7371_v63, %v5834_v50  ;;  %v7328_v49 = vpop.f32.mrb[30].mxu0 }
 0x223   : > { %5807 = vst [vmem:[%s8874_s21 + $0xf0] sm:$0xff] %v7373_v8  ;;  %v7375_v47 = vadd.f32 %v7328_v49, %v7136_v38  ;;  %v5637_v17 = vpop.f32.mrb[31].mxu0  ;;  %v5877_v26 = vmul.f32 %v7373_v8, %v7373_v8 }
 0x224   : > { %5805 = vst [vmem:[%s8874_s21 + $0xe0] sm:$0xff] %v7374_v13  ;;  %v5836_v19 = vadd.f32 %v7374_v13, %v5835_v14  ;;  %v5875_v20 = vmul.f32 %v7374_v13, %v7374_v13  ;;  %v5905_v21 = vadd.f32 %v5904_v11, %v5874_v10  ;;  %v7376_v22 = vadd.f32 %v5637_v17, %v3180_v15 }
 0x225   : > { %5808 = vst [vmem:[%s8874_s21 + $0xf8] sm:$0xff] %v7375_v47  ;;  %v5878_v32 = vmul.f32 %v7375_v47, %v7375_v47 }
 0x226   : > { %v5906_v23 = vadd.f32 %v5905_v21, %v5875_v20  ;;  %5806 = vst [vmem:[%s8874_s21 + $0xe8] sm:$0xff] %v7376_v22  ;;  %v5837_v24 = vadd.f32 %v7376_v22, %v5836_v19  ;;  %v5876_v25 = vmul.f32 %v7376_v22, %v7376_v22 }
 0x228   : > { %v5838_v28 = vadd.f32 %v7373_v8, %v5837_v24  ;;  %v5907_v31 = vadd.f32 %v5906_v23, %v5876_v25 }
 0x22a   : > { %v5839_v34 = vadd.f32 %v7375_v47, %v5838_v28  ;;  %v5908_v35 = vadd.f32 %v5907_v31, %v5877_v26 }
 0x22c   : > { %v5840_v39 = vrot.slane %v5839_v34, 4  ;;  %v5909_v40 = vadd.f32 %v5908_v35, %v5878_v32 }
 0x22e   : > { %v5841_v27 = vadd.f32 %v5840_v39, %v5839_v34  ;;  %v5910_v37 = vrot.slane %v5909_v40, 4 }
 0x230   : > { %v5842_v46 = vrot.slane %v5841_v27, 2  ;;  %v5911_v52 = vadd.f32 %v5910_v37, %v5909_v40 }
 0x232   : > { %v5843_v42 = vadd.f32 %v5842_v46, %v5841_v27  ;;  %v5912_v43 = vrot.slane %v5911_v52, 2 }
 0x234   : > { %v5844_v58 = vrot.slane %v5843_v42, 1  ;;  %v5913_v18 = vadd.f32 %v5912_v43, %v5911_v52 }
 0x236   : > { %v5845_v12 = vadd.f32 %v5844_v58, %v5843_v42  ;;  %v5914_v41 = vrot.slane %v5913_v18, 1 }
 0x238   : > { %5846 = vst [vmem:[%s211_s24] sm:$0x1] %v5845_v12  ;;  %v5915_v44 = vadd.f32 %v5914_v41, %v5913_v18 }
 0x23a   : > { %5916 = vst [vmem:[%s214_s27] sm:$0x1] %v5915_v44 }
 0x23b PF: > { %s15_s15 = sadd.s32 1, %s7744_s15  }
 0x23c   : > { %p12_p4 = scmp.ge.s32.totalorder %s15_s15, 4  }
 0x23e   :  { %14 = sbr.rel (!%p12_p4) target bundleno = 1 (0x1), region = 92 }

// kernel: basic_block_forward.8
= control target key start
LH: loop header
LB: loop body
LE: loop exit
PB: predicated region body
PF: predicated region fallthrough
CT: control target
= control target key end

     0   :  { %s7147_s15 = smov 0   ;;  %s8269_s0 = inlined_call_operand.vmem [shape: bf16[2,20,20,128], index: 0, kind: input, shape index: {}]   ;;  %s8270_s1 = inlined_call_operand.vmem [shape: bf16[9,128,128], index: 1, kind: input, shape index: {}]   ;;  %s8271_s2 = inlined_call_operand.vmem [shape: f32[2,16,16,128], index: 2, kind: output, shape index: {0}]   ;;  %s8272_s3 = inlined_call_operand.vmem [shape: f32[2,1,128], index: 3, kind: output, shape index: {1}]   ;;  %s8273_s4 = inlined_call_operand.vmem [shape: f32[2,1,128], index: 4, kind: output, shape index: {2}]  }
   0x1 LB: > { %s5350_s16 = sadd.s32 4294967295, %s7120_s15   ;;  %p5354_p0 = scmp.ge.s32.totalorder %s7120_s15, 1  ;;  %s7120_s15 = sphi %s7147_s15, %s15_s15  }
   0x2   : > { %p167_p1 = scmp.lt.s32.totalorder %s7120_s15, 3 }
   0x4   : > { %p168_p2 = pnand %p5354_p0, %p167_p1 }
   0x5   : > { %v6986_v0 = vld [vmem:[%s8270_s1] sm:$0xff] (!%p168_p2)   ;;  %v6988_v2 = vld [vmem:[%s8270_s1 + $0x8] sm:$0xff] (!%p168_p2)   ;;  %p199_p3 = scmp.lt.s32.totalorder (!%p168_p2), %s5350_s16, 1  ;;  %v6990_v4 = vld [vmem:[%s8270_s1 + $0x10] sm:$0xff] (!%p168_p2)   ;;  %vm697_vm0 = vcmask (!%p168_p2), 1042432   ;;  %vm698_vm1 = vcmask (!%p168_p2), 1046532  }
   0x6   : > { %171 = sbr.rel (%p168_p2) target bundleno = 557 (0x22d), region = 28  ;;  %v6987_v1 = vld [vmem:[%s8270_s1 + $0x100] sm:$0xff] (!%p168_p2)   ;;  %6273 = vmatprep.subr.bf16.mxu1 (!%p168_p2), %v6986_v0  ;;  %v6989_v3 = vld [vmem:[%s8270_s1 + $0x108] sm:$0xff] (!%p168_p2)   ;;  %v6991_v5 = vld [vmem:[%s8270_s1 + $0x110] sm:$0xff] (!%p168_p2)   ;;  %vm1294_vm3 = vcmask (!%p168_p2), 1041408   ;;  %vm1295_vm4 = vcmask (!%p168_p2), 1045508  }
   0x7   : > { %6465 = vmatprep.subr.bf16.mxu0 (!%p168_p2), %v6987_v1  ;;  %6274 = vmatpush3.bf16.msra.mxu1 (!%p168_p2), %v6986_v0  ;;  %v6992_v6 = vld [vmem:[%s8270_s1 + $0x18] sm:$0xff] (!%p168_p2)   ;;  %v6994_v8 = vld [vmem:[%s8270_s1 + $0x20] sm:$0xff] (!%p168_p2)   ;;  %v6996_v10 = vld [vmem:[%s8270_s1 + $0x28] sm:$0xff] (!%p168_p2)  }
   0x8   : > { %6466 = vmatpush3.bf16.msra.mxu0 (!%p168_p2), %v6987_v1  ;;  %6275 = vmatprep.subr.bf16.mxu1 (!%p168_p2), %v6988_v2  ;;  %v6993_v7 = vld [vmem:[%s8270_s1 + $0x118] sm:$0xff] (!%p168_p2)   ;;  %v6995_v9 = vld [vmem:[%s8270_s1 + $0x120] sm:$0xff] (!%p168_p2)   ;;  %v6997_v11 = vld [vmem:[%s8270_s1 + $0x128] sm:$0xff] (!%p168_p2)  }
   0x9   : > { %6467 = vmatprep.subr.bf16.mxu0 (!%p168_p2), %v6989_v3  ;;  %vm7200_vm2 = vmor (!%p168_p2), %vm697_vm0, %vm698_vm1  ;;  %v6998_v20 = vld [vmem:[%s8270_s1 + $0x30] sm:$0xff] (!%p168_p2)   ;;  %v7000_v27 = vld [vmem:[%s8270_s1 + $0x38] sm:$0xff] (!%p168_p2)  }
   0xa   : > { %v6999_v24 = vld [vmem:[%s8270_s1 + $0x130] sm:$0xff] (!%p168_p2)   ;;  %v7001_v30 = vld [vmem:[%s8270_s1 + $0x138] sm:$0xff] (!%p168_p2)   ;;  %v7004_v41 = vld [vmem:[%s8270_s1 + $0x40] sm:$0xff] (!%p168_p2)  }
   0xb   : > { %6276 = vmatpush3.bf16.msra.mxu1 (!%p168_p2), %v6988_v2  ;;  %v7005_v47 = vld [vmem:[%s8270_s1 + $0x140] sm:$0xff] (!%p168_p2)   ;;  %v7006_v54 = vld [vmem:[%s8270_s1 + $0x148] sm:$0xff] (!%p168_p2)   ;;  %vm7309_vm5 = vmor (!%p168_p2), %vm1294_vm3, %vm1295_vm4 }
   0xc   : > { %6468 = vmatpush3.bf16.msra.mxu0 (!%p168_p2), %v6989_v3  ;;  %6277 = vmatprep.subr.bf16.mxu1 (!%p168_p2), %v6990_v4  ;;  %v7009_v61 = vld [vmem:[%s8270_s1 + $0x48] sm:$0xff] (!%p168_p2)  }
   0xd   : > { %s8279_s16 = smov (!%p199_p3, %s5350_s16), 1  ;;  %6469 = vmatprep.subr.bf16.mxu0 %v6991_v5 }
   0xe   : > { %s6977_s7 = smul.u32 240, %s8279_s16  ;;  %s211_s24 = scalar_lea.vmem %s8272_s3, %s8279_s16 }
   0xf   : > { %6278 = vmatpush3.bf16.msra.mxu1 %v6990_v4  ;;  %s214_s27 = scalar_lea.vmem %s8273_s4, %s8279_s16 }
  0x10   : > { %6470 = vmatpush3.bf16.msra.mxu0 %v6991_v5  ;;  %6279 = vmatprep.subr.bf16.mxu1 %v6992_v6  ;;  %s7194_s18 = scalar_lea.vmem %s8269_s0, %s6977_s7 }
  0x11   : > { %6471 = vmatprep.subr.bf16.mxu0 %v6993_v7  ;;  %v7002_v12 = vld [vmem:[%s7194_s18] sm:$0xff]   ;;  %v5566_v14 = vld [vmem:[%s7194_s18 + $0x18] sm:$0xe]  ;;  %v5567_v15 = vld [vmem:[%s7194_s18 + $0x1c] sm:$0xf] }
  0x12   : > { %6289 = vmatprep.mubr.bf16.mxu1 %v7002_v12  ;;  %v5568_v16 = vld [vmem:[%s7194_s18 + $0x20] sm:$0x1]  ;;  %v5614_v17 = vrot.slane %v5566_v14, 9  ;;  %v2344_v18 = vrot.slane %v5567_v15, 5  ;;  %v5569_v23 = vld [vmem:[%s7194_s18 + $0x24] sm:$0xe] }
  0x13   : > { %6280 = vmatpush3.bf16.msra.mxu1 %v6992_v6  ;;  %v2347_v19 = vrot.slane %v5568_v16, 5  ;;  %v5570_v25 = vld [vmem:[%s7194_s18 + $0x28] sm:$0xf]  ;;  %v5571_v26 = vld [vmem:[%s7194_s18 + $0x2c] sm:$0x1]  ;;  %v5615_v32 = vrot.slane %v5569_v23, 9 }
  0x14   : > { %6472 = vmatpush3.bf16.msra.mxu0 %v6993_v7  ;;  %6281 = vmatprep.subr.bf16.mxu1 %v6994_v8  ;;  %v2345_v21 = vsel %vm7200_vm2, %v5614_v17, %v2344_v18  ;;  %v2346_v22 = vrot.slane %v2344_v18, 4  ;;  %v2351_v29 = vrot.slane %v5570_v25, 5  ;;  %v2354_v34 = vrot.slane %v5571_v26, 5  ;;  %v5572_v35 = vld [vmem:[%s7194_s18 + $0x30] sm:$0xe]  ;;  %v7007_v55 = vld [vmem:[%s7194_s18 + $0x18] sm:$0xff]  }
  0x15   : > { %6473 = vmatprep.subr.bf16.mxu0 %v6995_v9  ;;  %v5573_v36 = vld [vmem:[%s7194_s18 + $0x34] sm:$0xf]  ;;  %v5574_v37 = vld [vmem:[%s7194_s18 + $0x38] sm:$0x1]  ;;  %v5616_v38 = vrot.slane %v5572_v35, 9  ;;  %v7003_v50 = vld [vmem:[%s7194_s18 + $0xc] sm:$0xff]  }
  0x16   : > { %v2348_v28 = vsel %vm7200_vm2, %v2346_v22, %v2347_v19  ;;  %v2353_v33 = vrot.slane %v2351_v29, 4  ;;  %v2358_v39 = vrot.slane %v5573_v36, 5  ;;  %v2361_v40 = vrot.slane %v5574_v37, 5  ;;  %v5575_v45 = vld [vmem:[%s7194_s18 + $0x3c] sm:$0xe]  ;;  %v7008_v3 = vld [vmem:[%s7194_s18 + $0x24] sm:$0xff]  }
  0x17   : > { %6282 = vmatpush3.bf16.msra.mxu1 %v6994_v8  ;;  %v5646_v31 = vcombine.low %v2345_v21, %v2348_v28  ;;  %v2352_v42 = vsel %vm7200_vm2, %v5615_v32, %v2351_v29  ;;  %v5576_v46 = vld [vmem:[%s7194_s18 + $0x40] sm:$0xf]  ;;  %v5577_v48 = vld [vmem:[%s7194_s18 + $0x44] sm:$0x1]  ;;  %v5617_v56 = vrot.slane %v5575_v45, 9  ;;  %v7014_v7 = vld [vmem:[%s8270_s1 + $0x50] sm:$0xff]  }
  0x18   : > { %6474 = vmatpush3.bf16.msra.mxu0 %v6995_v9  ;;  %6283 = vmatprep.subr.bf16.mxu1 %v6996_v10  ;;  %v2355_v43 = vsel %vm7200_vm2, %v2353_v33, %v2354_v34  ;;  %v2360_v44 = vrot.slane %v2358_v39, 4  ;;  %v2365_v49 = vrot.slane %v5576_v46, 5  ;;  %v2359_v51 = vsel %vm7200_vm2, %v5616_v38, %v2358_v39  ;;  %v5578_v59 = vld [vmem:[%s7194_s18 + $0x48] sm:$0xe]  ;;  %v5579_v62 = vld [vmem:[%s7194_s18 + $0x4c] sm:$0xf] }
  0x19   : > { %6475 = vmatprep.subr.bf16.mxu0 %v6997_v11  ;;  %6481 = vmatprep.mubr.bf16.mxu0 %v5646_v31  ;;  %v5647_v53 = vcombine.low %v2352_v42, %v2355_v43  ;;  %v2368_v58 = vrot.slane %v5577_v48, 5  ;;  %v5580_v63 = vld [vmem:[%s7194_s18 + $0x50] sm:$0x1]  ;;  %v5618_v0 = vrot.slane %v5578_v59, 9  ;;  %v2372_v1 = vrot.slane %v5579_v62, 5  ;;  %v7011_v19 = vld [vmem:[%s8270_s1 + $0x158] sm:$0xff]  }
  0x1a   : > { %v2362_v52 = vsel %vm7200_vm2, %v2360_v44, %v2361_v40  ;;  %v2367_v57 = vrot.slane %v2365_v49, 4  ;;  %v2375_v2 = vrot.slane %v5580_v63, 5  ;;  %v2366_v4 = vsel %vm7200_vm2, %v5617_v56, %v2365_v49  ;;  %v5581_v8 = vld [vmem:[%s7194_s18 + $0x54] sm:$0xe]  ;;  %v5582_v9 = vld [vmem:[%s7194_s18 + $0x58] sm:$0xf] }
  0x1b   : > { %6284 = vmatpush3.bf16.msra.mxu1 %v6996_v10  ;;  %v5648_v60 = vcombine.low %v2359_v51, %v2362_v52  ;;  %v2374_v6 = vrot.slane %v2372_v1, 4  ;;  %v7010_v10 = vld [vmem:[%s8270_s1 + $0x150] sm:$0xff]   ;;  %v5583_v12 = vld [vmem:[%s7194_s18 + $0x5c] sm:$0x1]  ;;  %v2379_v14 = vrot.slane %v5582_v9, 5  ;;  %v5619_v17 = vrot.slane %v5581_v8, 9 }
  0x1c   : > { %6476 = vmatpush3.bf16.msra.mxu0 %v6997_v11  ;;  %6285 = vmatprep.subr.bf16.mxu1 %v6998_v20  ;;  %v2369_v5 = vsel %vm7200_vm2, %v2367_v57, %v2368_v58  ;;  %v2373_v11 = vsel %vm7200_vm2, %v5618_v0, %v2372_v1  ;;  %v7012_v15 = vld [vmem:[%s7194_s18 + $0x30] sm:$0xff]   ;;  %v2382_v21 = vrot.slane %v5583_v12, 5  ;;  %v5584_v23 = vld [vmem:[%s7194_s18 + $0x60] sm:$0xe]  ;;  %v5586_v25 = vld [vmem:[%s7194_s18 + $0x68] sm:$0x1] }
  0x1d   : > { %6477 = vmatprep.subr.bf16.mxu0 %v6999_v24  ;;  %v2376_v16 = vsel %vm7200_vm2, %v2374_v6, %v2375_v2  ;;  %v5649_v18 = vcombine.low %v2366_v4, %v2369_v5  ;;  %v5620_v26 = vrot.slane %v5584_v23, 9  ;;  %v2389_v28 = vrot.slane %v5586_v25, 5  ;;  %v5587_v31 = vld [vmem:[%s7194_s18 + $0x6c] sm:$0xe]  ;;  %v7013_v32 = vld [vmem:[%s7194_s18 + $0x3c] sm:$0xff]   ;;  %v7018_v59 = vld [vmem:[%s7194_s18 + $0x54] sm:$0xff]  }
  0x1e   : > { %v5650_v22 = vcombine.low %v2373_v11, %v2376_v16  ;;  %v2380_v33 = vsel %vm7200_vm2, %v5619_v17, %v2379_v14  ;;  %v5588_v35 = vld [vmem:[%s7194_s18 + $0x70] sm:$0xf]  ;;  %v5589_v36 = vld [vmem:[%s7194_s18 + $0x74] sm:$0x1]  ;;  %v7015_v37 = vld [vmem:[%s8270_s1 + $0x160] sm:$0xff]   ;;  %v5621_v42 = vrot.slane %v5587_v31, 9 }
  0x1f   : > { %6286 = vmatpush3.bf16.msra.mxu1 %v6998_v20  ;;  %v2381_v20 = vrot.slane %v2379_v14, 4  ;;  %v2393_v40 = vrot.slane %v5588_v35, 5  ;;  %v2396_v45 = vrot.slane %v5589_v36, 5  ;;  %v5671_v48 = vld [vmem:[%s7194_s18 + $0x1c] sm:$0xf]  ;;  %v7024_v56 = vld [vmem:[%s8270_s1 + $0x60] sm:$0xff]  }
  0x20   : > { %6478 = vmatpush3.bf16.msra.mxu0 %v6999_v24  ;;  %6287 = vmatprep.subr.bf16.mxu1 %v7000_v27  ;;  %v5585_v24 = vld [vmem:[%s7194_s18 + $0x64] sm:$0xf]  ;;  %v5672_v49 = vld [vmem:[%s7194_s18 + $0x20] sm:$0x3]  ;;  %v5674_v58 = vld [vmem:[%s7194_s18 + $0x28] sm:$0xf] }
  0x21   : > { %6479 = vmatprep.subr.bf16.mxu0 %v7001_v30  ;;  %v2383_v34 = vsel %vm7200_vm2, %v2381_v20, %v2382_v21  ;;  %v2395_v44 = vrot.slane %v2393_v40, 4  ;;  %v5673_v57 = vld [vmem:[%s7194_s18 + $0x24] sm:$0xc]  ;;  %v5675_v62 = vld [vmem:[%s7194_s18 + $0x2c] sm:$0x3]  ;;  %v2945_v63 = vrot.slane %v5674_v58, 6 }
  0x22   : > { %v5651_v43 = vcombine.low %v2380_v33, %v2383_v34  ;;  %v7020_v0 = vld [vmem:[%s8270_s1 + $0x170] sm:$0xff]   ;;  %v5719_v4 = vrot.slane %v5673_v57, 10  ;;  %v2948_v9 = vrot.slane %v5675_v62, 6  ;;  %v5678_v11 = vld [vmem:[%s7194_s18 + $0x38] sm:$0x3]  ;;  %v7028_v17 = vld [vmem:[%s8270_s1 + $0x68] sm:$0xff]  }
  0x23   : > { %6288 = vmatpush3.bf16.msra.mxu1 %v7000_v27  ;;  %v2386_v27 = vrot.slane %v5585_v24, 5  ;;  %v5676_v5 = vld [vmem:[%s7194_s18 + $0x30] sm:$0xc]  ;;  %v2947_v8 = vrot.slane %v2945_v63, 4  ;;  %v2955_v16 = vrot.slane %v5678_v11, 6 }
  0x24   : > { %6480 = vmatpush3.bf16.msra.mxu0 %v7001_v30  ;;  %6321 = vmatprep.subr.bf16.mxu1 %v7004_v41  ;;  %v7019_v30 = vld [vmem:[%s8270_s1 + $0x58] sm:$0xff]   ;;  %v5720_v14 = vrot.slane %v5676_v5, 10  ;;  %v5680_v20 = vld [vmem:[%s7194_s18 + $0x40] sm:$0xf]  ;;  %v5681_v21 = vld [vmem:[%s7194_s18 + $0x44] sm:$0x3]  ;;  %v2946_v24 = vsel %vm7309_vm5, %v5719_v4, %v2945_v63 }
  0x25   : > { %6513 = vmatprep.subr.bf16.mxu0 %v7005_v47  ;;  %v2388_v29 = vrot.slane %v2386_v27, 4  ;;  %v2387_v38 = vsel %vm7200_vm2, %v5620_v26, %v2386_v27  ;;  %v7023_v23 = vld [vmem:[%s7194_s18 + $0x6c] sm:$0xff]   ;;  %v2949_v25 = vsel %vm7309_vm5, %v2947_v8, %v2948_v9  ;;  %v7025_v26 = vld [vmem:[%s8270_s1 + $0x180] sm:$0xff]   ;;  %v7026_v27 = vld [vmem:[%s7194_s18 + $0x78] sm:$0xff]  }
  0x26   : > { %6290 = vmatmul.mubr.bf16.vlgmr.msra.gmra.mrb[0].mxu1 %v7003_v50  ;;  %v7016_v50 = vld [vmem:[%s8270_s1 + $0x168] sm:$0xff]   ;;  %v5684_v34 = vld [vmem:[%s7194_s18 + $0x50] sm:$0x3]  ;;  %v5751_v36 = vcombine.low %v2946_v24, %v2949_v25  ;;  %v5693_v8 = vld [vmem:[%s7194_s18 + $0x74] sm:$0x3] }
  0x27   : > { %6482 = vmatmul.mubr.bf16.vlgmr.msra.gmra.mrb[0].mxu0 %v5647_v53  ;;  %6322 = vmatpush3.bf16.msra.mxu1 %v7004_v41  ;;  %v2390_v39 = vsel %vm7200_vm2, %v2388_v29, %v2389_v28  ;;  %v7017_v41 = vld [vmem:[%s7194_s18 + $0x48] sm:$0xff]   ;;  %v2938_v53 = vrot.slane %v5671_v48, 6  ;;  %v7032_v35 = vld [vmem:[%s8270_s1 + $0x70] sm:$0xff]   ;;  %v602_v11 = vld [vmem:[%s7194_s18 + $0x4] sm:$0xf] }
  0x28   : > { %6514 = vmatpush3.bf16.msra.mxu0 %v7005_v47  ;;  %6293 = vmatprep.mubr.bf16.mxu1 %v7007_v55  ;;  %v5652_v46 = vcombine.low %v2387_v38, %v2390_v39  ;;  %v5670_v47 = vld [vmem:[%s7194_s18 + $0x18] sm:$0xc]  ;;  %v5682_v31 = vld [vmem:[%s7194_s18 + $0x48] sm:$0xc]  ;;  %v5683_v33 = vld [vmem:[%s7194_s18 + $0x4c] sm:$0xf] }
  0x29   : > { %6515 = vmatprep.subr.bf16.mxu0 %v7006_v54  ;;  %6485 = vmatprep.mubr.bf16.mxu0 %v5648_v60  ;;  %v5718_v52 = vrot.slane %v5670_v47, 10  ;;  %v2940_v55 = vrot.slane %v2938_v53, 4  ;;  %v2394_v60 = vsel %vm7200_vm2, %v5621_v42, %v2393_v40  ;;  %v2966_v38 = vrot.slane %v5683_v33, 6  ;;  %v7029_v42 = vld [vmem:[%s8270_s1 + $0x188] sm:$0xff]   ;;  %v5687_v47 = vld [vmem:[%s7194_s18 + $0x5c] sm:$0x3] }
  0x2a   : > { %6323 = vmatprep.subr.bf16.mxu1 %v7009_v61  ;;  %v5722_v40 = vrot.slane %v5682_v31, 10  ;;  %v7027_v48 = vld [vmem:[%s7194_s18 + $0x84] sm:$0xff]   ;;  %v2976_v63 = vrot.slane %v5687_v47, 6  ;;  %v5696_v24 = vld [vmem:[%s7194_s18 + $0x80] sm:$0x3] }
  0x2b   : > { %6324 = vmatpush3.bf16.msra.mxu1 %v7009_v61  ;;  %v2397_v61 = vsel %vm7200_vm2, %v2395_v44, %v2396_v45  ;;  %v2939_v1 = vsel %vm7309_vm5, %v5718_v52, %v2938_v53  ;;  %v5686_v44 = vld [vmem:[%s7194_s18 + $0x58] sm:$0xf]  ;;  %v5685_v45 = vld [vmem:[%s7194_s18 + $0x54] sm:$0xc]  ;;  %v5690_v57 = vld [vmem:[%s7194_s18 + $0x68] sm:$0x3] }
  0x2c   : > { %6516 = vmatpush3.bf16.msra.mxu0 %v7006_v54  ;;  %6325 = vmatprep.subr.bf16.mxu1 %v7014_v7  ;;  %v2941_v54 = vrot.slane %v5672_v49, 6  ;;  %v5653_v6 = vcombine.low %v2394_v60, %v2397_v61  ;;  %v2973_v53 = vrot.slane %v5686_v44, 6  ;;  %v5723_v60 = vrot.slane %v5685_v45, 10  ;;  %v7034_v25 = vld [vmem:[%s7194_s18 + $0xa8] sm:$0xff]  }
  0x2d   : > { %6517 = vmatprep.subr.bf16.mxu0 %v7010_v10  ;;  %v2983_v5 = vrot.slane %v5690_v57, 6  ;;  %v5699_v47 = vld [vmem:[%s7194_s18 + $0x8c] sm:$0x3] }
  0x2e   : > { %6294 = vmatmul.mubr.bf16.gmra.mrb[4].mxu1 %v7008_v3  ;;  %v2942_v2 = vsel %vm7309_vm5, %v2940_v55, %v2941_v54  ;;  %v7022_v3 = vld [vmem:[%s7194_s18 + $0x60] sm:$0xff]  }
  0x2f   : > { %6486 = vmatmul.mubr.bf16.gmra.mrb[4].mxu0 %v5649_v18  ;;  %6297 = vmatprep.mubr.bf16.mxu1 %v7012_v15  ;;  %v5750_v12 = vcombine.low %v2939_v1, %v2942_v2  ;;  %v5688_v54 = vld [vmem:[%s7194_s18 + $0x60] sm:$0xc]  ;;  %v5689_v55 = vld [vmem:[%s7194_s18 + $0x64] sm:$0xf]  ;;  %v7389_v1 = vld [vmem:[%s7194_s18 + $0x6c] sm:$0xc] }
  0x30   : > { %6518 = vmatpush3.bf16.msra.mxu0 %v7010_v10  ;;  %6489 = vmatprep.mubr.bf16.mxu0 %v5650_v22  ;;  %v5677_v10 = vld [vmem:[%s7194_s18 + $0x34] sm:$0xf]  ;;  %v2959_v22 = vrot.slane %v5680_v20, 6  ;;  %v2980_v58 = vrot.slane %v5689_v55, 6  ;;  %v2975_v2 = vrot.slane %v2973_v53, 4  ;;  %v5725_v9 = vrot.slane %v7389_v1, 10 }
  0x31   : > { %6519 = vmatprep.subr.bf16.mxu0 %v7011_v19  ;;  %6326 = vmatpush3.bf16.msra.mxu1 %v7014_v7  ;;  %v7021_v7 = vld [vmem:[%s8270_s1 + $0x178] sm:$0xff]   ;;  %v2952_v15 = vrot.slane %v5677_v10, 6  ;;  %v609_v55 = vld [vmem:[%s7194_s18 + $0x20] sm:$0x1]  ;;  %v3004_v1 = vrot.slane %v5699_v47, 6 }
  0x32   : > { %6327 = vmatprep.subr.bf16.mxu1 %v7019_v30  ;;  %v2982_v4 = vrot.slane %v2980_v58, 4 }
  0x33   : > { %v2954_v18 = vrot.slane %v2952_v15, 4  ;;  %v2953_v28 = vsel %vm7309_vm5, %v5720_v14, %v2952_v15  ;;  %v601_v14 = vld [vmem:[%s7194_s18] sm:$0xe]  ;;  %v603_v15 = vld [vmem:[%s7194_s18 + $0x8] sm:$0x1] }
  0x34   : > { %6520 = vmatpush3.bf16.msra.mxu0 %v7011_v19  ;;  %v5679_v19 = vld [vmem:[%s7194_s18 + $0x3c] sm:$0xc]  ;;  %v5382_v31 = vrot.slane %v601_v14, 9  ;;  %v612_v14 = vld [vmem:[%s7194_s18 + $0x2c] sm:$0x1] }
  0x35   : > { %6521 = vmatprep.subr.bf16.mxu0 %v7015_v37  ;;  %6328 = vmatpush3.bf16.msra.mxu1 %v7019_v30  ;;  %v2956_v29 = vsel %vm7309_vm5, %v2954_v18, %v2955_v16  ;;  %v5721_v30 = vrot.slane %v5679_v19, 10  ;;  %v702_v16 = vrot.slane %v602_v11, 5  ;;  %v7031_v18 = vld [vmem:[%s7194_s18 + $0x9c] sm:$0xff]   ;;  %v2977_v19 = vsel %vm7309_vm5, %v2975_v2, %v2976_v63  ;;  %v5702_v2 = vld [vmem:[%s7194_s18 + $0x98] sm:$0x3] }
  0x36   : > { %6298 = vmatmul.mubr.bf16.gmra.mrb[8].mxu1 %v7013_v32  ;;  %6329 = vmatprep.subr.bf16.mxu1 %v7024_v56  ;;  %v2962_v32 = vrot.slane %v5681_v21, 6  ;;  %v5752_v39 = vcombine.low %v2953_v28, %v2956_v29  ;;  %v2984_v21 = vsel %vm7309_vm5, %v2982_v4, %v2983_v5  ;;  %v7419_v28 = vld [vmem:[%s7194_s18 + $0xc] sm:$0xe]  ;;  %v7422_v29 = vld [vmem:[%s7194_s18 + $0x10] sm:$0xf] }
  0x37   : > { %6490 = vmatmul.mubr.bf16.gmra.mrb[8].mxu0 %v5651_v43  ;;  %6301 = vmatprep.mubr.bf16.mxu1 %v7017_v41  ;;  %v2969_v41 = vrot.slane %v5684_v34, 6  ;;  %v2968_v43 = vrot.slane %v2966_v38, 4  ;;  %v709_v33 = vrot.slane %v7422_v29, 5  ;;  %v7039_v34 = vld [vmem:[%s8270_s1 + $0x1a0] sm:$0xff]   ;;  %v703_v57 = vsel %vm7200_vm2, %v5382_v31, %v702_v16 }
  0x38   : > { %6522 = vmatpush3.bf16.msra.mxu0 %v7015_v37  ;;  %6493 = vmatprep.mubr.bf16.mxu0 %v5652_v46  ;;  %v2961_v37 = vrot.slane %v2959_v22, 4  ;;  %v2960_v46 = vsel %vm7309_vm5, %v5721_v30, %v2959_v22  ;;  %v5694_v22 = vld [vmem:[%s7194_s18 + $0x78] sm:$0xc]  ;;  %v610_v4 = vld [vmem:[%s7194_s18 + $0x24] sm:$0xe] }
  0x39   : > { %6523 = vmatprep.subr.bf16.mxu0 %v7016_v50  ;;  %6330 = vmatpush3.bf16.msra.mxu1 %v7024_v56  ;;  %v2970_v52 = vsel %vm7309_vm5, %v2968_v43, %v2969_v41  ;;  %v7033_v56 = vld [vmem:[%s8270_s1 + $0x190] sm:$0xff]   ;;  %v2997_v41 = vrot.slane %v5696_v24, 6  ;;  %v7434_v43 = vld [vmem:[%s7194_s18 + $0x88] sm:$0xf]  ;;  %v711_v44 = vrot.slane %v709_v33, 4 }
  0x3a   : > { %6331 = vmatprep.subr.bf16.mxu1 %v7028_v17  ;;  %v2963_v49 = vsel %vm7309_vm5, %v2961_v37, %v2962_v32  ;;  %v7425_v32 = vld [vmem:[%s7194_s18 + $0x14] sm:$0x1]  ;;  %v705_v37 = vrot.slane %v603_v15, 5  ;;  %v5705_v24 = vld [vmem:[%s7194_s18 + $0xa4] sm:$0x3] }
  0x3b   : > { %v5753_v61 = vcombine.low %v2960_v46, %v2963_v49  ;;  %v712_v45 = vrot.slane %v7425_v32, 5  ;;  %v5697_v46 = vld [vmem:[%s7194_s18 + $0x84] sm:$0xc]  ;;  %v7041_v49 = vld [vmem:[%s8270_s1 + $0x1a8] sm:$0xff]  }
  0x3c   : > { %6524 = vmatpush3.bf16.msra.mxu0 %v7016_v50  ;;  %v2967_v50 = vsel %vm7309_vm5, %v5722_v40, %v2966_v38  ;;  %v5726_v38 = vrot.slane %v5694_v22, 10  ;;  %v5703_v22 = vld [vmem:[%s7194_s18 + $0x9c] sm:$0xc] }
  0x3d   : > { %6525 = vmatprep.subr.bf16.mxu0 %v7020_v0  ;;  %6332 = vmatpush3.bf16.msra.mxu1 %v7028_v17  ;;  %v5754_v62 = vcombine.low %v2967_v50, %v2970_v52  ;;  %v7405_v17 = vld [vmem:[%s8270_s1 + $0x80] sm:$0xff]   ;;  %v713_v31 = vsel %vm7200_vm2, %v711_v44, %v712_v45  ;;  %v5707_v45 = vld [vmem:[%s7194_s18 + $0xac] sm:$0xf] }
  0x3e   : > { %6302 = vmatmul.mubr.bf16.gmra.mrb[12].mxu1 %v7018_v59  ;;  %6333 = vmatprep.subr.bf16.mxu1 %v7032_v35  ;;  %v7030_v59 = vld [vmem:[%s7194_s18 + $0x90] sm:$0xff]  }
  0x3f   : > { %6494 = vmatmul.mubr.bf16.gmra.mrb[12].mxu0 %v5653_v6  ;;  %6305 = vmatprep.mubr.bf16.mxu1 %v7022_v3  ;;  %v5724_v3 = vrot.slane %v5688_v54, 10  ;;  %v5692_v6 = vld [vmem:[%s7194_s18 + $0x70] sm:$0xf]  ;;  %v608_v54 = vld [vmem:[%s7194_s18 + $0x1c] sm:$0xf] }
  0x40   : > { %6526 = vmatpush3.bf16.msra.mxu0 %v7020_v0  ;;  %6529 = vmatprep.mubr.bf16.mxu0 %v5750_v12  ;;  %v7036_v0 = vld [vmem:[%s8270_s1 + $0x78] sm:$0xff]   ;;  %v2987_v10 = vrot.slane %v5692_v6, 6  ;;  %v2974_v12 = vsel %vm7309_vm5, %v5723_v60, %v2973_v53  ;;  %v716_v60 = vrot.slane %v608_v54, 5  ;;  %v7040_v54 = vld [vmem:[%s8270_s1 + $0x88] sm:$0xff]  }
  0x41   : > { %6527 = vmatprep.subr.bf16.mxu0 %v7021_v7  ;;  %6334 = vmatpush3.bf16.msra.mxu1 %v7032_v35  ;;  %v2981_v20 = vsel %vm7309_vm5, %v5724_v3, %v2980_v58  ;;  %v5755_v35 = vcombine.low %v2974_v12, %v2977_v19  ;;  %v607_v53 = vld [vmem:[%s7194_s18 + $0x18] sm:$0xe]  ;;  %v3011_v19 = vrot.slane %v5702_v2, 6 }
  0x42   : > { %6335 = vmatprep.subr.bf16.mxu1 %v7036_v0  ;;  %v2989_v30 = vrot.slane %v2987_v10, 4  ;;  %v2988_v50 = vsel %vm7309_vm5, %v5725_v9, %v2987_v10  ;;  %v5384_v6 = vrot.slane %v607_v53, 9  ;;  %v611_v9 = vld [vmem:[%s7194_s18 + $0x28] sm:$0xf]  ;;  %v718_v12 = vrot.slane %v716_v60, 4 }
  0x43   : > { %v723_v15 = vrot.slane %v611_v9, 5 }
  0x44   : > { %6528 = vmatpush3.bf16.msra.mxu0 %v7021_v7  ;;  %v7037_v7 = vld [vmem:[%s8270_s1 + $0x198] sm:$0xff]  }
  0x45   : > { %6561 = vmatprep.subr.bf16.mxu0 %v7025_v26  ;;  %6336 = vmatpush3.bf16.msra.mxu1 %v7036_v0 }
  0x46   : > { %6306 = vmatmul.mubr.bf16.gmra.mrb[16].mxu1 %v7023_v23  ;;  %v5695_v23 = vld [vmem:[%s7194_s18 + $0x7c] sm:$0xf]  ;;  %6369 = vmatprep.subr.bf16.mxu1 %v7405_v17 }
  0x47   : > { %6530 = vmatmul.mubr.bf16.vlgmr.msra.gmra.mrb[0].mxu0 %v5751_v36  ;;  %6309 = vmatprep.mubr.bf16.mxu1 %v7026_v27  ;;  %v2994_v27 = vrot.slane %v5695_v23, 6  ;;  %v5756_v36 = vcombine.low %v2981_v20, %v2984_v21  ;;  %v5385_v20 = vrot.slane %v610_v4, 9  ;;  %v7043_v21 = vld [vmem:[%s8270_s1 + $0x1b0] sm:$0xff]   ;;  %v5704_v23 = vld [vmem:[%s7194_s18 + $0xa0] sm:$0xf] }
  0x48   : > { %6562 = vmatpush3.bf16.msra.mxu0 %v7025_v26  ;;  %6533 = vmatprep.mubr.bf16.mxu0 %v5752_v39  ;;  %v2990_v26 = vrot.slane %v5693_v8, 6  ;;  %v704_v39 = vrot.slane %v702_v16, 4  ;;  %v5710_v4 = vld [vmem:[%s7194_s18 + $0xb8] sm:$0xf] }
  0x49   : > { %6563 = vmatprep.subr.bf16.mxu0 %v7029_v42  ;;  %v2996_v40 = vrot.slane %v2994_v27, 4  ;;  %v2995_v63 = vsel %vm7309_vm5, %v5726_v38, %v2994_v27  ;;  %v726_v27 = vrot.slane %v612_v14, 5  ;;  %v3018_v38 = vrot.slane %v5705_v24, 6  ;;  %v5713_v24 = vld [vmem:[%s7194_s18 + $0xc4] sm:$0xf] }
  0x4a   : > { %v2991_v52 = vsel %vm7309_vm5, %v2989_v30, %v2990_v26  ;;  %v706_v58 = vsel %vm7200_vm2, %v704_v39, %v705_v37  ;;  %v725_v26 = vrot.slane %v723_v15, 4  ;;  %v7045_v30 = vld [vmem:[%s8270_s1 + $0x1b8] sm:$0xff]   ;;  %v5729_v37 = vrot.slane %v5703_v22, 10 }
  0x4b   : > { %v2998_v0 = vsel %vm7309_vm5, %v2996_v40, %v2997_v41  ;;  %v5757_v10 = vcombine.low %v2988_v50, %v2991_v52  ;;  %v5414_v11 = vcombine.low %v703_v57, %v706_v58  ;;  %v615_v39 = vld [vmem:[%s7194_s18 + $0x38] sm:$0x1]  ;;  %v5706_v40 = vld [vmem:[%s7194_s18 + $0xa8] sm:$0xc]  ;;  %v3022_v50 = vrot.slane %v5707_v45, 6 }
  0x4c   : > { %6564 = vmatpush3.bf16.msra.mxu0 %v7029_v42  ;;  %v5383_v42 = vrot.slane %v7419_v28, 9  ;;  %v5758_v16 = vcombine.low %v2995_v63, %v2998_v0  ;;  %v3015_v28 = vrot.slane %v5704_v23, 6  ;;  %v7502_v53 = vsel %vm7200_vm2, %v5385_v20, %v723_v15  ;;  %v616_v57 = vld [vmem:[%s7194_s18 + $0x3c] sm:$0xe]  ;;  %v617_v58 = vld [vmem:[%s7194_s18 + $0x40] sm:$0xf] }
  0x4d   : > { %6565 = vmatprep.subr.bf16.mxu0 %v7033_v56  ;;  %v618_v63 = vld [vmem:[%s7194_s18 + $0x44] sm:$0x1]  ;;  %v3024_v2 = vrot.slane %v3022_v50, 4  ;;  %v619_v15 = vld [vmem:[%s7194_s18 + $0x48] sm:$0xe] }
  0x4e   : > { %6310 = vmatmul.mubr.bf16.gmra.mrb[20].mxu1 %v7027_v48  ;;  %v3001_v48 = vrot.slane %v7434_v43, 6  ;;  %v3017_v43 = vrot.slane %v3015_v28, 4  ;;  %v3016_v0 = vsel %vm7309_vm5, %v5729_v37, %v3015_v28  ;;  %v740_v22 = vrot.slane %v618_v63, 5  ;;  %v5712_v23 = vld [vmem:[%s7194_s18 + $0xc0] sm:$0xc] }
  0x4f   : > { %6534 = vmatmul.mubr.bf16.gmra.mrb[4].mxu0 %v5753_v61  ;;  %6313 = vmatprep.mubr.bf16.mxu1 %v7030_v59  ;;  %v5727_v59 = vrot.slane %v5697_v46, 10  ;;  %v5700_v61 = vld [vmem:[%s7194_s18 + $0x90] sm:$0xc]  ;;  %v5708_v46 = vld [vmem:[%s7194_s18 + $0xb0] sm:$0x3]  ;;  %v5732_v37 = vrot.slane %v5712_v23, 10 }
  0x50   : > { %6537 = vmatprep.mubr.bf16.mxu0 %v5754_v62  ;;  %6566 = vmatpush3.bf16.msra.mxu0 %v7033_v56  ;;  %v7035_v56 = vld [vmem:[%s7194_s18 + $0xb4] sm:$0xff]   ;;  %v3003_v5 = vrot.slane %v3001_v48, 4  ;;  %v5728_v8 = vrot.slane %v5700_v61, 10  ;;  %v5730_v61 = vrot.slane %v5706_v40, 10  ;;  %v5714_v28 = vld [vmem:[%s7194_s18 + $0xc8] sm:$0x3] }
  0x51   : > { %6567 = vmatprep.subr.bf16.mxu0 %v7037_v7  ;;  %v5701_v62 = vld [vmem:[%s7194_s18 + $0x94] sm:$0xf]  ;;  %v3002_v29 = vsel %vm7309_vm5, %v5727_v59, %v3001_v48  ;;  %v624_v45 = vld [vmem:[%s7194_s18 + $0x5c] sm:$0x1]  ;;  %v627_v63 = vld [vmem:[%s7194_s18 + $0x68] sm:$0x1] }
  0x52   : > { %v3008_v3 = vrot.slane %v5701_v62, 6  ;;  %v3005_v32 = vsel %vm7309_vm5, %v3003_v5, %v3004_v1  ;;  %v3025_v62 = vrot.slane %v5708_v46, 6  ;;  %v3019_v1 = vsel %vm7309_vm5, %v3017_v43, %v3018_v38  ;;  %v7044_v38 = vld [vmem:[%s8270_s1 + $0x98] sm:$0xff]   ;;  %v622_v43 = vld [vmem:[%s7194_s18 + $0x54] sm:$0xe] }
  0x53   : > { %v5759_v48 = vcombine.low %v3002_v29, %v3005_v32  ;;  %v5387_v5 = vrot.slane %v616_v57, 9  ;;  %v5388_v32 = vrot.slane %v619_v15, 9  ;;  %v7047_v57 = vld [vmem:[%s8270_s1 + $0xa0] sm:$0xff]  }
  0x54   : > { %6568 = vmatpush3.bf16.msra.mxu0 %v7037_v7  ;;  %v719_v7 = vrot.slane %v609_v55, 5  ;;  %v3009_v41 = vsel %vm7309_vm5, %v5728_v8, %v3008_v3  ;;  %v3026_v20 = vsel %vm7309_vm5, %v3024_v2, %v3025_v62  ;;  %v626_v62 = vld [vmem:[%s7194_s18 + $0x64] sm:$0xf] }
  0x55   : > { %6569 = vmatprep.subr.bf16.mxu0 %v7039_v34 }
  0x56   : > { %6314 = vmatmul.mubr.bf16.gmra.mrb[24].mxu1 %v7031_v18  ;;  %v3010_v18 = vrot.slane %v3008_v3, 4  ;;  %v737_v3 = vrot.slane %v617_v58, 5 }
  0x57   : > { %6538 = vmatmul.mubr.bf16.gmra.mrb[8].mxu0 %v5755_v35  ;;  %6317 = vmatprep.mubr.bf16.mxu1 %v7034_v25  ;;  %v710_v25 = vsel %vm7200_vm2, %v5383_v42, %v709_v33  ;;  %v613_v33 = vld [vmem:[%s7194_s18 + $0x30] sm:$0xe]  ;;  %v717_v35 = vsel %vm7200_vm2, %v5384_v6, %v716_v60  ;;  %v727_v60 = vsel %vm7200_vm2, %v725_v26, %v726_v27 }
  0x58   : > { %6541 = vmatprep.mubr.bf16.mxu0 %v5756_v36  ;;  %6570 = vmatpush3.bf16.msra.mxu0 %v7039_v34  ;;  %v614_v34 = vld [vmem:[%s7194_s18 + $0x34] sm:$0xf]  ;;  %v720_v36 = vsel %vm7200_vm2, %v718_v12, %v719_v7  ;;  %v3012_v42 = vsel %vm7309_vm5, %v3010_v18, %v3011_v19  ;;  %v5415_v47 = vcombine.low %v710_v25, %v713_v31  ;;  %v7530_v12 = vld [vmem:[%s8270_s1 + $0x1c0] sm:$0xff]   ;;  %v621_v18 = vld [vmem:[%s7194_s18 + $0x50] sm:$0x1] }
  0x59   : > { %6571 = vmatprep.subr.bf16.mxu0 %v7041_v49  ;;  %v730_v44 = vrot.slane %v614_v34, 5  ;;  %v5416_v52 = vcombine.low %v717_v35, %v720_v36  ;;  %v5760_v59 = vcombine.low %v3009_v41, %v3012_v42  ;;  %v7042_v6 = vld [vmem:[%s8270_s1 + $0x90] sm:$0xff]   ;;  %v5417_v14 = vcombine.low %v7502_v53, %v727_v60  ;;  %v623_v34 = vld [vmem:[%s7194_s18 + $0x58] sm:$0xf] }
  0x5a   : > { %v5709_v7 = vld [vmem:[%s7194_s18 + $0xb4] sm:$0xc]  ;;  %v3023_v19 = vsel %vm7309_vm5, %v5730_v61, %v3022_v50  ;;  %v3039_v42 = vrot.slane %v5714_v28, 6  ;;  %v751_v46 = vrot.slane %v623_v34, 5  ;;  %v5389_v60 = vrot.slane %v622_v43, 9  ;;  %v7059_v43 = vld [vmem:[%s8270_s1 + $0xb8] sm:$0xff]  }
  0x5b   : > { %v732_v55 = vrot.slane %v730_v44, 4  ;;  %v5731_v26 = vrot.slane %v5709_v7, 10  ;;  %v5762_v35 = vcombine.low %v3023_v19, %v3026_v20  ;;  %v754_v61 = vrot.slane %v624_v45, 5 }
  0x5c   : > { %6572 = vmatpush3.bf16.msra.mxu0 %v7041_v49  ;;  %v5386_v49 = vrot.slane %v613_v33, 9  ;;  %v747_v33 = vrot.slane %v621_v18, 5  ;;  %v753_v2 = vrot.slane %v751_v46, 4  ;;  %v752_v18 = vsel %vm7200_vm2, %v5389_v60, %v751_v46  ;;  %v7053_v60 = vld [vmem:[%s8270_s1 + $0x1c8] sm:$0xff]  }
  0x5d   : > { %6573 = vmatprep.subr.bf16.mxu0 %v7043_v21 }
  0x5e   : > { %6318 = vmatmul.mubr.bf16.gmra.mrb[28].mxu1 %v7035_v56  ;;  %v733_v56 = vrot.slane %v615_v39, 5  ;;  %v731_v8 = vsel %vm7200_vm2, %v5386_v49, %v730_v44  ;;  %v738_v39 = vsel %vm7200_vm2, %v5387_v5, %v737_v3  ;;  %v755_v19 = vsel %vm7200_vm2, %v753_v2, %v754_v61  ;;  %v644_v2 = vld [vmem:[%s7194_s18 + $0xac] sm:$0xf] }
  0x5f   : > { %6542 = vmatmul.mubr.bf16.gmra.mrb[12].mxu0 %v5757_v10  ;;  %6337 = vmatprep.mubr.bf16.mxu1 %v5414_v11  ;;  %v5711_v10 = vld [vmem:[%s7194_s18 + $0xbc] sm:$0x3]  ;;  %v3029_v11 = vrot.slane %v5710_v4, 6  ;;  %v5421_v28 = vcombine.low %v752_v18, %v755_v19  ;;  %v7054_v19 = vld [vmem:[%s7194_s18 + $0x60] sm:$0xff]  }
  0x60   : > { %6545 = vmatprep.mubr.bf16.mxu0 %v5758_v16  ;;  %6574 = vmatpush3.bf16.msra.mxu0 %v7043_v21  ;;  %v734_v9 = vsel %vm7200_vm2, %v732_v55, %v733_v56  ;;  %v620_v16 = vld [vmem:[%s7194_s18 + $0x4c] sm:$0xf]  ;;  %v739_v21 = vrot.slane %v737_v3, 4  ;;  %v3032_v29 = vrot.slane %v5711_v10, 6  ;;  %v625_v56 = vld [vmem:[%s7194_s18 + $0x60] sm:$0xe] }
  0x61   : > { %6575 = vmatprep.subr.bf16.mxu0 %v7045_v30  ;;  %v5418_v25 = vcombine.low %v731_v8, %v734_v9  ;;  %v744_v27 = vrot.slane %v620_v16, 5  ;;  %v3031_v31 = vrot.slane %v3029_v11, 4  ;;  %v3030_v44 = vsel %vm7309_vm5, %v5731_v26, %v3029_v11  ;;  %v629_v8 = vld [vmem:[%s7194_s18 + $0x70] sm:$0xf]  ;;  %v7051_v16 = vld [vmem:[%s8270_s1 + $0xa8] sm:$0xff]  }
  0x62   : > { %v741_v40 = vsel %vm7200_vm2, %v739_v21, %v740_v22  ;;  %v758_v3 = vrot.slane %v626_v62, 5  ;;  %v5390_v7 = vrot.slane %v625_v56, 9  ;;  %v761_v11 = vrot.slane %v627_v63, 5  ;;  %v631_v21 = vld [vmem:[%s7194_s18 + $0x78] sm:$0xe] }
  0x63   : > { %v746_v36 = vrot.slane %v744_v27, 4  ;;  %v745_v49 = vsel %vm7200_vm2, %v5388_v32, %v744_v27  ;;  %v5419_v53 = vcombine.low %v738_v39, %v741_v40  ;;  %v765_v15 = vrot.slane %v629_v8, 5  ;;  %v632_v22 = vld [vmem:[%s7194_s18 + $0x7c] sm:$0xf]  ;;  %v633_v26 = vld [vmem:[%s7194_s18 + $0x80] sm:$0x1] }
  0x64   : > { %6576 = vmatpush3.bf16.msra.mxu0 %v7045_v30  ;;  %v3036_v30 = vrot.slane %v5713_v24, 6  ;;  %v760_v10 = vrot.slane %v758_v3, 4  ;;  %v759_v24 = vsel %vm7200_vm2, %v5390_v7, %v758_v3  ;;  %v772_v27 = vrot.slane %v632_v22, 5  ;;  %v7046_v32 = vld [vmem:[%s7194_s18 + $0x30] sm:$0xff]   ;;  %v635_v39 = vld [vmem:[%s7194_s18 + $0x88] sm:$0xf] }
  0x65   : > { %6609 = vmatprep.subr.bf16.mxu0 %v7530_v12  ;;  %v748_v50 = vsel %vm7200_vm2, %v746_v36, %v747_v33  ;;  %v767_v33 = vrot.slane %v765_v15, 4  ;;  %v5392_v34 = vrot.slane %v631_v21, 9  ;;  %v775_v36 = vrot.slane %v633_v26, 5  ;;  %v634_v40 = vld [vmem:[%s7194_s18 + $0x84] sm:$0xe] }
  0x66   : > { %6338 = vmatmul.mubr.bf16.vlgmr.msra.gmra.mrb[0].mxu1 %v5415_v47  ;;  %v3038_v41 = vrot.slane %v3036_v30, 4  ;;  %v5716_v47 = vld [vmem:[%s7194_s18 + $0xd0] sm:$0xf]  ;;  %v3037_v58 = vsel %vm7309_vm5, %v5732_v37, %v3036_v30  ;;  %v779_v46 = vrot.slane %v635_v39, 5  ;;  %v5393_v56 = vrot.slane %v634_v40, 9  ;;  %v7065_v39 = vld [vmem:[%s8270_s1 + $0x1e0] sm:$0xff]  }
  0x67   : > { %6546 = vmatmul.mubr.bf16.gmra.mrb[16].mxu0 %v5759_v48  ;;  %6370 = vmatpush3.bf16.msra.mxu1 %v7405_v17  ;;  %v5761_v17 = vcombine.low %v3016_v0, %v3019_v1  ;;  %v3033_v48 = vsel %vm7309_vm5, %v3031_v31, %v3032_v29  ;;  %v3043_v55 = vrot.slane %v5716_v47, 6  ;;  %v5420_v1 = vcombine.low %v745_v49, %v748_v50  ;;  %v7055_v29 = vld [vmem:[%s8270_s1 + $0xb0] sm:$0xff]   ;;  %v642_v3 = vld [vmem:[%s7194_s18 + $0xa4] sm:$0x1]  ;;  %v643_v8 = vld [vmem:[%s7194_s18 + $0xa8] sm:$0xe] }
  0x68   : > { %6341 = vmatprep.mubr.bf16.mxu1 %v5416_v52  ;;  %6549 = vmatprep.mubr.bf16.mxu0 %v5760_v59  ;;  %v5715_v52 = vld [vmem:[%s7194_s18 + $0xcc] sm:$0xc]  ;;  %v3040_v59 = vsel %vm7309_vm5, %v3038_v41, %v3039_v42  ;;  %v5763_v0 = vcombine.low %v3030_v44, %v3033_v48  ;;  %v636_v41 = vld [vmem:[%s7194_s18 + $0x8c] sm:$0x1]  ;;  %v638_v42 = vld [vmem:[%s7194_s18 + $0x94] sm:$0xf]  ;;  %v773_v47 = vsel %vm7200_vm2, %v5392_v34, %v772_v27 }
  0x69   : > { %6371 = vmatprep.subr.bf16.mxu1 %v7040_v54  ;;  %v5733_v4 = vrot.slane %v5715_v52, 10  ;;  %v3045_v5 = vrot.slane %v3043_v55, 4  ;;  %v5764_v9 = vcombine.low %v3037_v58, %v3040_v59  ;;  %v637_v49 = vld [vmem:[%s7194_s18 + $0x90] sm:$0xe]  ;;  %v786_v50 = vrot.slane %v638_v42, 5  ;;  %v7048_v52 = vld [vmem:[%s7194_s18 + $0x3c] sm:$0xff]  }
  0x6a   : > { %v781_v59 = vrot.slane %v779_v46, 4  ;;  %v5394_v61 = vrot.slane %v637_v49, 9  ;;  %v796_v21 = vrot.slane %v642_v3, 5  ;;  %v5396_v22 = vrot.slane %v643_v8, 9  ;;  %v646_v26 = vld [vmem:[%s7194_s18 + $0xb4] sm:$0xe] }
  0x6b   : > { %6372 = vmatpush3.bf16.msra.mxu1 %v7040_v54  ;;  %v5717_v54 = vld [vmem:[%s7194_s18 + $0xd4] sm:$0x3]  ;;  %v3044_v20 = vsel %vm7309_vm5, %v5733_v4, %v3043_v55  ;;  %v7050_v55 = vld [vmem:[%s7194_s18 + $0x48] sm:$0xff]   ;;  %v788_v62 = vrot.slane %v786_v50, 4  ;;  %v7629_v4 = vld [vmem:[%s8270_s1 + $0xc0] sm:$0xff]  }
  0x6c   : > { %6373 = vmatprep.subr.bf16.mxu1 %v7042_v6 }
  0x6e   : > { %6342 = vmatmul.mubr.bf16.gmra.mrb[4].mxu1 %v5417_v14  ;;  %v628_v14 = vld [vmem:[%s7194_s18 + $0x6c] sm:$0xe] }
  0x6f   : > { %6550 = vmatmul.mubr.bf16.gmra.mrb[20].mxu0 %v5761_v17  ;;  %6345 = vmatprep.mubr.bf16.mxu1 %v5418_v25  ;;  %v630_v17 = vld [vmem:[%s7194_s18 + $0x74] sm:$0x1]  ;;  %v762_v25 = vsel %vm7200_vm2, %v760_v10, %v761_v11  ;;  %v5391_v30 = vrot.slane %v628_v14, 9  ;;  %v787_v10 = vsel %vm7200_vm2, %v5394_v61, %v786_v50  ;;  %v1205_v50 = vld [vmem:[%s7194_s18 + $0x1c] sm:$0xf] }
  0x70   : > { %6553 = vmatprep.mubr.bf16.mxu0 %v5762_v35  ;;  %6374 = vmatpush3.bf16.msra.mxu1 %v7042_v6  ;;  %v3046_v6 = vrot.slane %v5717_v54, 6  ;;  %v768_v31 = vrot.slane %v630_v17, 5  ;;  %v774_v35 = vrot.slane %v772_v27, 4  ;;  %v7057_v14 = vld [vmem:[%s8270_s1 + $0x1d0] sm:$0xff]   ;;  %v800_v17 = vrot.slane %v644_v2, 5  ;;  %v7061_v27 = vld [vmem:[%s8270_s1 + $0x1d8] sm:$0xff]  }
  0x71   : > { %6375 = vmatprep.subr.bf16.mxu1 %v7044_v38  ;;  %v766_v44 = vsel %vm7200_vm2, %v5391_v30, %v765_v15  ;;  %v648_v30 = vld [vmem:[%s7194_s18 + $0xbc] sm:$0x1]  ;;  %v7062_v2 = vld [vmem:[%s7194_s18 + $0x90] sm:$0xff]  }
  0x72   : > { %v3047_v23 = vsel %vm7309_vm5, %v3045_v5, %v3046_v6  ;;  %v769_v45 = vsel %vm7200_vm2, %v767_v33, %v768_v31  ;;  %v776_v48 = vsel %vm7200_vm2, %v774_v35, %v775_v36  ;;  %v780_v5 = vsel %vm7200_vm2, %v5393_v56, %v779_v46  ;;  %v1198_v33 = vld [vmem:[%s7194_s18] sm:$0xc]  ;;  %v7058_v46 = vld [vmem:[%s7194_s18 + $0x78] sm:$0xff]  }
  0x73   : > { %v5765_v37 = vcombine.low %v3044_v20, %v3047_v23  ;;  %v5423_v54 = vcombine.low %v766_v44, %v769_v45  ;;  %v5424_v58 = vcombine.low %v773_v47, %v776_v48  ;;  %v647_v23 = vld [vmem:[%s7194_s18 + $0xb8] sm:$0xf]  ;;  %v801_v34 = vsel %vm7200_vm2, %v5396_v22, %v800_v17  ;;  %v7056_v44 = vld [vmem:[%s7194_s18 + $0x6c] sm:$0xff]  }
  0x74   : > { %6376 = vmatpush3.bf16.msra.mxu1 %v7044_v38  ;;  %v5422_v38 = vcombine.low %v759_v24, %v762_v25  ;;  %v802_v24 = vrot.slane %v800_v17, 4  ;;  %v807_v31 = vrot.slane %v647_v23, 5  ;;  %v810_v42 = vrot.slane %v648_v30, 5 }
  0x75   : > { %6377 = vmatprep.subr.bf16.mxu1 %v7047_v57  ;;  %v5438_v47 = vrot.slane %v1198_v33, 10  ;;  %v1217_v33 = vld [vmem:[%s7194_s18 + $0x4c] sm:$0xf] }
  0x76   : > { %6346 = vmatmul.mubr.bf16.gmra.mrb[8].mxu1 %v5419_v53  ;;  %v639_v53 = vld [vmem:[%s7194_s18 + $0x98] sm:$0x1] }
  0x77   : > { %6554 = vmatmul.mubr.bf16.gmra.mrb[24].mxu0 %v5763_v0  ;;  %6349 = vmatprep.mubr.bf16.mxu1 %v5420_v1  ;;  %v789_v63 = vrot.slane %v639_v53, 5  ;;  %v641_v0 = vld [vmem:[%s7194_s18 + $0xa0] sm:$0xf]  ;;  %v640_v1 = vld [vmem:[%s7194_s18 + $0x9c] sm:$0xe] }
  0x78   : > { %6557 = vmatprep.mubr.bf16.mxu0 %v5764_v9  ;;  %6378 = vmatpush3.bf16.msra.mxu1 %v7047_v57  ;;  %v782_v57 = vrot.slane %v636_v41, 5  ;;  %v793_v7 = vrot.slane %v641_v0, 5  ;;  %v645_v9 = vld [vmem:[%s7194_s18 + $0xb0] sm:$0x1]  ;;  %v809_v41 = vrot.slane %v807_v31, 4 }
  0x79   : > { %6379 = vmatprep.subr.bf16.mxu1 %v7051_v16  ;;  %v790_v11 = vsel %vm7200_vm2, %v788_v62, %v789_v63  ;;  %v803_v25 = vrot.slane %v645_v9, 5  ;;  %v1203_v53 = vld [vmem:[%s7194_s18 + $0x14] sm:$0x3]  ;;  %v1206_v62 = vld [vmem:[%s7194_s18 + $0x20] sm:$0x3] }
  0x7a   : > { %v783_v6 = vsel %vm7200_vm2, %v781_v59, %v782_v57  ;;  %v5426_v18 = vcombine.low %v787_v10, %v790_v11  ;;  %v795_v20 = vrot.slane %v793_v7, 4  ;;  %v811_v57 = vsel %vm7200_vm2, %v809_v41, %v810_v42  ;;  %v1208_v0 = vld [vmem:[%s7194_s18 + $0x28] sm:$0xf]  ;;  %v1207_v11 = vld [vmem:[%s7194_s18 + $0x24] sm:$0xc] }
  0x7b   : > { %v5425_v15 = vcombine.low %v780_v5, %v783_v6  ;;  %v804_v35 = vsel %vm7200_vm2, %v802_v24, %v803_v25  ;;  %v1313_v59 = vrot.slane %v1205_v50, 6  ;;  %v1309_v6 = vrot.slane %v1203_v53, 6  ;;  %v7064_v25 = vld [vmem:[%s7194_s18 + $0x9c] sm:$0xff]   ;;  %v1216_v41 = vld [vmem:[%s7194_s18 + $0x48] sm:$0xc] }
  0x7c   : > { %6380 = vmatpush3.bf16.msra.mxu1 %v7051_v16  ;;  %v5395_v16 = vrot.slane %v640_v1, 9  ;;  %v5428_v45 = vcombine.low %v801_v34, %v804_v35  ;;  %v7060_v1 = vld [vmem:[%s7194_s18 + $0x84] sm:$0xff]   ;;  %v1316_v10 = vrot.slane %v1206_v62, 6  ;;  %v1320_v17 = vrot.slane %v1208_v0, 6  ;;  %v1218_v42 = vld [vmem:[%s7194_s18 + $0x50] sm:$0x3] }
  0x7d   : > { %6381 = vmatprep.subr.bf16.mxu1 %v7055_v29  ;;  %v1315_v9 = vrot.slane %v1313_v59, 4  ;;  %v5441_v22 = vrot.slane %v1207_v11, 10  ;;  %v7738_v50 = vld [vmem:[%s7194_s18 + $0x58] sm:$0xf] }
  0x7e   : > { %6350 = vmatmul.mubr.bf16.gmra.mrb[12].mxu1 %v5421_v28  ;;  %v1199_v28 = vld [vmem:[%s7194_s18 + $0x4] sm:$0xf]  ;;  %v1348_v0 = vrot.slane %v7738_v50, 6 }
  0x7f   : > { %6558 = vmatmul.mubr.bf16.gmra.mrb[28].mxu0 %v5765_v37  ;;  %6353 = vmatprep.mubr.bf16.mxu1 %v5422_v38  ;;  %v1299_v36 = vrot.slane %v1199_v28, 6  ;;  %v5397_v37 = vrot.slane %v646_v26, 9  ;;  %v1200_v38 = vld [vmem:[%s7194_s18 + $0x8] sm:$0x3]  ;;  %v1317_v26 = vsel %vm7309_vm5, %v1315_v9, %v1316_v10  ;;  %v5848_v10 = vld [vmem:[%s7194_s18 + $0x38] sm:$0x1] }
  0x80   : > { %6577 = vmatprep.mubr.bf16.mxu0 %v7046_v32  ;;  %6382 = vmatpush3.bf16.msra.mxu1 %v7055_v29  ;;  %v794_v29 = vsel %vm7200_vm2, %v5395_v16, %v793_v7  ;;  %v797_v32 = vsel %vm7200_vm2, %v795_v20, %v796_v21  ;;  %v1302_v49 = vrot.slane %v1200_v38, 6  ;;  %v1210_v16 = vld [vmem:[%s7194_s18 + $0x30] sm:$0xc]  ;;  %v1213_v38 = vld [vmem:[%s7194_s18 + $0x3c] sm:$0xc] }
  0x81   : > { %6383 = vmatprep.subr.bf16.mxu1 %v7059_v43  ;;  %v5427_v40 = vcombine.low %v794_v29, %v797_v32  ;;  %v1301_v48 = vrot.slane %v1299_v36, 4  ;;  %v808_v56 = vsel %vm7200_vm2, %v5397_v37, %v807_v31  ;;  %v5442_v28 = vrot.slane %v1210_v16, 10  ;;  %v7066_v29 = vld [vmem:[%s7194_s18 + $0xa8] sm:$0xff]   ;;  %v1214_v32 = vld [vmem:[%s7194_s18 + $0x40] sm:$0xf] }
  0x82   : > { %v5429_v63 = vcombine.low %v808_v56, %v811_v57  ;;  %v7067_v37 = vld [vmem:[%s8270_s1 + $0xc8] sm:$0xff]   ;;  %v1344_v56 = vrot.slane %v1218_v42, 6  ;;  %v7764_v16 = vld [vmem:[%s7194_s18 + $0x70] sm:$0xf] }
  0x83   : > { %v1303_v61 = vsel %vm7309_vm5, %v1301_v48, %v1302_v49  ;;  %v5443_v48 = vrot.slane %v1213_v38, 10  ;;  %v7071_v49 = vld [vmem:[%s8270_s1 + $0xd0] sm:$0xff]  }
  0x84   : > { %6384 = vmatpush3.bf16.msra.mxu1 %v7059_v43  ;;  %v1202_v43 = vld [vmem:[%s7194_s18 + $0x10] sm:$0xf] }
  0x85   : > { %6417 = vmatprep.subr.bf16.mxu1 %v7629_v4 }
  0x86   : > { %6354 = vmatmul.mubr.bf16.gmra.mrb[16].mxu1 %v5423_v54  ;;  %v1306_v54 = vrot.slane %v1202_v43, 6  ;;  %v1321_v43 = vsel %vm7309_vm5, %v5441_v22, %v1320_v17  ;;  %v7078_v22 = vld [vmem:[%s8270_s1 + $0xe0] sm:$0xff]  }
  0x87   : > { %6578 = vmatmul.mubr.bf16.vlgmr.msra.gmra.mrb[0].mxu0 %v7048_v52  ;;  %6357 = vmatprep.mubr.bf16.mxu1 %v5424_v58  ;;  %v1201_v52 = vld [vmem:[%s7194_s18 + $0xc] sm:$0xc]  ;;  %v1204_v58 = vld [vmem:[%s7194_s18 + $0x18] sm:$0xc] }
  0x88   : > { %6610 = vmatpush3.bf16.msra.mxu0 %v7530_v12  ;;  %6581 = vmatprep.mubr.bf16.mxu0 %v7050_v55  ;;  %v7052_v12 = vld [vmem:[%s7194_s18 + $0x54] sm:$0xff]   ;;  %v7069_v55 = vld [vmem:[%s8270_s1 + $0x1e8] sm:$0xff]   ;;  %v5439_v3 = vrot.slane %v1201_v52, 10  ;;  %v1308_v5 = vrot.slane %v1306_v54, 4  ;;  %v5440_v7 = vrot.slane %v1204_v58, 10  ;;  %v7070_v58 = vld [vmem:[%s7194_s18 + $0xc0] sm:$0xff]  }
  0x89   : > { %6611 = vmatprep.subr.bf16.mxu0 %v7053_v60  ;;  %v7068_v52 = vld [vmem:[%s7194_s18 + $0xb4] sm:$0xff]  }
  0x8a   : > { %v1310_v20 = vsel %vm7309_vm5, %v1308_v5, %v1309_v6  ;;  %v1314_v21 = vsel %vm7309_vm5, %v5440_v7, %v1313_v59  ;;  %v1219_v59 = vld [vmem:[%s7194_s18 + $0x54] sm:$0xc]  ;;  %v7075_v5 = vld [vmem:[%s8270_s1 + $0xd8] sm:$0xff]   ;;  %v5846_v7 = vld [vmem:[%s7194_s18 + $0x30] sm:$0xe] }
  0x8b   : > { %v5472_v34 = vcombine.low %v1314_v21, %v1317_v26  ;;  %v5894_v21 = vrot.slane %v5846_v7, 9  ;;  %v1225_v26 = vld [vmem:[%s7194_s18 + $0x6c] sm:$0xc]  ;;  %v1233_v7 = vld [vmem:[%s7194_s18 + $0x8c] sm:$0x3] }
  0x8c   : > { %6612 = vmatpush3.bf16.msra.mxu0 %v7053_v60  ;;  %v1300_v60 = vsel %vm7309_vm5, %v5438_v47, %v1299_v36  ;;  %v7077_v36 = vld [vmem:[%s8270_s1 + $0x1f8] sm:$0xff]  }
  0x8d   : > { %6613 = vmatprep.subr.bf16.mxu0 %v7057_v14  ;;  %v5470_v8 = vcombine.low %v1300_v60, %v1303_v61  ;;  %v1223_v60 = vld [vmem:[%s7194_s18 + $0x64] sm:$0xf] }
  0x8e   : > { %6358 = vmatmul.mubr.bf16.gmra.mrb[20].mxu1 %v5425_v15  ;;  %v7073_v15 = vld [vmem:[%s8270_s1 + $0x1f0] sm:$0xff]   ;;  %v1355_v6 = vrot.slane %v1223_v60, 6 }
  0x8f   : > { %6582 = vmatmul.mubr.bf16.gmra.mrb[4].mxu0 %v7052_v12  ;;  %6361 = vmatprep.mubr.bf16.mxu1 %v5426_v18  ;;  %v1211_v12 = vld [vmem:[%s7194_s18 + $0x34] sm:$0xf]  ;;  %v1212_v18 = vld [vmem:[%s7194_s18 + $0x38] sm:$0x3] }
  0x90   : > { %6585 = vmatprep.mubr.bf16.mxu0 %v7054_v19  ;;  %6614 = vmatpush3.bf16.msra.mxu0 %v7057_v14  ;;  %v1209_v14 = vld [vmem:[%s7194_s18 + $0x2c] sm:$0x3]  ;;  %v1307_v19 = vsel %vm7309_vm5, %v5439_v3, %v1306_v54  ;;  %v1327_v24 = vrot.slane %v1211_v12, 6  ;;  %v1330_v30 = vrot.slane %v1212_v18, 6  ;;  %v1224_v3 = vld [vmem:[%s7194_s18 + $0x68] sm:$0x3] }
  0x91   : > { %6615 = vmatprep.subr.bf16.mxu0 %v7061_v27  ;;  %v1323_v23 = vrot.slane %v1209_v14, 6  ;;  %v5471_v31 = vcombine.low %v1307_v19, %v1310_v20  ;;  %v1350_v18 = vrot.slane %v1348_v0, 4  ;;  %v1358_v20 = vrot.slane %v1224_v3, 6  ;;  %v1231_v3 = vld [vmem:[%s7194_s18 + $0x84] sm:$0xc] }
  0x92   : > { %v1329_v35 = vrot.slane %v1327_v24, 4 }
  0x94   : > { %6616 = vmatpush3.bf16.msra.mxu0 %v7061_v27  ;;  %v1322_v27 = vrot.slane %v1320_v17, 4  ;;  %v1331_v47 = vsel %vm7309_vm5, %v1329_v35, %v1330_v30  ;;  %v5851_v35 = vld [vmem:[%s7194_s18 + $0x44] sm:$0x1] }
  0x95   : > { %6617 = vmatprep.subr.bf16.mxu0 %v7065_v39 }
  0x96   : > { %6362 = vmatmul.mubr.bf16.gmra.mrb[24].mxu1 %v5427_v40  ;;  %v1215_v40 = vld [vmem:[%s7194_s18 + $0x44] sm:$0x3] }
  0x97   : > { %6586 = vmatmul.mubr.bf16.gmra.mrb[8].mxu0 %v7056_v44  ;;  %6365 = vmatprep.mubr.bf16.mxu1 %v5428_v45  ;;  %v1324_v44 = vsel %vm7309_vm5, %v1322_v27, %v1323_v23  ;;  %v1341_v45 = vrot.slane %v1217_v33, 6  ;;  %v1337_v54 = vrot.slane %v1215_v40, 6  ;;  %v7072_v23 = vld [vmem:[%s7194_s18 + $0xcc] sm:$0xff]   ;;  %v7772_v27 = vld [vmem:[%s7194_s18 + $0x40] sm:$0xf] }
  0x98   : > { %6589 = vmatprep.mubr.bf16.mxu0 %v7058_v46  ;;  %6618 = vmatpush3.bf16.msra.mxu0 %v7065_v39  ;;  %v1334_v39 = vrot.slane %v1214_v32, 6  ;;  %v7728_v46 = vld [vmem:[%s8270_s1 + $0x200] sm:$0xff]   ;;  %v5473_v57 = vcombine.low %v1321_v43, %v1324_v44  ;;  %v7777_v32 = vld [vmem:[%s7194_s18 + $0x7c] sm:$0xf]  ;;  %v3990_v38 = vrot.slane %v7772_v27, 5  ;;  %v7080_v44 = vld [vmem:[%s8270_s1 + $0xe8] sm:$0xff]  }
  0x99   : > { %6619 = vmatprep.subr.bf16.mxu0 %v7069_v55  ;;  %v1343_v62 = vrot.slane %v1341_v45, 4  ;;  %v1230_v40 = vld [vmem:[%s7194_s18 + $0x80] sm:$0x3]  ;;  %v1369_v43 = vrot.slane %v7777_v32, 6  ;;  %v1236_v27 = vld [vmem:[%s7194_s18 + $0x98] sm:$0x3] }
  0x9a   : > { %v1336_v53 = vrot.slane %v1334_v39, 4  ;;  %v5858_v32 = vld [vmem:[%s7194_s18 + $0x60] sm:$0xe] }
  0x9b   : > { %v1345_v17 = vsel %vm7309_vm5, %v1343_v62, %v1344_v56  ;;  %v7808_v56 = vld [vmem:[%s7194_s18 + $0x88] sm:$0xf] }
  0x9c   : > { %6620 = vmatpush3.bf16.msra.mxu0 %v7069_v55  ;;  %v5444_v55 = vrot.slane %v1216_v41, 10  ;;  %v1338_v9 = vsel %vm7309_vm5, %v1336_v53, %v1337_v54  ;;  %v7076_v62 = vld [vmem:[%s7194_s18 + $0xe4] sm:$0xff]  }
  0x9d   : > { %6621 = vmatprep.subr.bf16.mxu0 %v7073_v15 }
  0x9e   : > { %6366 = vmatmul.mubr.bf16.gmra.mrb[28].mxu1 %v5429_v63  ;;  %v1221_v63 = vld [vmem:[%s7194_s18 + $0x5c] sm:$0x3]  ;;  %v1342_v14 = vsel %vm7309_vm5, %v5444_v55, %v1341_v45 }
  0x9f   : > { %6590 = vmatmul.mubr.bf16.gmra.mrb[12].mxu0 %v7060_v1  ;;  %6385 = vmatprep.mubr.bf16.mxu1 %v5470_v8  ;;  %v5847_v1 = vld [vmem:[%s7194_s18 + $0x34] sm:$0xf]  ;;  %v1335_v8 = vsel %vm7309_vm5, %v5443_v48, %v1334_v39  ;;  %v1351_v12 = vrot.slane %v1221_v63, 6  ;;  %v5476_v33 = vcombine.low %v1342_v14, %v1345_v17  ;;  %v1228_v39 = vld [vmem:[%s7194_s18 + $0x78] sm:$0xc]  ;;  %v1371_v63 = vrot.slane %v1369_v43, 4 }
  0xa0   : > { %6593 = vmatprep.mubr.bf16.mxu0 %v7062_v2  ;;  %6622 = vmatpush3.bf16.msra.mxu0 %v7073_v15  ;;  %v1222_v2 = vld [vmem:[%s7194_s18 + $0x60] sm:$0xc]  ;;  %v3983_v11 = vrot.slane %v5847_v1, 5  ;;  %v5445_v15 = vrot.slane %v1219_v59, 10  ;;  %v5852_v48 = vld [vmem:[%s7194_s18 + $0x48] sm:$0xe] }
  0xa1   : > { %6623 = vmatprep.subr.bf16.mxu0 %v7077_v36  ;;  %v5446_v19 = vrot.slane %v1222_v2, 10  ;;  %v1352_v42 = vsel %vm7309_vm5, %v1350_v18, %v1351_v12  ;;  %v3993_v59 = vrot.slane %v5851_v35, 5  ;;  %v5448_v60 = vrot.slane %v1228_v39, 10  ;;  %v7820_v14 = vld [vmem:[%s7194_s18 + $0x94] sm:$0xf] }
  0xa2   : > { %v3985_v30 = vrot.slane %v3983_v11, 4  ;;  %v1349_v41 = vsel %vm7309_vm5, %v5445_v15, %v1348_v0  ;;  %v1372_v0 = vrot.slane %v1230_v40, 6  ;;  %v5896_v1 = vrot.slane %v5852_v48, 9  ;;  %v5857_v12 = vld [vmem:[%s7194_s18 + $0x5c] sm:$0x1] }
  0xa3   : > { %v1356_v45 = vsel %vm7309_vm5, %v5446_v19, %v1355_v6  ;;  %v7855_v39 = vld [vmem:[%s7194_s18 + $0xa0] sm:$0xf]  ;;  %v1239_v48 = vld [vmem:[%s7194_s18 + $0xa4] sm:$0x3] }
  0xa4   : > { %6624 = vmatpush3.bf16.msra.mxu0 %v7077_v36  ;;  %v7782_v36 = vld [vmem:[%s7194_s18 + $0x4c] sm:$0xf] }
  0xa5   : > { %6657 = vmatprep.subr.bf16.mxu0 %v7728_v46  ;;  %v3997_v50 = vrot.slane %v7782_v36, 5 }
  0xa6   : > { %6386 = vmatmul.mubr.bf16.vlgmr.msra.gmra.mrb[0].mxu1 %v5471_v31  ;;  %v1227_v31 = vld [vmem:[%s7194_s18 + $0x74] sm:$0x3] }
  0xa7   : > { %6594 = vmatmul.mubr.bf16.gmra.mrb[16].mxu0 %v7064_v25  ;;  %6418 = vmatpush3.bf16.msra.mxu1 %v7629_v4  ;;  %v1328_v4 = vsel %vm7309_vm5, %v5442_v28, %v1327_v24  ;;  %v1357_v24 = vrot.slane %v1355_v6, 4  ;;  %v3986_v25 = vrot.slane %v5848_v10, 5  ;;  %v5475_v28 = vcombine.low %v1335_v8, %v1338_v9  ;;  %v5856_v9 = vld [vmem:[%s7194_s18 + $0x58] sm:$0xf] }
  0xa8   : > { %6389 = vmatprep.mubr.bf16.mxu1 %v5472_v34  ;;  %6597 = vmatprep.mubr.bf16.mxu0 %v7066_v29  ;;  %v5474_v61 = vcombine.low %v1328_v4, %v1331_v47  ;;  %v1362_v29 = vrot.slane %v7764_v16, 6  ;;  %v5849_v34 = vld [vmem:[%s7194_s18 + $0x3c] sm:$0xe]  ;;  %v5447_v47 = vrot.slane %v1225_v26, 10  ;;  %v1365_v55 = vrot.slane %v1227_v31, 6 }
  0xa9   : > { %6419 = vmatprep.subr.bf16.mxu1 %v7067_v37  ;;  %v1359_v4 = vsel %vm7309_vm5, %v1357_v24, %v1358_v20  ;;  %v3987_v53 = vsel %vm7200_vm2, %v3985_v30, %v3986_v25  ;;  %v3999_v6 = vrot.slane %v3997_v50, 4  ;;  %v1376_v8 = vrot.slane %v7808_v56, 6  ;;  %v7826_v16 = vld [vmem:[%s7194_s18 + $0x64] sm:$0xf] }
  0xaa   : > { %v1364_v54 = vrot.slane %v1362_v29, 4  ;;  %v5478_v10 = vcombine.low %v1356_v45, %v1359_v4  ;;  %v1363_v15 = vsel %vm7309_vm5, %v5447_v47, %v1362_v29  ;;  %v1370_v24 = vsel %vm7309_vm5, %v5448_v60, %v1369_v43  ;;  %v5865_v60 = vld [vmem:[%s7194_s18 + $0x7c] sm:$0xf] }
  0xab   : > { %6420 = vmatpush3.bf16.msra.mxu1 %v7067_v37  ;;  %v7074_v37 = vld [vmem:[%s7194_s18 + $0xd8] sm:$0xff]   ;;  %v1373_v25 = vsel %vm7309_vm5, %v1371_v63, %v1372_v0  ;;  %v5449_v26 = vrot.slane %v1231_v3, 10  ;;  %v1378_v30 = vrot.slane %v1376_v8, 4  ;;  %v1379_v31 = vrot.slane %v1233_v7, 6  ;;  %v5861_v0 = vld [vmem:[%s7194_s18 + $0x6c] sm:$0xe] }
  0xac   : > { %6421 = vmatprep.subr.bf16.mxu1 %v7071_v49  ;;  %v1366_v18 = vsel %vm7309_vm5, %v1364_v54, %v1365_v55  ;;  %v3998_v35 = vsel %vm7200_vm2, %v5896_v1, %v3997_v50  ;;  %v1386_v43 = vrot.slane %v1236_v27, 6  ;;  %v5480_v45 = vcombine.low %v1370_v24, %v1373_v25  ;;  %v7081_v50 = vld [vmem:[%s8270_s1 + $0x208] sm:$0xff]   ;;  %v5863_v1 = vld [vmem:[%s7194_s18 + $0x74] sm:$0x1]  ;;  %v7879_v3 = vld [vmem:[%s8270_s1 + $0x100] sm:$0xff]  }
  0xad   : > { %v5898_v47 = vrot.slane %v5858_v32, 9  ;;  %v1390_v55 = vrot.slane %v7855_v39, 6  ;;  %v1393_v63 = vrot.slane %v1239_v48, 6  ;;  %v1240_v7 = vld [vmem:[%s7194_s18 + $0xa8] sm:$0xc] }
  0xae   : > { %6390 = vmatmul.mubr.bf16.gmra.mrb[4].mxu1 %v5473_v57  ;;  %v5895_v57 = vrot.slane %v5849_v34, 9  ;;  %v5479_v34 = vcombine.low %v1363_v15, %v1366_v18  ;;  %v5864_v15 = vld [vmem:[%s7194_s18 + $0x78] sm:$0xe]  ;;  %v5868_v32 = vld [vmem:[%s7194_s18 + $0x88] sm:$0xf] }
  0xaf   : > { %6598 = vmatmul.mubr.bf16.gmra.mrb[20].mxu0 %v7068_v52  ;;  %6393 = vmatprep.mubr.bf16.mxu1 %v5474_v61  ;;  %v3984_v52 = vsel %vm7200_vm2, %v5894_v21, %v3983_v11  ;;  %v7082_v61 = vld [vmem:[%s8270_s1 + $0xf0] sm:$0xff]   ;;  %v4004_v21 = vrot.slane %v5856_v9, 5 }
  0xb0   : > { %6601 = vmatprep.mubr.bf16.mxu0 %v7070_v58  ;;  %6422 = vmatpush3.bf16.msra.mxu1 %v7071_v49  ;;  %v5854_v49 = vld [vmem:[%s7194_s18 + $0x50] sm:$0x1]  ;;  %v3992_v58 = vrot.slane %v3990_v38, 4  ;;  %v5855_v11 = vld [vmem:[%s7194_s18 + $0x54] sm:$0xe]  ;;  %v5926_v17 = vcombine.low %v3984_v52, %v3987_v53  ;;  %v3991_v19 = vsel %vm7200_vm2, %v5895_v57, %v3990_v38  ;;  %v1377_v57 = vsel %vm7309_vm5, %v5449_v26, %v1376_v8 }
  0xb1   : > { %6423 = vmatprep.subr.bf16.mxu1 %v7075_v5  ;;  %v4000_v2 = vrot.slane %v5854_v49, 5  ;;  %v5897_v29 = vrot.slane %v5855_v11, 9  ;;  %v7852_v38 = vld [vmem:[%s7194_s18 + $0x9c] sm:$0xc]  ;;  %v4006_v40 = vrot.slane %v4004_v21, 4  ;;  %v5900_v26 = vrot.slane %v5864_v15, 9 }
  0xb2   : > { %v3994_v20 = vsel %vm7200_vm2, %v3992_v58, %v3993_v59  ;;  %v5862_v49 = vld [vmem:[%s7194_s18 + $0x70] sm:$0xf]  ;;  %v5451_v54 = vrot.slane %v7852_v38, 10  ;;  %v1380_v58 = vsel %vm7309_vm5, %v1378_v30, %v1379_v31  ;;  %v1241_v59 = vld [vmem:[%s7194_s18 + $0xac] sm:$0xf]  ;;  %v7085_v31 = vld [vmem:[%s8270_s1 + $0x218] sm:$0xff]  }
  0xb3   : > { %v4001_v36 = vsel %vm7200_vm2, %v3999_v6, %v4000_v2  ;;  %v4018_v2 = vrot.slane %v5862_v49, 5  ;;  %v1242_v8 = vld [vmem:[%s7194_s18 + $0xb0] sm:$0x3]  ;;  %v1397_v9 = vrot.slane %v1241_v59, 6  ;;  %v5481_v11 = vcombine.low %v1377_v57, %v1380_v58  ;;  %v1244_v30 = vld [vmem:[%s7194_s18 + $0xb8] sm:$0xf] }
  0xb4   : > { %6424 = vmatpush3.bf16.msra.mxu1 %v7075_v5  ;;  %v5477_v5 = vcombine.low %v1349_v41, %v1352_v42  ;;  %v4007_v41 = vrot.slane %v5857_v12, 5  ;;  %v5928_v56 = vcombine.low %v3998_v35, %v4001_v36  ;;  %v5866_v12 = vld [vmem:[%s7194_s18 + $0x80] sm:$0x1]  ;;  %v1400_v24 = vrot.slane %v1242_v8, 6  ;;  %v5875_v8 = vld [vmem:[%s7194_s18 + $0xa4] sm:$0x1] }
  0xb5   : > { %6425 = vmatprep.subr.bf16.mxu1 %v7078_v22  ;;  %v1399_v25 = vrot.slane %v1397_v9, 4  ;;  %v1404_v38 = vrot.slane %v1244_v30, 6 }
  0xb6   : > { %6394 = vmatmul.mubr.bf16.gmra.mrb[8].mxu1 %v5475_v28  ;;  %v1383_v28 = vrot.slane %v7820_v14, 6 }
  0xb7   : > { %6602 = vmatmul.mubr.bf16.gmra.mrb[24].mxu0 %v7072_v23  ;;  %6397 = vmatprep.mubr.bf16.mxu1 %v5476_v33  ;;  %v7084_v23 = vld [vmem:[%s8270_s1 + $0xf8] sm:$0xff]   ;;  %v4011_v33 = vrot.slane %v7826_v16, 5 }
  0xb8   : > { %6605 = vmatprep.mubr.bf16.mxu0 %v7074_v37  ;;  %6426 = vmatpush3.bf16.msra.mxu1 %v7078_v22  ;;  %v1234_v22 = vld [vmem:[%s7194_s18 + $0x90] sm:$0xc]  ;;  %v5860_v37 = vld [vmem:[%s7194_s18 + $0x68] sm:$0x1]  ;;  %v1385_v4 = vrot.slane %v1383_v28, 4 }
  0xb9   : > { %6427 = vmatprep.subr.bf16.mxu1 %v7080_v44  ;;  %v5450_v42 = vrot.slane %v1234_v22, 10  ;;  %v4013_v52 = vrot.slane %v4011_v33, 4  ;;  %v4014_v53 = vrot.slane %v5860_v37, 5  ;;  %v4021_v22 = vrot.slane %v5863_v1, 5  ;;  %v1243_v37 = vld [vmem:[%s7194_s18 + $0xb4] sm:$0xc] }
  0xba   : > { %v1387_v6 = vsel %vm7309_vm5, %v1385_v4, %v1386_v43  ;;  %v5867_v43 = vld [vmem:[%s7194_s18 + $0x84] sm:$0xe]  ;;  %v5869_v4 = vld [vmem:[%s7194_s18 + $0x8c] sm:$0x1]  ;;  %v5453_v49 = vrot.slane %v1243_v37, 10 }
  0xbb   : > { %v4015_v18 = vsel %vm7200_vm2, %v4013_v52, %v4014_v53  ;;  %v5872_v52 = vld [vmem:[%s7194_s18 + $0x98] sm:$0x1]  ;;  %v7088_v53 = vld [vmem:[%s8270_s1 + $0x220] sm:$0xff]  }
  0xbc   : > { %6428 = vmatpush3.bf16.msra.mxu1 %v7080_v44  ;;  %v5927_v44 = vcombine.low %v3991_v19, %v3994_v20  ;;  %v1392_v19 = vrot.slane %v1390_v55, 4  ;;  %v5899_v20 = vrot.slane %v5861_v0, 9 }
  0xbd   : > { %6429 = vmatprep.subr.bf16.mxu1 %v7082_v61 }
  0xbe   : > { %6398 = vmatmul.mubr.bf16.gmra.mrb[12].mxu1 %v5477_v5  ;;  %v1384_v5 = vsel %vm7309_vm5, %v5450_v42, %v1383_v28  ;;  %v4028_v28 = vrot.slane %v5866_v12, 5  ;;  %v1394_v35 = vsel %vm7309_vm5, %v1392_v19, %v1393_v63  ;;  %v4019_v36 = vsel %vm7200_vm2, %v5899_v20, %v4018_v2  ;;  %v1245_v42 = vld [vmem:[%s7194_s18 + $0xbc] sm:$0x3]  ;;  %v5878_v19 = vld [vmem:[%s7194_s18 + $0xb0] sm:$0x1] }
  0xbf   : > { %6606 = vmatmul.mubr.bf16.gmra.mrb[28].mxu0 %v7076_v62  ;;  %6401 = vmatprep.mubr.bf16.mxu1 %v5478_v10  ;;  %v4008_v62 = vsel %vm7200_vm2, %v4006_v40, %v4007_v41  ;;  %v4025_v10 = vrot.slane %v5865_v60, 5  ;;  %v5482_v16 = vcombine.low %v1384_v5, %v1387_v6  ;;  %v1407_v57 = vrot.slane %v1245_v42, 6  ;;  %v5874_v5 = vld [vmem:[%s7194_s18 + $0xa0] sm:$0xf]  ;;  %v5877_v6 = vld [vmem:[%s7194_s18 + $0xac] sm:$0xf] }
  0xc0   : > { %6625 = vmatprep.mubr.bf16.mxu0 %v5926_v17  ;;  %6430 = vmatpush3.bf16.msra.mxu1 %v7082_v61  ;;  %v4005_v61 = vsel %vm7200_vm2, %v5897_v29, %v4004_v21  ;;  %v4012_v17 = vsel %vm7200_vm2, %v5898_v47, %v4011_v33  ;;  %v4020_v21 = vrot.slane %v4018_v2, 4  ;;  %v5871_v33 = vld [vmem:[%s7194_s18 + $0x94] sm:$0xf]  ;;  %v4032_v47 = vrot.slane %v5868_v32, 5  ;;  %v5883_v32 = vld [vmem:[%s7194_s18 + $0xc4] sm:$0xf] }
  0xc1   : > { %6431 = vmatprep.subr.bf16.mxu1 %v7084_v23  ;;  %v5929_v14 = vcombine.low %v4005_v61, %v4008_v62  ;;  %v4027_v27 = vrot.slane %v4025_v10, 4  ;;  %v5930_v29 = vcombine.low %v4012_v17, %v4015_v18  ;;  %v4026_v41 = vsel %vm7200_vm2, %v5900_v26, %v4025_v10  ;;  %v7091_v62 = vld [vmem:[%s8270_s1 + $0x228] sm:$0xff]   ;;  %v7094_v20 = vld [vmem:[%s8270_s1 + $0x230] sm:$0xff]  }
  0xc2   : > { %v4022_v39 = vsel %vm7200_vm2, %v4020_v21, %v4021_v22  ;;  %v4039_v48 = vrot.slane %v5871_v33, 5  ;;  %v5901_v60 = vrot.slane %v5867_v43, 9  ;;  %v4035_v61 = vrot.slane %v5869_v4, 5  ;;  %v5876_v18 = vld [vmem:[%s7194_s18 + $0xa8] sm:$0xe]  ;;  %v7086_v22 = vld [vmem:[%s7194_s18 + $0x18] sm:$0xff]  }
  0xc3   : > { %v4034_v63 = vrot.slane %v4032_v47, 4  ;;  %v4042_v2 = vrot.slane %v5872_v52, 5  ;;  %v4053_v15 = vrot.slane %v5877_v6, 5  ;;  %v4056_v30 = vrot.slane %v5878_v19, 5  ;;  %v5879_v33 = vld [vmem:[%s7194_s18 + $0xb4] sm:$0xe] }
  0xc4   : > { %6432 = vmatpush3.bf16.msra.mxu1 %v7084_v23  ;;  %v5452_v23 = vrot.slane %v1240_v7, 10  ;;  %v4041_v1 = vrot.slane %v4039_v48, 4  ;;  %v5873_v7 = vld [vmem:[%s7194_s18 + $0x9c] sm:$0xe]  ;;  %v7087_v42 = vld [vmem:[%s7194_s18 + $0x24] sm:$0xff]   ;;  %v7089_v4 = vld [vmem:[%s7194_s18 + $0x30] sm:$0xff]  }
  0xc5   : > { %6705 = vmatprep.subr.bf16.mxu1 %v7879_v3  ;;  %v4036_v17 = vsel %vm7200_vm2, %v4034_v63, %v4035_v61  ;;  %v5884_v43 = vld [vmem:[%s7194_s18 + $0xc8] sm:$0x1]  ;;  %v5886_v52 = vld [vmem:[%s7194_s18 + $0xd0] sm:$0xf]  ;;  %v5888_v63 = vld [vmem:[%s7194_s18 + $0xd8] sm:$0xe] }
  0xc6   : > { %6402 = vmatmul.mubr.bf16.gmra.mrb[16].mxu1 %v5479_v34  ;;  %v1391_v34 = vsel %vm7309_vm5, %v5451_v54, %v1390_v55  ;;  %v1398_v40 = vsel %vm7309_vm5, %v5452_v23, %v1397_v9  ;;  %v5931_v55 = vcombine.low %v4019_v36, %v4022_v39  ;;  %v1405_v9 = vsel %vm7309_vm5, %v5453_v49, %v1404_v38  ;;  %v5881_v39 = vld [vmem:[%s7194_s18 + $0xbc] sm:$0x1]  ;;  %v7107_v61 = vld [vmem:[%s8270_s1 + $0x108] sm:$0xff]  }
  0xc7   : > { %6626 = vmatmul.mubr.bf16.vlgmr.msra.gmra.mrb[0].mxu0 %v5927_v44  ;;  %6405 = vmatprep.mubr.bf16.mxu1 %v5480_v45  ;;  %v1401_v44 = vsel %vm7309_vm5, %v1399_v25, %v1400_v24  ;;  %v4029_v45 = vsel %vm7200_vm2, %v4027_v27, %v4028_v28  ;;  %v5483_v54 = vcombine.low %v1391_v34, %v1394_v35  ;;  %v5903_v23 = vrot.slane %v5873_v7, 9  ;;  %v7092_v6 = vld [vmem:[%s7194_s18 + $0x48] sm:$0xff]  }
  0xc8   : > { %6658 = vmatpush3.bf16.msra.mxu0 %v7728_v46  ;;  %6629 = vmatprep.mubr.bf16.mxu0 %v5928_v56  ;;  %v7083_v46 = vld [vmem:[%s8270_s1 + $0x210] sm:$0xff]   ;;  %v1406_v56 = vrot.slane %v1404_v38, 4  ;;  %v5484_v58 = vcombine.low %v1398_v40, %v1401_v44  ;;  %v5932_v59 = vcombine.low %v4026_v41, %v4029_v45  ;;  %v4049_v25 = vrot.slane %v5875_v8, 5  ;;  %v5882_v40 = vld [vmem:[%s7194_s18 + $0xc0] sm:$0xe] }
  0xc9   : > { %6659 = vmatprep.subr.bf16.mxu0 %v7081_v50  ;;  %v5904_v27 = vrot.slane %v5876_v18, 9  ;;  %v4055_v28 = vrot.slane %v4053_v15, 4  ;;  %v4067_v41 = vrot.slane %v5883_v32, 5  ;;  %v5905_v45 = vrot.slane %v5879_v33, 9 }
  0xca   : > { %v1408_v10 = vsel %vm7309_vm5, %v1406_v56, %v1407_v57  ;;  %v4063_v49 = vrot.slane %v5881_v39, 5  ;;  %v5954_v39 = vld [vmem:[%s7194_s18 + $0x40] sm:$0xf] }
  0xcb   : > { %v4054_v37 = vsel %vm7200_vm2, %v5904_v27, %v4053_v15  ;;  %v4057_v38 = vsel %vm7200_vm2, %v4055_v28, %v4056_v30  ;;  %v5950_v27 = vld [vmem:[%s7194_s18 + $0x30] sm:$0xc]  ;;  %v5952_v28 = vld [vmem:[%s7194_s18 + $0x38] sm:$0x3] }
  0xcc   : > { %6660 = vmatpush3.bf16.msra.mxu0 %v7081_v50  ;;  %v5870_v50 = vld [vmem:[%s7194_s18 + $0x90] sm:$0xe] }
  0xcd   : > { %6661 = vmatprep.subr.bf16.mxu0 %v7083_v46  ;;  %v5902_v0 = vrot.slane %v5870_v50, 9  ;;  %v5906_v50 = vrot.slane %v5882_v40, 9  ;;  %v5957_v40 = vld [vmem:[%s7194_s18 + $0x4c] sm:$0xf] }
  0xce   : > { %6406 = vmatmul.mubr.bf16.gmra.mrb[20].mxu1 %v5481_v11  ;;  %v4046_v11 = vrot.slane %v5874_v5, 5 }
  0xcf   : > { %6630 = vmatmul.mubr.bf16.gmra.mrb[4].mxu0 %v5929_v14  ;;  %6409 = vmatprep.mubr.bf16.mxu1 %v5482_v16  ;;  %v4033_v14 = vsel %vm7200_vm2, %v5901_v60, %v4032_v47  ;;  %v4040_v12 = vsel %vm7200_vm2, %v5902_v0, %v4039_v48  ;;  %v4043_v16 = vsel %vm7200_vm2, %v4041_v1, %v4042_v2  ;;  %v4074_v60 = vrot.slane %v5886_v52, 5  ;;  %v7090_v1 = vld [vmem:[%s7194_s18 + $0x3c] sm:$0xff]   ;;  %v5956_v52 = vld [vmem:[%s7194_s18 + $0x48] sm:$0xc] }
  0xd0   : > { %6633 = vmatprep.mubr.bf16.mxu0 %v5930_v29  ;;  %6662 = vmatpush3.bf16.msra.mxu0 %v7083_v46  ;;  %v5485_v46 = vcombine.low %v1405_v9, %v1408_v10  ;;  %v5933_v21 = vcombine.low %v4033_v14, %v4036_v17  ;;  %v4048_v24 = vrot.slane %v4046_v11, 4  ;;  %v5934_v26 = vcombine.low %v4040_v12, %v4043_v16  ;;  %v5880_v29 = vld [vmem:[%s7194_s18 + $0xb8] sm:$0xf]  ;;  %v5890_v2 = vld [vmem:[%s7194_s18 + $0xe0] sm:$0x1]  ;;  %v7108_v9 = vld [vmem:[%s8270_s1 + $0x110] sm:$0xff]  }
  0xd1   : > { %6663 = vmatprep.subr.bf16.mxu0 %v7085_v31  ;;  %v4047_v34 = vsel %vm7200_vm2, %v5903_v23, %v4046_v11  ;;  %v4060_v36 = vrot.slane %v5880_v29, 5  ;;  %v5936_v47 = vcombine.low %v4054_v37, %v4057_v38  ;;  %v4076_v10 = vrot.slane %v4074_v60, 4  ;;  %v5892_v12 = vld [vmem:[%s7194_s18 + $0xe8] sm:$0xf]  ;;  %v5951_v16 = vld [vmem:[%s7194_s18 + $0x34] sm:$0xf] }
  0xd2   : > { %v4050_v35 = vsel %vm7200_vm2, %v4048_v24, %v4049_v25  ;;  %v5908_v14 = vrot.slane %v5888_v63, 9  ;;  %v4084_v15 = vrot.slane %v5890_v2, 5  ;;  %v5891_v23 = vld [vmem:[%s7194_s18 + $0xe4] sm:$0xe]  ;;  %v5893_v24 = vld [vmem:[%s7194_s18 + $0xec] sm:$0x1] }
  0xd3   : > { %v5935_v44 = vcombine.low %v4047_v34, %v4050_v35  ;;  %v4062_v48 = vrot.slane %v4060_v36, 4  ;;  %v4061_v56 = vsel %vm7200_vm2, %v5905_v45, %v4060_v36  ;;  %v4577_v25 = vrot.slane %v5951_v16, 6  ;;  %v7110_v38 = vld [vmem:[%s8270_s1 + $0x120] sm:$0xff]   ;;  %v7112_v63 = vld [vmem:[%s8270_s1 + $0x130] sm:$0xff]  }
  0xd4   : > { %6664 = vmatpush3.bf16.msra.mxu0 %v7085_v31  ;;  %v7097_v31 = vld [vmem:[%s8270_s1 + $0x238] sm:$0xff]   ;;  %v5909_v32 = vrot.slane %v5891_v23, 9  ;;  %v4091_v34 = vrot.slane %v5893_v24, 5  ;;  %v5998_v35 = vrot.slane %v5950_v27, 10  ;;  %v4580_v37 = vrot.slane %v5952_v28, 6  ;;  %v7100_v16 = vld [vmem:[%s7194_s18 + $0x90] sm:$0xff]  }
  0xd5   : > { %6665 = vmatprep.subr.bf16.mxu0 %v7088_v53  ;;  %v4064_v57 = vsel %vm7200_vm2, %v4062_v48, %v4063_v49  ;;  %v4579_v36 = vrot.slane %v4577_v25, 4  ;;  %v4591_v48 = vrot.slane %v5957_v40, 6  ;;  %v7111_v49 = vld [vmem:[%s8270_s1 + $0x128] sm:$0xff]  }
  0xd6   : > { %6410 = vmatmul.mubr.bf16.gmra.mrb[24].mxu1 %v5483_v54  ;;  %v4070_v54 = vrot.slane %v5884_v43, 5  ;;  %v5937_v5 = vcombine.low %v4061_v56, %v4064_v57  ;;  %v4584_v43 = vrot.slane %v5954_v39, 6 }
  0xd7   : > { %6634 = vmatmul.mubr.bf16.gmra.mrb[8].mxu0 %v5931_v55  ;;  %6413 = vmatprep.mubr.bf16.mxu1 %v5484_v58  ;;  %v5889_v55 = vld [vmem:[%s7194_s18 + $0xdc] sm:$0xf]  ;;  %v5885_v58 = vld [vmem:[%s7194_s18 + $0xcc] sm:$0xe]  ;;  %v4581_v45 = vsel %vm7309_vm5, %v4579_v36, %v4580_v37  ;;  %v5970_v36 = vld [vmem:[%s7194_s18 + $0x80] sm:$0x3] }
  0xd8   : > { %6637 = vmatprep.mubr.bf16.mxu0 %v5932_v59  ;;  %6666 = vmatpush3.bf16.msra.mxu0 %v7088_v53  ;;  %v4069_v53 = vrot.slane %v4067_v41, 4  ;;  %v5887_v59 = vld [vmem:[%s7194_s18 + $0xd4] sm:$0x1]  ;;  %v4081_v0 = vrot.slane %v5889_v55, 5  ;;  %v5907_v7 = vrot.slane %v5885_v58, 9  ;;  %v7098_v55 = vld [vmem:[%s7194_s18 + $0x78] sm:$0xff]  }
  0xd9   : > { %6667 = vmatprep.subr.bf16.mxu0 %v7091_v62  ;;  %v4077_v11 = vrot.slane %v5887_v59, 5  ;;  %v4586_v58 = vrot.slane %v4584_v43, 4 }
  0xda   : > { %v4083_v17 = vrot.slane %v4081_v0, 4  ;;  %v4075_v18 = vsel %vm7200_vm2, %v5907_v7, %v4074_v60  ;;  %v6000_v60 = vrot.slane %v5956_v52, 10  ;;  %v5971_v52 = vld [vmem:[%s7194_s18 + $0x84] sm:$0xc] }
  0xdb   : > { %v4078_v19 = vsel %vm7200_vm2, %v4076_v10, %v4077_v11  ;;  %v7113_v11 = vld [vmem:[%s8270_s1 + $0x138] sm:$0xff]  }
  0xdc   : > { %6668 = vmatpush3.bf16.msra.mxu0 %v7091_v62  ;;  %v4071_v62 = vsel %vm7200_vm2, %v4069_v53, %v4070_v54  ;;  %v5939_v30 = vcombine.low %v4075_v18, %v4078_v19  ;;  %v5958_v53 = vld [vmem:[%s7194_s18 + $0x50] sm:$0x3] }
  0xdd   : > { %6669 = vmatprep.subr.bf16.mxu0 %v7094_v20 }
  0xde   : > { %6414 = vmatmul.mubr.bf16.gmra.mrb[28].mxu1 %v5485_v46  ;;  %v4082_v46 = vsel %vm7200_vm2, %v5908_v14, %v4081_v0  ;;  %v5963_v0 = vld [vmem:[%s7194_s18 + $0x64] sm:$0xf] }
  0xdf   : > { %6638 = vmatmul.mubr.bf16.gmra.mrb[12].mxu0 %v5933_v21  ;;  %6433 = vmatprep.mubr.bf16.mxu1 %v7086_v22  ;;  %v4085_v21 = vsel %vm7200_vm2, %v4083_v17, %v4084_v15  ;;  %v7109_v22 = vld [vmem:[%s8270_s1 + $0x118] sm:$0xff]   ;;  %v4605_v10 = vrot.slane %v5963_v0, 6  ;;  %v7099_v14 = vld [vmem:[%s7194_s18 + $0x84] sm:$0xff]   ;;  %v5962_v17 = vld [vmem:[%s7194_s18 + $0x60] sm:$0xc] }
  0xe0   : > { %6641 = vmatprep.mubr.bf16.mxu0 %v5934_v26  ;;  %6670 = vmatpush3.bf16.msra.mxu0 %v7094_v20  ;;  %v4088_v20 = vrot.slane %v5892_v12, 5  ;;  %v7093_v26 = vld [vmem:[%s7194_s18 + $0x54] sm:$0xff]   ;;  %v5940_v29 = vcombine.low %v4082_v46, %v4085_v21  ;;  %v5964_v15 = vld [vmem:[%s7194_s18 + $0x68] sm:$0x3]  ;;  %v5966_v21 = vld [vmem:[%s7194_s18 + $0x70] sm:$0xf] }
  0xe1   : > { %6671 = vmatprep.subr.bf16.mxu0 %v7097_v31  ;;  %v4607_v23 = vrot.slane %v4605_v10, 4  ;;  %v4608_v24 = vrot.slane %v5964_v15, 6 }
  0xe2   : > { %v4090_v33 = vrot.slane %v4088_v20, 4 }
  0xe4   : > { %6672 = vmatpush3.bf16.msra.mxu0 %v7097_v31  ;;  %v7095_v31 = vld [vmem:[%s7194_s18 + $0x60] sm:$0xff]  }
  0xe6   : > { %6434 = vmatmul.mubr.bf16.vlgmr.msra.gmra.mrb[0].mxu1 %v7087_v42  ;;  %v4092_v42 = vsel %vm7200_vm2, %v4090_v33, %v4091_v34  ;;  %v7101_v34 = vld [vmem:[%s7194_s18 + $0x9c] sm:$0xff]  }
  0xe7   : > { %6642 = vmatmul.mubr.bf16.gmra.mrb[16].mxu0 %v5935_v44  ;;  %6713 = vmatpush3.bf16.msra.mxu1 %v7879_v3  ;;  %v4068_v3 = vsel %vm7200_vm2, %v5906_v50, %v4067_v41  ;;  %v4089_v41 = vsel %vm7200_vm2, %v5909_v32, %v4088_v20  ;;  %v4578_v44 = vsel %vm7309_vm5, %v5998_v35, %v4577_v25  ;;  %v7096_v50 = vld [vmem:[%s7194_s18 + $0x6c] sm:$0xff]   ;;  %v5969_v25 = vld [vmem:[%s7194_s18 + $0x7c] sm:$0xf]  ;;  %v5968_v35 = vld [vmem:[%s7194_s18 + $0x78] sm:$0xc] }
  0xe8   : > { %6437 = vmatprep.mubr.bf16.mxu1 %v7089_v4  ;;  %6645 = vmatprep.mubr.bf16.mxu0 %v5936_v47  ;;  %v5938_v8 = vcombine.low %v4068_v3, %v4071_v62  ;;  %v5953_v4 = vld [vmem:[%s7194_s18 + $0x3c] sm:$0xc]  ;;  %v5955_v47 = vld [vmem:[%s7194_s18 + $0x44] sm:$0x3]  ;;  %v5941_v54 = vcombine.low %v4089_v41, %v4092_v42  ;;  %v6030_v56 = vcombine.low %v4578_v44, %v4581_v45  ;;  %v4594_v3 = vrot.slane %v5958_v53, 6 }
  0xe9   : > { %6706 = vmatprep.subr.bf16.mxu1 %v7107_v61  ;;  %v5999_v57 = vrot.slane %v5953_v4, 10  ;;  %v4587_v59 = vrot.slane %v5955_v47, 6  ;;  %v5960_v62 = vld [vmem:[%s7194_s18 + $0x58] sm:$0xf]  ;;  %v4609_v32 = vsel %vm7309_vm5, %v4607_v23, %v4608_v24  ;;  %v4619_v33 = vrot.slane %v5969_v25, 6 }
  0xea   : > { %v5591_v44 = vld [vmem:[%s7194_s18 + $0x7c] sm:$0xf]  ;;  %v6004_v45 = vrot.slane %v5968_v35, 10  ;;  %v4622_v47 = vrot.slane %v5970_v36, 6  ;;  %v5980_v36 = vld [vmem:[%s7194_s18 + $0xa8] sm:$0xc] }
  0xeb   : > { %6714 = vmatpush3.bf16.msra.mxu1 %v7107_v61  ;;  %v4593_v61 = vrot.slane %v4591_v48, 4  ;;  %v4588_v2 = vsel %vm7309_vm5, %v4586_v58, %v4587_v59  ;;  %v4621_v4 = vrot.slane %v4619_v33, 4  ;;  %v7103_v58 = vld [vmem:[%s7194_s18 + $0xb4] sm:$0xff]   ;;  %v5977_v24 = vld [vmem:[%s7194_s18 + $0x9c] sm:$0xc] }
  0xec   : > { %6707 = vmatprep.subr.bf16.mxu1 %v7108_v9  ;;  %v4620_v59 = vsel %vm7309_vm5, %v6004_v45, %v4619_v33 }
  0xed   : > { %v4595_v7 = vsel %vm7309_vm5, %v4593_v61, %v4594_v3  ;;  %v5974_v61 = vld [vmem:[%s7194_s18 + $0x90] sm:$0xc] }
  0xee   : > { %6438 = vmatmul.mubr.bf16.gmra.mrb[4].mxu1 %v7090_v1  ;;  %v4585_v1 = vsel %vm7309_vm5, %v5999_v57, %v4584_v43  ;;  %v5972_v43 = vld [vmem:[%s7194_s18 + $0x88] sm:$0xf]  ;;  %v5592_v57 = vld [vmem:[%s7194_s18 + $0x80] sm:$0x1] }
  0xef   : > { %6646 = vmatmul.mubr.bf16.gmra.mrb[20].mxu0 %v5937_v5  ;;  %6441 = vmatprep.mubr.bf16.mxu1 %v7092_v6  ;;  %v4598_v5 = vrot.slane %v5960_v62, 6  ;;  %v4592_v6 = vsel %vm7309_vm5, %v6000_v60, %v4591_v48  ;;  %v6031_v12 = vcombine.low %v4585_v1, %v4588_v2  ;;  %v5975_v48 = vld [vmem:[%s7194_s18 + $0x94] sm:$0xf]  ;;  %v4626_v53 = vrot.slane %v5972_v43, 6  ;;  %v5976_v1 = vld [vmem:[%s7194_s18 + $0x98] sm:$0x3] }
  0xf0   : > { %6649 = vmatprep.mubr.bf16.mxu0 %v5938_v8  ;;  %6715 = vmatpush3.bf16.msra.mxu1 %v7108_v9  ;;  %v5959_v8 = vld [vmem:[%s7194_s18 + $0x54] sm:$0xc]  ;;  %v5961_v9 = vld [vmem:[%s7194_s18 + $0x5c] sm:$0x3]  ;;  %v6032_v18 = vcombine.low %v4592_v6, %v4595_v7  ;;  %v4623_v60 = vsel %vm7309_vm5, %v4621_v4, %v4622_v47  ;;  %v4633_v3 = vrot.slane %v5975_v48, 6 }
  0xf1   : > { %6708 = vmatprep.subr.bf16.mxu1 %v7109_v22  ;;  %v6001_v19 = vrot.slane %v5959_v8, 10  ;;  %v4600_v20 = vrot.slane %v4598_v5, 4  ;;  %v4601_v46 = vrot.slane %v5961_v9, 6  ;;  %v5594_v2 = vld [vmem:[%s7194_s18 + $0x88] sm:$0xf]  ;;  %v4628_v6 = vrot.slane %v4626_v53, 4 }
  0xf2   : > { %v2403_v9 = vrot.slane %v5592_v57, 5  ;;  %v4635_v15 = vrot.slane %v4633_v3, 4  ;;  %v5600_v43 = vld [vmem:[%s7194_s18 + $0xa0] sm:$0xf]  ;;  %v5599_v57 = vld [vmem:[%s7194_s18 + $0x9c] sm:$0xe] }
  0xf3   : > { %v4599_v27 = vsel %vm7309_vm5, %v6001_v19, %v4598_v5  ;;  %v4602_v28 = vsel %vm7309_vm5, %v4600_v20, %v4601_v46  ;;  %v7104_v5 = vld [vmem:[%s7194_s18 + $0xc0] sm:$0xff]   ;;  %v5595_v46 = vld [vmem:[%s7194_s18 + $0x8c] sm:$0x1] }
  0xf4   : > { %6716 = vmatpush3.bf16.msra.mxu1 %v7109_v22  ;;  %v6002_v22 = vrot.slane %v5962_v17, 10  ;;  %v6033_v37 = vcombine.low %v4599_v27, %v4602_v28  ;;  %v5597_v17 = vld [vmem:[%s7194_s18 + $0x94] sm:$0xf]  ;;  %v2410_v35 = vrot.slane %v5595_v46, 5  ;;  %v5988_v46 = vld [vmem:[%s7194_s18 + $0xc8] sm:$0x3] }
  0xf5   : > { %6709 = vmatprep.subr.bf16.mxu1 %v7110_v38  ;;  %v2414_v27 = vrot.slane %v5597_v17, 5 }
  0xf6   : > { %6442 = vmatmul.mubr.bf16.gmra.mrb[8].mxu1 %v7093_v26  ;;  %v4612_v26 = vrot.slane %v5966_v21, 6  ;;  %v5981_v21 = vld [vmem:[%s7194_s18 + $0xac] sm:$0xf] }
  0xf7   : > { %6650 = vmatmul.mubr.bf16.gmra.mrb[24].mxu0 %v5939_v30  ;;  %6445 = vmatprep.mubr.bf16.mxu1 %v7095_v31  ;;  %v5965_v30 = vld [vmem:[%s7194_s18 + $0x6c] sm:$0xc]  ;;  %v5967_v31 = vld [vmem:[%s7194_s18 + $0x74] sm:$0x3]  ;;  %v2416_v4 = vrot.slane %v2414_v27, 4 }
  0xf8   : > { %6653 = vmatprep.mubr.bf16.mxu0 %v5940_v29  ;;  %6717 = vmatpush3.bf16.msra.mxu1 %v7110_v38  ;;  %v4606_v29 = vsel %vm7309_vm5, %v6002_v22, %v4605_v10  ;;  %v7102_v38 = vld [vmem:[%s7194_s18 + $0xa8] sm:$0xff]   ;;  %v6003_v39 = vrot.slane %v5965_v30, 10  ;;  %v4614_v40 = vrot.slane %v4612_v26, 4  ;;  %v4615_v41 = vrot.slane %v5967_v31, 6  ;;  %v5979_v31 = vld [vmem:[%s7194_s18 + $0xa4] sm:$0x3] }
  0xf9   : > { %6710 = vmatprep.subr.bf16.mxu1 %v7111_v49  ;;  %v6034_v42 = vcombine.low %v4606_v29, %v4609_v32  ;;  %v6036_v10 = vcombine.low %v4620_v59, %v4623_v60  ;;  %v5598_v29 = vld [vmem:[%s7194_s18 + $0x98] sm:$0x1]  ;;  %v7105_v32 = vld [vmem:[%s7194_s18 + $0xcc] sm:$0xff]   ;;  %v4643_v45 = vrot.slane %v5979_v31, 6  ;;  %v4664_v31 = vrot.slane %v5988_v46, 6 }
  0xfa   : > { %v2417_v47 = vrot.slane %v5598_v29, 5  ;;  %v5609_v29 = vld [vmem:[%s7194_s18 + $0xc4] sm:$0xf] }
  0xfc   : > { %6718 = vmatpush3.bf16.msra.mxu1 %v7111_v49  ;;  %v4613_v49 = vsel %vm7309_vm5, %v6003_v39, %v4612_v26  ;;  %v5596_v26 = vld [vmem:[%s7194_s18 + $0x90] sm:$0xe] }
  0xfd   : > { %6711 = vmatprep.subr.bf16.mxu1 %v7112_v63 }
  0xfe   : > { %6446 = vmatmul.mubr.bf16.gmra.mrb[12].mxu1 %v7096_v50  ;;  %v4616_v50 = vsel %vm7309_vm5, %v4614_v40, %v4615_v41  ;;  %v6007_v40 = vrot.slane %v5977_v24, 10  ;;  %v5624_v41 = vrot.slane %v5596_v26, 9  ;;  %v5606_v26 = vld [vmem:[%s7194_s18 + $0xb8] sm:$0xf] }
  0xff   : > { %6654 = vmatmul.mubr.bf16.gmra.mrb[28].mxu0 %v5941_v54  ;;  %6449 = vmatprep.mubr.bf16.mxu1 %v7098_v55  ;;  %v5590_v54 = vld [vmem:[%s7194_s18 + $0x78] sm:$0xe]  ;;  %v2400_v55 = vrot.slane %v5591_v44, 5  ;;  %v6035_v62 = vcombine.low %v4613_v49, %v4616_v50  ;;  %v6008_v50 = vrot.slane %v5980_v36, 10  ;;  %v5993_v36 = vld [vmem:[%s7194_s18 + $0xdc] sm:$0xf] }
 0x100   : > { %6673 = vmatprep.mubr.bf16.mxu0 %v6030_v56  ;;  %6719 = vmatpush3.bf16.msra.mxu1 %v7112_v63  ;;  %v5973_v56 = vld [vmem:[%s7194_s18 + $0x8c] sm:$0x3]  ;;  %v6005_v63 = vrot.slane %v5971_v52, 10  ;;  %v5622_v0 = vrot.slane %v5590_v54, 9  ;;  %v5984_v52 = vld [vmem:[%s7194_s18 + $0xb8] sm:$0xf]  ;;  %v2415_v60 = vsel %vm7200_vm2, %v5624_v41, %v2414_v27 }
 0x101   : > { %6712 = vmatprep.subr.bf16.mxu1 %v7113_v11  ;;  %v4629_v7 = vrot.slane %v5973_v56, 6  ;;  %v2402_v8 = vrot.slane %v2400_v55, 4  ;;  %v5990_v27 = vld [vmem:[%s7194_s18 + $0xd0] sm:$0xf]  ;;  %v2435_v41 = vrot.slane %v5606_v26, 5 }
 0x102   : > { %v4627_v19 = vsel %vm7309_vm5, %v6005_v63, %v4626_v53  ;;  %v2401_v20 = vsel %vm7200_vm2, %v5622_v0, %v2400_v55  ;;  %v5603_v53 = vld [vmem:[%s7194_s18 + $0xac] sm:$0xf]  ;;  %v2418_v63 = vsel %vm7200_vm2, %v2416_v4, %v2417_v47  ;;  %v5983_v0 = vld [vmem:[%s7194_s18 + $0xb4] sm:$0xc] }
 0x103   : > { %v4630_v22 = vsel %vm7309_vm5, %v4628_v6, %v4629_v7  ;;  %v2404_v23 = vsel %vm7200_vm2, %v2402_v8, %v2403_v9  ;;  %v5625_v8 = vrot.slane %v5599_v57, 9  ;;  %v5985_v9 = vld [vmem:[%s7194_s18 + $0xbc] sm:$0x3]  ;;  %v5992_v57 = vld [vmem:[%s7194_s18 + $0xd8] sm:$0xc] }
 0x104   : > { %6720 = vmatpush3.bf16.msra.mxu1 %v7113_v11  ;;  %v6006_v11 = vrot.slane %v5974_v61, 10  ;;  %v5654_v39 = vcombine.low %v2401_v20, %v2404_v23  ;;  %v5601_v61 = vld [vmem:[%s7194_s18 + $0xa4] sm:$0x1]  ;;  %v5986_v20 = vld [vmem:[%s7194_s18 + $0xc0] sm:$0xc] }
 0x105   : > { %v2424_v17 = vrot.slane %v5601_v61, 5 }
 0x106   : > { %6450 = vmatmul.mubr.bf16.gmra.mrb[16].mxu1 %v7099_v14  ;;  %v5978_v14 = vld [vmem:[%s7194_s18 + $0xa0] sm:$0xf]  ;;  %v4634_v28 = vsel %vm7309_vm5, %v6006_v11, %v4633_v3  ;;  %v5987_v3 = vld [vmem:[%s7194_s18 + $0xc4] sm:$0xf] }
 0x107   : > { %6674 = vmatmul.mubr.bf16.vlgmr.msra.gmra.mrb[0].mxu0 %v6031_v12  ;;  %6453 = vmatprep.mubr.bf16.mxu1 %v7100_v16  ;;  %v4636_v12 = vrot.slane %v5976_v1, 6  ;;  %v5593_v16 = vld [vmem:[%s7194_s18 + $0x84] sm:$0xe]  ;;  %v4640_v25 = vrot.slane %v5978_v14, 6  ;;  %v4654_v1 = vrot.slane %v5984_v52, 6  ;;  %v4675_v52 = vrot.slane %v5993_v36, 6 }
 0x108   : > { %6677 = vmatprep.mubr.bf16.mxu0 %v6032_v18  ;;  %v2407_v18 = vrot.slane %v5594_v2, 5  ;;  %v5623_v30 = vrot.slane %v5593_v16, 9  ;;  %v5602_v2 = vld [vmem:[%s7194_s18 + $0xa8] sm:$0xe]  ;;  %v5656_v16 = vcombine.low %v2415_v60, %v2418_v63 }
 0x109   : > { %v4637_v33 = vsel %vm7309_vm5, %v4635_v15, %v4636_v12  ;;  %v4642_v44 = vrot.slane %v4640_v25, 4  ;;  %v4641_v59 = vsel %vm7309_vm5, %v6007_v40, %v4640_v25  ;;  %v4661_v15 = vrot.slane %v5987_v3, 6  ;;  %v5607_v40 = vld [vmem:[%s7194_s18 + $0xbc] sm:$0x1] }
 0x10a   : > { %v6038_v48 = vcombine.low %v4634_v28, %v4637_v33  ;;  %v2408_v49 = vsel %vm7200_vm2, %v5623_v30, %v2407_v18  ;;  %v6010_v28 = vrot.slane %v5986_v20, 10 }
 0x10b   : > { %v4663_v30 = vrot.slane %v4661_v15, 4 }
 0x10c   : > { %v4662_v47 = vsel %vm7309_vm5, %v6010_v28, %v4661_v15 }
 0x10e   : > { %6454 = vmatmul.mubr.bf16.gmra.mrb[20].mxu1 %v7101_v34  ;;  %v2409_v34 = vrot.slane %v2407_v18, 4  ;;  %v6009_v18 = vrot.slane %v5983_v0, 10 }
 0x10f   : > { %6678 = vmatmul.mubr.bf16.gmra.mrb[4].mxu0 %v6033_v37  ;;  %6457 = vmatprep.mubr.bf16.mxu1 %v7102_v38  ;;  %v4647_v37 = vrot.slane %v5981_v21, 6  ;;  %v6037_v38 = vcombine.low %v4627_v19, %v4630_v22  ;;  %v5626_v19 = vrot.slane %v5602_v2, 9  ;;  %v4656_v21 = vrot.slane %v4654_v1, 4  ;;  %v5612_v2 = vld [vmem:[%s7194_s18 + $0xd0] sm:$0xf] }
 0x110   : > { %6681 = vmatprep.mubr.bf16.mxu0 %v6034_v42  ;;  %v5982_v42 = vld [vmem:[%s7194_s18 + $0xb0] sm:$0x3]  ;;  %v2411_v54 = vsel %vm7200_vm2, %v2409_v34, %v2410_v35  ;;  %v4657_v22 = vrot.slane %v5985_v9, 6  ;;  %v4655_v34 = vsel %vm7309_vm5, %v6009_v18, %v4654_v1  ;;  %v5613_v18 = vld [vmem:[%s7194_s18 + $0xd4] sm:$0x1] }
 0x111   : > { %v4649_v55 = vrot.slane %v4647_v37, 4  ;;  %v4650_v56 = vrot.slane %v5982_v42, 6  ;;  %v5655_v6 = vcombine.low %v2408_v49, %v2411_v54  ;;  %v4648_v7 = vsel %vm7309_vm5, %v6008_v50, %v4647_v37  ;;  %v5608_v49 = vld [vmem:[%s7194_s18 + $0xc0] sm:$0xe]  ;;  %v5610_v50 = vld [vmem:[%s7194_s18 + $0xc8] sm:$0x1] }
 0x112   : > { %v4658_v37 = vsel %vm7309_vm5, %v4656_v21, %v4657_v22  ;;  %v4668_v42 = vrot.slane %v5990_v27, 6  ;;  %v5628_v63 = vrot.slane %v5608_v49, 9  ;;  %v2445_v1 = vrot.slane %v5610_v50, 5  ;;  %v5995_v21 = vld [vmem:[%s7194_s18 + $0xe4] sm:$0xc] }
 0x113   : > { %v4651_v11 = vsel %vm7309_vm5, %v4649_v55, %v4650_v56  ;;  %v2438_v56 = vrot.slane %v5607_v40, 5  ;;  %v5997_v22 = vld [vmem:[%s7194_s18 + $0xec] sm:$0x3]  ;;  %v2452_v28 = vrot.slane %v5613_v18, 5 }
 0x114   : > { %v6040_v25 = vcombine.low %v4648_v7, %v4651_v11  ;;  %v4670_v61 = vrot.slane %v4668_v42, 4 }
 0x116   : > { %6458 = vmatmul.mubr.bf16.gmra.mrb[24].mxu1 %v7103_v58  ;;  %v2421_v58 = vrot.slane %v5600_v43, 5  ;;  %v5989_v43 = vld [vmem:[%s7194_s18 + $0xcc] sm:$0xc] }
 0x117   : > { %6682 = vmatmul.mubr.bf16.gmra.mrb[8].mxu0 %v6035_v62  ;;  %6461 = vmatprep.mubr.bf16.mxu1 %v7104_v5  ;;  %v4644_v62 = vsel %vm7309_vm5, %v4642_v44, %v4643_v45  ;;  %v2428_v5 = vrot.slane %v5603_v53, 5  ;;  %v5991_v44 = vld [vmem:[%s7194_s18 + $0xd4] sm:$0x3]  ;;  %v2442_v45 = vrot.slane %v5609_v29, 5  ;;  %v6041_v53 = vcombine.low %v4655_v34, %v4658_v37 }
 0x118   : > { %6685 = vmatprep.mubr.bf16.mxu0 %v6036_v10  ;;  %v5604_v10 = vld [vmem:[%s7194_s18 + $0xb0] sm:$0x1]  ;;  %v2423_v14 = vrot.slane %v2421_v58, 4  ;;  %v6039_v12 = vcombine.low %v4641_v59, %v4644_v62  ;;  %v2437_v59 = vrot.slane %v2435_v41, 4  ;;  %v6011_v60 = vrot.slane %v5989_v43, 10 }
 0x119   : > { %v2430_v23 = vrot.slane %v2428_v5, 4  ;;  %v2431_v24 = vrot.slane %v5604_v10, 5  ;;  %v2429_v35 = vsel %vm7200_vm2, %v5626_v19, %v2428_v5  ;;  %v4671_v3 = vrot.slane %v5991_v44, 6 }
 0x11a   : > { %v2425_v33 = vsel %vm7200_vm2, %v2423_v14, %v2424_v17  ;;  %v2444_v0 = vrot.slane %v2442_v45, 4  ;;  %v6012_v5 = vrot.slane %v5992_v57, 10  ;;  %v2439_v10 = vsel %vm7200_vm2, %v2437_v59, %v2438_v56 }
 0x11b   : > { %v4669_v11 = vsel %vm7309_vm5, %v6011_v60, %v4668_v42  ;;  %v4672_v14 = vsel %vm7309_vm5, %v4670_v61, %v4671_v3  ;;  %v2449_v17 = vrot.slane %v5612_v2, 5  ;;  %v2443_v15 = vsel %vm7200_vm2, %v5628_v63, %v2442_v45 }
 0x11c   : > { %v4676_v20 = vsel %vm7309_vm5, %v6012_v5, %v4675_v52 }
 0x11d   : > { %v2451_v27 = vrot.slane %v2449_v17, 4 }
 0x11e   : > { %6462 = vmatmul.mubr.bf16.gmra.mrb[28].mxu1 %v7105_v32  ;;  %v2422_v32 = vsel %vm7200_vm2, %v5625_v8, %v2421_v58  ;;  %v5994_v58 = vld [vmem:[%s7194_s18 + $0xe0] sm:$0x3]  ;;  %v5996_v8 = vld [vmem:[%s7194_s18 + $0xe8] sm:$0xf] }
 0x11f   : > { %6686 = vmatmul.mubr.bf16.gmra.mrb[12].mxu0 %v6037_v38  ;;  %6497 = vmatprep.mubr.bf16.mxu1 %v5654_v39  ;;  %v2432_v38 = vsel %vm7200_vm2, %v2430_v23, %v2431_v24  ;;  %v5605_v39 = vld [vmem:[%s7194_s18 + $0xb4] sm:$0xe]  ;;  %v5657_v4 = vcombine.low %v2422_v32, %v2425_v33  ;;  %v4678_v7 = vrot.slane %v5994_v58, 6  ;;  %v4682_v19 = vrot.slane %v5996_v8, 6 }
 0x120   : > { %6689 = vmatprep.mubr.bf16.mxu0 %v6038_v48  ;;  %v4665_v48 = vsel %vm7309_vm5, %v4663_v30, %v4664_v31  ;;  %v5658_v54 = vcombine.low %v2429_v35, %v2432_v38  ;;  %v5627_v55 = vrot.slane %v5605_v39, 9  ;;  %v6043_v24 = vcombine.low %v4669_v11, %v4672_v14 }
 0x121   : > { %v6042_v62 = vcombine.low %v4662_v47, %v4665_v48  ;;  %v6013_v31 = vrot.slane %v5995_v21, 10  ;;  %v4684_v29 = vrot.slane %v4682_v19, 4  ;;  %v4685_v32 = vrot.slane %v5997_v22, 6 }
 0x122   : > { %v2436_v9 = vsel %vm7200_vm2, %v5627_v55, %v2435_v41  ;;  %v2453_v34 = vsel %vm7200_vm2, %v2451_v27, %v2452_v28 }
 0x123   : > { %v5659_v23 = vcombine.low %v2436_v9, %v2439_v10  ;;  %v4683_v35 = vsel %vm7309_vm5, %v6013_v31, %v4682_v19  ;;  %v4686_v36 = vsel %vm7309_vm5, %v4684_v29, %v4685_v32 }
 0x124   : > { %v6045_v38 = vcombine.low %v4683_v35, %v4686_v36 }
 0x126   : > { %6498 = vmatmul.mubr.bf16.vlgmr.msra.gmra.mrb[16].mxu1 %v5655_v6  ;;  %v4677_v6 = vrot.slane %v4675_v52, 4 }
 0x127   : > { %6690 = vmatmul.mubr.bf16.gmra.mrb[16].mxu0 %v6039_v12  ;;  %6501 = vmatprep.mubr.bf16.mxu1 %v5656_v16  ;;  %v2446_v12 = vsel %vm7200_vm2, %v2444_v0, %v2445_v1  ;;  %v5611_v16 = vld [vmem:[%s7194_s18 + $0xcc] sm:$0xe]  ;;  %s6056_s18 = sshll.u32 %s8279_s16, 8 }
 0x128   : > { %6693 = vmatprep.mubr.bf16.mxu0 %v6040_v25  ;;  %v4679_v46 = vsel %vm7309_vm5, %v4677_v6, %v4678_v7  ;;  %v5660_v25 = vcombine.low %v2443_v15, %v2446_v12  ;;  %v5629_v26 = vrot.slane %v5611_v16, 9  ;;  %s8219_s21 = scalar_lea.vmem %s8271_s2, %s6056_s18 }
 0x129   : > { %v6044_v30 = vcombine.low %v4676_v20, %v4679_v46 }
 0x12a   : > { %v2450_v33 = vsel %vm7200_vm2, %v5629_v26, %v2449_v17 }
 0x12b   : > { %v5661_v37 = vcombine.low %v2450_v33, %v2453_v34 }
 0x12e   : > { %6502 = vmatmul.mubr.bf16.gmra.mrb[20].mxu1 %v5657_v4 }
 0x12f   : > { %6694 = vmatmul.mubr.bf16.gmra.mrb[20].mxu0 %v6041_v53  ;;  %6505 = vmatprep.mubr.bf16.mxu1 %v5658_v54 }
 0x130   : > { %6697 = vmatprep.mubr.bf16.mxu0 %v6042_v62 }
 0x136   : > { %6506 = vmatmul.mubr.bf16.gmra.mrb[24].mxu1 %v5659_v23 }
 0x137   : > { %6698 = vmatmul.mubr.bf16.gmra.mrb[24].mxu0 %v6043_v24  ;;  %6509 = vmatprep.mubr.bf16.mxu1 %v5660_v25 }
 0x138   : > { %6701 = vmatprep.mubr.bf16.mxu0 %v6044_v30 }
 0x13e   : > { %6510 = vmatmul.mubr.bf16.gmra.mrb[28].mxu1 %v5661_v37 }
 0x13f   : > { %6702 = vmatmul.mubr.bf16.gmra.mrb[28].mxu0 %v6045_v38 }
 0x1b9   : > { %v6435_v39 = vpop.f32.mrb[0].mxu1 }
 0x1ba   : > { %v2023_v40 = vpop.f32.mrb[1].mxu1 }
 0x1bb   : > { %v6436_v41 = vpop.f32.mrb[2].mxu1 }
 0x1bc   : > { %v2026_v42 = vpop.f32.mrb[3].mxu1 }
 0x1c1   : > { %v6439_v43 = vpop.f32.mrb[4].mxu1 }
 0x1c2   : > { %v2039_v44 = vpop.f32.mrb[5].mxu1 }
 0x1c3   : > { %v6440_v13 = vpop.f32.mrb[6].mxu1 }
 0x1c4   : > { %v2042_v45 = vpop.f32.mrb[7].mxu1 }
 0x1c9   : > { %v6443_v4 = vpop.f32.mrb[8].mxu1 }
 0x1ca   : > { %v2055_v47 = vpop.f32.mrb[9].mxu1 }
 0x1cb   : > { %v6444_v48 = vpop.f32.mrb[10].mxu1 }
 0x1cc   : > { %v8205_v49 = vpop.f32.mrb[11].mxu1 }
 0x1d1   : > { %v8207_v51 = vpop.f32.mrb[12].mxu1 }
 0x1d2   : > { %v8209_v50 = vpop.f32.mrb[13].mxu1 }
 0x1d3   : > { %v8211_v52 = vpop.f32.mrb[14].mxu1 }
 0x1d4   : > { %v8213_v53 = vpop.f32.mrb[15].mxu1 }
 0x1da   : > { %v6675_v54 = vpop.f32.mrb[0].mxu0 }
 0x1db   : > { %v6721_v55 = vadd.f32 %v6675_v54, %v6435_v39  ;;  %v4850_v56 = vpop.f32.mrb[1].mxu0 }
 0x1dc   : > { %v6722_v57 = vadd.f32 %v4850_v56, %v2023_v40  ;;  %v6676_v58 = vpop.f32.mrb[2].mxu0 }
 0x1dd   : > { %5107 = vst [vmem:[%s8219_s21 + $0x10] sm:$0xff] %v6721_v55  ;;  %v6723_v59 = vadd.f32 %v6676_v58, %v6436_v41  ;;  %v4853_v60 = vpop.f32.mrb[3].mxu0  ;;  %v5177_v0 = vmul.f32 %v6721_v55, %v6721_v55 }
 0x1de   : > { %5105 = vst [vmem:[%s8219_s21] sm:$0xff] %v6722_v57  ;;  %v6724_v61 = vadd.f32 %v4853_v60, %v2026_v42  ;;  %v5175_v3 = vmul.f32 %v6722_v57, %v6722_v57 }
 0x1df   : > { %5108 = vst [vmem:[%s8219_s21 + $0x18] sm:$0xff] %v6723_v59  ;;  %v5178_v8 = vmul.f32 %v6723_v59, %v6723_v59 }
 0x1e0   : > { %5106 = vst [vmem:[%s8219_s21 + $0x8] sm:$0xff] %v6724_v61  ;;  %v5137_v62 = vadd.f32 %v6724_v61, %v6722_v57  ;;  %v5176_v63 = vmul.f32 %v6724_v61, %v6724_v61 }
 0x1e2   : > { %v5138_v1 = vadd.f32 %v6721_v55, %v5137_v62  ;;  %v5207_v2 = vadd.f32 %v5176_v63, %v5175_v3  ;;  %v6679_v5 = vpop.f32.mrb[4].mxu0 }
 0x1e3   : > { %v6725_v6 = vadd.f32 %v6679_v5, %v6439_v43  ;;  %v4866_v7 = vpop.f32.mrb[5].mxu0 }
 0x1e4   : > { %v5208_v9 = vadd.f32 %v5207_v2, %v5177_v0  ;;  %v6726_v10 = vadd.f32 %v4866_v7, %v2039_v44  ;;  %v5139_v11 = vadd.f32 %v6723_v59, %v5138_v1  ;;  %v6680_v14 = vpop.f32.mrb[6].mxu0 }
 0x1e5   : > { %5111 = vst [vmem:[%s8219_s21 + $0x30] sm:$0xff] %v6725_v6  ;;  %v6727_v17 = vadd.f32 %v6680_v14, %v6440_v13  ;;  %v4869_v15 = vpop.f32.mrb[7].mxu0  ;;  %v5181_v22 = vmul.f32 %v6725_v6, %v6725_v6 }
 0x1e6   : > { %5109 = vst [vmem:[%s8219_s21 + $0x20] sm:$0xff] %v6726_v10  ;;  %v5140_v12 = vadd.f32 %v6726_v10, %v5139_v11  ;;  %v5179_v16 = vmul.f32 %v6726_v10, %v6726_v10  ;;  %v5209_v18 = vadd.f32 %v5208_v9, %v5178_v8  ;;  %v6728_v19 = vadd.f32 %v4869_v15, %v2042_v45 }
 0x1e7   : > { %5112 = vst [vmem:[%s8219_s21 + $0x38] sm:$0xff] %v6727_v17  ;;  %v5182_v28 = vmul.f32 %v6727_v17, %v6727_v17 }
 0x1e8   : > { %v5210_v20 = vadd.f32 %v5209_v18, %v5179_v16  ;;  %5110 = vst [vmem:[%s8219_s21 + $0x28] sm:$0xff] %v6728_v19  ;;  %v5141_v46 = vadd.f32 %v6728_v19, %v5140_v12  ;;  %v5180_v21 = vmul.f32 %v6728_v19, %v6728_v19 }
 0x1ea   : > { %v5142_v23 = vadd.f32 %v6725_v6, %v5141_v46  ;;  %v5211_v24 = vadd.f32 %v5210_v20, %v5180_v21  ;;  %v6683_v25 = vpop.f32.mrb[8].mxu0 }
 0x1eb   : > { %v6729_v26 = vadd.f32 %v6683_v25, %v6443_v4  ;;  %v4882_v27 = vpop.f32.mrb[9].mxu0 }
 0x1ec   : > { %v5212_v30 = vadd.f32 %v5211_v24, %v5181_v22  ;;  %v6730_v31 = vadd.f32 %v4882_v27, %v2055_v47  ;;  %v5143_v29 = vadd.f32 %v6727_v17, %v5142_v23  ;;  %v6684_v32 = vpop.f32.mrb[10].mxu0 }
 0x1ed   : > { %5115 = vst [vmem:[%s8219_s21 + $0x50] sm:$0xff] %v6729_v26  ;;  %v6731_v33 = vadd.f32 %v6684_v32, %v6444_v48  ;;  %v4885_v34 = vpop.f32.mrb[11].mxu0  ;;  %v5185_v42 = vmul.f32 %v6729_v26, %v6729_v26 }
 0x1ee   : > { %5113 = vst [vmem:[%s8219_s21 + $0x40] sm:$0xff] %v6730_v31  ;;  %v5144_v35 = vadd.f32 %v6730_v31, %v5143_v29  ;;  %v5183_v36 = vmul.f32 %v6730_v31, %v6730_v31  ;;  %v5213_v37 = vadd.f32 %v5212_v30, %v5182_v28  ;;  %v6732_v38 = vadd.f32 %v4885_v34, %v8205_v49 }
 0x1ef   : > { %5116 = vst [vmem:[%s8219_s21 + $0x58] sm:$0xff] %v6731_v33  ;;  %v5186_v47 = vmul.f32 %v6731_v33, %v6731_v33 }
 0x1f0   : > { %v5214_v39 = vadd.f32 %v5213_v37, %v5183_v36  ;;  %5114 = vst [vmem:[%s8219_s21 + $0x48] sm:$0xff] %v6732_v38  ;;  %v5145_v40 = vadd.f32 %v6732_v38, %v5144_v35  ;;  %v5184_v41 = vmul.f32 %v6732_v38, %v6732_v38 }
 0x1f2   : > { %v5146_v43 = vadd.f32 %v6729_v26, %v5145_v40  ;;  %v5215_v44 = vadd.f32 %v5214_v39, %v5184_v41  ;;  %v6687_v13 = vpop.f32.mrb[12].mxu0 }
 0x1f3   : > { %v6733_v45 = vadd.f32 %v6687_v13, %v8207_v51  ;;  %v4898_v4 = vpop.f32.mrb[13].mxu0 }
 0x1f4   : > { %v5216_v48 = vadd.f32 %v5215_v44, %v5185_v42  ;;  %v6734_v49 = vadd.f32 %v4898_v4, %v8209_v50  ;;  %v5147_v54 = vadd.f32 %v6731_v33, %v5146_v43  ;;  %v6688_v55 = vpop.f32.mrb[14].mxu0 }
 0x1f5   : > { %5119 = vst [vmem:[%s8219_s21 + $0x70] sm:$0xff] %v6733_v45  ;;  %v6735_v56 = vadd.f32 %v6688_v55, %v8211_v52  ;;  %v4901_v57 = vpop.f32.mrb[15].mxu0  ;;  %v5189_v50 = vmul.f32 %v6733_v45, %v6733_v45 }
 0x1f6   : > { %5117 = vst [vmem:[%s8219_s21 + $0x60] sm:$0xff] %v6734_v49  ;;  %v5148_v58 = vadd.f32 %v6734_v49, %v5147_v54  ;;  %v5187_v59 = vmul.f32 %v6734_v49, %v6734_v49  ;;  %v5217_v60 = vadd.f32 %v5216_v48, %v5186_v47  ;;  %v6736_v61 = vadd.f32 %v4901_v57, %v8213_v53 }
 0x1f7   : > { %5120 = vst [vmem:[%s8219_s21 + $0x78] sm:$0xff] %v6735_v56  ;;  %v5190_v8 = vmul.f32 %v6735_v56, %v6735_v56 }
 0x1f8   : > { %v5218_v51 = vadd.f32 %v5217_v60, %v5187_v59  ;;  %5118 = vst [vmem:[%s8219_s21 + $0x68] sm:$0xff] %v6736_v61  ;;  %v5149_v3 = vadd.f32 %v6736_v61, %v5148_v58  ;;  %v5188_v62 = vmul.f32 %v6736_v61, %v6736_v61 }
 0x1f9   : > { %v6499_v63 = vpop.f32.mrb[16].mxu1 }
 0x1fa   : > { %v5150_v0 = vadd.f32 %v6733_v45, %v5149_v3  ;;  %v5219_v1 = vadd.f32 %v5218_v51, %v5188_v62  ;;  %v6691_v2 = vpop.f32.mrb[16].mxu0  ;;  %v2681_v52 = vpop.f32.mrb[17].mxu1 }
 0x1fb   : > { %v6737_v5 = vadd.f32 %v6691_v2, %v6499_v63  ;;  %v4914_v6 = vpop.f32.mrb[17].mxu0  ;;  %v6500_v7 = vpop.f32.mrb[18].mxu1 }
 0x1fc   : > { %v5220_v53 = vadd.f32 %v5219_v1, %v5189_v50  ;;  %v6738_v9 = vadd.f32 %v4914_v6, %v2681_v52  ;;  %v5151_v10 = vadd.f32 %v6735_v56, %v5150_v0  ;;  %v6692_v11 = vpop.f32.mrb[18].mxu0  ;;  %v2684_v14 = vpop.f32.mrb[19].mxu1 }
 0x1fd   : > { %5123 = vst [vmem:[%s8219_s21 + $0x90] sm:$0xff] %v6737_v5  ;;  %v6739_v17 = vadd.f32 %v6692_v11, %v6500_v7  ;;  %v4917_v15 = vpop.f32.mrb[19].mxu0  ;;  %v5193_v23 = vmul.f32 %v6737_v5, %v6737_v5 }
 0x1fe   : > { %5121 = vst [vmem:[%s8219_s21 + $0x80] sm:$0xff] %v6738_v9  ;;  %v5152_v12 = vadd.f32 %v6738_v9, %v5151_v10  ;;  %v5191_v16 = vmul.f32 %v6738_v9, %v6738_v9  ;;  %v5221_v18 = vadd.f32 %v5220_v53, %v5190_v8  ;;  %v6740_v19 = vadd.f32 %v4917_v15, %v2684_v14 }
 0x1ff   : > { %5124 = vst [vmem:[%s8219_s21 + $0x98] sm:$0xff] %v6739_v17  ;;  %v5194_v29 = vmul.f32 %v6739_v17, %v6739_v17 }
 0x200   : > { %v5222_v20 = vadd.f32 %v5221_v18, %v5191_v16  ;;  %5122 = vst [vmem:[%s8219_s21 + $0x88] sm:$0xff] %v6740_v19  ;;  %v5153_v46 = vadd.f32 %v6740_v19, %v5152_v12  ;;  %v5192_v21 = vmul.f32 %v6740_v19, %v6740_v19 }
 0x201   : > { %v6503_v22 = vpop.f32.mrb[20].mxu1 }
 0x202   : > { %v5154_v24 = vadd.f32 %v6737_v5, %v5153_v46  ;;  %v5223_v25 = vadd.f32 %v5222_v20, %v5192_v21  ;;  %v6695_v26 = vpop.f32.mrb[20].mxu0  ;;  %v2697_v27 = vpop.f32.mrb[21].mxu1 }
 0x203   : > { %v6741_v28 = vadd.f32 %v6695_v26, %v6503_v22  ;;  %v4930_v30 = vpop.f32.mrb[21].mxu0  ;;  %v6504_v31 = vpop.f32.mrb[22].mxu1 }
 0x204   : > { %v5224_v32 = vadd.f32 %v5223_v25, %v5193_v23  ;;  %v6742_v33 = vadd.f32 %v4930_v30, %v2697_v27  ;;  %v5155_v34 = vadd.f32 %v6739_v17, %v5154_v24  ;;  %v6696_v35 = vpop.f32.mrb[22].mxu0  ;;  %v2700_v36 = vpop.f32.mrb[23].mxu1 }
 0x205   : > { %5127 = vst [vmem:[%s8219_s21 + $0xb0] sm:$0xff] %v6741_v28  ;;  %v6743_v37 = vadd.f32 %v6696_v35, %v6504_v31  ;;  %v4933_v38 = vpop.f32.mrb[23].mxu0  ;;  %v5197_v4 = vmul.f32 %v6741_v28, %v6741_v28 }
 0x206   : > { %5125 = vst [vmem:[%s8219_s21 + $0xa0] sm:$0xff] %v6742_v33  ;;  %v5156_v39 = vadd.f32 %v6742_v33, %v5155_v34  ;;  %v5195_v40 = vmul.f32 %v6742_v33, %v6742_v33  ;;  %v5225_v41 = vadd.f32 %v5224_v32, %v5194_v29  ;;  %v6744_v42 = vadd.f32 %v4933_v38, %v2700_v36 }
 0x207   : > { %5128 = vst [vmem:[%s8219_s21 + $0xb8] sm:$0xff] %v6743_v37  ;;  %v5198_v58 = vmul.f32 %v6743_v37, %v6743_v37 }
 0x208   : > { %v5226_v43 = vadd.f32 %v5225_v41, %v5195_v40  ;;  %5126 = vst [vmem:[%s8219_s21 + $0xa8] sm:$0xff] %v6744_v42  ;;  %v5157_v44 = vadd.f32 %v6744_v42, %v5156_v39  ;;  %v5196_v13 = vmul.f32 %v6744_v42, %v6744_v42 }
 0x209   : > { %v6507_v45 = vpop.f32.mrb[24].mxu1 }
 0x20a   : > { %v5158_v47 = vadd.f32 %v6741_v28, %v5157_v44  ;;  %v5227_v48 = vadd.f32 %v5226_v43, %v5196_v13  ;;  %v6699_v49 = vpop.f32.mrb[24].mxu0  ;;  %v2713_v54 = vpop.f32.mrb[25].mxu1 }
 0x20b   : > { %v6745_v55 = vadd.f32 %v6699_v49, %v6507_v45  ;;  %v4946_v56 = vpop.f32.mrb[25].mxu0  ;;  %v6508_v57 = vpop.f32.mrb[26].mxu1 }
 0x20c   : > { %v5228_v59 = vadd.f32 %v5227_v48, %v5197_v4  ;;  %v6746_v60 = vadd.f32 %v4946_v56, %v2713_v54  ;;  %v5159_v61 = vadd.f32 %v6743_v37, %v5158_v47  ;;  %v6700_v51 = vpop.f32.mrb[26].mxu0  ;;  %v2716_v3 = vpop.f32.mrb[27].mxu1 }
 0x20d   : > { %5131 = vst [vmem:[%s8219_s21 + $0xd0] sm:$0xff] %v6745_v55  ;;  %v6747_v62 = vadd.f32 %v6700_v51, %v6508_v57  ;;  %v4949_v63 = vpop.f32.mrb[27].mxu0  ;;  %v5201_v8 = vmul.f32 %v6745_v55, %v6745_v55 }
 0x20e   : > { %5129 = vst [vmem:[%s8219_s21 + $0xc0] sm:$0xff] %v6746_v60  ;;  %v5160_v50 = vadd.f32 %v6746_v60, %v5159_v61  ;;  %v5199_v0 = vmul.f32 %v6746_v60, %v6746_v60  ;;  %v5229_v1 = vadd.f32 %v5228_v59, %v5198_v58  ;;  %v6748_v2 = vadd.f32 %v4949_v63, %v2716_v3 }
 0x20f   : > { %5132 = vst [vmem:[%s8219_s21 + $0xd8] sm:$0xff] %v6747_v62  ;;  %v5202_v12 = vmul.f32 %v6747_v62, %v6747_v62 }
 0x210   : > { %v5230_v52 = vadd.f32 %v5229_v1, %v5199_v0  ;;  %5130 = vst [vmem:[%s8219_s21 + $0xc8] sm:$0xff] %v6748_v2  ;;  %v5161_v5 = vadd.f32 %v6748_v2, %v5160_v50  ;;  %v5200_v6 = vmul.f32 %v6748_v2, %v6748_v2 }
 0x211   : > { %v6511_v7 = vpop.f32.mrb[28].mxu1 }
 0x212   : > { %v5162_v53 = vadd.f32 %v6745_v55, %v5161_v5  ;;  %v5231_v9 = vadd.f32 %v5230_v52, %v5200_v6  ;;  %v6703_v10 = vpop.f32.mrb[28].mxu0  ;;  %v2729_v11 = vpop.f32.mrb[29].mxu1 }
 0x213   : > { %v6749_v14 = vadd.f32 %v6703_v10, %v6511_v7  ;;  %v4962_v17 = vpop.f32.mrb[29].mxu0  ;;  %v6512_v15 = vpop.f32.mrb[30].mxu1 }
 0x214   : > { %v5232_v16 = vadd.f32 %v5231_v9, %v5201_v8  ;;  %v6750_v18 = vadd.f32 %v4962_v17, %v2729_v11  ;;  %v5163_v19 = vadd.f32 %v6747_v62, %v5162_v53  ;;  %v6704_v20 = vpop.f32.mrb[30].mxu0  ;;  %v2732_v46 = vpop.f32.mrb[31].mxu1 }
 0x215   : > { %5135 = vst [vmem:[%s8219_s21 + $0xf0] sm:$0xff] %v6749_v14  ;;  %v6751_v21 = vadd.f32 %v6704_v20, %v6512_v15  ;;  %v4965_v22 = vpop.f32.mrb[31].mxu0  ;;  %v5205_v31 = vmul.f32 %v6749_v14, %v6749_v14 }
 0x216   : > { %5133 = vst [vmem:[%s8219_s21 + $0xe0] sm:$0xff] %v6750_v18  ;;  %v5164_v23 = vadd.f32 %v6750_v18, %v5163_v19  ;;  %v5203_v24 = vmul.f32 %v6750_v18, %v6750_v18  ;;  %v5233_v25 = vadd.f32 %v5232_v16, %v5202_v12  ;;  %v6752_v26 = vadd.f32 %v4965_v22, %v2732_v46 }
 0x217   : > { %5136 = vst [vmem:[%s8219_s21 + $0xf8] sm:$0xff] %v6751_v21  ;;  %v5206_v33 = vmul.f32 %v6751_v21, %v6751_v21 }
 0x218   : > { %v5234_v27 = vadd.f32 %v5233_v25, %v5203_v24  ;;  %5134 = vst [vmem:[%s8219_s21 + $0xe8] sm:$0xff] %v6752_v26  ;;  %v5165_v28 = vadd.f32 %v6752_v26, %v5164_v23  ;;  %v5204_v30 = vmul.f32 %v6752_v26, %v6752_v26 }
 0x21a   : > { %v5166_v29 = vadd.f32 %v6749_v14, %v5165_v28  ;;  %v5235_v32 = vadd.f32 %v5234_v27, %v5204_v30 }
 0x21c   : > { %v5167_v34 = vadd.f32 %v6751_v21, %v5166_v29  ;;  %v5236_v35 = vadd.f32 %v5235_v32, %v5205_v31 }
 0x21e   : > { %v5168_v36 = vrot.slane %v5167_v34, 4  ;;  %v5237_v37 = vadd.f32 %v5236_v35, %v5206_v33 }
 0x220   : > { %v5169_v38 = vadd.f32 %v5168_v36, %v5167_v34  ;;  %v5238_v39 = vrot.slane %v5237_v37, 4 }
 0x222   : > { %v5170_v40 = vrot.slane %v5169_v38, 2  ;;  %v5239_v41 = vadd.f32 %v5238_v39, %v5237_v37 }
 0x224   : > { %v5171_v42 = vadd.f32 %v5170_v40, %v5169_v38  ;;  %v5240_v43 = vrot.slane %v5239_v41, 2 }
 0x226   : > { %v5172_v44 = vrot.slane %v5171_v42, 1  ;;  %v5241_v13 = vadd.f32 %v5240_v43, %v5239_v41 }
 0x228   : > { %v5173_v45 = vadd.f32 %v5172_v44, %v5171_v42  ;;  %v5242_v4 = vrot.slane %v5241_v13, 1 }
 0x22a   : > { %5174 = vst [vmem:[%s211_s24] sm:$0x1] %v5173_v45  ;;  %v5243_v47 = vadd.f32 %v5242_v4, %v5241_v13 }
 0x22c   : > { %5244 = vst [vmem:[%s214_s27] sm:$0x1] %v5243_v47 }
 0x22d PF: > { %s15_s15 = sadd.s32 1, %s7120_s15  }
 0x22e   : > { %p12_p4 = scmp.ge.s32.totalorder %s15_s15, 4  }
 0x230   :  { %14 = sbr.rel (!%p12_p4) target bundleno = 1 (0x1), region = 92 }

</bundles_post_ra>
